<compile_context>
chip_gen: v6e
topology: v6e:2x2x1
jax: 0.10.0
libtpu: 0.0.40
codegen_flags: <defaults>
</compile_context>

<pallas_src>
import jax
import jax.numpy as jnp
from jax import lax
from jax.experimental import pallas as pl
from jax.experimental.pallas import tpu as pltpu

NEG_BIG = 1e10   # matches masked_softmax's `logits[mask] -= 10000000000.0`


def _make_kernel(G, N, A):
    """G graphs per step, N nodes per graph, A xfer actions."""

    def kernel(nidx_ref, xidx_ref, mask_ref, x_ref, xsel_ref, xc_ref,
               wn1_ref, bn1_ref, wn2_ref, bn2_ref,
               wx1_ref, bx1_ref, wx2_ref, bx2_ref,
               wc1_ref, bc1_ref, wc2_ref, bc2_ref,
               out_ref):
        f32 = jnp.float32
        bf16 = jnp.bfloat16

        nidx = nidx_ref[...]                                      # (G, 1) int32
        xidx = xidx_ref[...]                                      # (G, 1) int32

        # ---------------- actor_node: Linear -> ReLU -> Linear, per-graph softmax.
        # First layer on the MXU over all R = G*N packed rows (bf16 in, f32 acc).
        h = jnp.maximum(
            jnp.dot(x_ref[...], wn1_ref[...], preferred_element_type=f32)
            + bn1_ref[...], 0.0)                                   # (R, H1) f32
        # Second layer is M=1: VPU multiply + lane reduce keeps the MXU free.
        # (R, H1) -> (G, N, H1) is a free leading-dim split (minor dim untouched),
        # so every per-graph reduction below is a lane reduction over N.
        H1 = h.shape[-1]
        nl = (jnp.sum((h * wn2_ref[...]).reshape(G, N, H1), axis=-1)
              + bn2_ref[...])                                      # (G, N) f32
        mx = jnp.max(nl, axis=-1, keepdims=True)                   # (G, 1)
        sh = nl - mx
        ez = jnp.exp(sh)
        s = jnp.sum(ez, axis=-1, keepdims=True)
        lse = jnp.log(s)
        n_iota = lax.broadcasted_iota(jnp.int32, (G, N), 1)
        nlp = jnp.sum(jnp.where(n_iota == nidx, sh - lse, 0.0),
                      axis=-1, keepdims=True)                      # (G, 1)
        nent = lse - jnp.sum(ez * sh, axis=-1, keepdims=True) / s  # (G, 1)

        # ---------------- actor_xfer: only on the chosen node's (host-gathered) row.
        h2 = jnp.maximum(
            jnp.dot(xsel_ref[...], wx1_ref[...], preferred_element_type=f32)
            + bx1_ref[...], 0.0)                                   # (G, AH) f32
        xl = (jnp.dot(h2.astype(bf16), wx2_ref[...],
                      preferred_element_type=f32) + bx2_ref[...])  # (G, A) f32
        xl = xl + jnp.where(mask_ref[...] > 0.5, 0.0, -NEG_BIG)    # masked logits
        mxx = jnp.max(xl, axis=-1, keepdims=True)
        shx = xl - mxx
        ezx = jnp.exp(shx)                                          # masked lanes -> 0.0
        sx = jnp.sum(ezx, axis=-1, keepdims=True)
        lsex = jnp.log(sx)
        a_iota = lax.broadcasted_iota(jnp.int32, (G, A), 1)
        xlp = jnp.sum(jnp.where(a_iota == xidx, shx - lsex, 0.0),
                      axis=-1, keepdims=True)                      # (G, 1)
        xent = lsex - jnp.sum(ezx * shx, axis=-1, keepdims=True) / sx

        # ---------------- critic: Linear -> ReLU -> Linear -> per-graph max pool.
        hc = jnp.maximum(
            jnp.dot(xc_ref[...], wc1_ref[...], preferred_element_type=f32)
            + bc1_ref[...], 0.0)                                   # (R, C) f32
        C = hc.shape[-1]
        vs = (jnp.sum((hc * wc2_ref[...]).reshape(G, N, C), axis=-1)
              + bc2_ref[...])                                      # (G, N)
        value = jnp.max(vs, axis=-1, keepdims=True)                # (G, 1)

        # ---------------- single packed (G, 8) block store (one writeback / step).
        pad = jnp.zeros((G, 3), f32)
        out_ref[...] = jnp.concatenate([value, nlp, nent, xlp, xent, pad], axis=-1)

    return kernel


def actor_critic_evaluate(params, graph_embed, critic_embed, mask, node_idx, xfer_idx,
                          graphs_per_step=64):
    """Batched `evaluate`: returns (values[B], node_logprobs[B], node_entropy,
    xfer_logprobs[B], xfer_entropy) matching the PyTorch module semantics."""
    B, N, E = graph_embed.shape
    C = critic_embed.shape[-1]
    A = mask.shape[-1]
    H1 = params["wn1"].shape[-1]
    AH = params["wx1"].shape[-1]
    G = graphs_per_step
    assert B % G == 0, "batch must be a multiple of graphs_per_step"
    R = G * N
    assert R % 256 == 0, "R = G*N should be a multiple of 256 (full MXU width on v6e/v7x)"
    assert B // G >= 2, "keep >=2 grid steps so both v7x TensorCores stay busy"

    f32, bf16, i32 = jnp.float32, jnp.bfloat16, jnp.int32

    # Host-side prep: free views + dtype casts only (no transposes, no duplicate
    # streams of the big tensors). The chosen node's embedding is gathered here.
    x2 = graph_embed.reshape(B * N, E).astype(bf16)                 # (B*N, E)
    xc2 = critic_embed.reshape(B * N, C).astype(bf16)               # (B*N, C)
    xsel = jnp.take_along_axis(
        graph_embed, node_idx[:, None, None].astype(i32), axis=1)[:, 0, :].astype(bf16)
    nidx = node_idx.reshape(B, 1).astype(i32)
    xidx = xfer_idx.reshape(B, 1).astype(i32)
    maskf = mask.astype(f32)

    # Weights: bf16 for the MXU operands, f32 for biases and the VPU second layers.
    wn1 = params["wn1"].astype(bf16)                                # (E, H1)
    bn1 = params["bn1"].reshape(1, H1).astype(f32)
    wn2 = params["wn2"].reshape(1, H1).astype(f32)
    bn2 = params["bn2"].reshape(1, 1).astype(f32)
    wx1 = params["wx1"].astype(bf16)                                # (E, AH)
    bx1 = params["bx1"].reshape(1, AH).astype(f32)
    wx2 = params["wx2"].astype(bf16)                                # (AH, A)
    bx2 = params["bx2"].reshape(1, A).astype(f32)
    wc1 = params["wc1"].astype(bf16)                                # (C, C)
    bc1 = params["bc1"].reshape(1, C).astype(f32)
    wc2 = params["wc2"].reshape(1, C).astype(f32)
    bc2 = params["bc2"].reshape(1, 1).astype(f32)

    kernel = _make_kernel(G, N, A)
    const = lambda b: (0, 0)                                        # resident weights

    in_specs = [
        pl.BlockSpec((G, 1), lambda b: (b, 0)),   # node_idx
        pl.BlockSpec((G, 1), lambda b: (b, 0)),   # xfer_idx
        pl.BlockSpec((G, A), lambda b: (b, 0)),   # mask
        pl.BlockSpec((R, E), lambda b: (b, 0)),   # graph_embed rows (natural layout)
        pl.BlockSpec((G, E), lambda b: (b, 0)),   # chosen-node rows (host gather)
        # critic_embed rows: the only large streamed operand; with a long grid,
        # pipeline_mode=pl.Buffered(3) could be added here (grid=2 -> not needed).
        pl.BlockSpec((R, C), lambda b: (b, 0)),
        pl.BlockSpec((E, H1), const),             # wn1 (bf16)
        pl.BlockSpec((1, H1), const),             # bn1
        pl.BlockSpec((1, H1), const),             # wn2 (VPU second layer)
        pl.BlockSpec((1, 1), const),              # bn2
        pl.BlockSpec((E, AH), const),             # wx1 (bf16)
        pl.BlockSpec((1, AH), const),             # bx1
        pl.BlockSpec((AH, A), const),             # wx2 (bf16)
        pl.BlockSpec((1, A), const),              # bx2
        pl.BlockSpec((C, C), const),              # wc1 (bf16, resident, 128 KB)
        pl.BlockSpec((1, C), const),              # bc1
        pl.BlockSpec((1, C), const),              # wc2 (VPU second layer)
        pl.BlockSpec((1, 1), const),              # bc2
    ]
    out_specs = pl.BlockSpec((G, 8), lambda b: (b, 0))
    out_shape = jax.ShapeDtypeStruct((B, 8), f32)

    packed = pl.pallas_call(
        kernel,
        out_shape=out_shape,
        grid=(B // G,),
        in_specs=in_specs,
        out_specs=out_specs,
        compiler_params=pltpu.CompilerParams(dimension_semantics=("parallel",)),
    )(nidx, xidx, maskf, x2, xsel, xc2,
      wn1, bn1, wn2, bn2, wx1, bx1, wx2, bx2, wc1, bc1, wc2, bc2)

    values = packed[:, 0]
    node_logprobs = packed[:, 1]
    node_entropy = packed[:, 2].sum()
    xfer_logprobs = packed[:, 3]
    xfer_entropy = packed[:, 4].sum()
    return values, node_logprobs, node_entropy, xfer_logprobs, xfer_entropy


def _reference(params, graph_embed, critic_embed, mask, node_idx, xfer_idx):
    """Plain-JAX mirror of ActorCritic.evaluate's dense math, with the same
    bf16 MXU-operand quantization the kernel uses (f32 accumulation)."""
    hp = lax.Precision.HIGHEST
    f32, bf = jnp.float32, jnp.bfloat16
    q = lambda a: a.astype(bf).astype(f32)

    ge = q(graph_embed)
    ce = q(critic_embed)
    wn1 = q(params["wn1"])
    wx1 = q(params["wx1"])
    wx2 = q(params["wx2"])
    wc1 = q(params["wc1"])

    h = jax.nn.relu(jnp.einsum('bne,eh->bnh', ge, wn1, precision=hp) + params["bn1"])
    node_logits = jnp.einsum('bnh,h->bn', h, params["wn2"], precision=hp) + params["bn2"]
    node_logp = jax.nn.log_softmax(node_logits, axis=-1)
    nlp = jnp.take_along_axis(node_logp, node_idx[:, None], axis=-1)[:, 0]
    nent = -jnp.sum(jnp.exp(node_logp) * node_logp, axis=-1)

    xsel = jnp.take_along_axis(ge, node_idx[:, None, None], axis=1)[:, 0, :]
    h2 = jax.nn.relu(jnp.einsum('be,eh->bh', xsel, wx1, precision=hp) + params["bx1"])
    xl = jnp.einsum('bh,ha->ba', q(h2), wx2, precision=hp) + params["bx2"]
    ml = xl + jnp.where(mask > 0.5, 0.0, -NEG_BIG)
    xlogp = jax.nn.log_softmax(ml, axis=-1)
    xlp = jnp.take_along_axis(xlogp, xfer_idx[:, None], axis=-1)[:, 0]
    xent = -jnp.sum(jnp.exp(xlogp) * xlogp, axis=-1)

    hc = jax.nn.relu(jnp.einsum('bnc,cd->bnd', ce, wc1, precision=hp) + params["bc1"])
    vs = jnp.einsum('bnc,c->bn', hc, params["wc2"], precision=hp) + params["bc2"]
    values = vs.max(axis=-1)
    return values, nlp, nent.sum(), xlp, xent.sum()


if __name__ == "__main__":
    B, N = 128, 8     # 128 graphs, 8 nodes each (fixed node count per graph)
    E = 32            # graph_embed_size
    H1 = E // 2       # actor_node hidden
    AH = 32           # actor_hidden_size
    A = 64            # action_dim (context.num_xfers)
    C = 256           # critic QGNN output / hidden size (fixed in Critic)
    G = 64            # graphs per grid step -> R = 512, grid = 2

    key = jax.random.PRNGKey(0)
    ks = jax.random.split(key, 16)
    init = lambda k, shape, s=0.1: s * jax.random.normal(k, shape, dtype=jnp.float32)

    params = {
        "wn1": init(ks[0], (E, H1)), "bn1": init(ks[1], (H1,)),
        "wn2": init(ks[2], (H1,)),  "bn2": init(ks[3], ()),
        "wx1": init(ks[4], (E, AH)), "bx1": init(ks[5], (AH,)),
        "wx2": init(ks[6], (AH, A)), "bx2": init(ks[7], (A,)),
        "wc1": init(ks[8], (C, C)),  "bc1": init(ks[9], (C,)),
        "wc2": init(ks[10], (C,)),   "bc2": init(ks[11], ()),
    }

    # TODO(synk): these embeddings stand in for the QGNN(6, 29, ...) message passing.
    graph_embed = jax.random.normal(ks[12], (B, N, E), dtype=jnp.float32)
    critic_embed = jax.random.normal(ks[13], (B, N, C), dtype=jnp.float32)

    node_idx = jax.random.randint(ks[14], (B,), 0, N, dtype=jnp.int32)
    xfer_idx = jax.random.randint(ks[15], (B,), 0, 16, dtype=jnp.int32)
    # TODO(synk): g.available_xfers is host-side graph logic; fixed availability mask here.
    mask = jnp.zeros((B, A), jnp.float32).at[:, :16].set(1.0)

    outs = actor_critic_evaluate(params, graph_embed, critic_embed, mask,
                                 node_idx, xfer_idx, graphs_per_step=G)
    outs = jax.block_until_ready(outs)

    refs = _reference(params, graph_embed, critic_embed, mask, node_idx, xfer_idx)
    names = ["values", "node_logprobs", "node_entropy", "xfer_logprobs", "xfer_entropy"]
    for name, got, want in zip(names, outs, refs):
        assert jnp.allclose(got, want, rtol=2e-3, atol=2e-3), (name, got, want)
    print("KERNEL_OK")
</pallas_src>

<mosaic_0001>
module attributes {stable_mosaic.version = 11 : i64} {
  func.func @kernel(%arg0: i32, %arg1: memref<64x1xi32, #tpu.memory_space<vmem>>, %arg2: memref<64x1xi32, #tpu.memory_space<vmem>>, %arg3: memref<64x64xf32, #tpu.memory_space<vmem>>, %arg4: memref<512x32xbf16, #tpu.memory_space<vmem>>, %arg5: memref<64x32xbf16, #tpu.memory_space<vmem>>, %arg6: memref<512x256xbf16, #tpu.memory_space<vmem>>, %arg7: memref<32x16xbf16, #tpu.memory_space<vmem>>, %arg8: memref<1x16xf32, #tpu.memory_space<vmem>>, %arg9: memref<1x16xf32, #tpu.memory_space<vmem>>, %arg10: memref<1x1xf32, #tpu.memory_space<vmem>>, %arg11: memref<32x32xbf16, #tpu.memory_space<vmem>>, %arg12: memref<1x32xf32, #tpu.memory_space<vmem>>, %arg13: memref<32x64xbf16, #tpu.memory_space<vmem>>, %arg14: memref<1x64xf32, #tpu.memory_space<vmem>>, %arg15: memref<256x256xbf16, #tpu.memory_space<vmem>>, %arg16: memref<1x256xf32, #tpu.memory_space<vmem>>, %arg17: memref<1x256xf32, #tpu.memory_space<vmem>>, %arg18: memref<1x1xf32, #tpu.memory_space<vmem>>, %arg19: memref<64x8xf32, #tpu.memory_space<vmem>>) attributes {dimension_semantics = [#tpu.dimension_semantics<parallel>], iteration_bounds = array<i64: 2>, scalar_prefetch = 0 : i64, scratch_operands = 0 : i64, tpu.core_type = #tpu.core_type<tc>, window_params = [{transform_indices = @transform_0, window_bounds = array<i64: 64, 1>}, {transform_indices = @transform_1, window_bounds = array<i64: 64, 1>}, {transform_indices = @transform_2, window_bounds = array<i64: 64, 64>}, {transform_indices = @transform_3, window_bounds = array<i64: 512, 32>}, {transform_indices = @transform_4, window_bounds = array<i64: 64, 32>}, {transform_indices = @transform_5, window_bounds = array<i64: 512, 256>}, {pipeline_mode = #tpu.pipeline_mode<synchronous>, transform_indices = @transform_6, window_bounds = array<i64: 32, 16>}, {pipeline_mode = #tpu.pipeline_mode<synchronous>, transform_indices = @transform_7, window_bounds = array<i64: 1, 16>}, {pipeline_mode = #tpu.pipeline_mode<synchronous>, transform_indices = @transform_8, window_bounds = array<i64: 1, 16>}, {pipeline_mode = #tpu.pipeline_mode<synchronous>, transform_indices = @transform_9, window_bounds = array<i64: 1, 1>}, {pipeline_mode = #tpu.pipeline_mode<synchronous>, transform_indices = @transform_10, window_bounds = array<i64: 32, 32>}, {pipeline_mode = #tpu.pipeline_mode<synchronous>, transform_indices = @transform_11, window_bounds = array<i64: 1, 32>}, {pipeline_mode = #tpu.pipeline_mode<synchronous>, transform_indices = @transform_12, window_bounds = array<i64: 32, 64>}, {pipeline_mode = #tpu.pipeline_mode<synchronous>, transform_indices = @transform_13, window_bounds = array<i64: 1, 64>}, {pipeline_mode = #tpu.pipeline_mode<synchronous>, transform_indices = @transform_14, window_bounds = array<i64: 256, 256>}, {pipeline_mode = #tpu.pipeline_mode<synchronous>, transform_indices = @transform_15, window_bounds = array<i64: 1, 256>}, {pipeline_mode = #tpu.pipeline_mode<synchronous>, transform_indices = @transform_16, window_bounds = array<i64: 1, 256>}, {pipeline_mode = #tpu.pipeline_mode<synchronous>, transform_indices = @transform_17, window_bounds = array<i64: 1, 1>}, {transform_indices = @transform_18, window_bounds = array<i64: 64, 8>}]} {
    %c0 = arith.constant 0 : index
    %c0_0 = arith.constant 0 : index
    %0 = vector.load %arg1[%c0, %c0_0] : memref<64x1xi32, #tpu.memory_space<vmem>>, vector<64x1xi32>
    %c0_1 = arith.constant 0 : index
    %c0_2 = arith.constant 0 : index
    %1 = vector.load %arg2[%c0_1, %c0_2] : memref<64x1xi32, #tpu.memory_space<vmem>>, vector<64x1xi32>
    %c0_3 = arith.constant 0 : index
    %c0_4 = arith.constant 0 : index
    %2 = vector.load %arg4[%c0_3, %c0_4] : memref<512x32xbf16, #tpu.memory_space<vmem>>, vector<512x32xbf16>
    %c0_5 = arith.constant 0 : index
    %c0_6 = arith.constant 0 : index
    %3 = vector.load %arg7[%c0_5, %c0_6] : memref<32x16xbf16, #tpu.memory_space<vmem>>, vector<32x16xbf16>
    %cst = arith.constant dense<0.000000e+00> : vector<512x16xf32>
    %4 = tpu.matmul %2, %3, %cst {dimension_numbers = #tpu.dot_dimension_numbers<[1], [0], [0], [1], [0, 0, 1, 1], [], []>} : vector<512x32xbf16>, vector<32x16xbf16>, vector<512x16xf32> -> vector<512x16xf32>
    %c0_7 = arith.constant 0 : index
    %c0_8 = arith.constant 0 : index
    %5 = vector.load %arg8[%c0_7, %c0_8] : memref<1x16xf32, #tpu.memory_space<vmem>>, vector<1x16xf32>
    %6 = vector.broadcast %5 : vector<1x16xf32> to vector<512x16xf32>
    %7 = arith.addf %4, %6 : vector<512x16xf32>
    %cst_9 = arith.constant 0.000000e+00 : f32
    %8 = vector.broadcast %cst_9 : f32 to vector<512x16xf32>
    %9 = arith.maximumf %7, %8 : vector<512x16xf32>
    %c0_10 = arith.constant 0 : index
    %c0_11 = arith.constant 0 : index
    %10 = vector.load %arg9[%c0_10, %c0_11] : memref<1x16xf32, #tpu.memory_space<vmem>>, vector<1x16xf32>
    %11 = vector.broadcast %10 : vector<1x16xf32> to vector<512x16xf32>
    %12 = arith.mulf %9, %11 : vector<512x16xf32>
    %13 = vector.shape_cast %12 : vector<512x16xf32> to vector<64x8x16xf32>
    %cst_12 = arith.constant dense<0.000000e+00> : vector<64x8xf32>
    %14 = vector.multi_reduction <add>, %13, %cst_12 [2] : vector<64x8x16xf32> to vector<64x8xf32>
    %c0_13 = arith.constant 0 : index
    %c0_14 = arith.constant 0 : index
    %15 = vector.load %arg10[%c0_13, %c0_14] : memref<1x1xf32, #tpu.memory_space<vmem>>, vector<1x1xf32>
    %16 = vector.broadcast %15 : vector<1x1xf32> to vector<64x8xf32>
    %17 = arith.addf %14, %16 : vector<64x8xf32>
    %cst_15 = arith.constant dense<0xFF800000> : vector<64xf32>
    %18 = vector.multi_reduction <maximumf>, %17, %cst_15 [1] : vector<64x8xf32> to vector<64xf32>
    %19 = vector.shape_cast %18 : vector<64xf32> to vector<64x1xf32>
    %20 = vector.broadcast %19 : vector<64x1xf32> to vector<64x8xf32>
    %21 = arith.subf %17, %20 : vector<64x8xf32>
    %22 = math.exp %21 : vector<64x8xf32>
    %cst_16 = arith.constant dense<0.000000e+00> : vector<64xf32>
    %23 = vector.multi_reduction <add>, %22, %cst_16 [1] : vector<64x8xf32> to vector<64xf32>
    %24 = vector.shape_cast %23 : vector<64xf32> to vector<64x1xf32>
    %25 = math.log %24 : vector<64x1xf32>
    %26 = tpu.iota {dimensions = array<i32: 1>} : vector<64x8xi32>
    %27 = vector.broadcast %0 : vector<64x1xi32> to vector<64x8xi32>
    %28 = arith.cmpi eq, %26, %27 : vector<64x8xi32>
    %29 = vector.broadcast %25 : vector<64x1xf32> to vector<64x8xf32>
    %30 = arith.subf %21, %29 : vector<64x8xf32>
    %cst_17 = arith.constant 0.000000e+00 : f32
    %31 = vector.broadcast %cst_17 : f32 to vector<64x8xf32>
    %32 = arith.select %28, %30, %31 : vector<64x8xi1>, vector<64x8xf32>
    %cst_18 = arith.constant dense<0.000000e+00> : vector<64xf32>
    %33 = vector.multi_reduction <add>, %32, %cst_18 [1] : vector<64x8xf32> to vector<64xf32>
    %34 = vector.shape_cast %33 : vector<64xf32> to vector<64x1xf32>
    %35 = arith.mulf %22, %21 : vector<64x8xf32>
    %cst_19 = arith.constant dense<0.000000e+00> : vector<64xf32>
    %36 = vector.multi_reduction <add>, %35, %cst_19 [1] : vector<64x8xf32> to vector<64xf32>
    %37 = vector.shape_cast %36 : vector<64xf32> to vector<64x1xf32>
    %38 = arith.divf %37, %24 : vector<64x1xf32>
    %39 = arith.subf %25, %38 : vector<64x1xf32>
    %c0_20 = arith.constant 0 : index
    %c0_21 = arith.constant 0 : index
    %40 = vector.load %arg5[%c0_20, %c0_21] : memref<64x32xbf16, #tpu.memory_space<vmem>>, vector<64x32xbf16>
    %c0_22 = arith.constant 0 : index
    %c0_23 = arith.constant 0 : index
    %41 = vector.load %arg11[%c0_22, %c0_23] : memref<32x32xbf16, #tpu.memory_space<vmem>>, vector<32x32xbf16>
    %cst_24 = arith.constant dense<0.000000e+00> : vector<64x32xf32>
    %42 = tpu.matmul %40, %41, %cst_24 {dimension_numbers = #tpu.dot_dimension_numbers<[1], [0], [0], [1], [0, 0, 1, 1], [], []>} : vector<64x32xbf16>, vector<32x32xbf16>, vector<64x32xf32> -> vector<64x32xf32>
    %c0_25 = arith.constant 0 : index
    %c0_26 = arith.constant 0 : index
    %43 = vector.load %arg12[%c0_25, %c0_26] : memref<1x32xf32, #tpu.memory_space<vmem>>, vector<1x32xf32>
    %44 = vector.broadcast %43 : vector<1x32xf32> to vector<64x32xf32>
    %45 = arith.addf %42, %44 : vector<64x32xf32>
    %cst_27 = arith.constant 0.000000e+00 : f32
    %46 = vector.broadcast %cst_27 : f32 to vector<64x32xf32>
    %47 = arith.maximumf %45, %46 : vector<64x32xf32>
    %48 = arith.truncf %47 : vector<64x32xf32> to vector<64x32xbf16>
    %c0_28 = arith.constant 0 : index
    %c0_29 = arith.constant 0 : index
    %49 = vector.load %arg13[%c0_28, %c0_29] : memref<32x64xbf16, #tpu.memory_space<vmem>>, vector<32x64xbf16>
    %cst_30 = arith.constant dense<0.000000e+00> : vector<64x64xf32>
    %50 = tpu.matmul %48, %49, %cst_30 {dimension_numbers = #tpu.dot_dimension_numbers<[1], [0], [0], [1], [0, 0, 1, 1], [], []>} : vector<64x32xbf16>, vector<32x64xbf16>, vector<64x64xf32> -> vector<64x64xf32>
    %c0_31 = arith.constant 0 : index
    %c0_32 = arith.constant 0 : index
    %51 = vector.load %arg14[%c0_31, %c0_32] : memref<1x64xf32, #tpu.memory_space<vmem>>, vector<1x64xf32>
    %52 = vector.broadcast %51 : vector<1x64xf32> to vector<64x64xf32>
    %53 = arith.addf %50, %52 : vector<64x64xf32>
    %c0_33 = arith.constant 0 : index
    %c0_34 = arith.constant 0 : index
    %54 = vector.load %arg3[%c0_33, %c0_34] : memref<64x64xf32, #tpu.memory_space<vmem>>, vector<64x64xf32>
    %cst_35 = arith.constant 5.000000e-01 : f32
    %55 = vector.broadcast %cst_35 : f32 to vector<64x64xf32>
    %56 = arith.cmpf ogt, %54, %55 : vector<64x64xf32>
    %cst_36 = arith.constant 0.000000e+00 : f32
    %cst_37 = arith.constant -1.000000e+10 : f32
    %57 = vector.broadcast %cst_36 : f32 to vector<64x64xf32>
    %58 = vector.broadcast %cst_37 : f32 to vector<64x64xf32>
    %59 = arith.select %56, %57, %58 : vector<64x64xi1>, vector<64x64xf32>
    %60 = arith.addf %53, %59 : vector<64x64xf32>
    %cst_38 = arith.constant dense<0xFF800000> : vector<64xf32>
    %61 = vector.multi_reduction <maximumf>, %60, %cst_38 [1] : vector<64x64xf32> to vector<64xf32>
    %62 = vector.shape_cast %61 : vector<64xf32> to vector<64x1xf32>
    %63 = vector.broadcast %62 : vector<64x1xf32> to vector<64x64xf32>
    %64 = arith.subf %60, %63 : vector<64x64xf32>
    %65 = math.exp %64 : vector<64x64xf32>
    %cst_39 = arith.constant dense<0.000000e+00> : vector<64xf32>
    %66 = vector.multi_reduction <add>, %65, %cst_39 [1] : vector<64x64xf32> to vector<64xf32>
    %67 = vector.shape_cast %66 : vector<64xf32> to vector<64x1xf32>
    %68 = math.log %67 : vector<64x1xf32>
    %69 = tpu.iota {dimensions = array<i32: 1>} : vector<64x64xi32>
    %70 = vector.broadcast %1 : vector<64x1xi32> to vector<64x64xi32>
    %71 = arith.cmpi eq, %69, %70 : vector<64x64xi32>
    %72 = vector.broadcast %68 : vector<64x1xf32> to vector<64x64xf32>
    %73 = arith.subf %64, %72 : vector<64x64xf32>
    %cst_40 = arith.constant 0.000000e+00 : f32
    %74 = vector.broadcast %cst_40 : f32 to vector<64x64xf32>
    %75 = arith.select %71, %73, %74 : vector<64x64xi1>, vector<64x64xf32>
    %cst_41 = arith.constant dense<0.000000e+00> : vector<64xf32>
    %76 = vector.multi_reduction <add>, %75, %cst_41 [1] : vector<64x64xf32> to vector<64xf32>
    %77 = vector.shape_cast %76 : vector<64xf32> to vector<64x1xf32>
    %78 = arith.mulf %65, %64 : vector<64x64xf32>
    %cst_42 = arith.constant dense<0.000000e+00> : vector<64xf32>
    %79 = vector.multi_reduction <add>, %78, %cst_42 [1] : vector<64x64xf32> to vector<64xf32>
    %80 = vector.shape_cast %79 : vector<64xf32> to vector<64x1xf32>
    %81 = arith.divf %80, %67 : vector<64x1xf32>
    %82 = arith.subf %68, %81 : vector<64x1xf32>
    %c0_43 = arith.constant 0 : index
    %c0_44 = arith.constant 0 : index
    %83 = vector.load %arg6[%c0_43, %c0_44] : memref<512x256xbf16, #tpu.memory_space<vmem>>, vector<512x256xbf16>
    %c0_45 = arith.constant 0 : index
    %c0_46 = arith.constant 0 : index
    %84 = vector.load %arg15[%c0_45, %c0_46] : memref<256x256xbf16, #tpu.memory_space<vmem>>, vector<256x256xbf16>
    %cst_47 = arith.constant dense<0.000000e+00> : vector<512x256xf32>
    %85 = tpu.matmul %83, %84, %cst_47 {dimension_numbers = #tpu.dot_dimension_numbers<[1], [0], [0], [1], [0, 0, 1, 1], [], []>} : vector<512x256xbf16>, vector<256x256xbf16>, vector<512x256xf32> -> vector<512x256xf32>
    %c0_48 = arith.constant 0 : index
    %c0_49 = arith.constant 0 : index
    %86 = vector.load %arg16[%c0_48, %c0_49] : memref<1x256xf32, #tpu.memory_space<vmem>>, vector<1x256xf32>
    %87 = vector.broadcast %86 : vector<1x256xf32> to vector<512x256xf32>
    %88 = arith.addf %85, %87 : vector<512x256xf32>
    %cst_50 = arith.constant 0.000000e+00 : f32
    %89 = vector.broadcast %cst_50 : f32 to vector<512x256xf32>
    %90 = arith.maximumf %88, %89 : vector<512x256xf32>
    %c0_51 = arith.constant 0 : index
    %c0_52 = arith.constant 0 : index
    %91 = vector.load %arg17[%c0_51, %c0_52] : memref<1x256xf32, #tpu.memory_space<vmem>>, vector<1x256xf32>
    %92 = vector.broadcast %91 : vector<1x256xf32> to vector<512x256xf32>
    %93 = arith.mulf %90, %92 : vector<512x256xf32>
    %94 = vector.shape_cast %93 : vector<512x256xf32> to vector<64x8x256xf32>
    %cst_53 = arith.constant dense<0.000000e+00> : vector<64x8xf32>
    %95 = vector.multi_reduction <add>, %94, %cst_53 [2] : vector<64x8x256xf32> to vector<64x8xf32>
    %c0_54 = arith.constant 0 : index
    %c0_55 = arith.constant 0 : index
    %96 = vector.load %arg18[%c0_54, %c0_55] : memref<1x1xf32, #tpu.memory_space<vmem>>, vector<1x1xf32>
    %97 = vector.broadcast %96 : vector<1x1xf32> to vector<64x8xf32>
    %98 = arith.addf %95, %97 : vector<64x8xf32>
    %cst_56 = arith.constant dense<0xFF800000> : vector<64xf32>
    %99 = vector.multi_reduction <maximumf>, %98, %cst_56 [1] : vector<64x8xf32> to vector<64xf32>
    %100 = vector.shape_cast %99 : vector<64xf32> to vector<64x1xf32>
    %cst_57 = arith.constant 0.000000e+00 : f32
    %101 = vector.broadcast %cst_57 : f32 to vector<64x3xf32>
    %102 = tpu.concatenate %100, %34, %39, %77, %82, %101 in 1 : vector<64x1xf32>, vector<64x1xf32>, vector<64x1xf32>, vector<64x1xf32>, vector<64x1xf32>, vector<64x3xf32> -> vector<64x8xf32>
    %c0_58 = arith.constant 0 : index
    %c0_59 = arith.constant 0 : index
    %103 = vector.load %arg19[%c0_58, %c0_59] : memref<64x8xf32, #tpu.memory_space<vmem>>, vector<64x8xf32>
    tpu.vector_store %arg19[%c0_58, %c0_59], %102 {strides = array<i32>} : memref<64x8xf32, #tpu.memory_space<vmem>>, vector<64x8xf32>,
    return
  }
  func.func @transform_0(%arg0: i32) -> (i32, i32) {
    %c0_i32 = arith.constant 0 : i32
    %c0_i32_0 = arith.constant 0 : i32
    return %arg0, %c0_i32 : i32, i32
  }
  func.func @transform_1(%arg0: i32) -> (i32, i32) {
    %c0_i32 = arith.constant 0 : i32
    %c0_i32_0 = arith.constant 0 : i32
    return %arg0, %c0_i32 : i32, i32
  }
  func.func @transform_2(%arg0: i32) -> (i32, i32) {
    %c0_i32 = arith.constant 0 : i32
    %c0_i32_0 = arith.constant 0 : i32
    return %arg0, %c0_i32 : i32, i32
  }
  func.func @transform_3(%arg0: i32) -> (i32, i32) {
    %c0_i32 = arith.constant 0 : i32
    %c0_i32_0 = arith.constant 0 : i32
    return %arg0, %c0_i32 : i32, i32
  }
  func.func @transform_4(%arg0: i32) -> (i32, i32) {
    %c0_i32 = arith.constant 0 : i32
    %c0_i32_0 = arith.constant 0 : i32
    return %arg0, %c0_i32 : i32, i32
  }
  func.func @transform_5(%arg0: i32) -> (i32, i32) {
    %c0_i32 = arith.constant 0 : i32
    %c0_i32_0 = arith.constant 0 : i32
    return %arg0, %c0_i32 : i32, i32
  }
  func.func @transform_6(%arg0: i32) -> (i32, i32) {
    %c0_i32 = arith.constant 0 : i32
    %c0_i32_0 = arith.constant 0 : i32
    %c0_i32_1 = arith.constant 0 : i32
    return %c0_i32, %c0_i32_0 : i32, i32
  }
  func.func @transform_7(%arg0: i32) -> (i32, i32) {
    %c0_i32 = arith.constant 0 : i32
    %c0_i32_0 = arith.constant 0 : i32
    %c0_i32_1 = arith.constant 0 : i32
    return %c0_i32, %c0_i32_0 : i32, i32
  }
  func.func @transform_8(%arg0: i32) -> (i32, i32) {
    %c0_i32 = arith.constant 0 : i32
    %c0_i32_0 = arith.constant 0 : i32
    %c0_i32_1 = arith.constant 0 : i32
    return %c0_i32, %c0_i32_0 : i32, i32
  }
  func.func @transform_9(%arg0: i32) -> (i32, i32) {
    %c0_i32 = arith.constant 0 : i32
    %c0_i32_0 = arith.constant 0 : i32
    %c0_i32_1 = arith.constant 0 : i32
    return %c0_i32, %c0_i32_0 : i32, i32
  }
  func.func @transform_10(%arg0: i32) -> (i32, i32) {
    %c0_i32 = arith.constant 0 : i32
    %c0_i32_0 = arith.constant 0 : i32
    %c0_i32_1 = arith.constant 0 : i32
    return %c0_i32, %c0_i32_0 : i32, i32
  }
  func.func @transform_11(%arg0: i32) -> (i32, i32) {
    %c0_i32 = arith.constant 0 : i32
    %c0_i32_0 = arith.constant 0 : i32
    %c0_i32_1 = arith.constant 0 : i32
    return %c0_i32, %c0_i32_0 : i32, i32
  }
  func.func @transform_12(%arg0: i32) -> (i32, i32) {
    %c0_i32 = arith.constant 0 : i32
    %c0_i32_0 = arith.constant 0 : i32
    %c0_i32_1 = arith.constant 0 : i32
    return %c0_i32, %c0_i32_0 : i32, i32
  }
  func.func @transform_13(%arg0: i32) -> (i32, i32) {
    %c0_i32 = arith.constant 0 : i32
    %c0_i32_0 = arith.constant 0 : i32
    %c0_i32_1 = arith.constant 0 : i32
    return %c0_i32, %c0_i32_0 : i32, i32
  }
  func.func @transform_14(%arg0: i32) -> (i32, i32) {
    %c0_i32 = arith.constant 0 : i32
    %c0_i32_0 = arith.constant 0 : i32
    %c0_i32_1 = arith.constant 0 : i32
    return %c0_i32, %c0_i32_0 : i32, i32
  }
  func.func @transform_15(%arg0: i32) -> (i32, i32) {
    %c0_i32 = arith.constant 0 : i32
    %c0_i32_0 = arith.constant 0 : i32
    %c0_i32_1 = arith.constant 0 : i32
    return %c0_i32, %c0_i32_0 : i32, i32
  }
  func.func @transform_16(%arg0: i32) -> (i32, i32) {
    %c0_i32 = arith.constant 0 : i32
    %c0_i32_0 = arith.constant 0 : i32
    %c0_i32_1 = arith.constant 0 : i32
    return %c0_i32, %c0_i32_0 : i32, i32
  }
  func.func @transform_17(%arg0: i32) -> (i32, i32) {
    %c0_i32 = arith.constant 0 : i32
    %c0_i32_0 = arith.constant 0 : i32
    %c0_i32_1 = arith.constant 0 : i32
    return %c0_i32, %c0_i32_0 : i32, i32
  }
  func.func @transform_18(%arg0: i32) -> (i32, i32) {
    %c0_i32 = arith.constant 0 : i32
    %c0_i32_0 = arith.constant 0 : i32
    return %arg0, %c0_i32 : i32, i32
  }
}

</mosaic_0001>

<bundles_post_ra>
// kernel: tpu_custom_call.1
= control target key start
LH: loop header
LB: loop body
LE: loop exit
PB: predicated region body
PF: predicated region fallthrough
CT: control target
= control target key end

     0   :  { %s12138_s0 = inlined_call_operand.vmem [shape: s32[128,1], index: 0, kind: input, shape index: {}]   ;;  %s12139_s1 = inlined_call_operand.vmem [shape: s32[128,1], index: 1, kind: input, shape index: {}]   ;;  %s12140_s2 = inlined_call_operand.vmem [shape: f32[128,64], index: 2, kind: input, shape index: {}]   ;;  %s12141_s3 = inlined_call_operand.vmem [shape: bf16[1024,32], index: 3, kind: input, shape index: {}]   ;;  %s12142_s4 = inlined_call_operand.vmem [shape: bf16[128,32], index: 4, kind: input, shape index: {}]   ;;  %s12143_s5 = inlined_call_operand.vmem [shape: bf16[1024,256], index: 5, kind: input, shape index: {}]   ;;  %s12144_s6 = inlined_call_operand.vmem [shape: bf16[32,16], index: 6, kind: input, shape index: {}]   ;;  %s12145_s7 = inlined_call_operand.vmem [shape: f32[1,16], index: 7, kind: input, shape index: {}]   ;;  %s12146_s8 = inlined_call_operand.vmem [shape: f32[1,16], index: 8, kind: input, shape index: {}]   ;;  %s12147_s9 = inlined_call_operand.<no memory space> [shape: f32[1,1], index: 9, kind: input, shape index: {}]   ;;  %s12148_s10 = inlined_call_operand.vmem [shape: bf16[32,32], index: 10, kind: input, shape index: {}]   ;;  %s12149_s11 = inlined_call_operand.vmem [shape: f32[1,32], index: 11, kind: input, shape index: {}]   ;;  %s12150_s12 = inlined_call_operand.vmem [shape: bf16[32,64], index: 12, kind: input, shape index: {}]   ;;  %s12151_s13 = inlined_call_operand.vmem [shape: f32[1,64], index: 13, kind: input, shape index: {}]   ;;  %s12152_s14 = inlined_call_operand.hbm [shape: bf16[256,256], index: 14, kind: input, shape index: {}]   ;;  %s12153_s15 = inlined_call_operand.vmem [shape: f32[1,256], index: 15, kind: input, shape index: {}]   ;;  %s12154_s16 = inlined_call_operand.vmem [shape: f32[1,256], index: 16, kind: input, shape index: {}]   ;;  %s12155_s18 = inlined_call_operand.vmem [shape: f32[128,8], index: 18, kind: output, shape index: {}]   ;;  %s12156_s17 = inlined_call_operand.<no memory space> [shape: f32[1,1], index: 17, kind: input, shape index: {}]  }
   0x1   :  { %12303 = sst [smem:[#allocation199_spill]] %s12138_s0  ;;  %v23_v0 = vstv %s12147_s9  ;;  %v25_v1 = vstv %s12156_s17 }
   0x2   :  { %12304 = sst [smem:[#allocation200_spill]] %s12139_s1  ;;  %24 = vst [vmem:[#allocation2] sm:$0x1] %v23_v0  ;;  %26 = vst [vmem:[#allocation3] sm:$0x1] %v25_v1 }
   0x3   :  { %12305 = sst [smem:[#allocation201_spill]] %s12140_s2 }
   0x4   :  { %27 = vsyncpa [#allocation5], 0  ;;  %s8533_s0 = smov 0  }
   0x5 LB: > { %s8539_s19 = sadd.s32 4294967295, %s8425_s0   ;;  %p7592_p0 = scmp.ge.s32.totalorder %s8425_s0, 1  ;;  %s8425_s0 = sphi %s8533_s0, %s33_s0  }
   0x6   : > { %p472_p1 = scmp.lt.s32.totalorder %s8425_s0, 3  ;;  %s8427_s9 = smov [#allocation4]  }
   0x7   : > { %s508_s17 = sshll.u32 %s8427_s9, 4  ;;  %p7977_p3 = scmp.eq.s32.totalorder %s8539_s19, 0  ;;  %s509_s17 = int_to_ptr.vmem [resolvable:$true] %s508_s17 }
   0x8   : > { %p8543_p2 = pnand %p7592_p0, %p472_p1  ;;  %s8400_s20 = scalar_lea.vmem %s509_s17, 4096 }
   0x9   : > { %p8401_p7 = scmp.ne.s32.totalorder %s509_s17, %s8400_s20  ;;  %p8408_p10 = scmp.lt.s32.totalorder %s509_s17, %s509_s17 }
   0xa   : > { %p7973_p4 = pneg %p8543_p2  ;;  %p8409_p11 = scmp.lt.s32.totalorder %s8400_s20, %s8400_s20 }
   0xc   : > { %p7974_p5 = pnand %p7977_p3, %p7973_p4  ;;  %p8410_p12 = por %p8409_p11, %p8408_p10 }
   0xe   : > { %p8391_p6 = pneg %p7974_p5 }
  0x10   : > { %p8403_p8 = pnand %p8401_p7, %p8391_p6 }
  0x12   : > { %p8404_p9 = pneg %p8403_p8 }
  0x14   : > { %p8411_p13 = pnand %p8410_p12, %p8404_p9 }
  0x16   : > { %8414 = shalt.err (!%p8411_p13)
}
  0x17   : > { %s8428_s21 = smov 128   ;;  %s8429_s22 = smov 8  }
  0x18   : > { %7976 = dma.hbm_to_vmem [thread:$0]  (!%p7974_p5), %s12152_s14, 4096, %s509_s17, [#allocation5], %s8428_s21, %s8428_s21, %s8429_s22  }
  0x19   : > { %588 = sbr.rel (%p8543_p2) target bundleno = 1888 (0x760), region = 92 }
  0x1e   : > { %8420 = dma.done.wait (%p7977_p3), [#allocation5], 4096  }
  0x1f   : > { %8422 = vsyncadd (%p7977_p3), [#allocation5], 4294963200  ;;  %s7603_s24 = sshll.u32 %s8539_s19, 6  ;;  %s7597_s25 = sshll.u32 %s8539_s19, 3  ;;  %v8430_v2 = vmov 0   ;;  %v7994_v3 = vld [vmem:[%s12144_s6 + $0x8] sm:$0xff]  }
  0x20   : > { %p687_p0 = scmp.lt.s32.totalorder %s7603_s24, 127  ;;  %p669_p1 = scmp.lt.s32.totalorder %s7597_s25, 15  ;;  %7993 = vset.pattern.permute.xlu1 %v8430_v2  ;;  %7992 = vset.pattern.permute.xlu0 %v8430_v2  ;;  %v7995_v4 = vld [vmem:[%s12148_s10 + $0x8] sm:$0xff]   ;;  %v7996_v5 = vld [vmem:[%s12144_s6] sm:$0xff]   ;;  %vm975_vm0 = vcmask 261120   ;;  %vm1496_vm1 = vcmask 130048  }
  0x21   : > { %7845 = vmatprep.subr.bf16.mxu0 %v7994_v3  ;;  %7913 = vmatprep.subr.bf16.mxu1 %v7995_v4  ;;  %v7997_v6 = vld [vmem:[%s12148_s10] sm:$0xff]   ;;  %v8593_v11 = vld [vmem:[#allocation4 + $0x70] ss:$8 sps:$4 sm:$0xff]   ;;  %s12307_s9 = sld [smem:[#allocation199_spill]]  ;;  %vm2085_vm2 = vcmask 1041409   ;;  %vm2087_vm3 = vcmask 1042434  }
  0x22   : > { %s12849_s24 = smov (!%p687_p0, %s7603_s24), 127  ;;  %s12851_s25 = smov (!%p669_p1, %s7597_s25), 15  ;;  %7846 = vmatpush3.bf16.msra.mxu0 %v7994_v3  ;;  %7914 = vmatpush3.bf16.msra.mxu1 %v7995_v4  ;;  %v8595_v12 = vld [vmem:[#allocation4 + $0x74] ss:$8 sps:$4 sm:$0xff]   ;;  %v8605_v17 = vld [vmem:[#allocation4 + $0x60] ss:$8 sps:$4 sm:$0xff]  }
  0x23   : > { %s7604_s26 = sshll.u32 %s12849_s24, 2  ;;  %s7606_s27 = sshll.u32 %s12851_s25, 2  ;;  %7847 = vmatprep.subr.bf16.mxu0 %v7996_v5  ;;  %7915 = vmatprep.subr.bf16.mxu1 %v7997_v6  ;;  %v8607_v18 = vld [vmem:[#allocation4 + $0x64] ss:$8 sps:$4 sm:$0xff]   ;;  %v8612_v20 = vld [vmem:[#allocation4 + $0x50] ss:$8 sps:$4 sm:$0xff]  }
  0x24   : > { %s8578_s1 = scalar_lea.vmem %s12141_s3, %s7604_s26  ;;  %s696_s23 = scalar_lea.vmem %s12142_s4, %s7606_s27  ;;  %v8614_v21 = vld [vmem:[#allocation4 + $0x54] ss:$8 sps:$4 sm:$0xff]   ;;  %v8620_v22 = vld [vmem:[#allocation4 + $0x40] ss:$8 sps:$4 sm:$0xff]   ;;  %v8623_v23 = vld [vmem:[#allocation4 + $0x44] ss:$8 sps:$4 sm:$0xff]  }
  0x25   : > { %v7998_v7 = vld [vmem:[%s8578_s1] sm:$0xff]   ;;  %v8000_v9 = vld [vmem:[%s8578_s1 + $0x8] sm:$0xff]   ;;  %v8005_v13 = vld [vmem:[%s8578_s1 + $0x10] sm:$0xff]   ;;  %s8672_s26 = sshll.u32 %s12851_s25, 3  ;;  %s7798_s25 = sshll.u32 %s12849_s24, 3  ;;  %vm2089_vm4 = vcmask 1043459  }
  0x26   : > { %v7999_v8 = vld [vmem:[%s696_s23] sm:$0xff]   ;;  %7849 = vmatprep.mubr.msk.bf16.mxu0 %vm975_vm0, %v7998_v7  ;;  %7848 = vmatpush3.bf16.msra.mxu0 %v7996_v5  ;;  %v8001_v10 = vld [vmem:[%s696_s23 + $0x8] sm:$0xff]   ;;  %v8006_v14 = vld [vmem:[%s696_s23 + $0x10] sm:$0xff]   ;;  %s8727_s21 = scalar_lea.vmem %s12143_s5, %s7798_s25  ;;  %s12308_s2 = sld [smem:[#allocation200_spill]]  ;;  %vm2091_vm5 = vcmask 1044484   ;;  %vm2093_vm6 = vcmask 1045509  }
  0x27   : > { %7917 = vmatprep.mubr.msk.bf16.mxu1 %vm975_vm0, %v7999_v8  ;;  %7916 = vmatpush3.bf16.msra.mxu1 %v7997_v6  ;;  %v8007_v15 = vld [vmem:[%s8578_s1 + $0x18] sm:$0xff]   ;;  %v8012_v19 = vld [vmem:[%s8578_s1 + $0x20] sm:$0xff]   ;;  %v8013_v24 = vld [vmem:[%s8578_s1 + $0x28] sm:$0xff]   ;;  %s8685_s19 = scalar_lea.vmem %s12307_s9, %s8672_s26  ;;  %vm2095_vm7 = vcmask 1046534   ;;  %vm2097_vm8 = vcmask 1047559   ;;  %vm2156_vm9 = vcmask 64512   ;;  %s12031_s20 = scalar_lea.vmem %s12155_s18, %s8672_s26 }
  0x28   : > { %6114 = vmatprep.subr.bf16.mxu0 %v8595_v12  ;;  %v8008_v16 = vld [vmem:[%s696_s23 + $0x18] sm:$0xff]   ;;  %v8017_v25 = vld [vmem:[%s8578_s1 + $0x30] sm:$0xff]   ;;  %v8640_v30 = vld [vmem:[#allocation4 + $0x20] ss:$8 sps:$4 sm:$0xff]  }
  0x29   : > { %7850 = vmatmul.mubr.msk.bf16.vlgmr.msra.gmra.mxu0 %vm975_vm0, %v8000_v9  ;;  %v8628_v26 = vld [vmem:[#allocation4 + $0x34] ss:$8 sps:$4 sm:$0xff]   ;;  %v8631_v27 = vld [vmem:[#allocation4 + $0x30] ss:$8 sps:$4 sm:$0xff]   ;;  %v8636_v28 = vld [vmem:[#allocation4 + $0x24] ss:$8 sps:$4 sm:$0xff]  }
  0x2a   : > { %7918 = vmatmul.mubr.msk.bf16.vlgmr.msra.gmra.mxu1 %vm975_vm0, %v8001_v10  ;;  %6115 = vmatpush1.bf16.msra.mxu0 %v8593_v11  ;;  %v8018_v29 = vld [vmem:[%s8578_s1 + $0x38] sm:$0xff]   ;;  %v8022_v31 = vld [vmem:[%s8578_s1 + $0x40] sm:$0xff]   ;;  %v8023_v35 = vld [vmem:[%s8578_s1 + $0x48] sm:$0xff]  }
  0x2b   : > { %7853 = vmatprep.mubr.msk.bf16.mxu0 %vm975_vm0, %v8005_v13  ;;  %7921 = vmatprep.mubr.msk.bf16.mxu1 %vm975_vm0, %v8006_v14  ;;  %v8644_v32 = vld [vmem:[#allocation4 + $0x14] ss:$8 sps:$4 sm:$0xff]   ;;  %v8647_v33 = vld [vmem:[#allocation4 + $0x10] ss:$8 sps:$4 sm:$0xff]   ;;  %v8651_v34 = vld [vmem:[#allocation4 + $0x4] ss:$8 sps:$4 sm:$0xff]  }
  0x2c   : > { %6116 = vmatprep.subr.bf16.mxu0 %v8607_v18  ;;  %v8656_v36 = vld [vmem:[#allocation4] ss:$8 sps:$4 sm:$0xff]   ;;  %v8659_v37 = vld [vmem:[#allocation4 + $0xf4] ss:$8 sps:$4 sm:$0xff]   ;;  %v8663_v39 = vld [vmem:[#allocation4 + $0xf0] ss:$8 sps:$4 sm:$0xff]   ;;  %s8737_s23 = scalar_lea.vmem %s12308_s2, %s8672_s26 }
  0x2d   : > { %v8027_v38 = vld [vmem:[%s8578_s1 + $0x50] sm:$0xff]   ;;  %v8028_v41 = vld [vmem:[%s8578_s1 + $0x58] sm:$0xff]   ;;  %v8675_v42 = vld [vmem:[#allocation4 + $0xe0] ss:$8 sps:$4 sm:$0xff]  }
  0x2e   : > { %6117 = vmatpush1.bf16.msra.mxu0 %v8605_v17  ;;  %v8667_v40 = vld [vmem:[#allocation4 + $0xe4] ss:$8 sps:$4 sm:$0xff]   ;;  %v8678_v43 = vld [vmem:[#allocation4 + $0xd4] ss:$8 sps:$4 sm:$0xff]   ;;  %v8687_v45 = vld [vmem:[#allocation4 + $0xd0] ss:$8 sps:$4 sm:$0xff]  }
  0x2f   : > { %6118 = vmatprep.subr.bf16.mxu0 %v8614_v21  ;;  %v8032_v44 = vld [vmem:[%s8578_s1 + $0x60] sm:$0xff]   ;;  %v8033_v48 = vld [vmem:[%s8578_s1 + $0x68] sm:$0xff]   ;;  %v714_v49 = vld [vmem:[%s8685_s19 + $0x10] sm:$0xff] }
  0x30   : > { %v8690_v46 = vld [vmem:[#allocation4 + $0xc4] ss:$8 sps:$4 sm:$0xff]   ;;  %v8699_v50 = vld [vmem:[#allocation4 + $0xc0] ss:$8 sps:$4 sm:$0xff]   ;;  %v8702_v51 = vld [vmem:[#allocation4 + $0xb4] ss:$8 sps:$4 sm:$0xff]  }
  0x31   : > { %7854 = vmatmul.mubr.msk.bf16.gmra.mxu0 %vm975_vm0, %v8007_v15  ;;  %v712_v47 = vld [vmem:[%s8685_s19] sm:$0xff]  ;;  %v8037_v52 = vld [vmem:[%s8578_s1 + $0x70] sm:$0xff]   ;;  %v715_v53 = vld [vmem:[%s8685_s19 + $0x18] sm:$0xff] }
  0x32   : > { %7922 = vmatmul.mubr.msk.bf16.gmra.mxu1 %vm975_vm0, %v8008_v16  ;;  %7857 = vmatprep.mubr.msk.bf16.mxu0 %vm975_vm0, %v8012_v19  ;;  %v8707_v54 = vld [vmem:[#allocation4 + $0xb0] ss:$8 sps:$4 sm:$0xff]   ;;  %v8711_v55 = vld [vmem:[#allocation4 + $0xa4] ss:$8 sps:$4 sm:$0xff]   ;;  %v8718_v58 = vld [vmem:[#allocation4 + $0xa0] ss:$8 sps:$4 sm:$0xff]  }
  0x33   : > { %6119 = vmatpush1.bf16.msra.mxu0 %v8612_v20  ;;  %3318 = vperm.xlu1 %7993, %v712_v47   ;;  %v8038_v56 = vld [vmem:[%s8578_s1 + $0x78] sm:$0xff]   ;;  %v717_v57 = vld [vmem:[%s8685_s19 + $0x28] sm:$0xff]  ;;  %v8042_v60 = vld [vmem:[%s8578_s1 + $0x80] sm:$0xff]  }
  0x34   : > { %6120 = vmatprep.subr.bf16.mxu0 %v8623_v23  ;;  %v8721_v59 = vld [vmem:[#allocation4 + $0x94] ss:$8 sps:$4 sm:$0xff]   ;;  %v8731_v63 = vld [vmem:[#allocation4 + $0x90] ss:$8 sps:$4 sm:$0xff]   ;;  %v713_v0 = vld [vmem:[%s8685_s19 + $0x8] sm:$0xff] }
  0x35   : > { %v7680_v61 = vld [vmem:[#allocation2] ss:$0 sm:$0xff]  ;;  %v719_v62 = vld [vmem:[%s8685_s19 + $0x38] sm:$0xff]  ;;  %v8742_v1 = vld [vmem:[#allocation4 + $0x84] ss:$8 sps:$4 sm:$0xff]  }
  0x36   : > { %1696 = vperm.xlu0 %7992, %v7680_v61   ;;  %v720_v2 = vld [vmem:[%s8737_s23] sm:$0xff]  ;;  %v8043_v5 = vld [vmem:[%s8578_s1 + $0x88] sm:$0xff]   ;;  %v8047_v6 = vld [vmem:[%s8578_s1 + $0x90] sm:$0xff]  }
  0x37   : > { %6121 = vmatpush1.bf16.msra.mxu0 %v8620_v22  ;;  %3324 = vperm.xlu1 %7993, %v714_v49   ;;  %v8746_v3 = vld [vmem:[#allocation4 + $0x80] ss:$8 sps:$4 sm:$0xff]   ;;  %v722_v7 = vld [vmem:[%s8737_s23 + $0x10] sm:$0xff]  ;;  %v723_v9 = vld [vmem:[%s8737_s23 + $0x18] sm:$0xff] }
  0x38   : > { %6122 = vmatprep.subr.bf16.mxu0 %v8628_v26  ;;  %v716_v4 = vld [vmem:[%s8685_s19 + $0x20] sm:$0xff]  ;;  %v718_v8 = vld [vmem:[%s8685_s19 + $0x30] sm:$0xff]  ;;  %v8048_v10 = vld [vmem:[%s8578_s1 + $0x98] sm:$0xff]  }
  0x39   : > { %7858 = vmatmul.mubr.msk.bf16.gmra.mxu0 %vm975_vm0, %v8013_v24  ;;  %v721_v13 = vld [vmem:[%s8737_s23 + $0x8] sm:$0xff]  ;;  %v8052_v15 = vld [vmem:[%s8578_s1 + $0xa0] sm:$0xff]   ;;  %v727_v24 = vld [vmem:[%s8737_s23 + $0x38] sm:$0xff] }
  0x3a   : > { %7861 = vmatprep.mubr.msk.bf16.mxu0 %vm975_vm0, %v8017_v25  ;;  %3321 = vperm.xlu0 %7992, %v713_v0   ;;  %v8106_v14 = vld [vmem:[%s12150_s12 + $0x8] sm:$0xff]   ;;  %v724_v19 = vld [vmem:[%s8737_s23 + $0x20] sm:$0xff]  ;;  %v8067_v47 = vld [vmem:[%s8578_s1 + $0xd0] sm:$0xff]  }
  0x3b   : > { %6123 = vmatpush1.bf16.msra.mxu0 %v8631_v27  ;;  %3327 = vperm.xlu1 %7993, %v715_v53   ;;  %v725_v16 = vld [vmem:[%s8737_s23 + $0x28] sm:$0xff]  ;;  %v8110_v25 = vld [vmem:[%s12150_s12] sm:$0xff]   ;;  %v8078_v53 = vld [vmem:[%s8578_s1 + $0xf8] sm:$0xff]  }
  0x3c   : > { %6124 = vmatprep.subr.bf16.mxu0 %v8636_v28  ;;  %7925 = vmatprep.subr.bf16.mxu1 %v8106_v14  ;;  %v8073_v49 = vld [vmem:[%s8578_s1 + $0xe8] sm:$0xff]   ;;  %v8087_v61 = vld [vmem:[%s8727_s21 + $0x10] ss:$8 sps:$4 sm:$0xff]  }
  0x3d   : > { %7926 = vmatpush3.bf16.msra.mxu1 %v8106_v14  ;;  %v8090_v0 = vld [vmem:[%s8727_s21 + $0x20] ss:$8 sps:$4 sm:$0xff]   ;;  %v8105_v14 = vld [vmem:[%s8727_s21 + $0x70] ss:$8 sps:$4 sm:$0xff]  }
  0x3e   : > { %3330 = vperm.xlu0 %7992, %v716_v4   ;;  %7927 = vmatprep.subr.bf16.mxu1 %v8110_v25  ;;  %v8093_v4 = vld [vmem:[%s8727_s21 + $0x30] ss:$8 sps:$4 sm:$0xff]  }
  0x3f   : > { %6125 = vmatpush1.bf16.msra.mxu0 %v8640_v30  ;;  %3333 = vperm.xlu1 %7993, %v717_v57   ;;  %v8082_v57 = vld [vmem:[%s8727_s21] ss:$8 sps:$4 sm:$0xff]  }
  0x40   : > { %6126 = vmatprep.subr.bf16.mxu0 %v8644_v32 }
  0x41   : > { %7862 = vmatmul.mubr.msk.bf16.gmra.mxu0 %vm975_vm0, %v8018_v29  ;;  %v726_v29 = vld [vmem:[%s8737_s23 + $0x30] sm:$0xff]  ;;  %7928 = vmatpush3.bf16.msra.mxu1 %v8110_v25 }
  0x42   : > { %7865 = vmatprep.mubr.msk.bf16.mxu0 %vm975_vm0, %v8022_v31  ;;  %3336 = vperm.xlu0 %7992, %v718_v8   ;;  %v8053_v31 = vld [vmem:[%s8578_s1 + $0xa8] sm:$0xff]   ;;  %v8099_v8 = vld [vmem:[%s8727_s21 + $0x50] ss:$8 sps:$4 sm:$0xff]  }
  0x43   : > { %6127 = vmatpush1.bf16.msra.mxu0 %v8647_v33  ;;  %3339 = vperm.xlu1 %7993, %v719_v62   ;;  %v8088_v62 = vld [vmem:[%s8727_s21 + $0x24] ss:$8 sps:$4 sm:$0xff]  }
  0x44   : > { %6128 = vmatprep.subr.bf16.mxu0 %v8651_v34  ;;  %7937 = vmatprep.subr.bf16.mxu1 %v8595_v12  ;;  %v8068_v12 = vld [vmem:[%s8578_s1 + $0xd8] sm:$0xff]  }
  0x46   : > { %5402 = vperm.xlu0 %7992, %v721_v13   ;;  %v8103_v13 = vld [vmem:[%s8727_s21 + $0x74] ss:$8 sps:$4 sm:$0xff]  }
  0x47   : > { %6129 = vmatpush1.bf16.msra.mxu0 %v8656_v36  ;;  %5399 = vperm.xlu1 %7993, %v720_v2   ;;  %v8091_v2 = vld [vmem:[%s8727_s21 + $0x34] ss:$8 sps:$4 sm:$0xff]  }
  0x48   : > { %6130 = vmatprep.subr.bf16.mxu0 %v8659_v37 }
  0x49   : > { %7866 = vmatmul.mubr.msk.bf16.gmra.mxu0 %vm975_vm0, %v8023_v35  ;;  %v8057_v35 = vld [vmem:[%s8578_s1 + $0xb0] sm:$0xff]  }
  0x4a   : > { %7869 = vmatprep.mubr.msk.bf16.mxu0 %vm975_vm0, %v8027_v38  ;;  %5411 = vperm.xlu0 %7992, %v724_v19   ;;  %v8058_v38 = vld [vmem:[%s8578_s1 + $0xb8] sm:$0xff]  }
  0x4b   : > { %6131 = vmatpush2.bf16.msra.mxu0 %v8663_v39  ;;  %5405 = vperm.xlu1 %7993, %v722_v7   ;;  %v8097_v7 = vld [vmem:[%s8727_s21 + $0x54] ss:$8 sps:$4 sm:$0xff]  }
  0x4c   : > { %6132 = vmatprep.subr.bf16.mxu0 %v8667_v40  ;;  %v8111_v19 = vld [vmem:[%s8727_s21 + $0x94] ss:$8 sps:$4 sm:$0xff]  }
  0x4e   : > { %5417 = vperm.xlu0 %7992, %v726_v29  }
  0x4f   : > { %6133 = vmatpush2.bf16.msra.mxu0 %v8675_v42  ;;  %5408 = vperm.xlu1 %7993, %v723_v9   ;;  %v8100_v9 = vld [vmem:[%s8727_s21 + $0x64] ss:$8 sps:$4 sm:$0xff]  }
  0x50   : > { %6134 = vmatprep.subr.bf16.mxu0 %v8678_v43 }
  0x51   : > { %7870 = vmatmul.mubr.msk.bf16.gmra.mxu0 %vm975_vm0, %v8028_v41  ;;  %v8062_v41 = vld [vmem:[%s8578_s1 + $0xc0] sm:$0xff]  }
  0x52   : > { %7873 = vmatprep.mubr.msk.bf16.mxu0 %vm975_vm0, %v8032_v44  ;;  %v8063_v44 = vld [vmem:[%s8578_s1 + $0xc8] sm:$0xff]  }
  0x53   : > { %6135 = vmatpush2.bf16.msra.mxu0 %v8687_v45  ;;  %5414 = vperm.xlu1 %7993, %v725_v16   ;;  %v8109_v16 = vld [vmem:[%s8727_s21 + $0x80] ss:$8 sps:$4 sm:$0xff]  }
  0x54   : > { %6136 = vmatprep.subr.bf16.mxu0 %v8690_v46 }
  0x57   : > { %6137 = vmatpush2.bf16.msra.mxu0 %v8699_v50  ;;  %5420 = vperm.xlu1 %7993, %v727_v24   ;;  %v8819_v24 = vld [vmem:[%s12145_s7] ss:$0 sm:$0xff] }
  0x58   : > { %6138 = vmatprep.subr.bf16.mxu0 %v8702_v51 }
  0x59   : > { %7874 = vmatmul.mubr.msk.bf16.gmra.mxu0 %vm975_vm0, %v8033_v48  ;;  %v8072_v48 = vld [vmem:[%s8578_s1 + $0xe0] sm:$0xff]  }
  0x5a   : > { %7877 = vmatprep.mubr.msk.bf16.mxu0 %vm975_vm0, %v8037_v52  ;;  %v8077_v52 = vld [vmem:[%s8578_s1 + $0xf0] sm:$0xff]   ;;  %s12328_s1 = sld [smem:[#allocation201_spill]] }
  0x5b   : > { %6139 = vmatpush2.bf16.msra.mxu0 %v8707_v54 }
  0x5c   : > { %6140 = vmatprep.subr.bf16.mxu0 %v8711_v55 }
  0x5f   : > { %6141 = vmatpush2.bf16.msra.mxu0 %v8718_v58 }
  0x60   : > { %6142 = vmatprep.subr.bf16.mxu0 %v8721_v59  ;;  %s9307_s9 = scalar_lea.vmem %s12328_s1, %s8672_s26 }
  0x61   : > { %7878 = vmatmul.mubr.msk.bf16.gmra.mxu0 %vm975_vm0, %v8038_v56  ;;  %v8084_v56 = vld [vmem:[%s8727_s21 + $0x4] ss:$8 sps:$4 sm:$0xff]  }
  0x62   : > { %7881 = vmatprep.mubr.msk.bf16.mxu0 %vm975_vm0, %v8042_v60  ;;  %v8085_v60 = vld [vmem:[%s8727_s21 + $0x14] ss:$8 sps:$4 sm:$0xff]  }
  0x63   : > { %6143 = vmatpush2.bf16.msra.mxu0 %v8731_v63 }
  0x64   : > { %6144 = vmatprep.subr.bf16.mxu0 %v8742_v1 }
  0x67   : > { %6145 = vmatpush2.bf16.msra.mxu0 %v8746_v3 }
  0x69   : > { %7882 = vmatmul.mubr.msk.bf16.gmra.mxu0 %vm975_vm0, %v8043_v5  ;;  %v8094_v5 = vld [vmem:[%s8727_s21 + $0x44] ss:$8 sps:$4 sm:$0xff]  }
  0x6a   : > { %7885 = vmatprep.mubr.msk.bf16.mxu0 %vm975_vm0, %v8047_v6  ;;  %v8096_v6 = vld [vmem:[%s8727_s21 + $0x40] ss:$8 sps:$4 sm:$0xff]  }
  0x71   : > { %7886 = vmatmul.mubr.msk.bf16.gmra.mxu0 %vm975_vm0, %v8048_v10  ;;  %v8102_v10 = vld [vmem:[%s8727_s21 + $0x60] ss:$8 sps:$4 sm:$0xff]  }
  0x72   : > { %7889 = vmatprep.mubr.msk.bf16.mxu0 %vm975_vm0, %v8052_v15  ;;  %v8107_v15 = vld [vmem:[%s8727_s21 + $0x84] ss:$8 sps:$4 sm:$0xff]  }
  0x79   : > { %7890 = vmatmul.mubr.msk.bf16.gmra.mxu0 %vm975_vm0, %v8053_v31 }
  0x7a   : > { %7893 = vmatprep.mubr.msk.bf16.mxu0 %vm975_vm0, %v8057_v35 }
  0x81   : > { %7894 = vmatmul.mubr.msk.bf16.gmra.mxu0 %vm975_vm0, %v8058_v38  ;;  %v8825_v38 = vld [vmem:[%s12146_s8] ss:$0 sm:$0xff] }
  0x82   : > { %7897 = vmatprep.mubr.msk.bf16.mxu0 %vm975_vm0, %v8062_v41 }
  0x89   : > { %7898 = vmatmul.mubr.msk.bf16.gmra.mxu0 %vm975_vm0, %v8063_v44  ;;  %v8830_v44 = vld [vmem:[%s12149_s11] ss:$0 sm:$0xff] }
  0x8a   : > { %7901 = vmatprep.mubr.msk.bf16.mxu0 %vm975_vm0, %v8067_v47 }
  0x91   : > { %7902 = vmatmul.mubr.msk.bf16.gmra.mxu0 %vm975_vm0, %v8068_v12 }
  0x92   : > { %7905 = vmatprep.mubr.msk.bf16.mxu0 %vm975_vm0, %v8072_v48 }
  0x99   : > { %7906 = vmatmul.mubr.msk.bf16.gmra.mxu0 %vm975_vm0, %v8073_v49  ;;  %v8113_v49 = vld [vmem:[%s8727_s21 + $0x90] ss:$8 sps:$4 sm:$0xff]  }
  0x9a   : > { %7909 = vmatprep.mubr.msk.bf16.mxu0 %vm975_vm0, %v8077_v52 }
  0xa1   : > { %7910 = vmatmul.mubr.msk.bf16.gmra.mxu0 %vm975_vm0, %v8078_v53 }
  0xa2   : > { %6146 = vmatprep.mubr.bf16.mxu0 %v8084_v56 }
  0xa9   : > { %6147 = vmatmul.mubr.bf16.vlgmr.msra.gmra.mxu0 %v8082_v57 }
  0xaa   : > { %6156 = vmatprep.mubr.bf16.mxu0 %v8085_v60  ;;  %v8114_v60 = vld [vmem:[%s8727_s21 + $0xa4] ss:$8 sps:$4 sm:$0xff]  }
  0xb1   : > { %6157 = vmatmul.mubr.bf16.gmra.mxu0 %v8087_v61 }
  0xb2   : > { %6166 = vmatprep.mubr.bf16.mxu0 %v8088_v62 }
  0xb9   : > { %6167 = vmatmul.mubr.bf16.gmra.mxu0 %v8090_v0 }
  0xba   : > { %6176 = vmatprep.mubr.bf16.mxu0 %v8091_v2 }
  0xc1   : > { %6177 = vmatmul.mubr.bf16.gmra.mxu0 %v8093_v4 }
  0xc2   : > { %6186 = vmatprep.mubr.bf16.mxu0 %v8094_v5 }
  0xc9   : > { %6187 = vmatmul.mubr.bf16.gmra.mxu0 %v8096_v6 }
  0xca   : > { %6196 = vmatprep.mubr.bf16.mxu0 %v8097_v7 }
  0xd1   : > { %6197 = vmatmul.mubr.bf16.gmra.mxu0 %v8099_v8 }
  0xd2   : > { %6206 = vmatprep.mubr.bf16.mxu0 %v8100_v9 }
  0xd9   : > { %6207 = vmatmul.mubr.bf16.gmra.mxu0 %v8102_v10 }
  0xda   : > { %6216 = vmatprep.mubr.bf16.mxu0 %v8103_v13 }
  0xe1   : > { %6217 = vmatmul.mubr.bf16.gmra.mxu0 %v8105_v14 }
  0xe2   : > { %6226 = vmatprep.mubr.bf16.mxu0 %v8107_v15 }
  0xe9   : > { %v7851_v25 = vpop.f32.mrf.mxu0  ;;  %6227 = vmatmul.mubr.bf16.gmra.mxu0 %v8109_v16 }
  0xea   : > { %v1115_v29 = vadd.f32 %v7851_v25, %v8819_v24  ;;  %v7919_v31 = vpop.f32.mrf.mxu1  ;;  %6236 = vmatprep.mubr.bf16.mxu0 %v8111_v19 }
  0xeb   : > { %v1106_v35 = vpop.f32.mrf.mxu0  ;;  %v5143_v61 = vadd.f32 %v7919_v31, %v8830_v44 }
  0xec   : > { %v1363_v41 = vmax.f32 %v1115_v29, 0.0  ;;  %v1107_v47 = vadd.f32 %v8819_v24, %v1106_v35  ;;  %v5134_v12 = vpop.f32.mrf.mxu1 }
  0xed   : > { %v7852_v48 = vpop.f32.mrf.mxu0  ;;  %v5135_v62 = vadd.f32 %v8830_v44, %v5134_v12  ;;  %v5167_v29 = vmax.f32 %v5143_v61, 0.0 }
  0xee   : > { %v1361_v52 = vmax.f32 %v1107_v47, 0.0  ;;  %v1118_v53 = vadd.f32 %v7852_v48, %v8819_v24  ;;  %v7920_v56 = vpop.f32.mrf.mxu1  ;;  %v1434_v57 = vmul.f32 %v8825_v38, %v1363_v41 }
  0xef   : > { %v5146_v0 = vadd.f32 %v7920_v56, %v8830_v44  ;;  %v1109_v2 = vpop.f32.mrf.mxu0  ;;  %v5165_v31 = vmax.f32 %v5135_v62, 0.0  ;;  %v8116_v62 = vld [vmem:[%s8727_s21 + $0xa0] ss:$8 sps:$4 sm:$0xff]  }
  0xf0   : > { %v1364_v4 = vmax.f32 %v1118_v53, 0.0  ;;  %v1110_v5 = vadd.f32 %v8819_v24, %v1109_v2  ;;  %v5137_v6 = vpop.f32.mrf.mxu1  ;;  %v1503_v7 = vsel %vm1496_vm1, %v1434_v57, 0.0  ;;  %v1432_v8 = vmul.f32 %v8825_v38, %v1361_v52 }
  0xf1   : > { %v5168_v9 = vmax.f32 %v5146_v0, 0.0  ;;  %v5138_v10 = vadd.f32 %v8830_v44, %v5137_v6  ;;  %v7855_v13 = vpop.f32.mrf.mxu0  ;;  %6237 = vmatmul.mubr.bf16.gmra.mxu0 %v8113_v49  ;;  %1504 = vadd.xlane.f32.xlu1 %v1503_v7  ;;  %v8117_v7 = vld [vmem:[%s8727_s21 + $0xb4] ss:$8 sps:$4 sm:$0xff]  }
  0xf2   : > { %v1362_v14 = vmax.f32 %v1110_v5, 0.0  ;;  %v1131_v15 = vadd.f32 %v7855_v13, %v8819_v24  ;;  %v7923_v16 = vpop.f32.mrf.mxu1  ;;  %v1497_v19 = vsel %vm1496_vm1, %v1432_v8, 0.0  ;;  %v1435_v25 = vmul.f32 %v8825_v38, %v1364_v4  ;;  %6246 = vmatprep.mubr.bf16.mxu0 %v8114_v60 }
  0xf3   : > { %v5166_v35 = vmax.f32 %v5138_v10, 0.0  ;;  %v5159_v41 = vadd.f32 %v7923_v16, %v8830_v44  ;;  %v1122_v47 = vpop.f32.mrf.mxu0  ;;  %1498 = vadd.xlane.f32.xlu0 %v1497_v19  ;;  %v5174_v56 = vpack.c.bf16 %v5168_v9, %v5167_v29 }
  0xf4   : > { %v1367_v12 = vmax.f32 %v1131_v15, 0.0  ;;  %v1123_v48 = vadd.f32 %v8819_v24, %v1122_v47  ;;  %v5150_v49 = vpop.f32.mrf.mxu1  ;;  %v1506_v52 = vsel %vm1496_vm1, %v1435_v25, 0.0  ;;  %v1433_v53 = vmul.f32 %v8825_v38, %v1362_v14 }
  0xf5   : > { %v5173_v57 = vpack.c.bf16 %v5166_v35, %v5165_v31  ;;  %v5151_v60 = vadd.f32 %v8830_v44, %v5150_v49  ;;  %v7856_v61 = vpop.f32.mrf.mxu0  ;;  %1507 = vadd.xlane.f32.xlu1 %v1506_v52  ;;  %v5171_v8 = vmax.f32 %v5159_v41, 0.0 }
  0xf6   : > { %v1365_v0 = vmax.f32 %v1123_v48, 0.0  ;;  %v1134_v2 = vadd.f32 %v7856_v61, %v8819_v24  ;;  %v7924_v4 = vpop.f32.mrf.mxu1  ;;  %v1500_v5 = vsel %vm1496_vm1, %v1433_v53, 0.0  ;;  %v1438_v6 = vmul.f32 %v8825_v38, %v1367_v12 }
  0xf7   : > { %v5162_v10 = vadd.f32 %v7924_v4, %v8830_v44  ;;  %7929 = vmatprep.mubr.msk.bf16.mxu1 %vm975_vm0, %v5173_v57  ;;  %v1125_v9 = vpop.f32.mrf.mxu0  ;;  %1501 = vadd.xlane.f32.xlu0 %v1500_v5  ;;  %v5169_v19 = vmax.f32 %v5151_v60, 0.0 }
  0xf8   : > { %v1368_v13 = vmax.f32 %v1134_v2, 0.0  ;;  %v1126_v14 = vadd.f32 %v8819_v24, %v1125_v9  ;;  %v5153_v15 = vpop.f32.mrf.mxu1  ;;  %7930 = vmatmul.mubr.msk.bf16.vlgmr.msra.gmra.mxu1 %vm975_vm0, %v5174_v56  ;;  %v1515_v16 = vsel %vm1496_vm1, %v1438_v6, 0.0  ;;  %v1436_v12 = vmul.f32 %v8825_v38, %v1365_v0  ;;  %v8119_v2 = vld [vmem:[%s8727_s21 + $0xb0] ss:$8 sps:$4 sm:$0xff]  }
  0xf9   : > { %v5172_v25 = vmax.f32 %v5162_v10, 0.0  ;;  %v5154_v29 = vadd.f32 %v8830_v44, %v5153_v15  ;;  %7953 = vmatpush1.bf16.msra.mxu1 %v8593_v11  ;;  %v7859_v31 = vpop.f32.mrf.mxu0  ;;  %6247 = vmatmul.mubr.bf16.gmra.mxu0 %v8116_v62  ;;  %v8125_v10 = vld [vmem:[%s8727_s21 + $0xd4] ss:$8 sps:$4 sm:$0xff]  }
  0xfa   : > { %v1366_v35 = vmax.f32 %v1126_v14, 0.0  ;;  %v1147_v41 = vadd.f32 %v7859_v31, %v8819_v24  ;;  %7938 = vmatprep.subr.bf16.mxu1 %v8607_v18  ;;  %v1439_v47 = vmul.f32 %v8825_v38, %v1368_v13  ;;  %6256 = vmatprep.mubr.bf16.mxu0 %v8117_v7  ;;  %v1509_v62 = vsel %vm1496_vm1, %v1436_v12, 0.0  ;;  %v8120_v12 = vld [vmem:[%s8727_s21 + $0xc0] ss:$8 sps:$4 sm:$0xff]  }
  0xfb   : > { %v5176_v48 = vpack.c.bf16 %v5172_v25, %v5171_v8  ;;  %v5170_v49 = vmax.f32 %v5154_v29, 0.0  ;;  %v1138_v52 = vpop.f32.mrf.mxu0  ;;  %1516 = vadd.xlane.f32.xlu0 %v1515_v16 }
  0xfc   : > { %v1371_v44 = vmax.f32 %v1147_v41, 0.0  ;;  %v1139_v11 = vadd.f32 %v8819_v24, %v1138_v52  ;;  %v1518_v53 = vsel %vm1496_vm1, %v1439_v47, 0.0  ;;  %v1437_v56 = vmul.f32 %v8825_v38, %v1366_v35 }
  0xfd   : > { %v5175_v57 = vpack.c.bf16 %v5170_v49, %v5169_v19  ;;  %7954 = vmatpush1.bf16.msra.mxu1 %v8605_v17  ;;  %v7860_v18 = vpop.f32.mrf.mxu0  ;;  %1519 = vadd.xlane.f32.xlu1 %v1518_v53  ;;  %v8122_v17 = vld [vmem:[%s8727_s21 + $0xc4] ss:$8 sps:$4 sm:$0xff]  }
  0xfe   : > { %v1369_v60 = vmax.f32 %v1139_v11, 0.0  ;;  %v1150_v61 = vadd.f32 %v7860_v18, %v8819_v24  ;;  %7939 = vmatprep.subr.bf16.mxu1 %v8614_v21  ;;  %v1442_v0 = vmul.f32 %v8825_v38, %v1371_v44  ;;  %v1512_v5 = vsel %vm1496_vm1, %v1437_v56, 0.0 }
  0xff   : > { %7933 = vmatprep.mubr.msk.bf16.mxu1 %vm975_vm0, %v5175_v57  ;;  %v1141_v4 = vpop.f32.mrf.mxu0  ;;  %1510 = vadd.xlane.f32.xlu0 %v1509_v62 }
 0x100   : > { %v1372_v6 = vmax.f32 %v1150_v61, 0.0  ;;  %v1142_v7 = vadd.f32 %v8819_v24, %v1141_v4  ;;  %7934 = vmatmul.mubr.msk.bf16.gmra.mxu1 %vm975_vm0, %v5176_v48  ;;  %v1527_v8 = vsel %vm1496_vm1, %v1442_v0, 0.0  ;;  %v1440_v21 = vmul.f32 %v8825_v38, %v1369_v60 }
 0x101   : > { %7955 = vmatpush1.bf16.msra.mxu1 %v8612_v20  ;;  %v7863_v9 = vpop.f32.mrf.mxu0  ;;  %1513 = vadd.xlane.f32.xlu1 %v1512_v5 }
 0x102   : > { %v1370_v13 = vmax.f32 %v1142_v7, 0.0  ;;  %v1163_v14 = vadd.f32 %v7863_v9, %v8819_v24  ;;  %7940 = vmatprep.subr.bf16.mxu1 %v8623_v23  ;;  %v1443_v15 = vmul.f32 %v8825_v38, %v1372_v6  ;;  %6257 = vmatmul.mubr.bf16.gmra.mxu0 %v8119_v2  ;;  %v1521_v19 = vsel %vm1496_vm1, %v1440_v21, 0.0 }
 0x103   : > { %v1154_v16 = vpop.f32.mrf.mxu0  ;;  %1528 = vadd.xlane.f32.xlu0 %v1527_v8  ;;  %6266 = vmatprep.mubr.bf16.mxu0 %v8122_v17 }
 0x104   : > { %v1375_v25 = vmax.f32 %v1163_v14, 0.0  ;;  %v1155_v29 = vadd.f32 %v8819_v24, %v1154_v16  ;;  %v1530_v20 = vsel %vm1496_vm1, %v1443_v15, 0.0  ;;  %v1441_v31 = vmul.f32 %v8825_v38, %v1370_v13  ;;  %6276 = vmatprep.mubr.bf16.mxu1 %v8125_v10 }
 0x105   : > { %7956 = vmatpush1.bf16.msra.mxu1 %v8620_v22  ;;  %v7864_v23 = vpop.f32.mrf.mxu0  ;;  %1531 = vadd.xlane.f32.xlu1 %v1530_v20 }
 0x106   : > { %v1373_v35 = vmax.f32 %v1155_v29, 0.0  ;;  %v1166_v41 = vadd.f32 %v7864_v23, %v8819_v24  ;;  %7941 = vmatprep.subr.bf16.mxu1 %v8628_v26  ;;  %v1446_v47 = vmul.f32 %v8825_v38, %v1375_v25  ;;  %v1524_v49 = vsel %vm1496_vm1, %v1441_v31, 0.0 }
 0x107   : > { %v1157_v48 = vpop.f32.mrf.mxu0  ;;  %1522 = vadd.xlane.f32.xlu0 %v1521_v19 }
 0x108   : > { %v1376_v52 = vmax.f32 %v1166_v41, 0.0  ;;  %v1158_v44 = vadd.f32 %v8819_v24, %v1157_v48  ;;  %v1539_v11 = vsel %vm1496_vm1, %v1446_v47, 0.0  ;;  %v1444_v22 = vmul.f32 %v8825_v38, %v1373_v35 }
 0x109   : > { %7957 = vmatpush1.bf16.msra.mxu1 %v8631_v27  ;;  %v7867_v53 = vpop.f32.mrf.mxu0  ;;  %1525 = vadd.xlane.f32.xlu1 %v1524_v49 }
 0x10a   : > { %v1374_v56 = vmax.f32 %v1158_v44, 0.0  ;;  %v1179_v26 = vadd.f32 %v7867_v53, %v8819_v24  ;;  %7942 = vmatprep.subr.bf16.mxu1 %v8636_v28  ;;  %v1447_v57 = vmul.f32 %v8825_v38, %v1376_v52  ;;  %6267 = vmatmul.mubr.bf16.gmra.mxu0 %v8120_v12  ;;  %v1533_v60 = vsel %vm1496_vm1, %v1444_v22, 0.0 }
 0x10b   : > { %v1170_v18 = vpop.f32.mrf.mxu0  ;;  %1540 = vadd.xlane.f32.xlu0 %v1539_v11 }
 0x10c   : > { %v1379_v61 = vmax.f32 %v1179_v26, 0.0  ;;  %v1171_v62 = vadd.f32 %v8819_v24, %v1170_v18  ;;  %v1542_v0 = vsel %vm1496_vm1, %v1447_v57, 0.0  ;;  %v1445_v27 = vmul.f32 %v8825_v38, %v1374_v56 }
 0x10d   : > { %7958 = vmatpush1.bf16.msra.mxu1 %v8640_v30  ;;  %v7868_v2 = vpop.f32.mrf.mxu0  ;;  %1543 = vadd.xlane.f32.xlu1 %v1542_v0 }
 0x10e   : > { %v1377_v4 = vmax.f32 %v1171_v62, 0.0  ;;  %v1182_v28 = vadd.f32 %v7868_v2, %v8819_v24  ;;  %7943 = vmatprep.subr.bf16.mxu1 %v8644_v32  ;;  %v1450_v5 = vmul.f32 %v8825_v38, %v1379_v61  ;;  %v1536_v6 = vsel %vm1496_vm1, %v1445_v27, 0.0 }
 0x10f   : > { %v1173_v17 = vpop.f32.mrf.mxu0  ;;  %1534 = vadd.xlane.f32.xlu0 %v1533_v60 }
 0x110   : > { %v1380_v7 = vmax.f32 %v1182_v28, 0.0  ;;  %v1174_v8 = vadd.f32 %v8819_v24, %v1173_v17  ;;  %v1551_v21 = vsel %vm1496_vm1, %v1450_v5, 0.0  ;;  %v1448_v30 = vmul.f32 %v8825_v38, %v1377_v4 }
 0x111   : > { %7959 = vmatpush1.bf16.msra.mxu1 %v8647_v33  ;;  %v7871_v10 = vpop.f32.mrf.mxu0  ;;  %1537 = vadd.xlane.f32.xlu1 %v1536_v6 }
 0x112   : > { %v1378_v9 = vmax.f32 %v1174_v8, 0.0  ;;  %v1195_v32 = vadd.f32 %v7871_v10, %v8819_v24  ;;  %7944 = vmatprep.subr.bf16.mxu1 %v8651_v34  ;;  %v1451_v13 = vmul.f32 %v8825_v38, %v1380_v7  ;;  %v1545_v15 = vsel %vm1496_vm1, %v1448_v30, 0.0 }
 0x113   : > { %v1186_v14 = vpop.f32.mrf.mxu0  ;;  %1552 = vadd.xlane.f32.xlu0 %v1551_v21 }
 0x114   : > { %v1383_v16 = vmax.f32 %v1195_v32, 0.0  ;;  %v1187_v19 = vadd.f32 %v8819_v24, %v1186_v14  ;;  %v1554_v25 = vsel %vm1496_vm1, %v1451_v13, 0.0  ;;  %v1449_v33 = vmul.f32 %v8825_v38, %v1378_v9 }
 0x115   : > { %7960 = vmatpush1.bf16.msra.mxu1 %v8656_v36  ;;  %v7872_v29 = vpop.f32.mrf.mxu0  ;;  %1555 = vadd.xlane.f32.xlu1 %v1554_v25 }
 0x116   : > { %v1381_v20 = vmax.f32 %v1187_v19, 0.0  ;;  %v1198_v34 = vadd.f32 %v7872_v29, %v8819_v24  ;;  %7945 = vmatprep.subr.bf16.mxu1 %v8659_v37  ;;  %v1454_v31 = vmul.f32 %v8825_v38, %v1383_v16  ;;  %v1548_v35 = vsel %vm1496_vm1, %v1449_v33, 0.0 }
 0x117   : > { %v1189_v23 = vpop.f32.mrf.mxu0  ;;  %1546 = vadd.xlane.f32.xlu0 %v1545_v15 }
 0x118   : > { %v1384_v41 = vmax.f32 %v1198_v34, 0.0  ;;  %v1190_v47 = vadd.f32 %v8819_v24, %v1189_v23  ;;  %v1563_v12 = vsel %vm1496_vm1, %v1454_v31, 0.0  ;;  %v1452_v36 = vmul.f32 %v8825_v38, %v1381_v20 }
 0x119   : > { %7961 = vmatpush2.bf16.msra.mxu1 %v8663_v39  ;;  %v7875_v48 = vpop.f32.mrf.mxu0  ;;  %1549 = vadd.xlane.f32.xlu1 %v1548_v35 }
 0x11a   : > { %v1382_v49 = vmax.f32 %v1190_v47, 0.0  ;;  %v1211_v37 = vadd.f32 %v7875_v48, %v8819_v24  ;;  %7946 = vmatprep.subr.bf16.mxu1 %v8667_v40  ;;  %v1455_v52 = vmul.f32 %v8825_v38, %v1384_v41  ;;  %v1557_v11 = vsel %vm1496_vm1, %v1452_v36, 0.0 }
 0x11b   : > { %v1202_v44 = vpop.f32.mrf.mxu0  ;;  %1564 = vadd.xlane.f32.xlu0 %v1563_v12 }
 0x11c   : > { %v1387_v22 = vmax.f32 %v1211_v37, 0.0  ;;  %v1203_v53 = vadd.f32 %v8819_v24, %v1202_v44  ;;  %v1566_v56 = vsel %vm1496_vm1, %v1455_v52, 0.0  ;;  %v1453_v39 = vmul.f32 %v8825_v38, %v1382_v49 }
 0x11d   : > { %7962 = vmatpush2.bf16.msra.mxu1 %v8675_v42  ;;  %v7876_v26 = vpop.f32.mrf.mxu0  ;;  %1567 = vadd.xlane.f32.xlu1 %v1566_v56 }
 0x11e   : > { %v1385_v57 = vmax.f32 %v1203_v53, 0.0  ;;  %v1214_v40 = vadd.f32 %v7876_v26, %v8819_v24  ;;  %7947 = vmatprep.subr.bf16.mxu1 %v8678_v43  ;;  %v1458_v18 = vmul.f32 %v8825_v38, %v1387_v22  ;;  %v1560_v61 = vsel %vm1496_vm1, %v1453_v39, 0.0  ;;  %v8123_v39 = vld [vmem:[%s8727_s21 + $0xd0] ss:$8 sps:$4 sm:$0xff]  }
 0x11f   : > { %v1205_v60 = vpop.f32.mrf.mxu0  ;;  %1558 = vadd.xlane.f32.xlu0 %v1557_v11 }
 0x120   : > { %v1388_v62 = vmax.f32 %v1214_v40, 0.0  ;;  %v1206_v0 = vadd.f32 %v8819_v24, %v1205_v60  ;;  %v1575_v27 = vsel %vm1496_vm1, %v1458_v18, 0.0  ;;  %v1456_v42 = vmul.f32 %v8825_v38, %v1385_v57  ;;  %v8126_v40 = vld [vmem:[%s8727_s21 + $0xe4] ss:$8 sps:$4 sm:$0xff]  }
 0x121   : > { %7963 = vmatpush2.bf16.msra.mxu1 %v8687_v45  ;;  %v7879_v2 = vpop.f32.mrf.mxu0  ;;  %1561 = vadd.xlane.f32.xlu1 %v1560_v61 }
 0x122   : > { %v1386_v4 = vmax.f32 %v1206_v0, 0.0  ;;  %v1227_v43 = vadd.f32 %v7879_v2, %v8819_v24  ;;  %7948 = vmatprep.subr.bf16.mxu1 %v8690_v46  ;;  %v1459_v28 = vmul.f32 %v8825_v38, %v1388_v62  ;;  %v1569_v17 = vsel %vm1496_vm1, %v1456_v42, 0.0 }
 0x123   : > { %v1218_v5 = vpop.f32.mrf.mxu0  ;;  %1576 = vadd.xlane.f32.xlu0 %v1575_v27 }
 0x124   : > { %v1391_v6 = vmax.f32 %v1227_v43, 0.0  ;;  %v1219_v7 = vadd.f32 %v8819_v24, %v1218_v5  ;;  %v1578_v8 = vsel %vm1496_vm1, %v1459_v28, 0.0  ;;  %v1457_v45 = vmul.f32 %v8825_v38, %v1386_v4 }
 0x125   : > { %7964 = vmatpush2.bf16.msra.mxu1 %v8699_v50  ;;  %v7880_v21 = vpop.f32.mrf.mxu0  ;;  %1579 = vadd.xlane.f32.xlu1 %v1578_v8 }
 0x126   : > { %v1389_v30 = vmax.f32 %v1219_v7, 0.0  ;;  %v1230_v46 = vadd.f32 %v7880_v21, %v8819_v24  ;;  %7949 = vmatprep.subr.bf16.mxu1 %v8702_v51  ;;  %v1462_v10 = vmul.f32 %v8825_v38, %v1391_v6  ;;  %v1572_v32 = vsel %vm1496_vm1, %v1457_v45, 0.0  ;;  %v8128_v45 = vld [vmem:[%s8727_s21 + $0xe0] ss:$8 sps:$4 sm:$0xff]  }
 0x127   : > { %v1221_v9 = vpop.f32.mrf.mxu0  ;;  %1570 = vadd.xlane.f32.xlu0 %v1569_v17 }
 0x128   : > { %v1392_v13 = vmax.f32 %v1230_v46, 0.0  ;;  %v1222_v14 = vadd.f32 %v8819_v24, %v1221_v9  ;;  %v1587_v15 = vsel %vm1496_vm1, %v1462_v10, 0.0  ;;  %v1460_v50 = vmul.f32 %v8825_v38, %v1389_v30  ;;  %v8129_v46 = vld [vmem:[%s8727_s21 + $0xf4] ss:$8 sps:$4 sm:$0xff]  }
 0x129   : > { %7965 = vmatpush2.bf16.msra.mxu1 %v8707_v54  ;;  %v7883_v16 = vpop.f32.mrf.mxu0  ;;  %1573 = vadd.xlane.f32.xlu1 %v1572_v32 }
 0x12a   : > { %v1390_v19 = vmax.f32 %v1222_v14, 0.0  ;;  %v1243_v51 = vadd.f32 %v7883_v16, %v8819_v24  ;;  %7950 = vmatprep.subr.bf16.mxu1 %v8711_v55  ;;  %v1463_v25 = vmul.f32 %v8825_v38, %v1392_v13  ;;  %v1581_v29 = vsel %vm1496_vm1, %v1460_v50, 0.0 }
 0x12b   : > { %v1234_v33 = vpop.f32.mrf.mxu0  ;;  %1588 = vadd.xlane.f32.xlu0 %v1587_v15 }
 0x12c   : > { %v1395_v20 = vmax.f32 %v1243_v51, 0.0  ;;  %v1235_v34 = vadd.f32 %v8819_v24, %v1234_v33  ;;  %v1590_v31 = vsel %vm1496_vm1, %v1463_v25, 0.0  ;;  %v1461_v54 = vmul.f32 %v8825_v38, %v1390_v19  ;;  %v9013_v25 = vpop.permute.xlu1 %3318 }
 0x12d   : > { %7966 = vmatpush2.bf16.msra.mxu1 %v8718_v58  ;;  %v7884_v23 = vpop.f32.mrf.mxu0  ;;  %1591 = vadd.xlane.f32.xlu1 %v1590_v31  ;;  %12309 = vst [vmem:[#allocation7_spill] sm:$0xff] %v9013_v25 }
 0x12e   : > { %v1393_v35 = vmax.f32 %v1235_v34, 0.0  ;;  %v1246_v55 = vadd.f32 %v7884_v23, %v8819_v24  ;;  %7951 = vmatprep.subr.bf16.mxu1 %v8721_v59  ;;  %v1466_v41 = vmul.f32 %v8825_v38, %v1395_v20  ;;  %v1584_v12 = vsel %vm1496_vm1, %v1461_v54, 0.0 }
 0x12f   : > { %v1237_v47 = vpop.f32.mrf.mxu0  ;;  %1582 = vadd.xlane.f32.xlu0 %v1581_v29 }
 0x130   : > { %v1396_v36 = vmax.f32 %v1246_v55, 0.0  ;;  %v1238_v48 = vadd.f32 %v8819_v24, %v1237_v47  ;;  %v1599_v49 = vsel %vm1496_vm1, %v1466_v41, 0.0  ;;  %v1464_v58 = vmul.f32 %v8825_v38, %v1393_v35  ;;  %v8131_v55 = vld [vmem:[%s8727_s21 + $0xf0] ss:$8 sps:$4 sm:$0xff]  }
 0x131   : > { %7967 = vmatpush2.bf16.msra.mxu1 %v8731_v63  ;;  %v7887_v37 = vpop.f32.mrf.mxu0  ;;  %1585 = vadd.xlane.f32.xlu1 %v1584_v12  ;;  %v8132_v12 = vld [vmem:[%s8727_s21 + $0x104] ss:$8 sps:$4 sm:$0xff]  }
 0x132   : > { %v1394_v59 = vmax.f32 %v1238_v48, 0.0  ;;  %v1259_v52 = vadd.f32 %v7887_v37, %v8819_v24  ;;  %7952 = vmatprep.subr.bf16.mxu1 %v8742_v1  ;;  %v1467_v44 = vmul.f32 %v8825_v38, %v1396_v36  ;;  %v1593_v22 = vsel %vm1496_vm1, %v1464_v58, 0.0 }
 0x133   : > { %v1250_v11 = vpop.f32.mrf.mxu0  ;;  %1600 = vadd.xlane.f32.xlu0 %v1599_v49 }
 0x134   : > { %v1399_v53 = vmax.f32 %v1259_v52, 0.0  ;;  %v1251_v56 = vadd.f32 %v8819_v24, %v1250_v11  ;;  %v1602_v63 = vsel %vm1496_vm1, %v1467_v44, 0.0  ;;  %v1465_v26 = vmul.f32 %v8825_v38, %v1394_v59  ;;  %v9026_v59 = vpop.permute.xlu1 %3324 }
 0x135   : > { %7968 = vmatpush2.bf16.msra.mxu1 %v8746_v3  ;;  %v7888_v57 = vpop.f32.mrf.mxu0  ;;  %1603 = vadd.xlane.f32.xlu1 %v1602_v63  ;;  %12310 = vst [vmem:[#allocation8_spill] sm:$0xff] %v9026_v59 }
 0x136   : > { %v1397_v1 = vmax.f32 %v1251_v56, 0.0  ;;  %v1262_v18 = vadd.f32 %v7888_v57, %v8819_v24  ;;  %v1470_v60 = vmul.f32 %v8825_v38, %v1399_v53  ;;  %v1596_v62 = vsel %vm1496_vm1, %v1465_v26, 0.0 }
 0x137   : > { %v1253_v61 = vpop.f32.mrf.mxu0  ;;  %1594 = vadd.xlane.f32.xlu0 %v1593_v22 }
 0x138   : > { %v1400_v0 = vmax.f32 %v1262_v18, 0.0  ;;  %6277 = vmatmul.mubr.bf16.vlgmr.msra.gmra.mxu1 %v8123_v39  ;;  %v1254_v27 = vadd.f32 %v8819_v24, %v1253_v61  ;;  %v1611_v42 = vsel %vm1496_vm1, %v1470_v60, 0.0  ;;  %v1468_v3 = vmul.f32 %v8825_v38, %v1397_v1  ;;  %v8134_v60 = vld [vmem:[%s8727_s21 + $0x100] ss:$8 sps:$4 sm:$0xff]  }
 0x139   : > { %v7891_v2 = vpop.f32.mrf.mxu0  ;;  %1597 = vadd.xlane.f32.xlu1 %v1596_v62  ;;  %6286 = vmatprep.mubr.bf16.mxu1 %v8126_v40 }
 0x13a   : > { %v1398_v4 = vmax.f32 %v1254_v27, 0.0  ;;  %v1275_v43 = vadd.f32 %v7891_v2, %v8819_v24  ;;  %v1471_v28 = vmul.f32 %v8825_v38, %v1400_v0  ;;  %v1605_v17 = vsel %vm1496_vm1, %v1468_v3, 0.0  ;;  %v8135_v0 = vld [vmem:[%s8727_s21 + $0x114] ss:$8 sps:$4 sm:$0xff]   ;;  %v9039_v27 = vpop.permute.xlu1 %3327 }
 0x13b   : > { %v1266_v5 = vpop.f32.mrf.mxu0  ;;  %1612 = vadd.xlane.f32.xlu0 %v1611_v42  ;;  %12311 = vst [vmem:[#allocation9_spill] sm:$0xff] %v9039_v27 }
 0x13c   : > { %v1403_v6 = vmax.f32 %v1275_v43, 0.0  ;;  %v1267_v7 = vadd.f32 %v8819_v24, %v1266_v5  ;;  %v1614_v8 = vsel %vm1496_vm1, %v1471_v28, 0.0  ;;  %v1469_v21 = vmul.f32 %v8825_v38, %v1398_v4 }
 0x13d   : > { %v7892_v30 = vpop.f32.mrf.mxu0  ;;  %1615 = vadd.xlane.f32.xlu1 %v1614_v8 }
 0x13e   : > { %v1401_v10 = vmax.f32 %v1267_v7, 0.0  ;;  %v1278_v9 = vadd.f32 %v7892_v30, %v8819_v24  ;;  %v1474_v32 = vmul.f32 %v8825_v38, %v1403_v6  ;;  %v1608_v14 = vsel %vm1496_vm1, %v1469_v21, 0.0 }
 0x13f   : > { %v1269_v13 = vpop.f32.mrf.mxu0  ;;  %1606 = vadd.xlane.f32.xlu0 %v1605_v17 }
 0x140   : > { %v1404_v15 = vmax.f32 %v1278_v9, 0.0  ;;  %6287 = vmatmul.mubr.bf16.gmra.mxu1 %v8128_v45  ;;  %v1270_v50 = vadd.f32 %v8819_v24, %v1269_v13  ;;  %v1623_v16 = vsel %vm1496_vm1, %v1474_v32, 0.0  ;;  %v1472_v19 = vmul.f32 %v8825_v38, %v1401_v10  ;;  %v9050_v10 = vpop.permute.xlu1 %3333  ;;  %v9052_v9 = vpop.permute.xlu0 %1696 }
 0x141   : > { %v7895_v51 = vpop.f32.mrf.mxu0  ;;  %1609 = vadd.xlane.f32.xlu1 %v1608_v14  ;;  %6296 = vmatprep.mubr.bf16.mxu1 %v8129_v46  ;;  %12312 = vst [vmem:[#allocation10_spill] sm:$0xff] %v9050_v10 }
 0x142   : > { %v1402_v33 = vmax.f32 %v1270_v50, 0.0  ;;  %v1291_v29 = vadd.f32 %v7895_v51, %v8819_v24  ;;  %v1475_v20 = vmul.f32 %v8825_v38, %v1404_v15  ;;  %v1617_v31 = vsel %vm1496_vm1, %v1472_v19, 0.0  ;;  %v8137_v15 = vld [vmem:[%s8727_s21 + $0x110] ss:$8 sps:$4 sm:$0xff]   ;;  %v8138_v19 = vld [vmem:[%s8727_s21 + $0x124] ss:$8 sps:$4 sm:$0xff]  }
 0x143   : > { %v1282_v34 = vpop.f32.mrf.mxu0  ;;  %1624 = vadd.xlane.f32.xlu0 %v1623_v16 }
 0x144   : > { %v1407_v54 = vmax.f32 %v1291_v29, 0.0  ;;  %v1283_v23 = vadd.f32 %v8819_v24, %v1282_v34  ;;  %v1626_v35 = vsel %vm1496_vm1, %v1475_v20, 0.0  ;;  %v1473_v41 = vmul.f32 %v8825_v38, %v1402_v33 }
 0x145   : > { %v7896_v47 = vpop.f32.mrf.mxu0  ;;  %1627 = vadd.xlane.f32.xlu1 %v1626_v35 }
 0x146   : > { %v1405_v36 = vmax.f32 %v1283_v23, 0.0  ;;  %v1294_v48 = vadd.f32 %v7896_v47, %v8819_v24  ;;  %v1478_v49 = vmul.f32 %v8825_v38, %v1407_v54  ;;  %v1620_v37 = vsel %vm1496_vm1, %v1473_v41, 0.0  ;;  %v9065_v41 = vpop.permute.xlu1 %3339  ;;  %v9067_v47 = vpop.permute.xlu0 %3321 }
 0x147   : > { %v1285_v58 = vpop.f32.mrf.mxu0  ;;  %1618 = vadd.xlane.f32.xlu0 %v1617_v31  ;;  %12313 = vst [vmem:[#allocation11_spill] sm:$0xff] %v9065_v41  ;;  %12314 = vst [vmem:[#allocation12_spill] sm:$0xff] %v9067_v47  ;;  %v5283_v47 = vld [vmem:[%s9307_s9 + $0x30] sm:$0xff] }
 0x148   : > { %v1408_v52 = vmax.f32 %v1294_v48, 0.0  ;;  %6297 = vmatmul.mubr.bf16.gmra.mxu1 %v8131_v55  ;;  %v1286_v44 = vadd.f32 %v8819_v24, %v1285_v58  ;;  %v1635_v11 = vsel %vm1496_vm1, %v1478_v49, 0.0  ;;  %v1476_v22 = vmul.f32 %v8825_v38, %v1405_v36 }
 0x149   : > { %v7899_v53 = vpop.f32.mrf.mxu0  ;;  %1621 = vadd.xlane.f32.xlu1 %v1620_v37  ;;  %6306 = vmatprep.mubr.bf16.mxu1 %v8132_v12  ;;  %v1827_v49 = vlaneseq  ;;  %vm5291_vm14 = vcmp.gt.f32.partialorder %v5283_v47, 0.5 }
 0x14a   : > { %v1406_v56 = vmax.f32 %v1286_v44, 0.0  ;;  %v1307_v39 = vadd.f32 %v7899_v53, %v8819_v24  ;;  %v1479_v63 = vmul.f32 %v8825_v38, %v1408_v52  ;;  %v1629_v57 = vsel %vm1496_vm1, %v1476_v22, 0.0  ;;  %v8140_v53 = vld [vmem:[%s8727_s21 + $0x120] ss:$8 sps:$4 sm:$0xff]  }
 0x14b   : > { %v1298_v26 = vpop.f32.mrf.mxu0  ;;  %1636 = vadd.xlane.f32.xlu0 %v1635_v11 }
 0x14c   : > { %v1411_v40 = vmax.f32 %v1307_v39, 0.0  ;;  %v1299_v1 = vadd.f32 %v8819_v24, %v1298_v26  ;;  %v1638_v18 = vsel %vm1496_vm1, %v1479_v63, 0.0  ;;  %v1477_v61 = vmul.f32 %v8825_v38, %v1406_v56  ;;  %v8141_v39 = vld [vmem:[%s8727_s21 + $0x134] ss:$8 sps:$4 sm:$0xff]  }
 0x14d   : > { %v7900_v62 = vpop.f32.mrf.mxu0  ;;  %1639 = vadd.xlane.f32.xlu1 %v1638_v18  ;;  %v9078_v63 = vshrl.u32 %v1827_v49, 7 }
 0x14e   : > { %v1409_v42 = vmax.f32 %v1299_v1, 0.0  ;;  %v1310_v3 = vadd.f32 %v7900_v62, %v8819_v24  ;;  %v1482_v2 = vmul.f32 %v8825_v38, %v1411_v40  ;;  %v1632_v43 = vsel %vm1496_vm1, %v1477_v61, 0.0  ;;  %v9085_v61 = vpop.permute.xlu0 %3330 }
 0x14f   : > { %v1301_v4 = vpop.f32.mrf.mxu0  ;;  %1630 = vadd.xlane.f32.xlu0 %v1629_v57  ;;  %12316 = vst [vmem:[#allocation14_spill] sm:$0xff] %v9085_v61 }
 0x150   : > { %v1412_v28 = vmax.f32 %v1310_v3, 0.0  ;;  %6307 = vmatmul.mubr.bf16.gmra.mxu1 %v8134_v60  ;;  %v1302_v5 = vadd.f32 %v8819_v24, %v1301_v4  ;;  %v1647_v17 = vsel %vm1496_vm1, %v1482_v2, 0.0  ;;  %v1480_v6 = vmul.f32 %v8825_v38, %v1409_v42  ;;  %v9083_v60 = vpop.permute.xlu1 %5399 }
 0x151   : > { %v7903_v7 = vpop.f32.mrf.mxu0  ;;  %1633 = vadd.xlane.f32.xlu1 %v1632_v43  ;;  %6316 = vmatprep.mubr.bf16.mxu1 %v8135_v0  ;;  %12315 = vst [vmem:[#allocation13_spill] sm:$0xff] %v9083_v60  ;;  %v9091_v4 = vsub.s32 0, %v9078_v63 }
 0x152   : > { %v1410_v8 = vmax.f32 %v1302_v5, 0.0  ;;  %v1323_v45 = vadd.f32 %v7903_v7, %v8819_v24  ;;  %v1483_v21 = vmul.f32 %v8825_v38, %v1412_v28  ;;  %v1641_v46 = vsel %vm1496_vm1, %v1480_v6, 0.0  ;;  %v5622_v6 = vld [vmem:[%s12153_s15] sm:$0x3] }
 0x153   : > { %v1314_v30 = vpop.f32.mrf.mxu0  ;;  %1648 = vadd.xlane.f32.xlu0 %v1647_v17  ;;  %v9096_v17 = vsub.s32 1, %v9078_v63 }
 0x154   : > { %v1415_v32 = vmax.f32 %v1323_v45, 0.0  ;;  %v1315_v13 = vadd.f32 %v8819_v24, %v1314_v30  ;;  %v1650_v14 = vsel %vm1496_vm1, %v1483_v21, 0.0  ;;  %v1481_v50 = vmul.f32 %v8825_v38, %v1410_v8 }
 0x155   : > { %v7904_v16 = vpop.f32.mrf.mxu0  ;;  %1651 = vadd.xlane.f32.xlu1 %v1650_v14  ;;  %12317 = vst [vmem:[#allocation15_spill] sm:$0xff] %v9096_v17  ;;  %v8144_v14 = vld [vmem:[%s8727_s21 + $0x144] ss:$8 sps:$4 sm:$0xff]  }
 0x156   : > { %v1413_v51 = vmax.f32 %v1315_v13, 0.0  ;;  %v1326_v33 = vadd.f32 %v7904_v16, %v8819_v24  ;;  %v1486_v29 = vmul.f32 %v8825_v38, %v1415_v32  ;;  %v1644_v34 = vsel %vm1496_vm1, %v1481_v50, 0.0  ;;  %v8143_v32 = vld [vmem:[%s8727_s21 + $0x130] ss:$8 sps:$4 sm:$0xff]   ;;  %v9110_v50 = vpop.permute.xlu1 %5405  ;;  %v9112_v16 = vpop.permute.xlu0 %3336 }
 0x157   : > { %v1317_v20 = vpop.f32.mrf.mxu0  ;;  %1642 = vadd.xlane.f32.xlu0 %v1641_v46  ;;  %12318 = vst [vmem:[#allocation16_spill] sm:$0xff] %v9110_v50  ;;  %12319 = vst [vmem:[#allocation17_spill] sm:$0xff] %v9112_v16  ;;  %v12158_v16 = vmov -1e+10  }
 0x158   : > { %v1416_v31 = vmax.f32 %v1326_v33, 0.0  ;;  %6317 = vmatmul.mubr.bf16.gmra.mxu1 %v8137_v15  ;;  %v1318_v54 = vadd.f32 %v8819_v24, %v1317_v20  ;;  %v1659_v23 = vsel %vm1496_vm1, %v1486_v29, 0.0  ;;  %v1484_v35 = vmul.f32 %v8825_v38, %v1413_v51  ;;  %v6595_v20 = vld [vmem:[%s12154_s16] sm:$0x3] }
 0x159   : > { %v7907_v55 = vpop.f32.mrf.mxu0  ;;  %1645 = vadd.xlane.f32.xlu1 %v1644_v34  ;;  %6326 = vmatprep.mubr.bf16.mxu1 %v8138_v19  ;;  %v9108_v15 = vrot.slane %v5622_v6, %v9091_v4  ;;  %v9117_v29 = vrot.slane %v5622_v6, %v9096_v17 }
 0x15a   : > { %v1414_v12 = vmax.f32 %v1318_v54, 0.0  ;;  %v1339_v36 = vadd.f32 %v7907_v55, %v8819_v24  ;;  %v1487_v48 = vmul.f32 %v8825_v38, %v1416_v31  ;;  %v1653_v37 = vsel %vm1496_vm1, %v1484_v35, 0.0 }
 0x15b   : > { %v1330_v58 = vpop.f32.mrf.mxu0  ;;  %1660 = vadd.xlane.f32.xlu0 %v1659_v23 }
 0x15c   : > { %v1419_v52 = vmax.f32 %v1339_v36, 0.0  ;;  %v1331_v44 = vadd.f32 %v8819_v24, %v1330_v58  ;;  %v1662_v11 = vsel %vm1496_vm1, %v1487_v48, 0.0  ;;  %v1485_v22 = vmul.f32 %v8825_v38, %v1414_v12 }
 0x15d   : > { %v7908_v56 = vpop.f32.mrf.mxu0  ;;  %1663 = vadd.xlane.f32.xlu1 %v1662_v11  ;;  %v9127_v36 = vrot.slane %v6595_v20, %v9091_v4  ;;  %v9135_v11 = vpop.permute.xlu1 %5408 }
 0x15e   : > { %v1417_v26 = vmax.f32 %v1331_v44, 0.0  ;;  %v1342_v57 = vadd.f32 %v7908_v56, %v8819_v24  ;;  %v1490_v40 = vmul.f32 %v8825_v38, %v1419_v52  ;;  %v1656_v18 = vsel %vm1496_vm1, %v1485_v22, 0.0  ;;  %12320 = vst [vmem:[#allocation18_spill] sm:$0xff] %v9135_v11  ;;  %v9137_v22 = vpop.permute.xlu0 %5402 }
 0x15f   : > { %v1333_v1 = vpop.f32.mrf.mxu0  ;;  %1654 = vadd.xlane.f32.xlu0 %v1653_v37  ;;  %12321 = vst [vmem:[#allocation19_spill] sm:$0xff] %v9137_v22 }
 0x160   : > { %v1420_v62 = vmax.f32 %v1342_v57, 0.0  ;;  %v1334_v0 = vadd.f32 %v8819_v24, %v1333_v1  ;;  %v1671_v42 = vsel %vm1496_vm1, %v1490_v40, 0.0  ;;  %v1488_v3 = vmul.f32 %v8825_v38, %v1417_v26  ;;  %6327 = vmatmul.mubr.bf16.gmra.mxu1 %v8140_v53  ;;  %v8146_v57 = vld [vmem:[%s8727_s21 + $0x140] ss:$8 sps:$4 sm:$0xff]   ;;  %v8147_v1 = vld [vmem:[%s8727_s21 + $0x154] ss:$8 sps:$4 sm:$0xff]  }
 0x161   : > { %v7911_v2 = vpop.f32.mrf.mxu0  ;;  %1657 = vadd.xlane.f32.xlu1 %v1656_v18  ;;  %6336 = vmatprep.mubr.bf16.mxu1 %v8141_v39  ;;  %v9151_v6 = vpop.permute.xlu1 %5414 }
 0x162   : > { %v1418_v43 = vmax.f32 %v1334_v0, 0.0  ;;  %v1355_v28 = vadd.f32 %v7911_v2, %v8819_v24  ;;  %v1491_v5 = vmul.f32 %v8825_v38, %v1420_v62  ;;  %v1665_v8 = vsel %vm1496_vm1, %v1488_v3, 0.0  ;;  %12322 = vst [vmem:[#allocation20_spill] sm:$0xff] %v9151_v6 }
 0x163   : > { %v1346_v7 = vpop.f32.mrf.mxu0  ;;  %1672 = vadd.xlane.f32.xlu0 %v1671_v42 }
 0x164   : > { %v1423_v45 = vmax.f32 %v1355_v28, 0.0  ;;  %v1347_v21 = vadd.f32 %v8819_v24, %v1346_v7  ;;  %v1674_v30 = vsel %vm1496_vm1, %v1491_v5, 0.0  ;;  %v1489_v46 = vmul.f32 %v8825_v38, %v1418_v43  ;;  %v9153_v7 = vpop.permute.xlu0 %5411 }
 0x165   : > { %v7912_v13 = vpop.f32.mrf.mxu0  ;;  %1675 = vadd.xlane.f32.xlu1 %v1674_v30  ;;  %12323 = vst [vmem:[#allocation21_spill] sm:$0xff] %v9153_v7 }
 0x166   : > { %v1421_v19 = vmax.f32 %v1347_v21, 0.0  ;;  %v1358_v51 = vadd.f32 %v7912_v13, %v8819_v24  ;;  %v1494_v33 = vmul.f32 %v8825_v38, %v1423_v45  ;;  %v1668_v31 = vsel %vm1496_vm1, %v1489_v46, 0.0 }
 0x167   : > { %v1349_v34 = vpop.f32.mrf.mxu0  ;;  %1666 = vadd.xlane.f32.xlu0 %v1665_v8 }
 0x168   : > { %v1424_v54 = vmax.f32 %v1358_v51, 0.0  ;;  %v1350_v23 = vadd.f32 %v8819_v24, %v1349_v34  ;;  %v1683_v35 = vsel %vm1496_vm1, %v1494_v33, 0.0  ;;  %v1492_v55 = vmul.f32 %v8825_v38, %v1421_v19  ;;  %6337 = vmatmul.mubr.bf16.gmra.mxu1 %v8143_v32  ;;  %v8149_v19 = vld [vmem:[%s8727_s21 + $0x150] ss:$8 sps:$4 sm:$0xff]  }
 0x169   : > { %v6148_v12 = vpop.f32.mrf.mxu0  ;;  %1669 = vadd.xlane.f32.xlu1 %v1668_v31  ;;  %6346 = vmatprep.mubr.bf16.mxu1 %v8144_v14  ;;  %v9132_v24 = vrot.slane %v6595_v20, %v9096_v17 }
 0x16a   : > { %v1422_v48 = vmax.f32 %v1350_v23, 0.0  ;;  %v6149_v58 = vadd.f32 %v6148_v12, %v9108_v15  ;;  %v1495_v37 = vmul.f32 %v8825_v38, %v1424_v54  ;;  %v1677_v44 = vsel %vm1496_vm1, %v1492_v55, 0.0  ;;  %v8388_v38 = vld [vmem:[%s12146_s8] ss:$0 sm:$0xff]  ;;  %v9162_v23 = vpop.permute.xlu1 %5420 }
 0x16b   : > { %v6150_v52 = vpop.f32.mrf.mxu0  ;;  %1684 = vadd.xlane.f32.xlu0 %v1683_v35  ;;  %12324 = vst [vmem:[#allocation22_spill] sm:$0xff] %v9162_v23  ;;  %v9164_v35 = vpop.permute.xlu0 %5417 }
 0x16c   : > { %v6467_v53 = vmax.f32 %v6149_v58, 0.0  ;;  %v6151_v56 = vadd.f32 %v6150_v52, %v9117_v29  ;;  %v1686_v39 = vsel %vm1496_vm1, %v1495_v37, 0.0  ;;  %v1493_v26 = vmul.f32 %v8388_v38, %v1422_v48  ;;  %12325 = vst [vmem:[#allocation23_spill] sm:$0xff] %v9164_v35 }
 0x16d   : > { %v6152_v40 = vpop.f32.mrf.mxu0  ;;  %1687 = vadd.xlane.f32.xlu1 %v1686_v39 }
 0x16e   : > { %v6607_v18 = vmul.f32 %v9127_v36, %v6467_v53  ;;  %v6468_v62 = vmax.f32 %v6151_v56, 0.0  ;;  %v6153_v0 = vadd.f32 %v6152_v40, %v9108_v15  ;;  %v1680_v28 = vsel %vm1496_vm1, %v1493_v26, 0.0 }
 0x16f   : > { %v6154_v42 = vpop.f32.mrf.mxu0  ;;  %1678 = vadd.xlane.f32.xlu0 %v1677_v44 }
 0x170   : > { %v6608_v3 = vmul.f32 %v9132_v24, %v6468_v62  ;;  %v6469_v2 = vmax.f32 %v6153_v0, 0.0  ;;  %v6155_v43 = vadd.f32 %v6154_v42, %v9117_v29  ;;  %6347 = vmatmul.mubr.bf16.gmra.mxu1 %v8146_v57 }
 0x171   : > { %v6158_v5 = vpop.f32.mrf.mxu0  ;;  %1681 = vadd.xlane.f32.xlu1 %v1680_v28  ;;  %6356 = vmatprep.mubr.bf16.mxu1 %v8147_v1 }
 0x172   : > { %v6609_v8 = vmul.f32 %v9127_v36, %v6469_v2  ;;  %v6470_v45 = vmax.f32 %v6155_v43, 0.0  ;;  %v6159_v21 = vadd.f32 %v6158_v5, %v9108_v15  ;;  %v6735_v30 = vadd.f32 %v6608_v3, %v6607_v18 }
 0x173   : > { %v6160_v46 = vpop.f32.mrf.mxu0  ;;  %v9175_v3 = vand.u32 127, %v1827_v49 }
 0x174   : > { %v6610_v32 = vmul.f32 %v9132_v24, %v6470_v45  ;;  %v6471_v13 = vmax.f32 %v6159_v21, 0.0  ;;  %v6161_v14 = vadd.f32 %v6160_v46, %v9117_v29 }
 0x175   : > { %v6162_v51 = vpop.f32.mrf.mxu0  ;;  %6736 = vadd.xlane.f32.xlu1 %v6735_v30  ;;  %12326 = vst [vmem:[#allocation24_spill] sm:$0xff] %v9175_v3  ;;  %v9184_v21 = vsub.s32 %v9175_v3, %v9078_v63 }
 0x176   : > { %v6611_v33 = vmul.f32 %v9127_v36, %v6471_v13  ;;  %v6472_v20 = vmax.f32 %v6161_v14, 0.0  ;;  %v6163_v34 = vadd.f32 %v6162_v51, %v9108_v15  ;;  %v6738_v31 = vadd.f32 %v6610_v32, %v6609_v8 }
 0x177   : > { %v6164_v54 = vpop.f32.mrf.mxu0  ;;  %12327 = vst [vmem:[#allocation25_spill] sm:$0xff] %v9184_v21 }
 0x178   : > { %v6612_v55 = vmul.f32 %v9132_v24, %v6472_v20  ;;  %v6473_v12 = vmax.f32 %v6163_v34, 0.0  ;;  %v6165_v48 = vadd.f32 %v6164_v54, %v9117_v29  ;;  %6739 = vadd.xlane.f32.xlu0 %v6738_v31  ;;  %6357 = vmatmul.mubr.bf16.gmra.mxu1 %v8149_v19 }
 0x179   : > { %v6168_v58 = vpop.f32.mrf.mxu0 }
 0x17a   : > { %v6613_v37 = vmul.f32 %v9127_v36, %v6473_v12  ;;  %v6474_v52 = vmax.f32 %v6165_v48, 0.0  ;;  %v6169_v44 = vadd.f32 %v6168_v58, %v9108_v15  ;;  %v6741_v53 = vadd.f32 %v6612_v55, %v6611_v33  ;;  %v1505_v26 = vpop.xlane.xlu1 %1504 }
 0x17b   : > { %v6170_v56 = vpop.f32.mrf.mxu0  ;;  %v9191_v19 = vadd.f32 %v9052_v9, %v1505_v26 }
 0x17c   : > { %v6614_v39 = vmul.f32 %v9132_v24, %v6474_v52  ;;  %v6475_v38 = vmax.f32 %v6169_v44, 0.0  ;;  %v6171_v57 = vadd.f32 %v6170_v56, %v9117_v29  ;;  %v1499_v40 = vpop.xlane.xlu0 %1498  ;;  %6742 = vadd.xlane.f32.xlu1 %v6741_v53 }
 0x17d   : > { %v6172_v1 = vpop.f32.mrf.mxu0  ;;  %v9179_v28 = vadd.f32 %v9052_v9, %v1499_v40 }
 0x17e   : > { %v6615_v18 = vmul.f32 %v9127_v36, %v6475_v38  ;;  %v6476_v62 = vmax.f32 %v6171_v57, 0.0  ;;  %v6173_v0 = vadd.f32 %v6172_v1, %v9108_v15  ;;  %v6744_v42 = vadd.f32 %v6614_v39, %v6613_v37  ;;  %v1508_v46 = vpop.xlane.xlu1 %1507 }
 0x17f   : > { %v6174_v2 = vpop.f32.mrf.mxu0  ;;  %v1832_v34 = vrot.slane %v9179_v28, %v9184_v21  ;;  %v9201_v48 = vadd.f32 %v9052_v9, %v1508_v46  ;;  %v1840_v39 = vrot.slane %v9191_v19, %v9184_v21 }
 0x180   : > { %v6616_v43 = vmul.f32 %v9132_v24, %v6476_v62  ;;  %v6477_v5 = vmax.f32 %v6173_v0, 0.0  ;;  %v6175_v8 = vadd.f32 %v6174_v2, %v9117_v29  ;;  %6745 = vadd.xlane.f32.xlu0 %v6744_v42  ;;  %v1502_v45 = vpop.xlane.xlu0 %1501 }
 0x181   : > { %v9187_v30 = vadd.f32 %v9052_v9, %v1502_v45  ;;  %v6178_v49 = vpop.f32.mrf.mxu0  ;;  %v1844_v62 = vrot.slane %v9201_v48, %v9184_v21 }
 0x182   : > { %v6478_v32 = vmax.f32 %v6175_v8, 0.0  ;;  %v6179_v13 = vadd.f32 %v6178_v49, %v9108_v15  ;;  %v6747_v14 = vadd.f32 %v6616_v43, %v6615_v18  ;;  %v6617_v51 = vmul.f32 %v9127_v36, %v6477_v5 }
 0x183   : > { %v1836_v33 = vrot.slane %v9187_v30, %v9184_v21  ;;  %v6180_v20 = vpop.f32.mrf.mxu0 }
 0x184   : > { %v6618_v31 = vmul.f32 %v9132_v24, %v6478_v32  ;;  %v6479_v54 = vmax.f32 %v6179_v13, 0.0  ;;  %v6181_v55 = vadd.f32 %v6180_v20, %v9117_v29  ;;  %v1517_v12 = vpop.xlane.xlu0 %1516  ;;  %6748 = vadd.xlane.f32.xlu1 %v6747_v14 }
 0x185   : > { %v6182_v58 = vpop.f32.mrf.mxu0  ;;  %v2086_v37 = vsel %vm2085_vm2, %v1836_v33, %v1832_v34  ;;  %v9214_v42 = vadd.f32 %v9052_v9, %v1517_v12 }
 0x186   : > { %v6619_v52 = vmul.f32 %v9127_v36, %v6479_v54  ;;  %v6480_v44 = vmax.f32 %v6181_v55, 0.0  ;;  %v6183_v53 = vadd.f32 %v6182_v58, %v9108_v15  ;;  %v1520_v56 = vpop.xlane.xlu1 %1519  ;;  %v6750_v26 = vadd.f32 %v6618_v31, %v6617_v51 }
 0x187   : > { %v6184_v38 = vpop.f32.mrf.mxu0  ;;  %v2088_v0 = vsel %vm2087_vm3, %v1840_v39, %v2086_v37  ;;  %v9222_v32 = vadd.f32 %v9052_v9, %v1520_v56  ;;  %v8150_v37 = vld [vmem:[%s8727_s21 + $0x164] ss:$8 sps:$4 sm:$0xff]  }
 0x188   : > { %v6620_v57 = vmul.f32 %v9132_v24, %v6480_v44  ;;  %v6481_v40 = vmax.f32 %v6183_v53, 0.0  ;;  %v6185_v1 = vadd.f32 %v6184_v38, %v9117_v29  ;;  %v1511_v18 = vpop.xlane.xlu0 %1510  ;;  %6751 = vadd.xlane.f32.xlu0 %v6750_v26  ;;  %v2090_v54 = vsel %vm2089_vm4, %v1844_v62, %v2088_v0  ;;  %v8152_v38 = vld [vmem:[%s8727_s21 + $0x160] ss:$8 sps:$4 sm:$0xff]   ;;  %6366 = vmatprep.mubr.bf16.mxu1 %v8150_v37 }
 0x189   : > { %v9217_v2 = vadd.f32 %v9052_v9, %v1511_v18  ;;  %v6188_v43 = vpop.f32.mrf.mxu0  ;;  %v1860_v26 = vrot.slane %v9222_v32, %v9184_v21  ;;  %6367 = vmatmul.mubr.bf16.gmra.mxu1 %v8152_v38 }
 0x18a   : > { %v6621_v5 = vmul.f32 %v9127_v36, %v6481_v40  ;;  %v6482_v8 = vmax.f32 %v6185_v1, 0.0  ;;  %v6189_v45 = vadd.f32 %v6188_v43, %v9108_v15  ;;  %v1514_v49 = vpop.xlane.xlu1 %1513  ;;  %v6753_v46 = vadd.f32 %v6620_v57, %v6619_v52 }
 0x18b   : > { %v1848_v13 = vrot.slane %v9217_v2, %v9184_v21  ;;  %v9227_v14 = vadd.f32 %v9052_v9, %v1514_v49  ;;  %v6190_v51 = vpop.f32.mrf.mxu0  ;;  %v1856_v52 = vrot.slane %v9214_v42, %v9184_v21 }
 0x18c   : > { %v6622_v33 = vmul.f32 %v9132_v24, %v6482_v8  ;;  %v6483_v20 = vmax.f32 %v6189_v45, 0.0  ;;  %v6191_v34 = vadd.f32 %v6190_v51, %v9117_v29  ;;  %v1529_v31 = vpop.xlane.xlu0 %1528  ;;  %6754 = vadd.xlane.f32.xlu1 %v6753_v46 }
 0x18d   : > { %v1852_v55 = vrot.slane %v9227_v14, %v9184_v21  ;;  %v6192_v12 = vpop.f32.mrf.mxu0  ;;  %v2092_v58 = vsel %vm2091_vm5, %v1848_v13, %v2090_v54 }
 0x18e   : > { %v6484_v44 = vmax.f32 %v6191_v34, 0.0  ;;  %v6193_v53 = vadd.f32 %v6192_v12, %v9108_v15  ;;  %v1532_v56 = vpop.xlane.xlu1 %1531  ;;  %v6756_v39 = vadd.f32 %v6622_v33, %v6621_v5  ;;  %v6623_v57 = vmul.f32 %v9127_v36, %v6483_v20 }
 0x18f   : > { %v6194_v40 = vpop.f32.mrf.mxu0  ;;  %v2094_v1 = vsel %vm2093_vm6, %v1852_v55, %v2092_v58  ;;  %v9255_v34 = vadd.f32 %v9052_v9, %v1529_v31 }
 0x190   : > { %v6624_v18 = vmul.f32 %v9132_v24, %v6484_v44  ;;  %v6485_v62 = vmax.f32 %v6193_v53, 0.0  ;;  %v6195_v0 = vadd.f32 %v6194_v40, %v9117_v29  ;;  %6757 = vadd.xlane.f32.xlu0 %v6756_v39  ;;  %v1523_v43 = vpop.xlane.xlu0 %1522  ;;  %v2096_v5 = vsel %vm2095_vm7, %v1856_v52, %v2094_v1 }
 0x191   : > { %v9248_v8 = vadd.f32 %v9052_v9, %v1523_v43  ;;  %v6198_v45 = vpop.f32.mrf.mxu0  ;;  %v2098_v49 = vsel %vm2097_vm8, %v1860_v26, %v2096_v5  ;;  %v9263_v53 = vadd.f32 %v9052_v9, %v1532_v56  ;;  %v8153_v26 = vld [vmem:[%s8727_s21 + $0x174] ss:$8 sps:$4 sm:$0xff]   ;;  %v1872_v56 = vrot.slane %v9255_v34, %v9184_v21 }
 0x192   : > { %v6625_v46 = vmul.f32 %v9127_v36, %v6485_v62  ;;  %v6486_v13 = vmax.f32 %v6195_v0, 0.0  ;;  %v6199_v51 = vadd.f32 %v6198_v45, %v9108_v15  ;;  %v1526_v33 = vpop.xlane.xlu1 %1525  ;;  %v2157_v20 = vsel %vm2156_vm9, %v2098_v49, -inf  ;;  %v8155_v0 = vld [vmem:[%s8727_s21 + $0x170] ss:$8 sps:$4 sm:$0xff]   ;;  %6376 = vmatprep.mubr.bf16.mxu1 %v8153_v26 }
 0x193   : > { %v9258_v54 = vadd.f32 %v9052_v9, %v1526_v33  ;;  %v6200_v55 = vpop.f32.mrf.mxu0  ;;  %2158 = vmax.xlane.f32.xlu1 %v2157_v20  ;;  %v6759_v12 = vadd.f32 %v6624_v18, %v6623_v57  ;;  %v1864_v31 = vrot.slane %v9248_v8, %v9184_v21  ;;  %6377 = vmatmul.mubr.bf16.gmra.mxu1 %v8155_v0 }
 0x194   : > { %v6626_v58 = vmul.f32 %v9132_v24, %v6486_v13  ;;  %v6487_v37 = vmax.f32 %v6199_v51, 0.0  ;;  %v6201_v52 = vadd.f32 %v6200_v55, %v9117_v29  ;;  %v1541_v44 = vpop.xlane.xlu0 %1540 }
 0x195   : > { %v1868_v39 = vrot.slane %v9258_v54, %v9184_v21  ;;  %v6202_v38 = vpop.f32.mrf.mxu0  ;;  %v9282_v20 = vadd.f32 %v9052_v9, %v1541_v44 }
 0x196   : > { %v6627_v40 = vmul.f32 %v9127_v36, %v6487_v37  ;;  %v6488_v57 = vmax.f32 %v6201_v52, 0.0  ;;  %v6203_v1 = vadd.f32 %v6202_v38, %v9108_v15  ;;  %v1544_v18 = vpop.xlane.xlu1 %1543  ;;  %v6762_v62 = vadd.f32 %v6626_v58, %v6625_v46 }
 0x197   : > { %v2099_v43 = vsel %vm2085_vm2, %v1868_v39, %v1864_v31  ;;  %v6204_v5 = vpop.f32.mrf.mxu0  ;;  %6760 = vadd.xlane.f32.xlu1 %v6759_v12  ;;  %v1876_v46 = vrot.slane %v9263_v53, %v9184_v21  ;;  %v9290_v38 = vadd.f32 %v9052_v9, %v1544_v18 }
 0x198   : > { %v6628_v45 = vmul.f32 %v9132_v24, %v6488_v57  ;;  %v6489_v49 = vmax.f32 %v6203_v1, 0.0  ;;  %v6205_v13 = vadd.f32 %v6204_v5, %v9117_v29  ;;  %v1535_v51 = vpop.xlane.xlu0 %1534  ;;  %6763 = vadd.xlane.f32.xlu0 %v6762_v62  ;;  %v2100_v33 = vsel %vm2087_vm3, %v1872_v56, %v2099_v43 }
 0x199   : > { %v9285_v55 = vadd.f32 %v9052_v9, %v1535_v51  ;;  %v6208_v12 = vpop.f32.mrf.mxu0  ;;  %v2101_v62 = vsel %vm2089_vm4, %v1876_v46, %v2100_v33 }
 0x19a   : > { %v6629_v58 = vmul.f32 %v9127_v36, %v6489_v49  ;;  %v6490_v37 = vmax.f32 %v6205_v13, 0.0  ;;  %v6209_v52 = vadd.f32 %v6208_v12, %v9108_v15  ;;  %v1538_v31 = vpop.xlane.xlu1 %1537  ;;  %v6765_v39 = vadd.f32 %v6628_v45, %v6627_v40  ;;  %v8156_v45 = vld [vmem:[%s8727_s21 + $0x184] ss:$8 sps:$4 sm:$0xff]   ;;  %v8158_v12 = vld [vmem:[%s8727_s21 + $0x180] ss:$8 sps:$4 sm:$0xff]  }
 0x19b   : > { %v1880_v44 = vrot.slane %v9285_v55, %v9184_v21  ;;  %v9295_v26 = vadd.f32 %v9052_v9, %v1538_v31  ;;  %v6210_v57 = vpop.f32.mrf.mxu0  ;;  %v1888_v49 = vrot.slane %v9282_v20, %v9184_v21  ;;  %6386 = vmatprep.mubr.bf16.mxu1 %v8156_v45 }
 0x19c   : > { %v6630_v1 = vmul.f32 %v9132_v24, %v6490_v37  ;;  %v6211_v0 = vadd.f32 %v6210_v57, %v9117_v29  ;;  %v1553_v56 = vpop.xlane.xlu0 %1552  ;;  %6766 = vadd.xlane.f32.xlu1 %v6765_v39  ;;  %v6491_v18 = vmax.f32 %v6209_v52, 0.0  ;;  %v1892_v37 = vrot.slane %v9290_v38, %v9184_v21  ;;  %6387 = vmatmul.mubr.bf16.gmra.mxu1 %v8158_v12 }
 0x19d   : > { %v2102_v40 = vsel %vm2091_vm5, %v1880_v44, %v2101_v62  ;;  %v1884_v43 = vrot.slane %v9295_v26, %v9184_v21  ;;  %v6212_v5 = vpop.f32.mrf.mxu0 }
 0x19e   : > { %v6492_v13 = vmax.f32 %v6211_v0, 0.0  ;;  %v6213_v51 = vadd.f32 %v6212_v5, %v9108_v15  ;;  %v1556_v46 = vpop.xlane.xlu1 %1555  ;;  %v6768_v33 = vadd.f32 %v6630_v1, %v6629_v58  ;;  %v5279_v0 = vld [vmem:[%s9307_s9 + $0x10] sm:$0xff]  ;;  %v6631_v58 = vmul.f32 %v9127_v36, %v6491_v18 }
 0x19f   : > { %v6214_v52 = vpop.f32.mrf.mxu0  ;;  %v2103_v31 = vsel %vm2093_vm6, %v1884_v43, %v2102_v40  ;;  %v5277_v43 = vld [vmem:[%s9307_s9] sm:$0xff]  ;;  %v9331_v18 = vadd.f32 %v9052_v9, %v1553_v56  ;;  %vm5287_vm10 = vcmp.gt.f32.partialorder %v5279_v0, 0.5 }
 0x1a0   : > { %v6493_v39 = vmax.f32 %v6213_v51, 0.0  ;;  %v6215_v44 = vadd.f32 %v6214_v52, %v9117_v29  ;;  %v1547_v57 = vpop.xlane.xlu0 %1546  ;;  %v2104_v62 = vsel %vm2095_vm7, %v1888_v49, %v2103_v31  ;;  %6769 = vadd.xlane.f32.xlu0 %v6768_v33  ;;  %v6632_v1 = vmul.f32 %v9132_v24, %v6492_v13 }
 0x1a1   : > { %v9323_v5 = vadd.f32 %v9052_v9, %v1547_v57  ;;  %v6218_v41 = vpop.f32.mrf.mxu0  ;;  %v2105_v40 = vsel %vm2097_vm8, %v1892_v37, %v2104_v62  ;;  %vm5285_vm11 = vcmp.gt.f32.partialorder %v5277_v43, 0.5 }
 0x1a2   : > { %v6633_v45 = vmul.f32 %v9127_v36, %v6493_v39  ;;  %v6494_v51 = vmax.f32 %v6215_v44, 0.0  ;;  %v6219_v52 = vadd.f32 %v6218_v41, %v9108_v15  ;;  %v1550_v49 = vpop.xlane.xlu1 %1549  ;;  %v2160_v33 = vsel %vm2156_vm9, %v2105_v40, -inf  ;;  %v5280_v40 = vld [vmem:[%s9307_s9 + $0x18] sm:$0xff] }
 0x1a3   : > { %v9334_v13 = vadd.f32 %v9052_v9, %v1550_v49  ;;  %v6220_v12 = vpop.f32.mrf.mxu0  ;;  %2161 = vmax.xlane.f32.xlu1 %v2160_v33  ;;  %v9339_v41 = vadd.f32 %v9052_v9, %v1556_v46  ;;  %v1896_v56 = vrot.slane %v9323_v5, %v9184_v21  ;;  %v9346_v49 = vadd.f32 %v6632_v1, %v6631_v58 }
 0x1a4   : > { %v6634_v37 = vmul.f32 %v9132_v24, %v6494_v51  ;;  %v6495_v31 = vmax.f32 %v6219_v52, 0.0  ;;  %v6221_v39 = vadd.f32 %v6220_v12, %v9117_v29  ;;  %v1565_v44 = vpop.xlane.xlu0 %1564  ;;  %v1904_v46 = vrot.slane %v9331_v18, %v9184_v21 }
 0x1a5   : > { %v1900_v57 = vrot.slane %v9334_v13, %v9184_v21  ;;  %v6222_v62 = vpop.f32.mrf.mxu0  ;;  %12329 = vst [vmem:[#allocation26_spill] sm:$0xff] %v9346_v49  ;;  %v9357_v58 = vsel %vm5287_vm10, 0.0, %v12158_v16  ;;  %v9361_v1 = vsel %vm5285_vm11, 0.0, %v12158_v16  ;;  %vm5288_vm12 = vcmp.gt.f32.partialorder %v5280_v40, 0.5 }
 0x1a6   : > { %v6635_v51 = vmul.f32 %v9127_v36, %v6495_v31  ;;  %v6496_v52 = vmax.f32 %v6221_v39, 0.0  ;;  %v6223_v33 = vadd.f32 %v6222_v62, %v9108_v15  ;;  %v1568_v12 = vpop.xlane.xlu1 %1567  ;;  %v9350_v10 = vadd.f32 %v6634_v37, %v6633_v45  ;;  %v5278_v62 = vld [vmem:[%s9307_s9 + $0x8] sm:$0xff] }
 0x1a7   : > { %v2106_v27 = vsel %vm2085_vm2, %v1900_v57, %v1896_v56  ;;  %v6224_v59 = vpop.f32.mrf.mxu0  ;;  %v1908_v56 = vrot.slane %v9339_v41, %v9184_v21  ;;  %v9370_v57 = vadd.f32 %v9052_v9, %v1565_v44  ;;  %vm5286_vm13 = vcmp.gt.f32.partialorder %v5278_v62, 0.5 }
 0x1a8   : > { %12330 = vst [vmem:[#allocation27_spill] sm:$0xff] %v9350_v10  ;;  %v6636_v31 = vmul.f32 %v9132_v24, %v6496_v52  ;;  %v6497_v45 = vmax.f32 %v6223_v33, 0.0  ;;  %v6225_v37 = vadd.f32 %v6224_v59, %v9117_v29  ;;  %v1559_v39 = vpop.xlane.xlu0 %1558  ;;  %v2107_v0 = vsel %vm2087_vm3, %v1904_v46, %v2106_v27 }
 0x1a9   : > { %12331 = vst [vmem:[#allocation28_spill] sm:$0xff] %v9370_v57  ;;  %v9373_v43 = vadd.f32 %v9052_v9, %v1559_v39  ;;  %v6228_v16 = vpop.f32.mrf.mxu0  ;;  %v9381_v10 = vadd.f32 %v9052_v9, %v1568_v12  ;;  %vm5309_vm10 = vcmask 523264  }
 0x1aa   : > { %v6637_v52 = vmul.f32 %v9127_v36, %v6497_v45  ;;  %v6498_v33 = vmax.f32 %v6225_v37, 0.0  ;;  %v6229_v59 = vadd.f32 %v6228_v16, %v9108_v15  ;;  %v1562_v61 = vpop.xlane.xlu1 %1561  ;;  %v9378_v25 = vadd.f32 %v6636_v31, %v6635_v51 }
 0x1ab   : > { %v1912_v27 = vrot.slane %v9373_v43, %v9184_v21  ;;  %v9386_v44 = vadd.f32 %v9052_v9, %v1562_v61  ;;  %v6230_v46 = vpop.f32.mrf.mxu0  ;;  %v2108_v16 = vsel %vm2089_vm4, %v1908_v56, %v2107_v0  ;;  %v12333_v61 = vmov -1e+10  }
 0x1ac   : > { %12332 = vst [vmem:[#allocation29_spill] sm:$0xff] %v9378_v25  ;;  %v6638_v45 = vmul.f32 %v9132_v24, %v6498_v33  ;;  %v6499_v37 = vmax.f32 %v6229_v59, 0.0  ;;  %v6231_v51 = vadd.f32 %v6230_v46, %v9117_v29  ;;  %v1577_v31 = vpop.xlane.xlu0 %1576  ;;  %v9396_v6 = vsel %vm5288_vm12, 0.0, %v12333_v61  ;;  %v5281_v59 = vld [vmem:[%s9307_s9 + $0x20] sm:$0xff]  ;;  %v5284_v46 = vld [vmem:[%s9307_s9 + $0x38] sm:$0xff] }
 0x1ad   : > { %v2109_v12 = vsel %vm2091_vm5, %v1912_v27, %v2108_v16  ;;  %v1916_v39 = vrot.slane %v9386_v44, %v9184_v21  ;;  %v6232_v25 = vpop.f32.mrf.mxu0  ;;  %v1920_v33 = vrot.slane %v9370_v57, %v9184_v21  ;;  %v1924_v16 = vrot.slane %v9381_v10, %v9184_v21 }
 0x1ae   : > { %v6500_v23 = vmax.f32 %v6231_v51, 0.0  ;;  %v6233_v56 = vadd.f32 %v6232_v25, %v9108_v15  ;;  %v1580_v0 = vpop.xlane.xlu1 %1579  ;;  %v9403_v27 = vadd.f32 %v6638_v45, %v6637_v52  ;;  %v6639_v11 = vmul.f32 %v9127_v36, %v6499_v37  ;;  %v5282_v45 = vld [vmem:[%s9307_s9 + $0x28] sm:$0xff] }
 0x1af   : > { %v6234_v40 = vpop.f32.mrf.mxu0  ;;  %v2110_v60 = vsel %vm2093_vm6, %v1916_v39, %v2109_v12  ;;  %v9411_v50 = vsel %vm5286_vm13, 0.0, %v12333_v61  ;;  %vm5289_vm15 = vcmp.gt.f32.partialorder %v5281_v59, 0.5  ;;  %vm5292_vm0 = vcmp.gt.f32.partialorder %v5284_v46, 0.5 }
 0x1b0   : > { %12334 = vst [vmem:[#allocation30_spill] sm:$0xff] %v9403_v27  ;;  %v6640_v51 = vmul.f32 %v9132_v24, %v6500_v23  ;;  %v6501_v25 = vmax.f32 %v6233_v56, 0.0  ;;  %v6235_v49 = vadd.f32 %v6234_v40, %v9117_v29  ;;  %v1571_v7 = vpop.xlane.xlu0 %1570  ;;  %v2111_v52 = vsel %vm2095_vm7, %v1920_v33, %v2110_v60 }
 0x1b1   : > { %v9418_v27 = vadd.f32 %v9052_v9, %v1571_v7  ;;  %v6238_v37 = vpop.f32.mrf.mxu0  ;;  %v2112_v35 = vsel %vm2097_vm8, %v1924_v16, %v2111_v52  ;;  %v9425_v40 = vadd.f32 %v9052_v9, %v1577_v31  ;;  %vm5290_vm1 = vcmp.gt.f32.partialorder %v5282_v45, 0.5 }
 0x1b2   : > { %v6641_v62 = vmul.f32 %v9127_v36, %v6501_v25  ;;  %v6502_v12 = vmax.f32 %v6235_v49, 0.0  ;;  %v6239_v23 = vadd.f32 %v6238_v37, %v9108_v15  ;;  %v1574_v39 = vpop.xlane.xlu1 %1573  ;;  %v2163_v56 = vsel %vm2156_vm9, %v2112_v35, -inf }
 0x1b3   : > { %12335 = vst [vmem:[#allocation31_spill] sm:$0xff] %v9418_v27  ;;  %12336 = vst [vmem:[#allocation32_spill] sm:$0xff] %v9425_v40  ;;  %v9428_v60 = vadd.f32 %v9052_v9, %v1574_v39  ;;  %v6240_v7 = vpop.f32.mrf.mxu0  ;;  %2164 = vmax.xlane.f32.xlu1 %v2163_v56  ;;  %v6783_v33 = vadd.f32 %v6640_v51, %v6639_v11  ;;  %v9431_v16 = vadd.f32 %v9052_v9, %v1580_v0  ;;  %v9451_v56 = vld [vmem:[%s12151_s13] ss:$0 sm:$0xff] }
 0x1b4   : > { %v6642_v49 = vmul.f32 %v9132_v24, %v6502_v12  ;;  %v6503_v25 = vmax.f32 %v6239_v23, 0.0  ;;  %v6241_v52 = vadd.f32 %v6240_v7, %v9117_v29  ;;  %v1589_v37 = vpop.xlane.xlu0 %1588  ;;  %v1928_v35 = vrot.slane %v9418_v27, %v9184_v21 }
 0x1b5   : > { %12337 = vst [vmem:[#allocation33_spill] sm:$0xff] %v9428_v60  ;;  %12338 = vst [vmem:[#allocation34_spill] sm:$0xff] %v9431_v16  ;;  %v1932_v31 = vrot.slane %v9428_v60, %v9184_v21  ;;  %v9441_v11 = vsel %vm5291_vm14, 0.0, %v12333_v61  ;;  %v6242_v51 = vpop.f32.mrf.mxu0  ;;  %v9445_v0 = vsel %vm5289_vm15, 0.0, %v12333_v61  ;;  %v1936_v47 = vrot.slane %v9425_v40, %v9184_v21 }
 0x1b6   : > { %v6643_v12 = vmul.f32 %v9127_v36, %v6503_v25  ;;  %v6504_v23 = vmax.f32 %v6241_v52, 0.0  ;;  %v1592_v39 = vpop.xlane.xlu1 %1591  ;;  %v6786_v7 = vadd.f32 %v6642_v49, %v6641_v62  ;;  %v6243_v3 = vadd.f32 %v6242_v51, %v9108_v15 }
 0x1b7   : > { %v2113_v22 = vsel %vm2085_vm2, %v1932_v31, %v1928_v35  ;;  %6784 = vadd.xlane.f32.xlu1 %v6783_v33  ;;  %v6244_v59 = vpop.f32.mrf.mxu0  ;;  %v9459_v25 = vsel %vm5290_vm1, 0.0, %v12333_v61  ;;  %v9463_v52 = vsel %vm5292_vm0, 0.0, %v12333_v61  ;;  %v1940_v62 = vrot.slane %v9431_v16, %v9184_v21 }
 0x1b8   : > { %v6644_v49 = vmul.f32 %v9132_v24, %v6504_v23  ;;  %v9469_v51 = vadd.f32 %v9052_v9, %v1589_v37  ;;  %v7931_v40 = vpop.f32.mrf.mxu1  ;;  %v1583_v35 = vpop.xlane.xlu0 %1582  ;;  %6787 = vadd.xlane.f32.xlu0 %v6786_v7  ;;  %v6245_v33 = vadd.f32 %v6244_v59, %v9117_v29  ;;  %v2114_v45 = vsel %vm2087_vm3, %v1936_v47, %v2113_v22 }
 0x1b9   : > { %v9474_v31 = vadd.f32 %v9052_v9, %v1592_v39  ;;  %v5255_v61 = vadd.f32 %v7931_v40, %v9451_v56  ;;  %v9478_v46 = vadd.f32 %v9052_v9, %v1583_v35  ;;  %v6248_v27 = vpop.f32.mrf.mxu0  ;;  %v6505_v60 = vmax.f32 %v6243_v3, 0.0 }
 0x1ba   : > { %12339 = vst [vmem:[#allocation35_spill] sm:$0xff] %v9469_v51  ;;  %v5246_v23 = vpop.f32.mrf.mxu1  ;;  %v1586_v16 = vpop.xlane.xlu1 %1585  ;;  %v6789_v37 = vadd.f32 %v6644_v49, %v6643_v12  ;;  %v6506_v57 = vmax.f32 %v6245_v33, 0.0  ;;  %v6249_v7 = vadd.f32 %v6248_v27, %v9108_v15  ;;  %v1952_v35 = vrot.slane %v9469_v51, %v9184_v21 }
 0x1bb   : > { %12340 = vst [vmem:[#allocation36_spill] sm:$0xff] %v9474_v31  ;;  %12341 = vst [vmem:[#allocation37_spill] sm:$0xff] %v9478_v46  ;;  %v9482_v59 = vadd.f32 %v9357_v58, %v5255_v61  ;;  %v1944_v22 = vrot.slane %v9478_v46, %v9184_v21  ;;  %v5247_v39 = vadd.f32 %v9451_v56, %v5246_v23  ;;  %v6250_v47 = vpop.f32.mrf.mxu0 }
 0x1bc   : > { %v9488_v40 = vadd.f32 %v9052_v9, %v1586_v16  ;;  %v2115_v3 = vsel %vm2089_vm4, %v1940_v62, %v2114_v45  ;;  %v7932_v12 = vpop.f32.mrf.mxu1  ;;  %v1601_v49 = vpop.xlane.xlu0 %1600  ;;  %6790 = vadd.xlane.f32.xlu1 %v6789_v37  ;;  %v6507_v27 = vmax.f32 %v6249_v7, 0.0  ;;  %v6251_v58 = vadd.f32 %v6250_v47, %v9117_v29 }
 0x1bd   : > { %12342 = vst [vmem:[#allocation38_spill] sm:$0xff] %v9482_v59  ;;  %v2116_v33 = vsel %vm2091_vm5, %v1944_v22, %v2115_v3  ;;  %v9496_v61 = vadd.f32 %v9361_v1, %v5247_v39  ;;  %v5258_v23 = vadd.f32 %v7932_v12, %v9451_v56  ;;  %v6252_v46 = vpop.f32.mrf.mxu0  ;;  %v1956_v62 = vrot.slane %v9474_v31, %v9184_v21 }
 0x1be   : > { %12343 = vst [vmem:[#allocation39_spill] sm:$0xff] %v9488_v40  ;;  %v1948_v16 = vrot.slane %v9488_v40, %v9184_v21  ;;  %v9504_v45 = vadd.f32 %v9052_v9, %v1601_v49  ;;  %v5249_v37 = vpop.f32.mrf.mxu1  ;;  %v1604_v7 = vpop.xlane.xlu1 %1603  ;;  %v9507_v47 = vmul.f32 %v9127_v36, %v6505_v60  ;;  %v9510_v1 = vmul.f32 %v9132_v24, %v6506_v57 }
 0x1bf   : > { %12344 = vst [vmem:[#allocation40_spill] sm:$0xff] %v9496_v61  ;;  %v5250_v22 = vadd.f32 %v9451_v56, %v5249_v37  ;;  %v5316_v39 = vsel %vm5309_vm10, %v9482_v59, -inf  ;;  %v9516_v3 = vadd.f32 %v9396_v6, %v5258_v23  ;;  %v6508_v12 = vmax.f32 %v6251_v58, 0.0  ;;  %v6254_v51 = vpop.f32.mrf.mxu0 }
 0x1c0   : > { %12345 = vst [vmem:[#allocation41_spill] sm:$0xff] %v9504_v45  ;;  %v9519_v49 = vadd.f32 %v9052_v9, %v1604_v7  ;;  %v7935_v31 = vpop.f32.mrf.mxu1  ;;  %v1595_v40 = vpop.xlane.xlu0 %1594  ;;  %5317 = vmax.xlane.f32.xlu1 %v5316_v39  ;;  %v9522_v60 = vmul.f32 %v9127_v36, %v6507_v27  ;;  %v6253_v57 = vadd.f32 %v6252_v46, %v9108_v15  ;;  %v5310_v23 = vsel %vm5309_vm10, %v9496_v61, -inf }
 0x1c1   : > { %12346 = vst [vmem:[#allocation42_spill] sm:$0xff] %v9516_v3  ;;  %v2117_v37 = vsel %vm2093_vm6, %v1948_v16, %v2116_v33  ;;  %v5271_v59 = vadd.f32 %v7935_v31, %v9451_v56  ;;  %v9528_v6 = vadd.f32 %v9052_v9, %v1595_v40  ;;  %v5319_v58 = vsel %vm5309_vm10, %v9516_v3, -inf }
 0x1c2   : > { %12347 = vst [vmem:[#allocation43_spill] sm:$0xff] %v9519_v49  ;;  %v5262_v7 = vpop.f32.mrf.mxu1  ;;  %5320 = vmax.xlane.f32.xlu0 %v5319_v58  ;;  %v1598_v39 = vpop.xlane.xlu1 %1597  ;;  %v9535_v27 = vadd.f32 %v9411_v50, %v5250_v22  ;;  %v6509_v46 = vmax.f32 %v6253_v57, 0.0  ;;  %v2118_v33 = vsel %vm2095_vm7, %v1952_v35, %v2117_v37  ;;  %v6255_v31 = vadd.f32 %v6254_v51, %v9117_v29 }
 0x1c3   : > { %12348 = vst [vmem:[#allocation44_spill] sm:$0xff] %v9528_v6  ;;  %v1968_v40 = vrot.slane %v9504_v45, %v9184_v21  ;;  %v5263_v16 = vadd.f32 %v9451_v56, %v5262_v7  ;;  %v9543_v3 = vadd.f32 %v9052_v9, %v1598_v39  ;;  %v9546_v61 = vmul.f32 %v9132_v24, %v6508_v12  ;;  %v6258_v58 = vpop.f32.mrf.mxu0 }
 0x1c4   : > { %12349 = vst [vmem:[#allocation45_spill] sm:$0xff] %v9535_v27  ;;  %v9549_v50 = vadd.f32 %v9441_v11, %v5271_v59  ;;  %v1960_v35 = vrot.slane %v9528_v6, %v9184_v21  ;;  %v7936_v22 = vpop.f32.mrf.mxu1  ;;  %v1613_v51 = vpop.xlane.xlu0 %1612  ;;  %5311 = vmax.xlane.f32.xlu1 %v5310_v23  ;;  %v2119_v57 = vsel %vm2097_vm8, %v1956_v62, %v2118_v33  ;;  %v6510_v37 = vmax.f32 %v6255_v31, 0.0 }
 0x1c5   : > { %12350 = vst [vmem:[#allocation46_spill] sm:$0xff] %v9543_v3  ;;  %v1964_v7 = vrot.slane %v9543_v3, %v9184_v21  ;;  %v5274_v39 = vadd.f32 %v7936_v22, %v9451_v56  ;;  %v9558_v12 = vadd.f32 %v9052_v9, %v1613_v51  ;;  %v5313_v11 = vsel %vm5309_vm10, %v9535_v27, -inf  ;;  %v6260_v59 = vpop.f32.mrf.mxu0 }
 0x1c6   : > { %v1972_v45 = vrot.slane %v9519_v49, %v9184_v21  ;;  %v9565_v23 = vadd.f32 %v9445_v0, %v5263_v16  ;;  %5314 = vmax.xlane.f32.xlu0 %v5313_v11  ;;  %v1616_v62 = vpop.xlane.xlu1 %1615  ;;  %v5265_v33 = vpop.f32.mrf.mxu1  ;;  %v9568_v31 = vmul.f32 %v9127_v36, %v6509_v46  ;;  %v6259_v22 = vadd.f32 %v6258_v58, %v9108_v15 }
 0x1c7   : > { %12351 = vst [vmem:[#allocation47_spill] sm:$0xff] %v9558_v12  ;;  %v2120_v51 = vsel %vm2085_vm2, %v1964_v7, %v1960_v35  ;;  %v9573_v6 = vadd.f32 %v9052_v9, %v1616_v62  ;;  %v5266_v3 = vadd.f32 %v9451_v56, %v5265_v33  ;;  %v2166_v49 = vsel %vm2156_vm9, %v2119_v57, -inf  ;;  %v6262_v27 = vpop.f32.mrf.mxu0 }
 0x1c8   : > { %v2121_v0 = vsel %vm2087_vm3, %v1968_v40, %v2120_v51  ;;  %v1607_v16 = vpop.xlane.xlu0 %1606  ;;  %2167 = vmax.xlane.f32.xlu1 %v2166_v49  ;;  %v9579_v11 = vadd.f32 %v9463_v52, %v5274_v39  ;;  %v6650_v46 = vmul.f32 %v9132_v24, %v6510_v37  ;;  %v6261_v58 = vadd.f32 %v6260_v59, %v9117_v29 }
 0x1c9   : > { %12352 = vst [vmem:[#allocation48_spill] sm:$0xff] %v9573_v6  ;;  %v1984_v35 = vrot.slane %v9558_v12, %v9184_v21  ;;  %v9586_v7 = vadd.f32 %v9459_v25, %v5266_v3  ;;  %v9589_v56 = vadd.f32 %v9052_v9, %v1607_v16  ;;  %v5328_v40 = vsel %vm5309_vm10, %v9549_v50, -inf  ;;  %v6264_v49 = vpop.f32.mrf.mxu0 }
 0x1ca   : > { %12353 = vst [vmem:[#allocation49_spill] sm:$0xff] %v9579_v11  ;;  %v1988_v52 = vrot.slane %v9573_v6, %v9184_v21  ;;  %v5331_v57 = vsel %vm5309_vm10, %v9579_v11, -inf  ;;  %v1610_v37 = vpop.xlane.xlu1 %1609  ;;  %v6511_v39 = vmax.f32 %v6259_v22, 0.0  ;;  %v6263_v59 = vadd.f32 %v6262_v27, %v9108_v15 }
 0x1cb   : > { %12354 = vst [vmem:[#allocation50_spill] sm:$0xff] %v9586_v7  ;;  %12355 = vst [vmem:[#allocation51_spill] sm:$0xff] %v9589_v56  ;;  %v1976_v25 = vrot.slane %v9589_v56, %v9184_v21  ;;  %v2122_v3 = vsel %vm2089_vm4, %v1972_v45, %v2121_v0  ;;  %5332 = vmax.xlane.f32.xlu0 %v5331_v57  ;;  %v9602_v62 = vadd.f32 %v9052_v9, %v1610_v37  ;;  %v6268_v51 = vpop.f32.mrf.mxu0 }
 0x1cc   : > { %v6512_v33 = vmax.f32 %v6261_v58, 0.0  ;;  %v1625_v16 = vpop.xlane.xlu0 %1624  ;;  %5329 = vmax.xlane.f32.xlu1 %v5328_v40  ;;  %v5325_v12 = vsel %vm5309_vm10, %v9586_v7, -inf  ;;  %v6513_v11 = vmax.f32 %v6263_v59, 0.0  ;;  %v6265_v22 = vadd.f32 %v6264_v49, %v9117_v29 }
 0x1cd   : > { %12356 = vst [vmem:[#allocation52_spill] sm:$0xff] %v9602_v62  ;;  %v6269_v27 = vadd.f32 %v6268_v51, %v9108_v15  ;;  %v2123_v56 = vsel %vm2091_vm5, %v1976_v25, %v2122_v3  ;;  %v1980_v45 = vrot.slane %v9602_v62, %v9184_v21  ;;  %v5322_v0 = vsel %vm5309_vm10, %v9565_v23, -inf  ;;  %v6270_v58 = vpop.f32.mrf.mxu0 }
 0x1ce   : > { %v9615_v40 = vadd.f32 %v9510_v1, %v9507_v47  ;;  %v6651_v57 = vmul.f32 %v9127_v36, %v6511_v39  ;;  %v1628_v37 = vpop.xlane.xlu1 %1627  ;;  %v6514_v59 = vmax.f32 %v6265_v22, 0.0  ;;  %v6271_v51 = vadd.f32 %v6270_v58, %v9117_v29 }
 0x1cf   : > { %v6515_v49 = vmax.f32 %v6269_v27, 0.0  ;;  %5326 = vmax.xlane.f32.xlu0 %v5325_v12  ;;  %v6652_v25 = vmul.f32 %v9132_v24, %v6512_v33  ;;  %v6653_v3 = vmul.f32 %v9127_v36, %v6513_v11  ;;  %v2124_v7 = vsel %vm2093_vm6, %v1980_v45, %v2123_v56  ;;  %v6272_v6 = vpop.f32.mrf.mxu0 }
 0x1d0   : > { %12357 = vst [vmem:[#allocation53_spill] sm:$0xff] %v9615_v40  ;;  %v9624_v62 = vadd.f32 %v9546_v61, %v9522_v60  ;;  %v1619_v47 = vpop.xlane.xlu0 %1618  ;;  %5323 = vmax.xlane.f32.xlu1 %v5322_v0  ;;  %v6654_v1 = vmul.f32 %v9132_v24, %v6514_v59  ;;  %v2125_v22 = vsel %vm2095_vm7, %v1984_v35, %v2124_v7  ;;  %v6516_v12 = vmax.f32 %v6271_v51, 0.0 }
 0x1d1   : > { %v6655_v39 = vmul.f32 %v9127_v36, %v6515_v49  ;;  %v9630_v33 = vadd.f32 %v9052_v9, %v1619_v47  ;;  %v2126_v11 = vsel %vm2097_vm8, %v1988_v52, %v2125_v22  ;;  %v6273_v56 = vadd.f32 %v6272_v6, %v9108_v15  ;;  %v6274_v27 = vpop.f32.mrf.mxu0 }
 0x1d2   : > { %12358 = vst [vmem:[#allocation54_spill] sm:$0xff] %v9624_v62  ;;  %v1622_v45 = vpop.xlane.xlu1 %1621  ;;  %v2169_v61 = vsel %vm2156_vm9, %v2126_v11, -inf  ;;  %v6656_v60 = vmul.f32 %v9132_v24, %v6516_v12  ;;  %v6275_v0 = vadd.f32 %v6274_v27, %v9117_v29  ;;  %v9638_v58 = vadd.f32 %v6650_v46, %v9568_v31 }
 0x1d3   : > { %12359 = vst [vmem:[#allocation55_spill] sm:$0xff] %v9630_v33  ;;  %v9641_v35 = vadd.f32 %v9052_v9, %v1625_v16  ;;  %v9644_v7 = vadd.f32 %v9052_v9, %v1622_v45  ;;  %v6517_v52 = vmax.f32 %v6273_v56, 0.0  ;;  %v9646_v59 = vadd.f32 %v6654_v1, %v6653_v3 }
 0x1d4   : > { %12360 = vst [vmem:[#allocation56_spill] sm:$0xff] %v9638_v58  ;;  %v1637_v6 = vpop.xlane.xlu0 %1636  ;;  %2170 = vmax.xlane.f32.xlu1 %v2169_v61  ;;  %v6807_v49 = vadd.f32 %v6656_v60, %v6655_v39  ;;  %v6518_v51 = vmax.f32 %v6275_v0, 0.0  ;;  %v9648_v47 = vadd.f32 %v6652_v25, %v6651_v57  ;;  %v1992_v22 = vrot.slane %v9630_v33, %v9184_v21 }
 0x1d5   : > { %12361 = vst [vmem:[#allocation57_spill] sm:$0xff] %v9641_v35  ;;  %12362 = vst [vmem:[#allocation58_spill] sm:$0xff] %v9646_v59  ;;  %v1996_v31 = vrot.slane %v9644_v7, %v9184_v21  ;;  %v6657_v46 = vmul.f32 %v9127_v36, %v6517_v52  ;;  %v9656_v16 = vadd.f32 %v9052_v9, %v1628_v37 }
 0x1d6   : > { %12363 = vst [vmem:[#allocation59_spill] sm:$0xff] %v9648_v47  ;;  %v1640_v12 = vpop.xlane.xlu1 %1639  ;;  %v6658_v3 = vmul.f32 %v9132_v24, %v6518_v51  ;;  %v2000_v1 = vrot.slane %v9641_v35, %v9184_v21  ;;  %v9669_v27 = vadd.f32 %v9052_v9, %v1637_v6 }
 0x1d7   : > { %v2127_v57 = vsel %vm2085_vm2, %v1996_v31, %v1992_v22  ;;  %v2004_v37 = vrot.slane %v9656_v16, %v9184_v21  ;;  %v9672_v61 = vadd.f32 %v9052_v9, %v1640_v12 }
 0x1d8   : > { %v1631_v25 = vpop.xlane.xlu0 %1630  ;;  %6808 = vadd.xlane.f32.xlu1 %v6807_v49  ;;  %v6810_v39 = vadd.f32 %v6658_v3, %v6657_v46  ;;  %v2128_v11 = vsel %vm2087_vm3, %v2000_v1, %v2127_v57  ;;  %12365 = vst [vmem:[#allocation61_spill] sm:$0xff] %v9669_v27  ;;  %v2016_v22 = vrot.slane %v9669_v27, %v9184_v21 }
 0x1d9   : > { %v9664_v56 = vadd.f32 %v9052_v9, %v1631_v25  ;;  %v2129_v52 = vsel %vm2089_vm4, %v2004_v37, %v2128_v11  ;;  %v2020_v46 = vrot.slane %v9672_v61, %v9184_v21 }
 0x1da   : > { %v1634_v45 = vpop.xlane.xlu1 %1633  ;;  %6811 = vadd.xlane.f32.xlu0 %v6810_v39 }
 0x1db   : > { %12364 = vst [vmem:[#allocation60_spill] sm:$0xff] %v9664_v56  ;;  %v2008_v60 = vrot.slane %v9664_v56, %v9184_v21  ;;  %v9677_v0 = vadd.f32 %v9052_v9, %v1634_v45 }
 0x1dc   : > { %v1649_v49 = vpop.xlane.xlu0 %1648 }
 0x1dd   : > { %v2130_v51 = vsel %vm2091_vm5, %v2008_v60, %v2129_v52  ;;  %v2012_v6 = vrot.slane %v9677_v0, %v9184_v21  ;;  %v9695_v37 = vadd.f32 %v9052_v9, %v1649_v49 }
 0x1de   : > { %v1652_v31 = vpop.xlane.xlu1 %1651 }
 0x1df   : > { %v2131_v12 = vsel %vm2093_vm6, %v2012_v6, %v2130_v51  ;;  %12367 = vst [vmem:[#allocation63_spill] sm:$0xff] %v9695_v37  ;;  %v9705_v6 = vadd.f32 %v9052_v9, %v1652_v31 }
 0x1e0   : > { %v1643_v3 = vpop.xlane.xlu0 %1642  ;;  %v2132_v1 = vsel %vm2095_vm7, %v2016_v22, %v2131_v12 }
 0x1e1   : > { %v9690_v57 = vadd.f32 %v9052_v9, %v1643_v3  ;;  %v2133_v25 = vsel %vm2097_vm8, %v2020_v46, %v2132_v1  ;;  %12369 = vst [vmem:[#allocation65_spill] sm:$0xff] %v9705_v6  ;;  %v2032_v46 = vrot.slane %v9695_v37, %v9184_v21 }
 0x1e2   : > { %v1646_v39 = vpop.xlane.xlu1 %1645  ;;  %v2172_v11 = vsel %vm2156_vm9, %v2133_v25, -inf  ;;  %v2036_v25 = vrot.slane %v9705_v6, %v9184_v21  ;;  %v9885_v6 = vsub.s32 6, %v9078_v63 }
 0x1e3   : > { %12366 = vst [vmem:[#allocation62_spill] sm:$0xff] %v9690_v57  ;;  %v9698_v45 = vadd.f32 %v9052_v9, %v1646_v39  ;;  %2173 = vmax.xlane.f32.xlu1 %v2172_v11  ;;  %v2024_v52 = vrot.slane %v9690_v57, %v9184_v21 }
 0x1e4   : > { %v1661_v60 = vpop.xlane.xlu0 %1660 }
 0x1e5   : > { %12368 = vst [vmem:[#allocation64_spill] sm:$0xff] %v9698_v45  ;;  %v2028_v51 = vrot.slane %v9698_v45, %v9184_v21  ;;  %v9717_v39 = vadd.f32 %v9052_v9, %v1661_v60 }
 0x1e6   : > { %v1664_v22 = vpop.xlane.xlu1 %1663 }
 0x1e7   : > { %v2134_v49 = vsel %vm2085_vm2, %v2028_v51, %v2024_v52  ;;  %12371 = vst [vmem:[#allocation67_spill] sm:$0xff] %v9717_v39  ;;  %v9720_v11 = vadd.f32 %v9052_v9, %v1664_v22  ;;  %v2048_v60 = vrot.slane %v9717_v39, %v9184_v21 }
 0x1e8   : > { %v1655_v12 = vpop.xlane.xlu0 %1654  ;;  %v2135_v3 = vsel %vm2087_vm3, %v2032_v46, %v2134_v49 }
 0x1e9   : > { %v9712_v1 = vadd.f32 %v9052_v9, %v1655_v12  ;;  %12372 = vst [vmem:[#allocation68_spill] sm:$0xff] %v9720_v11  ;;  %v2136_v51 = vsel %vm2089_vm4, %v2036_v25, %v2135_v3  ;;  %v2052_v22 = vrot.slane %v9720_v11, %v9184_v21 }
 0x1ea   : > { %v1658_v31 = vpop.xlane.xlu1 %1657 }
 0x1eb   : > { %12370 = vst [vmem:[#allocation66_spill] sm:$0xff] %v9712_v1  ;;  %v2040_v47 = vrot.slane %v9712_v1, %v9184_v21  ;;  %v9725_v52 = vadd.f32 %v9052_v9, %v1658_v31 }
 0x1ec   : > { %v1673_v46 = vpop.xlane.xlu0 %1672 }
 0x1ed   : > { %12373 = vst [vmem:[#allocation69_spill] sm:$0xff] %v9725_v52  ;;  %v2137_v49 = vsel %vm2091_vm5, %v2040_v47, %v2136_v51  ;;  %v2044_v12 = vrot.slane %v9725_v52, %v9184_v21  ;;  %v9743_v1 = vadd.f32 %v9052_v9, %v1673_v46 }
 0x1ee   : > { %v1676_v59 = vpop.xlane.xlu1 %1675 }
 0x1ef   : > { %v2138_v58 = vsel %vm2093_vm6, %v2044_v12, %v2137_v49  ;;  %12375 = vst [vmem:[#allocation71_spill] sm:$0xff] %v9743_v1  ;;  %v2064_v46 = vrot.slane %v9743_v1, %v9184_v21 }
 0x1f0   : > { %v1667_v62 = vpop.xlane.xlu0 %1666  ;;  %v2139_v31 = vsel %vm2095_vm7, %v2048_v60, %v2138_v58  ;;  %v9753_v58 = vadd.f32 %v9052_v9, %v1676_v59 }
 0x1f1   : > { %v9738_v3 = vadd.f32 %v9052_v9, %v1667_v62  ;;  %v2140_v47 = vsel %vm2097_vm8, %v2052_v22, %v2139_v31 }
 0x1f2   : > { %v1670_v25 = vpop.xlane.xlu1 %1669  ;;  %v2175_v51 = vsel %vm2156_vm9, %v2140_v47, -inf  ;;  %12377 = vst [vmem:[#allocation73_spill] sm:$0xff] %v9753_v58  ;;  %v2068_v59 = vrot.slane %v9753_v58, %v9184_v21 }
 0x1f3   : > { %12374 = vst [vmem:[#allocation70_spill] sm:$0xff] %v9738_v3  ;;  %v9746_v39 = vadd.f32 %v9052_v9, %v1670_v25  ;;  %2176 = vmax.xlane.f32.xlu1 %v2175_v51  ;;  %v2056_v49 = vrot.slane %v9738_v3, %v9184_v21 }
 0x1f4   : > { %v1685_v37 = vpop.xlane.xlu0 %1684 }
 0x1f5   : > { %12376 = vst [vmem:[#allocation72_spill] sm:$0xff] %v9746_v39  ;;  %v2060_v62 = vrot.slane %v9746_v39, %v9184_v21 }
 0x1f6   : > { %v1688_v12 = vpop.xlane.xlu1 %1687 }
 0x1f7   : > { %v2141_v60 = vsel %vm2085_vm2, %v2060_v62, %v2056_v49  ;;  %v9777_v1 = vadd.f32 %v9052_v9, %v1688_v12 }
 0x1f8   : > { %v6278_v22 = vpop.f32.mrf.mxu1  ;;  %v1679_v31 = vpop.xlane.xlu0 %1678  ;;  %v2142_v47 = vsel %vm2087_vm3, %v2064_v46, %v2141_v60  ;;  %v8159_v46 = vld [vmem:[%s8727_s21 + $0x194] ss:$8 sps:$4 sm:$0xff]   ;;  %v9773_v60 = vadd.f32 %v9052_v9, %v1685_v37 }
 0x1f9   : > { %v6279_v25 = vadd.f32 %v6278_v22, %v9108_v15  ;;  %v9761_v51 = vadd.f32 %v9052_v9, %v1679_v31  ;;  %v2143_v22 = vsel %vm2089_vm4, %v2068_v59, %v2142_v47  ;;  %12381 = vst [vmem:[#allocation77_spill] sm:$0xff] %v9777_v1  ;;  %6396 = vmatprep.mubr.bf16.mxu1 %v8159_v46 }
 0x1fa   : > { %v6280_v3 = vpop.f32.mrf.mxu1  ;;  %v1682_v57 = vpop.xlane.xlu1 %1681  ;;  %12380 = vst [vmem:[#allocation76_spill] sm:$0xff] %v9773_v60  ;;  %v2084_v59 = vrot.slane %v9777_v1, %v9184_v21 }
 0x1fb   : > { %12378 = vst [vmem:[#allocation74_spill] sm:$0xff] %v9761_v51  ;;  %v6519_v40 = vmax.f32 %v6279_v25, 0.0  ;;  %v6281_v27 = vadd.f32 %v6280_v3, %v9117_v29  ;;  %v2072_v49 = vrot.slane %v9761_v51, %v9184_v21  ;;  %v9769_v62 = vadd.f32 %v9052_v9, %v1682_v57 }
 0x1fc   : > { %v6282_v31 = vpop.f32.mrf.mxu1  ;;  %v2080_v9 = vrot.slane %v9773_v60, %v9184_v21 }
 0x1fd   : > { %12379 = vst [vmem:[#allocation75_spill] sm:$0xff] %v9769_v62  ;;  %v6520_v56 = vmax.f32 %v6281_v27, 0.0  ;;  %v2144_v25 = vsel %vm2091_vm5, %v2072_v49, %v2143_v22  ;;  %v6283_v3 = vadd.f32 %v6282_v31, %v9108_v15  ;;  %v2076_v57 = vrot.slane %v9769_v62, %v9184_v21 }
 0x1fe   : > { %v6284_v51 = vpop.f32.mrf.mxu1  ;;  %v6659_v35 = vmul.f32 %v9127_v36, %v6519_v40 }
 0x1ff   : > { %v6660_v37 = vmul.f32 %v9132_v24, %v6520_v56  ;;  %v6521_v33 = vmax.f32 %v6283_v3, 0.0  ;;  %v6285_v47 = vadd.f32 %v6284_v51, %v9117_v29  ;;  %v2145_v12 = vsel %vm2093_vm6, %v2076_v57, %v2144_v25 }
 0x200   : > { %v6288_v27 = vpop.f32.mrf.mxu1  ;;  %v2146_v31 = vsel %vm2095_vm7, %v2080_v9, %v2145_v12 }
 0x201   : > { %v6522_v49 = vmax.f32 %v6285_v47, 0.0  ;;  %v6289_v46 = vadd.f32 %v6288_v27, %v9108_v15  ;;  %v6813_v22 = vadd.f32 %v6660_v37, %v6659_v35  ;;  %v6661_v40 = vmul.f32 %v9127_v36, %v6521_v33  ;;  %v8161_v47 = vld [vmem:[%s8727_s21 + $0x190] ss:$8 sps:$4 sm:$0xff]  }
 0x202   : > { %v6290_v56 = vpop.f32.mrf.mxu1  ;;  %v2147_v25 = vsel %vm2097_vm8, %v2084_v59, %v2146_v31  ;;  %6397 = vmatmul.mubr.bf16.gmra.mxu1 %v8161_v47 }
 0x203   : > { %v6662_v51 = vmul.f32 %v9132_v24, %v6522_v49  ;;  %v6523_v3 = vmax.f32 %v6289_v46, 0.0  ;;  %v6291_v60 = vadd.f32 %v6290_v56, %v9117_v29  ;;  %6814 = vadd.xlane.f32.xlu0 %v6813_v22  ;;  %v2178_v21 = vsel %vm2156_vm9, %v2147_v25, -inf }
 0x204   : > { %v6292_v57 = vpop.f32.mrf.mxu1  ;;  %2179 = vmax.xlane.f32.xlu1 %v2178_v21 }
 0x205   : > { %v6524_v1 = vmax.f32 %v6291_v60, 0.0  ;;  %v6293_v35 = vadd.f32 %v6292_v57, %v9108_v15  ;;  %v9800_v33 = vadd.f32 %v6662_v51, %v6661_v40  ;;  %v6663_v9 = vmul.f32 %v9127_v36, %v6523_v3  ;;  %v9808_v60 = vpop.xlane.xlu1 %6736 }
 0x206   : > { %v6294_v37 = vpop.f32.mrf.mxu1  ;;  %12384 = vst [vmem:[#allocation80_spill] sm:$0xff] %v9808_v60 }
 0x207   : > { %12382 = vst [vmem:[#allocation78_spill] sm:$0xff] %v9800_v33  ;;  %v6664_v27 = vmul.f32 %v9132_v24, %v6524_v1  ;;  %v6525_v12 = vmax.f32 %v6293_v35, 0.0  ;;  %v6295_v49 = vadd.f32 %v6294_v37, %v9117_v29  ;;  %v9867_v33 = vsub.s32 7, %v9078_v63 }
 0x208   : > { %v6298_v59 = vpop.f32.mrf.mxu1 }
 0x209   : > { %v6526_v46 = vmax.f32 %v6295_v49, 0.0  ;;  %v6299_v22 = vadd.f32 %v6298_v59, %v9108_v15  ;;  %v9806_v56 = vadd.f32 %v6664_v27, %v6663_v9  ;;  %v6665_v40 = vmul.f32 %v9127_v36, %v6525_v12  ;;  %v9816_v35 = vpop.xlane.xlu1 %6742  ;;  %12394 = vst [vmem:[#allocation90_spill] sm:$0xff] %v9867_v33 }
 0x20a   : > { %v6300_v21 = vpop.f32.mrf.mxu1  ;;  %12386 = vst [vmem:[#allocation82_spill] sm:$0xff] %v9816_v35 }
 0x20b   : > { %12383 = vst [vmem:[#allocation79_spill] sm:$0xff] %v9806_v56  ;;  %v6666_v31 = vmul.f32 %v9132_v24, %v6526_v46  ;;  %v6527_v51 = vmax.f32 %v6299_v22, 0.0  ;;  %v6301_v3 = vadd.f32 %v6300_v21, %v9117_v29 }
 0x20c   : > { %v6302_v1 = vpop.f32.mrf.mxu1 }
 0x20d   : > { %v6528_v25 = vmax.f32 %v6301_v3, 0.0  ;;  %v6303_v57 = vadd.f32 %v6302_v1, %v9108_v15  ;;  %v9814_v47 = vadd.f32 %v6666_v31, %v6665_v40  ;;  %v6667_v9 = vmul.f32 %v9127_v36, %v6527_v51  ;;  %v9824_v1 = vpop.xlane.xlu1 %6748 }
 0x20e   : > { %v6304_v37 = vpop.f32.mrf.mxu1  ;;  %12388 = vst [vmem:[#allocation84_spill] sm:$0xff] %v9824_v1 }
 0x20f   : > { %12385 = vst [vmem:[#allocation81_spill] sm:$0xff] %v9814_v47  ;;  %v6668_v27 = vmul.f32 %v9132_v24, %v6528_v25  ;;  %v6529_v49 = vmax.f32 %v6303_v57, 0.0  ;;  %v6305_v12 = vadd.f32 %v6304_v37, %v9117_v29  ;;  %v9864_v47 = vsub.s32 4, %v9078_v63 }
 0x210   : > { %v6308_v59 = vpop.f32.mrf.mxu1 }
 0x211   : > { %v6530_v46 = vmax.f32 %v6305_v12, 0.0  ;;  %v6309_v22 = vadd.f32 %v6308_v59, %v9108_v15  ;;  %v9822_v21 = vadd.f32 %v6668_v27, %v6667_v9  ;;  %v6669_v40 = vmul.f32 %v9127_v36, %v6529_v49 }
 0x212   : > { %v6310_v3 = vpop.f32.mrf.mxu1 }
 0x213   : > { %12387 = vst [vmem:[#allocation83_spill] sm:$0xff] %v9822_v21  ;;  %v6670_v31 = vmul.f32 %v9132_v24, %v6530_v46  ;;  %v6531_v35 = vmax.f32 %v6309_v22, 0.0  ;;  %v6311_v51 = vadd.f32 %v6310_v3, %v9117_v29 }
 0x214   : > { %v6312_v25 = vpop.f32.mrf.mxu1 }
 0x215   : > { %v6532_v57 = vmax.f32 %v6311_v51, 0.0  ;;  %v9829_v60 = vadd.f32 %v6670_v31, %v6669_v40  ;;  %v9831_v12 = vpop.xlane.xlu1 %6754  ;;  %v6671_v9 = vmul.f32 %v9127_v36, %v6531_v35  ;;  %v6313_v49 = vadd.f32 %v6312_v25, %v9108_v15 }
 0x216   : > { %v6314_v37 = vpop.f32.mrf.mxu1  ;;  %12390 = vst [vmem:[#allocation86_spill] sm:$0xff] %v9831_v12 }
 0x217   : > { %12389 = vst [vmem:[#allocation85_spill] sm:$0xff] %v9829_v60  ;;  %v6672_v27 = vmul.f32 %v9132_v24, %v6532_v57  ;;  %v6315_v59 = vadd.f32 %v6314_v37, %v9117_v29  ;;  %v6533_v31 = vmax.f32 %v6313_v49, 0.0  ;;  %v9842_v57 = vsub.s32 3, %v9078_v63 }
 0x218   : > { %v6318_v1 = vpop.f32.mrf.mxu1 }
 0x219   : > { %v6319_v46 = vadd.f32 %v6318_v1, %v9108_v15  ;;  %v6831_v22 = vadd.f32 %v6672_v27, %v6671_v9  ;;  %v6534_v3 = vmax.f32 %v6315_v59, 0.0  ;;  %12391 = vst [vmem:[#allocation87_spill] sm:$0xff] %v9842_v57  ;;  %v9848_v9 = vsub.s32 2, %v9078_v63 }
 0x21a   : > { %v6320_v21 = vpop.f32.mrf.mxu1  ;;  %v6673_v59 = vmul.f32 %v9127_v36, %v6533_v31 }
 0x21b   : > { %v6321_v40 = vadd.f32 %v6320_v21, %v9117_v29  ;;  %6832 = vadd.xlane.f32.xlu1 %v6831_v22  ;;  %v6535_v51 = vmax.f32 %v6319_v46, 0.0  ;;  %v6674_v1 = vmul.f32 %v9132_v24, %v6534_v3  ;;  %v9851_v21 = vsub.s32 5, %v9078_v63 }
 0x21c   : > { %v9839_v12 = vpop.xlane.xlu1 %2158  ;;  %v6322_v35 = vpop.f32.mrf.mxu1 }
 0x21d   : > { %v6536_v60 = vmax.f32 %v6321_v40, 0.0  ;;  %v2192_v25 = vrot.slane %v9839_v12, %v9091_v4  ;;  %12392 = vst [vmem:[#allocation88_spill] sm:$0xff] %v9851_v21  ;;  %v6675_v49 = vmul.f32 %v9127_v36, %v6535_v51  ;;  %v2196_v22 = vrot.slane %v9839_v12, %v9096_v17 }
 0x21e   : > { %v6324_v37 = vpop.f32.mrf.mxu1  ;;  %v2204_v40 = vrot.slane %v9839_v12, %v9842_v57  ;;  %v2200_v31 = vrot.slane %v9839_v12, %v9848_v9  ;;  %v2212_v51 = vrot.slane %v9839_v12, %v9851_v21  ;;  %v6323_v58 = vadd.f32 %v6322_v35, %v9108_v15 }
 0x21f   : > { %v9854_v27 = vsub.f32 %v9179_v28, %v2192_v25  ;;  %v6676_v46 = vmul.f32 %v9132_v24, %v6536_v60  ;;  %v6834_v28 = vadd.f32 %v6674_v1, %v6673_v59  ;;  %v9875_v56 = vsub.f32 %v9187_v30, %v2196_v22 }
 0x220   : > { %v6328_v3 = vpop.f32.mrf.mxu1  ;;  %v9879_v11 = vsub.f32 %v9201_v48, %v2204_v40  ;;  %v6325_v1 = vadd.f32 %v6324_v37, %v9117_v29  ;;  %v2208_v30 = vrot.slane %v9839_v12, %v9864_v47  ;;  %v6537_v35 = vmax.f32 %v6323_v58, 0.0 }
 0x221   : > { %12393 = vst [vmem:[#allocation89_spill] sm:$0xff] %v9854_v27  ;;  %v2573_v60 = vmul.f32 1.442695, %v9854_v27  ;;  %12395 = vst [vmem:[#allocation91_spill] sm:$0xff] %v9875_v56  ;;  %6835 = vadd.xlane.f32.xlu0 %v6834_v28  ;;  %v6837_v62 = vadd.f32 %v6676_v46, %v6675_v49  ;;  %v6329_v59 = vadd.f32 %v6328_v3, %v9108_v15  ;;  %v2575_v63 = vmul.f32 1.442695, %v9875_v56 }
 0x222   : > { %v6330_v25 = vpop.f32.mrf.mxu1  ;;  %12396 = vst [vmem:[#allocation92_spill] sm:$0xff] %v9879_v11  ;;  %v2220_v49 = vrot.slane %v9839_v12, %v9867_v33  ;;  %v6538_v48 = vmax.f32 %v6325_v1, 0.0  ;;  %v9892_v3 = vsub.f32 %v9191_v19, %v2200_v31  ;;  %v9895_v40 = vsub.f32 %v9227_v14, %v2212_v51 }
 0x223   : > { %v6331_v52 = vadd.f32 %v6330_v25, %v9117_v29  ;;  %6838 = vadd.xlane.f32.xlu1 %v6837_v62  ;;  %8180 = vpow2.f32 %v2573_v60  ;;  %v6539_v22 = vmax.f32 %v6329_v59, 0.0  ;;  %v6677_v28 = vmul.f32 %v9127_v36, %v6537_v35 }
 0x224   : > { %v6332_v39 = vpop.f32.mrf.mxu1  ;;  %12397 = vst [vmem:[#allocation93_spill] sm:$0xff] %v9892_v3  ;;  %12398 = vst [vmem:[#allocation94_spill] sm:$0xff] %v9895_v40  ;;  %v2579_v45 = vmul.f32 1.442695, %v9879_v11  ;;  %v6678_v58 = vmul.f32 %v9132_v24, %v6538_v48  ;;  %v2216_v19 = vrot.slane %v9839_v12, %v9885_v6  ;;  %v9910_v51 = vsub.f32 %v9217_v2, %v2208_v30 }
 0x225   : > { %v6540_v37 = vmax.f32 %v6331_v52, 0.0  ;;  %v6679_v62 = vmul.f32 %v9127_v36, %v6539_v22  ;;  %8182 = vpow2.f32 %v2575_v63  ;;  %v2577_v1 = vmul.f32 1.442695, %v9892_v3 }
 0x226   : > { %v6334_v46 = vpop.f32.mrf.mxu1  ;;  %v9905_v31 = vadd.f32 %v6678_v58, %v6677_v28  ;;  %12400 = vst [vmem:[#allocation96_spill] sm:$0xff] %v9910_v51  ;;  %v9914_v59 = vsub.f32 %v9222_v32, %v2220_v49  ;;  %8184 = vpow2.f32 %v2579_v45  ;;  %v2583_v35 = vmul.f32 1.442695, %v9895_v40 }
 0x227   : > { %v6680_v60 = vmul.f32 %v9132_v24, %v6540_v37  ;;  %v9918_v22 = vsub.f32 %v9214_v42, %v2216_v19  ;;  %v6333_v12 = vadd.f32 %v6332_v39, %v9108_v15  ;;  %v6335_v37 = vadd.f32 %v6334_v46, %v9117_v29 }
 0x228   : > { %v6338_v25 = vpop.f32.mrf.mxu1  ;;  %12401 = vst [vmem:[#allocation97_spill] sm:$0xff] %v9914_v59  ;;  %8186 = vpow2.f32 %v2577_v1  ;;  %v2581_v2 = vmul.f32 1.442695, %v9910_v51  ;;  %v2587_v32 = vmul.f32 1.442695, %v9914_v59 }
 0x229   : > { %v9907_v14 = vadd.f32 %v6680_v60, %v6679_v62  ;;  %12402 = vst [vmem:[#allocation98_spill] sm:$0xff] %v9918_v22  ;;  %v6339_v30 = vadd.f32 %v6338_v25, %v9108_v15  ;;  %8188 = vpow2.f32 %v2583_v35  ;;  %v6541_v49 = vmax.f32 %v6333_v12, 0.0 }
 0x22a   : > { %v6340_v52 = vpop.f32.mrf.mxu1  ;;  %v6542_v28 = vmax.f32 %v6335_v37, 0.0  ;;  %8190 = vpow2.f32 %v2581_v2  ;;  %v2585_v42 = vmul.f32 1.442695, %v9918_v22 }
 0x22b   : > { %12399 = vst [vmem:[#allocation95_spill] sm:$0xff] %v9907_v14  ;;  %v6341_v63 = vadd.f32 %v6340_v52, %v9117_v29  ;;  %v6543_v39 = vmax.f32 %v6339_v30, 0.0  ;;  %8192 = vpow2.f32 %v2587_v32  ;;  %v6681_v25 = vmul.f32 %v9127_v36, %v6541_v49 }
 0x22c   : > { %v6342_v48 = vpop.f32.mrf.mxu1  ;;  %v6682_v52 = vmul.f32 %v9132_v24, %v6542_v28  ;;  %8194 = vpow2.f32 %v2585_v42 }
 0x22d   : > { %v6544_v62 = vmax.f32 %v6341_v63, 0.0  ;;  %v6343_v46 = vadd.f32 %v6342_v48, %v9108_v15  ;;  %v6683_v35 = vmul.f32 %v9127_v36, %v6543_v39 }
 0x22e   : > { %v6344_v45 = vpop.f32.mrf.mxu1  ;;  %v9935_v63 = vadd.f32 %v6682_v52, %v6681_v25 }
 0x22f   : > { %v6345_v60 = vadd.f32 %v6344_v45, %v9117_v29  ;;  %v6545_v19 = vmax.f32 %v6343_v46, 0.0  ;;  %v6684_v12 = vmul.f32 %v9132_v24, %v6544_v62 }
 0x230   : > { %v8181_v58 = vpop.eup %8180  ;;  %12403 = vst [vmem:[#allocation99_spill] sm:$0xff] %v9935_v63 }
 0x231   : > { %v6546_v1 = vmax.f32 %v6345_v60, 0.0  ;;  %v6685_v2 = vmul.f32 %v9127_v36, %v6545_v19  ;;  %v9937_v32 = vadd.f32 %v6684_v12, %v6683_v35  ;;  %v4349_v46 = vmul.f32 %v8181_v58, %v9854_v27  ;;  %v8162_v35 = vld [vmem:[%s8727_s21 + $0x1a4] ss:$8 sps:$4 sm:$0xff]   ;;  %v8164_v12 = vld [vmem:[%s8727_s21 + $0x1a0] ss:$8 sps:$4 sm:$0xff]  }
 0x232   : > { %v8183_v37 = vpop.eup %8182  ;;  %6406 = vmatprep.mubr.bf16.mxu1 %v8162_v35 }
 0x233   : > { %v6686_v30 = vmul.f32 %v9132_v24, %v6546_v1  ;;  %v8185_v48 = vpop.eup %8184  ;;  %12404 = vst [vmem:[#allocation100_spill] sm:$0xff] %v9937_v32  ;;  %v4350_v60 = vmul.f32 %v8183_v37, %v9875_v56  ;;  %6407 = vmatmul.mubr.bf16.gmra.mxu1 %v8164_v12 }
 0x234   : > { %2766 = vperm.xlu1 %7993, %v8181_v58   ;;  %v4352_v19 = vmul.f32 %v8185_v48, %v9879_v11 }
 0x235   : > { %v9939_v45 = vadd.f32 %v6686_v30, %v6685_v2  ;;  %v8187_v49 = vpop.eup %8186 }
 0x236   : > { %v8189_v28 = vpop.eup %8188  ;;  %v4351_v25 = vmul.f32 %v8187_v49, %v9892_v3 }
 0x237   : > { %2769 = vperm.xlu0 %7992, %v8183_v37   ;;  %12405 = vst [vmem:[#allocation101_spill] sm:$0xff] %v9939_v45  ;;  %v8191_v42 = vpop.eup %8190  ;;  %v4354_v58 = vmul.f32 %v8189_v28, %v9895_v40  ;;  %v6348_v37 = vpop.f32.mrf.mxu1 }
 0x238   : > { %2775 = vperm.xlu1 %7993, %v8185_v48   ;;  %v8193_v39 = vpop.eup %8192  ;;  %v4353_v52 = vmul.f32 %v8191_v42, %v9910_v51  ;;  %v8165_v48 = vld [vmem:[%s8727_s21 + $0x1b4] ss:$8 sps:$4 sm:$0xff]  }
 0x239   : > { %v8195_v62 = vpop.eup %8194  ;;  %v4356_v2 = vmul.f32 %v8193_v39, %v9914_v59  ;;  %v6350_v30 = vpop.f32.mrf.mxu1  ;;  %6416 = vmatprep.mubr.bf16.mxu1 %v8165_v48 }
 0x23a   : > { %v4355_v1 = vmul.f32 %v8195_v62, %v9918_v22 }
 0x23b   : > { %2772 = vperm.xlu0 %7992, %v8187_v49   ;;  %v6352_v49 = vpop.f32.mrf.mxu1 }
 0x23c   : > { %2781 = vperm.xlu1 %7993, %v8189_v28  }
 0x23d   : > { %v6354_v28 = vpop.f32.mrf.mxu1 }
 0x23f   : > { %2778 = vperm.xlu0 %7992, %v8191_v42   ;;  %v8167_v42 = vld [vmem:[%s8727_s21 + $0x1b0] ss:$8 sps:$4 sm:$0xff]   ;;  %v9961_v35 = vpop.f32.mrf.mxu1 }
 0x240   : > { %2787 = vperm.xlu1 %7993, %v8193_v39   ;;  %6417 = vmatmul.mubr.bf16.gmra.mxu1 %v8167_v42  ;;  %v8170_v39 = vld [vmem:[%s8727_s21 + $0x1c0] ss:$8 sps:$4 sm:$0xff]   ;;  %v6349_v42 = vadd.f32 %v6348_v37, %v9108_v15 }
 0x243   : > { %2784 = vperm.xlu0 %7992, %v8195_v62   ;;  %v9953_v62 = vpop.xlane.xlu1 %6760 }
 0x244   : > { %4478 = vperm.xlu1 %7993, %v4349_v46   ;;  %12406 = vst [vmem:[#allocation102_spill] sm:$0xff] %v9953_v62  ;;  %v8168_v46 = vld [vmem:[%s8727_s21 + $0x1c4] ss:$8 sps:$4 sm:$0xff]  }
 0x245   : > { %6426 = vmatprep.mubr.bf16.mxu1 %v8168_v46 }
 0x247   : > { %4481 = vperm.xlu0 %7992, %v4350_v60   ;;  %v6353_v60 = vadd.f32 %v6352_v49, %v9108_v15  ;;  %v6351_v49 = vadd.f32 %v6350_v30, %v9117_v29 }
 0x248   : > { %4484 = vperm.xlu1 %7993, %v4351_v25   ;;  %v6355_v25 = vadd.f32 %v6354_v28, %v9117_v29  ;;  %6427 = vmatmul.mubr.bf16.gmra.mxu1 %v8170_v39  ;;  %v9968_v28 = vpop.f32.mrf.mxu1  ;;  %v6547_v39 = vmax.f32 %v6349_v42, 0.0 }
 0x24b   : > { %4490 = vperm.xlu0 %7992, %v4353_v52   ;;  %v9958_v52 = vpop.xlane.xlu1 %6766 }
 0x24c   : > { %4487 = vperm.xlu1 %7993, %v4352_v19   ;;  %12407 = vst [vmem:[#allocation103_spill] sm:$0xff] %v9958_v52  ;;  %v6549_v19 = vmax.f32 %v6353_v60, 0.0  ;;  %v6548_v52 = vmax.f32 %v6351_v49, 0.0 }
 0x24e   : > { %v6689_v12 = vmul.f32 %v9127_v36, %v6549_v19 }
 0x24f   : > { %4496 = vperm.xlu0 %7992, %v4355_v1   ;;  %v6550_v1 = vmax.f32 %v6355_v25, 0.0 }
 0x250   : > { %4493 = vperm.xlu1 %7993, %v4354_v58   ;;  %v2162_v58 = vpop.xlane.xlu1 %2161 }
 0x251   : > { %v2224_v48 = vrot.slane %v2162_v58, %v9091_v4  ;;  %v2232_v60 = vrot.slane %v2162_v58, %v9848_v9  ;;  %v2228_v19 = vrot.slane %v2162_v58, %v9096_v17  ;;  %v2240_v62 = vrot.slane %v2162_v58, %v9864_v47 }
 0x252   : > { %v2248_v49 = vrot.slane %v2162_v58, %v9885_v6 }
 0x253   : > { %v9972_v25 = vsub.f32 %v9248_v8, %v2224_v48  ;;  %v9977_v37 = vsub.f32 %v9255_v34, %v2232_v60  ;;  %v2236_v8 = vrot.slane %v2162_v58, %v9842_v57  ;;  %v9984_v48 = vsub.f32 %v9258_v54, %v2228_v19 }
 0x254   : > { %4499 = vperm.xlu1 %7993, %v4356_v2   ;;  %v6690_v2 = vmul.f32 %v9132_v24, %v6550_v1  ;;  %v6362_v1 = vpop.f32.mrf.mxu1  ;;  %v9988_v45 = vsub.f32 %v9285_v55, %v2240_v62  ;;  %v9997_v19 = vsub.f32 %v9282_v20, %v2248_v49  ;;  %v2252_v62 = vrot.slane %v2162_v58, %v9867_v33 }
 0x255   : > { %12408 = vst [vmem:[#allocation104_spill] sm:$0xff] %v9972_v25  ;;  %12409 = vst [vmem:[#allocation105_spill] sm:$0xff] %v9977_v37  ;;  %v2589_v30 = vmul.f32 1.442695, %v9972_v25  ;;  %v2593_v34 = vmul.f32 1.442695, %v9977_v37 }
 0x256   : > { %v6858_v46 = vadd.f32 %v6690_v2, %v6689_v12  ;;  %v6687_v12 = vmul.f32 %v9127_v36, %v6547_v39  ;;  %v6688_v2 = vmul.f32 %v9132_v24, %v6548_v52  ;;  %12410 = vst [vmem:[#allocation106_spill] sm:$0xff] %v9984_v48  ;;  %v6364_v42 = vpop.f32.mrf.mxu1  ;;  %12411 = vst [vmem:[#allocation107_spill] sm:$0xff] %v9988_v45  ;;  %v2591_v22 = vmul.f32 1.442695, %v9984_v48 }
 0x257   : > { %8196 = vpow2.f32 %v2589_v30  ;;  %v2244_v39 = vrot.slane %v2162_v58, %v9851_v21  ;;  %v9993_v52 = vsub.f32 %v9263_v53, %v2236_v8  ;;  %12413 = vst [vmem:[#allocation109_spill] sm:$0xff] %v9997_v19  ;;  %v2597_v55 = vmul.f32 1.442695, %v9988_v45 }
 0x258   : > { %v6855_v60 = vadd.f32 %v6688_v2, %v6687_v12  ;;  %8198 = vpow2.f32 %v2593_v34  ;;  %v6363_v53 = vadd.f32 %v6362_v1, %v9108_v15  ;;  %v6365_v2 = vadd.f32 %v6364_v42, %v9117_v29 }
 0x259   : > { %12412 = vst [vmem:[#allocation108_spill] sm:$0xff] %v9993_v52  ;;  %v10002_v30 = vsub.f32 %v9295_v26, %v2244_v39  ;;  %8200 = vpow2.f32 %v2591_v22  ;;  %v2595_v12 = vmul.f32 1.442695, %v9993_v52  ;;  %v2601_v20 = vmul.f32 1.442695, %v9997_v19 }
 0x25a   : > { %8202 = vpow2.f32 %v2597_v55  ;;  %v10009_v49 = vsub.f32 %v9290_v38, %v2252_v62  ;;  %v6553_v34 = vmax.f32 %v6363_v53, 0.0  ;;  %v6554_v26 = vmax.f32 %v6365_v2, 0.0 }
 0x25b   : > { %12414 = vst [vmem:[#allocation110_spill] sm:$0xff] %v10002_v30  ;;  %8204 = vpow2.f32 %v2595_v12  ;;  %v2599_v58 = vmul.f32 1.442695, %v10002_v30 }
 0x25c   : > { %12415 = vst [vmem:[#allocation111_spill] sm:$0xff] %v10009_v49  ;;  %8206 = vpow2.f32 %v2601_v20  ;;  %v2603_v1 = vmul.f32 1.442695, %v10009_v49  ;;  %v6693_v42 = vmul.f32 %v9127_v36, %v6553_v34  ;;  %v6694_v39 = vmul.f32 %v9132_v24, %v6554_v26  ;;  %v10021_v26 = vpop.xlane.xlu1 %2164 }
 0x25d   : > { %8208 = vpow2.f32 %v2599_v58 }
 0x25e   : > { %8210 = vpow2.f32 %v2603_v1  ;;  %v10017_v2 = vadd.f32 %v6694_v39, %v6693_v42 }
 0x260   : > { %12416 = vst [vmem:[#allocation112_spill] sm:$0xff] %v10017_v2 }
 0x264   : > { %v8197_v22 = vpop.eup %8196 }
 0x265   : > { %v8199_v59 = vpop.eup %8198 }
 0x266   : > { %v8201_v38 = vpop.eup %8200 }
 0x267   : > { %v8203_v34 = vpop.eup %8202 }
 0x268   : > { %v8205_v51 = vpop.eup %8204 }
 0x269   : > { %v8207_v27 = vpop.eup %8206 }
 0x26a   : > { %v8209_v42 = vpop.eup %8208 }
 0x26e   : > { %6859 = vadd.xlane.f32.xlu0 %v6858_v46  ;;  %v6368_v46 = vpop.f32.mrf.mxu1 }
 0x26f   : > { %v6369_v62 = vadd.f32 %v6368_v46, %v9108_v15 }
 0x270   : > { %v6370_v54 = vpop.f32.mrf.mxu1 }
 0x271   : > { %v6371_v12 = vadd.f32 %v6370_v54, %v9117_v29  ;;  %v6555_v1 = vmax.f32 %v6369_v62, 0.0  ;;  %v2260_v54 = vrot.slane %v10021_v26, %v9096_v17 }
 0x272   : > { %v6372_v8 = vpop.f32.mrf.mxu1 }
 0x273   : > { %v6373_v20 = vadd.f32 %v6372_v8, %v9108_v15  ;;  %v6556_v40 = vmax.f32 %v6371_v12, 0.0  ;;  %v4357_v8 = vmul.f32 %v8197_v22, %v9972_v25 }
 0x275   : > { %v6557_v11 = vmax.f32 %v6373_v20, 0.0  ;;  %v6696_v39 = vmul.f32 %v9132_v24, %v6556_v40  ;;  %v8211_v40 = vpop.eup %8210 }
 0x277   : > { %v6697_v20 = vmul.f32 %v9127_v36, %v6557_v11 }
 0x278   : > { %6856 = vadd.xlane.f32.xlu1 %v6855_v60  ;;  %v6374_v60 = vpop.f32.mrf.mxu1 }
 0x279   : > { %v6375_v58 = vadd.f32 %v6374_v60, %v9117_v29  ;;  %v6695_v60 = vmul.f32 %v9127_v36, %v6555_v1  ;;  %v10037_v1 = vsub.f32 %v9334_v13, %v2260_v54  ;;  %v4358_v54 = vmul.f32 %v8201_v38, %v9984_v48  ;;  %v12479_v48 = vld [vmem:[#allocation43_spill] sm:$0xff] }
 0x27a   : > { %v6378_v55 = vpop.f32.mrf.mxu1 }
 0x27b   : > { %v6558_v46 = vmax.f32 %v6375_v58, 0.0  ;;  %v6379_v56 = vadd.f32 %v6378_v55, %v9108_v15  ;;  %12417 = vst [vmem:[#allocation113_spill] sm:$0xff] %v10037_v1  ;;  %v4359_v55 = vmul.f32 %v8199_v59, %v9977_v37  ;;  %v2607_v13 = vmul.f32 1.442695, %v10037_v1 }
 0x27c   : > { %v6380_v53 = vpop.f32.mrf.mxu1 }
 0x27d   : > { %v6381_v62 = vadd.f32 %v6380_v53, %v9117_v29  ;;  %v6698_v58 = vmul.f32 %v9132_v24, %v6558_v46  ;;  %v6559_v53 = vmax.f32 %v6379_v56, 0.0  ;;  %v10040_v46 = vadd.f32 %v6696_v39, %v6695_v60 }
 0x27e   : > { %v6382_v3 = vpop.f32.mrf.mxu1  ;;  %v2284_v56 = vrot.slane %v10021_v26, %v9867_v33  ;;  %8212 = vpow2.f32 %v2607_v13  ;;  %v4360_v39 = vmul.f32 %v8205_v51, %v9993_v52 }
 0x27f   : > { %v6383_v32 = vadd.f32 %v6382_v3, %v9108_v15  ;;  %v6560_v25 = vmax.f32 %v6381_v62, 0.0  ;;  %12418 = vst [vmem:[#allocation114_spill] sm:$0xff] %v10040_v46  ;;  %v10042_v3 = vadd.f32 %v6698_v58, %v6697_v20  ;;  %v4364_v58 = vmul.f32 %v8211_v40, %v10009_v49  ;;  %v12486_v46 = vld [vmem:[#allocation48_spill] sm:$0xff] }
 0x280   : > { %v6384_v12 = vpop.f32.mrf.mxu1 }
 0x281   : > { %v6385_v63 = vadd.f32 %v6384_v12, %v9117_v29  ;;  %v6561_v11 = vmax.f32 %v6383_v32, 0.0  ;;  %12419 = vst [vmem:[#allocation115_spill] sm:$0xff] %v10042_v3  ;;  %v2276_v12 = vrot.slane %v10021_v26, %v9851_v21  ;;  %v6700_v32 = vmul.f32 %v9132_v24, %v6560_v25 }
 0x282   : > { %v10069_v25 = vsub.f32 %v9381_v10, %v2284_v56  ;;  %v2256_v56 = vrot.slane %v10021_v26, %v9091_v4 }
 0x283   : > { %v6562_v14 = vmax.f32 %v6385_v63, 0.0  ;;  %v6699_v63 = vmul.f32 %v9127_v36, %v6559_v53  ;;  %v10059_v60 = vsub.f32 %v9386_v44, %v2276_v12 }
 0x284   : > { %2790 = vperm.xlu0 %7992, %v8197_v22   ;;  %v2268_v22 = vrot.slane %v10021_v26, %v9842_v57  ;;  %12424 = vst [vmem:[#allocation120_spill] sm:$0xff] %v10069_v25 }
 0x285   : > { %12421 = vst [vmem:[#allocation117_spill] sm:$0xff] %v10059_v60  ;;  %v10064_v62 = vadd.f32 %v6700_v32, %v6699_v63  ;;  %v2615_v44 = vmul.f32 1.442695, %v10059_v60  ;;  %v10088_v63 = vsub.f32 %v9323_v5, %v2256_v56  ;;  %v2280_v5 = vrot.slane %v10021_v26, %v9885_v6 }
 0x286   : > { %v10047_v2 = vsub.f32 %v9339_v41, %v2268_v22  ;;  %v6702_v41 = vmul.f32 %v9132_v24, %v6562_v14  ;;  %v4362_v14 = vmul.f32 %v8209_v42, %v10002_v30 }
 0x287   : > { %12422 = vst [vmem:[#allocation118_spill] sm:$0xff] %v10064_v62  ;;  %12425 = vst [vmem:[#allocation121_spill] sm:$0xff] %v10088_v63 }
 0x288   : > { %2796 = vperm.xlu0 %7992, %v8199_v59   ;;  %12420 = vst [vmem:[#allocation116_spill] sm:$0xff] %v10047_v2  ;;  %v4361_v59 = vmul.f32 %v8203_v34, %v9988_v45  ;;  %v12476_v45 = vld [vmem:[#allocation46_spill] sm:$0xff] }
 0x289   : > { %2793 = vperm.xlu1 %7993, %v8201_v38   ;;  %v2611_v38 = vmul.f32 1.442695, %v10047_v2 }
 0x28b   : > { %8214 = vpow2.f32 %v2611_v38  ;;  %v2605_v38 = vmul.f32 1.442695, %v10088_v63 }
 0x28c   : > { %2802 = vperm.xlu0 %7992, %v8203_v34   ;;  %v4363_v34 = vmul.f32 %v8207_v27, %v9997_v19  ;;  %8216 = vpow2.f32 %v2615_v44 }
 0x28d   : > { %2799 = vperm.xlu1 %7993, %v8205_v51   ;;  %v2619_v51 = vmul.f32 1.442695, %v10069_v25 }
 0x28f   : > { %8218 = vpow2.f32 %v2619_v51 }
 0x290   : > { %2808 = vperm.xlu0 %7992, %v8207_v27   ;;  %v8213_v27 = vpop.eup %8212  ;;  %8220 = vpow2.f32 %v2605_v38 }
 0x291   : > { %2805 = vperm.xlu1 %7993, %v8209_v42   ;;  %v6361_v42 = vadd.f32 %v9968_v28, %v9117_v29  ;;  %v2264_v28 = vrot.slane %v10021_v26, %v9848_v9 }
 0x293   : > { %v6552_v12 = vmax.f32 %v6361_v42, 0.0 }
 0x294   : > { %4502 = vperm.xlu0 %7992, %v4357_v8   ;;  %v6701_v8 = vmul.f32 %v9127_v36, %v6561_v11 }
 0x295   : > { %2811 = vperm.xlu1 %7993, %v8211_v40   ;;  %v4366_v40 = vmul.f32 %v8213_v27, %v10037_v1 }
 0x296   : > { %v10066_v20 = vadd.f32 %v6702_v41, %v6701_v8  ;;  %v2272_v8 = vrot.slane %v10021_v26, %v9864_v47  ;;  %v10094_v41 = vsub.f32 %v9331_v18, %v2264_v28  ;;  %v12430_v18 = vld [vmem:[#allocation28_spill] sm:$0xff] }
 0x298   : > { %4508 = vperm.xlu0 %7992, %v4359_v55   ;;  %12423 = vst [vmem:[#allocation119_spill] sm:$0xff] %v10066_v20  ;;  %v8215_v22 = vpop.eup %8214  ;;  %v6359_v55 = vadd.f32 %v9961_v35, %v9108_v15  ;;  %12426 = vst [vmem:[#allocation122_spill] sm:$0xff] %v10094_v41  ;;  %v10103_v44 = vsub.f32 %v9373_v43, %v2272_v8  ;;  %v12432_v43 = vld [vmem:[#allocation38_spill] sm:$0xff] }
 0x299   : > { %4505 = vperm.xlu1 %7993, %v4358_v54   ;;  %v8217_v10 = vpop.eup %8216  ;;  %v6692_v54 = vmul.f32 %v9132_v24, %v6552_v12  ;;  %v4368_v35 = vmul.f32 %v8215_v22, %v10047_v2 }
 0x29a   : > { %v6551_v11 = vmax.f32 %v6359_v55, 0.0  ;;  %v4370_v32 = vmul.f32 %v8217_v10, %v10059_v60  ;;  %12428 = vst [vmem:[#allocation124_spill] sm:$0xff] %v10103_v44  ;;  %v6388_v55 = vpop.f32.mrf.mxu1 }
 0x29c   : > { %4514 = vperm.xlu0 %7992, %v4361_v59   ;;  %v8219_v53 = vpop.eup %8218  ;;  %v6691_v13 = vmul.f32 %v9127_v36, %v6551_v11  ;;  %v10116_v11 = vpop.xlane.xlu0 %6739 }
 0x29d   : > { %4511 = vperm.xlu1 %7993, %v4360_v39   ;;  %v10097_v39 = vpop.xlane.xlu1 %6784  ;;  %v8221_v26 = vpop.eup %8220  ;;  %12434 = vst [vmem:[#allocation126_spill] sm:$0xff] %v10116_v11 }
 0x29e   : > { %v6861_v59 = vadd.f32 %v6692_v54, %v6691_v13  ;;  %12427 = vst [vmem:[#allocation123_spill] sm:$0xff] %v10097_v39  ;;  %v6390_v12 = vpop.f32.mrf.mxu1  ;;  %v12435_v54 = vld [vmem:[#allocation40_spill] sm:$0xff] }
 0x2a0   : > { %4520 = vperm.xlu0 %7992, %v4363_v34   ;;  %v4372_v34 = vmul.f32 %v8219_v53, %v10069_v25  ;;  %v10124_v28 = vpop.xlane.xlu0 %6745 }
 0x2a1   : > { %4517 = vperm.xlu1 %7993, %v4362_v14   ;;  %v2609_v14 = vmul.f32 1.442695, %v10094_v41  ;;  %v10106_v51 = vpop.xlane.xlu1 %6790  ;;  %12437 = vst [vmem:[#allocation127_spill] sm:$0xff] %v10124_v28 }
 0x2a2   : > { %12429 = vst [vmem:[#allocation125_spill] sm:$0xff] %v10106_v51  ;;  %v12447_v51 = vld [vmem:[#allocation42_spill] sm:$0xff] }
 0x2a3   : > { %8222 = vpow2.f32 %v2609_v14 }
 0x2a5   : > { %4523 = vperm.xlu1 %7993, %v4364_v58   ;;  %v10109_v58 = vsub.f32 %v12430_v18, %v2280_v5  ;;  %v10127_v5 = vpop.xlane.xlu0 %6751 }
 0x2a6   : > { %12438 = vst [vmem:[#allocation128_spill] sm:$0xff] %v10127_v5 }
 0x2a7   : > { %12431 = vst [vmem:[#allocation28_spill] sm:$0xff] %v10109_v58 }
 0x2a9   : > { %2817 = vperm.xlu1 %7993, %v8213_v27   ;;  %v2613_v27 = vmul.f32 1.442695, %v10103_v44 }
 0x2ab   : > { %8224 = vpow2.f32 %v2613_v27 }
 0x2ad   : > { %2823 = vperm.xlu1 %7993, %v8215_v22   ;;  %v2617_v22 = vmul.f32 1.442695, %v10109_v58 }
 0x2af   : > { %8226 = vpow2.f32 %v2617_v22  ;;  %v10131_v22 = vpop.xlane.xlu0 %6757 }
 0x2b0   : > { %12439 = vst [vmem:[#allocation129_spill] sm:$0xff] %v10131_v22 }
 0x2b1   : > { %2829 = vperm.xlu1 %7993, %v8217_v10   ;;  %v5318_v10 = vpop.xlane.xlu1 %5317 }
 0x2b2   : > { %v10114_v42 = vsub.f32 %v12432_v43, %v5318_v10  ;;  %v4365_v10 = vmul.f32 %v8221_v26, %v10088_v63 }
 0x2b3   : > { %v10134_v43 = vpop.xlane.xlu0 %6763 }
 0x2b4   : > { %12433 = vst [vmem:[#allocation38_spill] sm:$0xff] %v10114_v42  ;;  %v5346_v13 = vmul.f32 1.442695, %v10114_v42  ;;  %12440 = vst [vmem:[#allocation130_spill] sm:$0xff] %v10134_v43 }
 0x2b5   : > { %2835 = vperm.xlu1 %7993, %v8219_v53   ;;  %v5312_v53 = vpop.xlane.xlu1 %5311 }
 0x2b6   : > { %v10120_v56 = vsub.f32 %v12435_v54, %v5312_v53  ;;  %8228 = vpow2.f32 %v5346_v13 }
 0x2b7   : > { %v10138_v54 = vpop.xlane.xlu0 %6769 }
 0x2b8   : > { %12436 = vst [vmem:[#allocation40_spill] sm:$0xff] %v10120_v56  ;;  %v5342_v8 = vmul.f32 1.442695, %v10120_v56  ;;  %12441 = vst [vmem:[#allocation131_spill] sm:$0xff] %v10138_v54 }
 0x2b9   : > { %4529 = vperm.xlu1 %7993, %v4366_v40   ;;  %v8223_v40 = vpop.eup %8222 }
 0x2ba   : > { %8230 = vpow2.f32 %v5342_v8  ;;  %v4367_v53 = vmul.f32 %v8223_v40, %v10094_v41 }
 0x2bd   : > { %4535 = vperm.xlu1 %7993, %v4368_v35   ;;  %v6389_v35 = vadd.f32 %v6388_v55, %v9108_v15 }
 0x2bf   : > { %6862 = vadd.xlane.f32.xlu0 %v6861_v59  ;;  %v6391_v59 = vadd.f32 %v6390_v12, %v9117_v29  ;;  %v6563_v38 = vmax.f32 %v6389_v35, 0.0  ;;  %v10140_v35 = vpop.xlane.xlu1 %2167 }
 0x2c1   : > { %4541 = vperm.xlu1 %7993, %v4370_v32   ;;  %v8225_v32 = vpop.eup %8224  ;;  %v6703_v18 = vmul.f32 %v9127_v36, %v6563_v38 }
 0x2c2   : > { %v8227_v14 = vpop.eup %8226  ;;  %v4369_v13 = vmul.f32 %v8225_v32, %v10103_v44 }
 0x2c3   : > { %v8229_v12 = vpop.eup %8228  ;;  %v4371_v38 = vmul.f32 %v8227_v14, %v10109_v58 }
 0x2c5   : > { %4547 = vperm.xlu1 %7993, %v4372_v34   ;;  %v6564_v34 = vmax.f32 %v6391_v59, 0.0  ;;  %v5364_v59 = vsel %vm5309_vm10, %v8229_v12, 0.0 }
 0x2c7   : > { %v6704_v27 = vmul.f32 %v9132_v24, %v6564_v34  ;;  %v8231_v8 = vpop.eup %8230  ;;  %v10148_v34 = vpop.xlane.xlu0 %6787 }
 0x2c8   : > { %12442 = vst [vmem:[#allocation132_spill] sm:$0xff] %v10148_v34  ;;  %v12449_v34 = vld [vmem:[#allocation39_spill] sm:$0xff] }
 0x2c9   : > { %v6879_v55 = vadd.f32 %v6704_v27, %v6703_v18  ;;  %v12443_v18 = vld [vmem:[#allocation33_spill] sm:$0xff] }
 0x2d5   : > { %2814 = vperm.xlu0 %7992, %v8221_v26   ;;  %v2292_v26 = vrot.slane %v10140_v35, %v9096_v17 }
 0x2d7   : > { %v10151_v27 = vsub.f32 %v12443_v18, %v2292_v26  ;;  %v8173_v18 = vld [vmem:[%s8727_s21 + $0x1d0] ss:$8 sps:$4 sm:$0xff]  }
 0x2d9   : > { %2820 = vperm.xlu0 %7992, %v8223_v40   ;;  %v5358_v40 = vsel %vm5309_vm10, %v8231_v8, 0.0  ;;  %12444 = vst [vmem:[#allocation33_spill] sm:$0xff] %v10151_v27 }
 0x2dd   : > { %2826 = vperm.xlu0 %7992, %v8225_v32   ;;  %v5472_v32 = vmul.f32 %v8229_v12, %v10114_v42  ;;  %v2308_v12 = vrot.slane %v10140_v35, %v9851_v21 }
 0x2df   : > { %v10172_v39 = vsub.f32 %v12449_v34, %v2308_v12 }
 0x2e1   : > { %2832 = vperm.xlu0 %7992, %v8227_v14   ;;  %v5470_v14 = vmul.f32 %v8231_v8, %v10120_v56  ;;  %v6392_v8 = vpop.f32.mrf.mxu1  ;;  %12450 = vst [vmem:[#allocation39_spill] sm:$0xff] %v10172_v39 }
 0x2e3   : > { %v5478_v26 = vsel %vm5309_vm10, %v5470_v14, 0.0 }
 0x2e5   : > { %4526 = vperm.xlu0 %7992, %v4365_v10   ;;  %v2300_v10 = vrot.slane %v10140_v35, %v9842_v57 }
 0x2e9   : > { %4532 = vperm.xlu0 %7992, %v4367_v53   ;;  %6880 = vadd.xlane.f32.xlu1 %v6879_v55  ;;  %v5484_v55 = vsel %vm5309_vm10, %v5472_v32, 0.0  ;;  %v2623_v53 = vmul.f32 1.442695, %v10151_v27 }
 0x2eb   : > { %8232 = vpow2.f32 %v2623_v53 }
 0x2ed   : > { %4538 = vperm.xlu0 %7992, %v4369_v13   ;;  %5365 = vadd.xlane.f32.xlu1 %v5364_v59  ;;  %v5321_v13 = vpop.xlane.xlu0 %5320  ;;  %v12445_v59 = vld [vmem:[#allocation34_spill] sm:$0xff] }
 0x2ee   : > { %v10167_v32 = vsub.f32 %v12447_v51, %v5321_v13  ;;  %v2631_v51 = vmul.f32 1.442695, %v10172_v39  ;;  %v6393_v13 = vadd.f32 %v6392_v8, %v9108_v15 }
 0x2f0   : > { %12448 = vst [vmem:[#allocation42_spill] sm:$0xff] %v10167_v32  ;;  %v5348_v14 = vmul.f32 1.442695, %v10167_v32  ;;  %v6565_v12 = vmax.f32 %v6393_v13, 0.0 }
 0x2f1   : > { %4544 = vperm.xlu0 %7992, %v4371_v38   ;;  %5359 = vadd.xlane.f32.xlu1 %v5358_v40  ;;  %v10161_v38 = vsub.f32 %v12445_v59, %v2300_v10  ;;  %v8171_v40 = vld [vmem:[%s8727_s21 + $0x1d4] ss:$8 sps:$4 sm:$0xff]   ;;  %v10175_v59 = vpop.xlane.xlu1 %5329 }
 0x2f2   : > { %6436 = vmatprep.mubr.bf16.mxu1 %v8171_v40  ;;  %v12451_v40 = vld [vmem:[#allocation36_spill] sm:$0xff] }
 0x2f3   : > { %12446 = vst [vmem:[#allocation34_spill] sm:$0xff] %v10161_v38  ;;  %6437 = vmatmul.mubr.bf16.gmra.mxu1 %v8173_v18  ;;  %v2627_v10 = vmul.f32 1.442695, %v10161_v38 }
 0x2f5   : > { %5485 = vadd.xlane.f32.xlu1 %v5484_v55  ;;  %v2316_v55 = vrot.slane %v10140_v35, %v9867_v33  ;;  %8234 = vpow2.f32 %v2627_v10  ;;  %v10185_v53 = vpop.xlane.xlu1 %5323 }
 0x2f6   : > { %8236 = vpow2.f32 %v5348_v14 }
 0x2f7   : > { %v10179_v54 = vsub.f32 %v12451_v40, %v2316_v55  ;;  %8238 = vpow2.f32 %v2631_v51  ;;  %v6705_v55 = vmul.f32 %v9127_v36, %v6565_v12  ;;  %v2288_v51 = vrot.slane %v10140_v35, %v9091_v4 }
 0x2f8   : > { %v8233_v22 = vpop.eup %8232 }
 0x2f9   : > { %5479 = vadd.xlane.f32.xlu1 %v5478_v26  ;;  %v6394_v26 = vpop.f32.mrf.mxu1  ;;  %12452 = vst [vmem:[#allocation36_spill] sm:$0xff] %v10179_v54  ;;  %v2635_v34 = vmul.f32 1.442695, %v10179_v54  ;;  %v10187_v5 = vpop.xlane.xlu1 %2170  ;;  %v4374_v58 = vmul.f32 %v8233_v22, %v10151_v27 }
 0x2fa   : > { %v6395_v18 = vadd.f32 %v6394_v26, %v9117_v29 }
 0x2fb   : > { %8240 = vpow2.f32 %v2635_v34  ;;  %v12454_v34 = vld [vmem:[#allocation31_spill] sm:$0xff] }
 0x2fc   : > { %v6566_v43 = vmax.f32 %v6395_v18, 0.0  ;;  %v10202_v12 = vsub.f32 %v12454_v34, %v2288_v51  ;;  %v2312_v51 = vrot.slane %v10140_v35, %v9885_v6  ;;  %v12458_v34 = vld [vmem:[#allocation37_spill] sm:$0xff] }
 0x2fd   : > { %v10191_v40 = vpop.xlane.xlu1 %6808 }
 0x2fe   : > { %v6706_v10 = vmul.f32 %v9132_v24, %v6566_v43  ;;  %12453 = vst [vmem:[#allocation133_spill] sm:$0xff] %v10191_v40  ;;  %v2296_v43 = vrot.slane %v10140_v35, %v9848_v9  ;;  %12455 = vst [vmem:[#allocation31_spill] sm:$0xff] %v10202_v12  ;;  %v2621_v11 = vmul.f32 1.442695, %v10202_v12 }
 0x300   : > { %v6882_v14 = vadd.f32 %v6706_v10, %v6705_v55  ;;  %v2304_v10 = vrot.slane %v10140_v35, %v9864_v47  ;;  %8242 = vpow2.f32 %v2621_v11 }
 0x301   : > { %v10204_v40 = vpop.xlane.xlu1 %2173 }
 0x302   : > { %v8235_v8 = vpop.eup %8234 }
 0x303   : > { %v10193_v26 = vpop.eup %8236 }
 0x304   : > { %v8239_v13 = vpop.eup %8238  ;;  %v5367_v18 = vsel %vm5309_vm10, %v10193_v26, 0.0 }
 0x305   : > { %v10212_v20 = vpop.xlane.xlu1 %2176  ;;  %v4378_v35 = vmul.f32 %v8239_v13, %v10172_v39 }
 0x308   : > { %v8241_v55 = vpop.eup %8240 }
 0x309   : > { %v10221_v44 = vpop.xlane.xlu1 %2179 }
 0x30a   : > { %2841 = vperm.xlu1 %7993, %v8233_v22  }
 0x30d   : > { %v10228_v22 = vpop.xlane.xlu1 %6832 }
 0x30e   : > { %2847 = vperm.xlu1 %7993, %v8235_v8   ;;  %12462 = vst [vmem:[#allocation134_spill] sm:$0xff] %v10228_v22  ;;  %v10260_v22 = vsub.f32 %v9565_v23, %v10185_v53 }
 0x310   : > { %6883 = vadd.xlane.f32.xlu0 %v6882_v14  ;;  %v12456_v14 = vld [vmem:[#allocation32_spill] sm:$0xff] }
 0x311   : > { %v10209_v28 = vsub.f32 %v12456_v14, %v2296_v43  ;;  %v4376_v43 = vmul.f32 %v8235_v8, %v10161_v38  ;;  %v12460_v14 = vld [vmem:[#allocation35_spill] sm:$0xff]  ;;  %v10235_v8 = vpop.eup %8242  ;;  %v12467_v38 = vld [vmem:[#allocation45_spill] sm:$0xff] }
 0x312   : > { %2853 = vperm.xlu1 %7993, %v8239_v13   ;;  %v10225_v60 = vsub.f32 %v12460_v14, %v2312_v51  ;;  %v6398_v14 = vpop.f32.mrf.mxu1 }
 0x313   : > { %12457 = vst [vmem:[#allocation32_spill] sm:$0xff] %v10209_v28  ;;  %v2625_v25 = vmul.f32 1.442695, %v10209_v28 }
 0x314   : > { %5368 = vadd.xlane.f32.xlu0 %v5367_v18  ;;  %v10218_v18 = vsub.f32 %v12458_v34, %v2304_v10  ;;  %12461 = vst [vmem:[#allocation35_spill] sm:$0xff] %v10225_v60  ;;  %v2633_v11 = vmul.f32 1.442695, %v10225_v60  ;;  %v10232_v10 = vpop.xlane.xlu1 %6838  ;;  %v4380_v34 = vmul.f32 %v8241_v55, %v10179_v54  ;;  %v6399_v54 = vadd.f32 %v6398_v14, %v9108_v15 }
 0x315   : > { %8244 = vpow2.f32 %v2625_v25  ;;  %12463 = vst [vmem:[#allocation135_spill] sm:$0xff] %v10232_v10 }
 0x316   : > { %2859 = vperm.xlu1 %7993, %v8241_v55   ;;  %12459 = vst [vmem:[#allocation37_spill] sm:$0xff] %v10218_v18  ;;  %v6567_v41 = vmax.f32 %v6399_v54, 0.0 }
 0x318   : > { %v10237_v51 = vpop.permute.xlu1 %2766  ;;  %v6707_v53 = vmul.f32 %v9127_v36, %v6567_v41 }
 0x319   : > { %12464 = vst [vmem:[#allocation136_spill] sm:$0xff] %v10237_v51 }
 0x31a   : > { %4553 = vperm.xlu1 %7993, %v4374_v58   ;;  %v2629_v58 = vmul.f32 1.442695, %v10218_v18 }
 0x31c   : > { %8246 = vpow2.f32 %v2629_v58  ;;  %v10243_v13 = vpop.permute.xlu1 %2775  ;;  %v10252_v58 = vsub.f32 %v9549_v50, %v10175_v59  ;;  %v5350_v59 = vmul.f32 1.442695, %v10260_v22 }
 0x31d   : > { %8248 = vpow2.f32 %v2633_v11  ;;  %12465 = vst [vmem:[#allocation137_spill] sm:$0xff] %v10243_v13  ;;  %v6400_v11 = vpop.f32.mrf.mxu1 }
 0x31e   : > { %4559 = vperm.xlu1 %7993, %v4376_v43   ;;  %v5354_v10 = vmul.f32 1.442695, %v10252_v58  ;;  %v6401_v39 = vadd.f32 %v6400_v11, %v9117_v29 }
 0x31f   : > { %v6402_v52 = vpop.f32.mrf.mxu1 }
 0x320   : > { %8250 = vpow2.f32 %v5354_v10  ;;  %v6568_v2 = vmax.f32 %v6401_v39, 0.0 }
 0x321   : > { %8252 = vpow2.f32 %v5350_v59 }
 0x322   : > { %4565 = vperm.xlu1 %7993, %v4378_v35   ;;  %v10240_v25 = vpop.eup %8244  ;;  %v10254_v35 = vpop.permute.xlu1 %2781  ;;  %v6708_v14 = vmul.f32 %v9132_v24, %v6568_v2  ;;  %v2324_v2 = vrot.slane %v10187_v5, %v9096_v17 }
 0x323   : > { %12466 = vst [vmem:[#allocation138_spill] sm:$0xff] %v10254_v35 }
 0x324   : > { %v6885_v11 = vadd.f32 %v6708_v14, %v6707_v53  ;;  %v10305_v30 = vsub.f32 %v12476_v45, %v2324_v2 }
 0x326   : > { %4571 = vperm.xlu1 %7993, %v4380_v34   ;;  %v5315_v34 = vpop.xlane.xlu0 %5314  ;;  %v10267_v50 = vpop.permute.xlu1 %2787  ;;  %12477 = vst [vmem:[#allocation46_spill] sm:$0xff] %v10305_v30  ;;  %v2639_v45 = vmul.f32 1.442695, %v10305_v30 }
 0x327   : > { %v10265_v27 = vsub.f32 %v12467_v38, %v5315_v34  ;;  %12468 = vst [vmem:[#allocation45_spill] sm:$0xff] %v10267_v50 }
 0x329   : > { %v10245_v43 = vpop.eup %8246  ;;  %v5344_v1 = vmul.f32 1.442695, %v10265_v27 }
 0x32a   : > { %2838 = vperm.xlu0 %7992, %v10235_v8   ;;  %v10248_v55 = vpop.eup %8248  ;;  %v10270_v63 = vpop.xlane.xlu0 %5332 }
 0x32b   : > { %v10273_v23 = vpop.permute.xlu1 %4478  ;;  %8254 = vpow2.f32 %v5344_v1 }
 0x32c   : > { %12469 = vst [vmem:[#allocation139_spill] sm:$0xff] %v10273_v23  ;;  %8256 = vpow2.f32 %v2639_v45 }
 0x32d   : > { %v8251_v39 = vpop.eup %8250 }
 0x32e   : > { %2844 = vperm.xlu0 %7992, %v10240_v25   ;;  %v10277_v38 = vpop.xlane.xlu0 %5326  ;;  %v5376_v54 = vsel %vm5309_vm10, %v8251_v39, 0.0  ;;  %v8253_v19 = vpop.eup %8252  ;;  %v5476_v53 = vmul.f32 %v8251_v39, %v10252_v58 }
 0x32f   : > { %v10279_v10 = vpop.permute.xlu1 %4484  ;;  %v5370_v1 = vsel %vm5309_vm10, %v8253_v19, 0.0 }
 0x330   : > { %12470 = vst [vmem:[#allocation140_spill] sm:$0xff] %v10279_v10  ;;  %v5496_v39 = vsel %vm5309_vm10, %v5476_v53, 0.0  ;;  %v2348_v53 = vrot.slane %v10187_v5, %v9867_v33 }
 0x332   : > { %2850 = vperm.xlu0 %7992, %v10245_v43   ;;  %v10281_v34 = vpop.xlane.xlu0 %6811 }
 0x333   : > { %12471 = vst [vmem:[#allocation141_spill] sm:$0xff] %v10281_v34  ;;  %v10284_v59 = vpop.permute.xlu1 %4487 }
 0x334   : > { %12472 = vst [vmem:[#allocation142_spill] sm:$0xff] %v10284_v59 }
 0x336   : > { %2856 = vperm.xlu0 %7992, %v10248_v55   ;;  %v10286_v49 = vpop.xlane.xlu0 %6814 }
 0x337   : > { %12473 = vst [vmem:[#allocation143_spill] sm:$0xff] %v10286_v49  ;;  %v2332_v49 = vrot.slane %v10187_v5, %v9842_v57 }
 0x338   : > { %v10288_v41 = vpop.eup %8254 }
 0x339   : > { %v5361_v34 = vsel %vm5309_vm10, %v10288_v41, 0.0  ;;  %v10315_v62 = vsub.f32 %v12479_v48, %v2332_v49 }
 0x33a   : > { %v10294_v14 = vpop.xlane.xlu0 %6835 }
 0x33b   : > { %12474 = vst [vmem:[#allocation144_spill] sm:$0xff] %v10294_v14  ;;  %12480 = vst [vmem:[#allocation43_spill] sm:$0xff] %v10315_v62  ;;  %v2643_v3 = vmul.f32 1.442695, %v10315_v62 }
 0x33d   : > { %8258 = vpow2.f32 %v2643_v3 }
 0x33e   : > { %v10309_v14 = vpop.permute.xlu0 %2769 }
 0x33f   : > { %12478 = vst [vmem:[#allocation146_spill] sm:$0xff] %v10309_v14 }
 0x342   : > { %v10327_v48 = vpop.permute.xlu0 %2772 }
 0x343   : > { %12484 = vst [vmem:[#allocation148_spill] sm:$0xff] %v10327_v48 }
 0x34a   : > { %6886 = vadd.xlane.f32.xlu1 %v6885_v11  ;;  %v10296_v11 = vpop.permute.xlu1 %4493 }
 0x34b   : > { %12475 = vst [vmem:[#allocation145_spill] sm:$0xff] %v10296_v11  ;;  %v4373_v11 = vmul.f32 %v10235_v8, %v10202_v12  ;;  %v4377_v12 = vmul.f32 %v10245_v43, %v10218_v18 }
 0x34e   : > { %5377 = vadd.xlane.f32.xlu1 %v5376_v54  ;;  %v5473_v54 = vmul.f32 %v10193_v26, %v10167_v32  ;;  %v2340_v26 = vrot.slane %v10187_v5, %v9851_v21  ;;  %v10319_v2 = vpop.permute.xlu1 %4499  ;;  %v10335_v32 = vpop.permute.xlu0 %2778 }
 0x34f   : > { %12481 = vst [vmem:[#allocation147_spill] sm:$0xff] %v10319_v2  ;;  %12488 = vst [vmem:[#allocation150_spill] sm:$0xff] %v10335_v32 }
 0x350   : > { %v5487_v37 = vsel %vm5309_vm10, %v5473_v54, 0.0  ;;  %v12482_v54 = vld [vmem:[#allocation52_spill] sm:$0xff] }
 0x352   : > { %5371 = vadd.xlane.f32.xlu1 %v5370_v1  ;;  %v5474_v1 = vmul.f32 %v8253_v19, %v10260_v22  ;;  %v6404_v19 = vpop.f32.mrf.mxu1  ;;  %v10329_v49 = vpop.xlane.xlu1 %6856 }
 0x353   : > { %12485 = vst [vmem:[#allocation149_spill] sm:$0xff] %v10329_v49  ;;  %v10340_v42 = vpop.permute.xlu0 %2784  ;;  %v6403_v49 = vadd.f32 %v6402_v52, %v9108_v15 }
 0x354   : > { %12489 = vst [vmem:[#allocation151_spill] sm:$0xff] %v10340_v42 }
 0x355   : > { %5362 = vadd.xlane.f32.xlu0 %v5361_v34  ;;  %v5490_v34 = vsel %vm5309_vm10, %v5474_v1, 0.0  ;;  %v10332_v1 = vsub.f32 %v12486_v46, %v2348_v53  ;;  %v6405_v46 = vadd.f32 %v6404_v19, %v9117_v29  ;;  %v8257_v53 = vpop.eup %8256  ;;  %v6569_v50 = vmax.f32 %v6403_v49, 0.0 }
 0x356   : > { %5497 = vadd.xlane.f32.xlu1 %v5496_v39  ;;  %v10324_v39 = vsub.f32 %v12482_v54, %v2340_v26  ;;  %v10337_v56 = vpop.permute.xlu1 %2793  ;;  %v8259_v59 = vpop.eup %8258  ;;  %v4375_v19 = vmul.f32 %v10240_v25, %v10209_v28  ;;  %v4382_v32 = vmul.f32 %v8257_v53, %v10305_v30 }
 0x357   : > { %12487 = vst [vmem:[#allocation48_spill] sm:$0xff] %v10332_v1  ;;  %v2651_v45 = vmul.f32 1.442695, %v10332_v1  ;;  %v10348_v10 = vpop.permute.xlu0 %4481  ;;  %v6709_v42 = vmul.f32 %v9127_v36, %v6569_v50 }
 0x358   : > { %12483 = vst [vmem:[#allocation52_spill] sm:$0xff] %v10324_v39  ;;  %12490 = vst [vmem:[#allocation152_spill] sm:$0xff] %v10348_v10 }
 0x359   : > { %5488 = vadd.xlane.f32.xlu0 %v5487_v37  ;;  %v6408_v37 = vpop.f32.mrf.mxu1 }
 0x35a   : > { %5491 = vadd.xlane.f32.xlu1 %v5490_v34  ;;  %v2647_v34 = vmul.f32 1.442695, %v10324_v39  ;;  %v10344_v3 = vpop.permute.xlu1 %2799  ;;  %v6409_v8 = vadd.f32 %v6408_v37, %v9108_v15 }
 0x35b   : > { %v6410_v26 = vpop.f32.mrf.mxu1 }
 0x35c   : > { %8260 = vpow2.f32 %v2647_v34  ;;  %v6570_v34 = vmax.f32 %v6405_v46, 0.0  ;;  %v6411_v49 = vadd.f32 %v6410_v26, %v9117_v29  ;;  %v6571_v37 = vmax.f32 %v6409_v8, 0.0 }
 0x35d   : > { %v6412_v54 = vpop.f32.mrf.mxu1  ;;  %8262 = vpow2.f32 %v2651_v45 }
 0x35e   : > { %v10350_v45 = vpop.permute.xlu1 %2805  ;;  %v6710_v35 = vmul.f32 %v9132_v24, %v6570_v34  ;;  %v6413_v10 = vadd.f32 %v6412_v54, %v9108_v15 }
 0x35f   : > { %v6414_v2 = vpop.f32.mrf.mxu1 }
 0x360   : > { %v6415_v25 = vadd.f32 %v6414_v2, %v9117_v29  ;;  %v10364_v50 = vadd.f32 %v6710_v35, %v6709_v42  ;;  %v6573_v43 = vmax.f32 %v6413_v10, 0.0  ;;  %v4384_v42 = vmul.f32 %v8259_v59, %v10315_v62 }
 0x361   : > { %v6418_v52 = vpop.f32.mrf.mxu1 }
 0x362   : > { %v10366_v28 = vpop.permute.xlu1 %2811  ;;  %v6574_v18 = vmax.f32 %v6415_v25, 0.0  ;;  %v6419_v8 = vadd.f32 %v6418_v52, %v9108_v15  ;;  %v6713_v10 = vmul.f32 %v9127_v36, %v6573_v43 }
 0x363   : > { %v6420_v46 = vpop.f32.mrf.mxu1 }
 0x365   : > { %v6422_v26 = vpop.f32.mrf.mxu1 }
 0x366   : > { %v10374_v35 = vpop.permute.xlu1 %4505 }
 0x369   : > { %v8261_v23 = vpop.eup %8260 }
 0x36a   : > { %v8263_v34 = vpop.eup %8262  ;;  %v4386_v25 = vmul.f32 %v8261_v23, %v10324_v39  ;;  %v10391_v43 = vpop.permute.xlu1 %4511 }
 0x36b   : > { %2865 = vperm.xlu1 %7993, %v8257_v53   ;;  %v6714_v53 = vmul.f32 %v9132_v24, %v6574_v18 }
 0x36f   : > { %4550 = vperm.xlu0 %7992, %v4373_v11   ;;  %2871 = vperm.xlu1 %7993, %v8259_v59   ;;  %v10358_v11 = vpop.permute.xlu0 %4490 }
 0x370   : > { %12491 = vst [vmem:[#allocation153_spill] sm:$0xff] %v10358_v11  ;;  %v4379_v11 = vmul.f32 %v10248_v55, %v10225_v60  ;;  %v6421_v55 = vadd.f32 %v6420_v46, %v9117_v29  ;;  %v10389_v46 = vadd.f32 %v6714_v53, %v6713_v10  ;;  %v12498_v53 = vld [vmem:[#allocation50_spill] sm:$0xff]  ;;  %v2356_v60 = vrot.slane %v10204_v40, %v9096_v17 }
 0x372   : > { %12495 = vst [vmem:[#allocation157_spill] sm:$0xff] %v10389_v46 }
 0x373   : > { %4556 = vperm.xlu0 %7992, %v4375_v19   ;;  %2877 = vperm.xlu1 %7993, %v8261_v23   ;;  %v6572_v19 = vmax.f32 %v6411_v49, 0.0  ;;  %v10371_v54 = vpop.permute.xlu0 %4496  ;;  %v6424_v49 = vpop.f32.mrf.mxu1 }
 0x374   : > { %12492 = vst [vmem:[#allocation154_spill] sm:$0xff] %v10371_v54  ;;  %v12527_v54 = vld [vmem:[#allocation64_spill] sm:$0xff] }
 0x375   : > { %v6712_v2 = vmul.f32 %v9132_v24, %v6572_v19  ;;  %v6576_v19 = vmax.f32 %v6421_v55, 0.0  ;;  %v10404_v55 = vpop.permute.xlu1 %4517 }
 0x377   : > { %4562 = vperm.xlu0 %7992, %v4377_v12   ;;  %2883 = vperm.xlu1 %7993, %v8263_v34   ;;  %v6711_v12 = vmul.f32 %v9127_v36, %v6571_v37  ;;  %v10384_v59 = vpop.xlane.xlu0 %6859  ;;  %v6575_v37 = vmax.f32 %v6419_v8, 0.0  ;;  %v6716_v8 = vmul.f32 %v9132_v24, %v6576_v19 }
 0x378   : > { %12493 = vst [vmem:[#allocation155_spill] sm:$0xff] %v10384_v59 }
 0x379   : > { %v10387_v30 = vadd.f32 %v6712_v2, %v6711_v12  ;;  %v6715_v23 = vmul.f32 %v9127_v36, %v6575_v37 }
 0x37b   : > { %4568 = vperm.xlu0 %7992, %v4379_v11   ;;  %4577 = vperm.xlu1 %7993, %v4382_v32   ;;  %v6423_v11 = vadd.f32 %v6422_v26, %v9108_v15  ;;  %v6425_v32 = vadd.f32 %v6424_v49, %v9117_v29  ;;  %12494 = vst [vmem:[#allocation156_spill] sm:$0xff] %v10387_v30  ;;  %v10393_v18 = vpop.permute.xlu0 %2790  ;;  %v12496_v26 = vld [vmem:[#allocation49_spill] sm:$0xff]  ;;  %v12507_v30 = vld [vmem:[#allocation44_spill] sm:$0xff] }
 0x37c   : > { %v10397_v49 = vsub.f32 %v12496_v26, %v10270_v63 }
 0x37d   : > { %v6577_v62 = vmax.f32 %v6423_v11, 0.0  ;;  %v6578_v52 = vmax.f32 %v6425_v32, 0.0  ;;  %v10409_v11 = vsub.f32 %v12498_v53, %v10277_v38  ;;  %v5471_v38 = vmul.f32 %v10288_v41, %v10265_v27 }
 0x37e   : > { %12497 = vst [vmem:[#allocation49_spill] sm:$0xff] %v10397_v49  ;;  %v5356_v10 = vmul.f32 1.442695, %v10397_v49 }
 0x37f   : > { %4583 = vperm.xlu1 %7993, %v4384_v42   ;;  %v4388_v42 = vmul.f32 %v8263_v34, %v10332_v1  ;;  %v6717_v12 = vmul.f32 %v9127_v36, %v6577_v62  ;;  %v6718_v2 = vmul.f32 %v9132_v24, %v6578_v52  ;;  %12499 = vst [vmem:[#allocation50_spill] sm:$0xff] %v10409_v11  ;;  %v10411_v63 = vpop.permute.xlu0 %2796  ;;  %v5352_v62 = vmul.f32 1.442695, %v10409_v11  ;;  %v6428_v52 = vpop.f32.mrf.mxu1 }
 0x380   : > { %v10413_v34 = vadd.f32 %v6716_v8, %v6715_v23  ;;  %8264 = vpow2.f32 %v5356_v10  ;;  %v5481_v23 = vsel %vm5309_vm10, %v5471_v38, 0.0  ;;  %v6429_v10 = vadd.f32 %v6428_v52, %v9108_v15 }
 0x381   : > { %v10415_v32 = vadd.f32 %v6718_v2, %v6717_v12  ;;  %8266 = vpow2.f32 %v5352_v62 }
 0x382   : > { %12500 = vst [vmem:[#allocation158_spill] sm:$0xff] %v10413_v34  ;;  %v2364_v34 = vrot.slane %v10204_v40, %v9842_v57 }
 0x383   : > { %4589 = vperm.xlu1 %7993, %v4386_v25   ;;  %12501 = vst [vmem:[#allocation159_spill] sm:$0xff] %v10415_v32  ;;  %v10418_v25 = vpop.permute.xlu1 %4523  ;;  %v10420_v37 = vpop.permute.xlu0 %2802  ;;  %v6579_v32 = vmax.f32 %v6429_v10, 0.0  ;;  %v2320_v10 = vrot.slane %v10187_v5, %v9091_v4 }
 0x385   : > { %v6719_v52 = vmul.f32 %v9127_v36, %v6579_v32 }
 0x387   : > { %4595 = vperm.xlu1 %7993, %v4388_v42   ;;  %v10422_v19 = vpop.permute.xlu1 %2817  ;;  %v10424_v26 = vpop.permute.xlu0 %2808 }
 0x388   : > { %12502 = vst [vmem:[#allocation160_spill] sm:$0xff] %v10422_v19  ;;  %v6430_v42 = vpop.f32.mrf.mxu1 }
 0x389   : > { %v6431_v53 = vadd.f32 %v6430_v42, %v9117_v29 }
 0x38b   : > { %v10429_v12 = vpop.permute.xlu1 %2823  ;;  %v10431_v2 = vpop.permute.xlu0 %4502  ;;  %v6580_v1 = vmax.f32 %v6431_v53, 0.0 }
 0x38c   : > { %12503 = vst [vmem:[#allocation161_spill] sm:$0xff] %v10429_v12 }
 0x38d   : > { %v8265_v8 = vpop.eup %8264  ;;  %v6720_v42 = vmul.f32 %v9132_v24, %v6580_v1  ;;  %v2328_v1 = vrot.slane %v10187_v5, %v9848_v9 }
 0x38e   : > { %v5379_v62 = vsel %vm5309_vm10, %v8265_v8, 0.0  ;;  %v8267_v59 = vpop.eup %8266 }
 0x38f   : > { %v10436_v41 = vpop.permute.xlu1 %2829  ;;  %v10438_v39 = vpop.permute.xlu0 %4508  ;;  %v5373_v38 = vsel %vm5309_vm10, %v8267_v59, 0.0  ;;  %v6903_v32 = vadd.f32 %v6720_v42, %v6719_v52  ;;  %v2336_v52 = vrot.slane %v10187_v5, %v9864_v47  ;;  %v12511_v42 = vld [vmem:[#allocation41_spill] sm:$0xff] }
 0x390   : > { %12504 = vst [vmem:[#allocation162_spill] sm:$0xff] %v10436_v41 }
 0x393   : > { %v10455_v46 = vpop.permute.xlu1 %2835 }
 0x394   : > { %12506 = vst [vmem:[#allocation164_spill] sm:$0xff] %v10455_v46  ;;  %v2344_v46 = vrot.slane %v10187_v5, %v9885_v6 }
 0x39a   : > { %5482 = vadd.xlane.f32.xlu0 %v5481_v23  ;;  %v5477_v23 = vmul.f32 %v8265_v8, %v10397_v49  ;;  %v10453_v8 = vsub.f32 %v9644_v7, %v2356_v60  ;;  %v10462_v49 = vsub.f32 %v12507_v30, %v2320_v10  ;;  %v10468_v7 = vsub.f32 %v9656_v16, %v2364_v34 }
 0x39b   : > { %v10476_v30 = vsub.f32 %v12511_v42, %v2328_v1  ;;  %v2380_v16 = vrot.slane %v10204_v40, %v9867_v33 }
 0x39c   : > { %v5499_v53 = vsel %vm5309_vm10, %v5477_v23, 0.0  ;;  %12505 = vst [vmem:[#allocation163_spill] sm:$0xff] %v10453_v8  ;;  %12508 = vst [vmem:[#allocation44_spill] sm:$0xff] %v10462_v49  ;;  %v2372_v23 = vrot.slane %v10204_v40, %v9851_v21  ;;  %v2655_v60 = vmul.f32 1.442695, %v10453_v8 }
 0x39d   : > { %12509 = vst [vmem:[#allocation165_spill] sm:$0xff] %v10468_v7  ;;  %12512 = vst [vmem:[#allocation41_spill] sm:$0xff] %v10476_v30  ;;  %v2637_v10 = vmul.f32 1.442695, %v10462_v49  ;;  %v2641_v1 = vmul.f32 1.442695, %v10476_v30  ;;  %v10496_v41 = vsub.f32 %v9672_v61, %v2380_v16 }
 0x39e   : > { %5380 = vadd.xlane.f32.xlu0 %v5379_v62  ;;  %v5475_v62 = vmul.f32 %v8267_v59, %v10409_v11  ;;  %v10484_v34 = vsub.f32 %v9677_v0, %v2372_v23  ;;  %8268 = vpow2.f32 %v2655_v60 }
 0x39f   : > { %8270 = vpow2.f32 %v2637_v10  ;;  %12517 = vst [vmem:[#allocation169_spill] sm:$0xff] %v10496_v41  ;;  %v12520_v10 = vld [vmem:[#allocation47_spill] sm:$0xff]  ;;  %v2667_v5 = vmul.f32 1.442695, %v10496_v41 }
 0x3a0   : > { %v5493_v59 = vsel %vm5309_vm10, %v5475_v62, 0.0  ;;  %12513 = vst [vmem:[#allocation167_spill] sm:$0xff] %v10484_v34  ;;  %v2663_v0 = vmul.f32 1.442695, %v10484_v34 }
 0x3a2   : > { %5374 = vadd.xlane.f32.xlu0 %v5373_v38  ;;  %v10457_v38 = vpop.permute.xlu0 %4514 }
 0x3a6   : > { %5500 = vadd.xlane.f32.xlu0 %v5499_v53  ;;  %v10471_v53 = vpop.permute.xlu1 %4529  ;;  %v10479_v62 = vpop.permute.xlu0 %4520 }
 0x3a7   : > { %12510 = vst [vmem:[#allocation166_spill] sm:$0xff] %v10471_v53 }
 0x3aa   : > { %5494 = vadd.xlane.f32.xlu0 %v5493_v59  ;;  %v12514_v59 = vld [vmem:[#allocation51_spill] sm:$0xff]  ;;  %v10491_v42 = vpop.xlane.xlu0 %6862  ;;  %v10499_v23 = vpop.permute.xlu1 %4535 }
 0x3ab   : > { %6904 = vadd.xlane.f32.xlu1 %v6903_v32  ;;  %v2659_v32 = vmul.f32 1.442695, %v10468_v7  ;;  %v10488_v11 = vsub.f32 %v12514_v59, %v2336_v52  ;;  %12516 = vst [vmem:[#allocation168_spill] sm:$0xff] %v10491_v42  ;;  %12518 = vst [vmem:[#allocation170_spill] sm:$0xff] %v10499_v23  ;;  %v10505_v59 = vsub.f32 %v12520_v10, %v2344_v46  ;;  %v8176_v46 = vld [vmem:[%s8727_s21 + $0x1e0] ss:$8 sps:$4 sm:$0xff]  }
 0x3ad   : > { %12515 = vst [vmem:[#allocation51_spill] sm:$0xff] %v10488_v11  ;;  %8272 = vpow2.f32 %v2659_v32  ;;  %v2645_v60 = vmul.f32 1.442695, %v10488_v11  ;;  %12521 = vst [vmem:[#allocation47_spill] sm:$0xff] %v10505_v59  ;;  %v2649_v16 = vmul.f32 1.442695, %v10505_v59  ;;  %v8269_v32 = vpop.eup %8268 }
 0x3ae   : > { %8274 = vpow2.f32 %v2641_v1  ;;  %v10502_v52 = vpop.permute.xlu0 %2814  ;;  %v10508_v61 = vpop.permute.xlu1 %4541  ;;  %v8174_v1 = vld [vmem:[%s8727_s21 + $0x1e4] ss:$8 sps:$4 sm:$0xff]   ;;  %v4390_v48 = vmul.f32 %v8269_v32, %v10453_v8 }
 0x3af   : > { %12519 = vst [vmem:[#allocation171_spill] sm:$0xff] %v10502_v52  ;;  %8276 = vpow2.f32 %v2663_v0  ;;  %12522 = vst [vmem:[#allocation172_spill] sm:$0xff] %v10508_v61  ;;  %v8271_v23 = vpop.eup %8270  ;;  %6446 = vmatprep.mubr.bf16.mxu1 %v8174_v1 }
 0x3b0   : > { %8278 = vpow2.f32 %v2645_v60  ;;  %6447 = vmatmul.mubr.bf16.gmra.mxu1 %v8176_v46 }
 0x3b1   : > { %8280 = vpow2.f32 %v2667_v5  ;;  %v2388_v5 = vrot.slane %v10212_v20, %v9096_v17 }
 0x3b2   : > { %v10511_v42 = vpop.permute.xlu0 %2820  ;;  %8282 = vpow2.f32 %v2649_v16  ;;  %v10514_v53 = vpop.permute.xlu1 %4547 }
 0x3b3   : > { %12523 = vst [vmem:[#allocation173_spill] sm:$0xff] %v10511_v42  ;;  %12524 = vst [vmem:[#allocation174_spill] sm:$0xff] %v10514_v53  ;;  %v2396_v53 = vrot.slane %v10212_v20, %v9842_v57  ;;  %v10526_v1 = vsub.f32 %v12527_v54, %v2388_v5  ;;  %v2412_v54 = vrot.slane %v10212_v20, %v9867_v33  ;;  %v12533_v5 = vld [vmem:[#allocation69_spill] sm:$0xff] }
 0x3b5   : > { %12528 = vst [vmem:[#allocation64_spill] sm:$0xff] %v10526_v1  ;;  %v2671_v13 = vmul.f32 1.442695, %v10526_v1 }
 0x3b6   : > { %v10517_v0 = vpop.permute.xlu0 %2826  ;;  %v10521_v61 = vpop.xlane.xlu1 %6880 }
 0x3b7   : > { %12525 = vst [vmem:[#allocation175_spill] sm:$0xff] %v10517_v0  ;;  %12526 = vst [vmem:[#allocation176_spill] sm:$0xff] %v10521_v61  ;;  %v2404_v61 = vrot.slane %v10212_v20, %v9851_v21  ;;  %v12531_v0 = vld [vmem:[#allocation65_spill] sm:$0xff]  ;;  %8284 = vpow2.f32 %v2671_v13 }
 0x3b8   : > { %v10535_v52 = vsub.f32 %v12531_v0, %v2396_v53  ;;  %v4381_v0 = vmul.f32 %v8271_v23, %v10462_v49 }
 0x3ba   : > { %v8273_v10 = vpop.eup %8272  ;;  %v10528_v42 = vpop.permute.xlu0 %2832  ;;  %12532 = vst [vmem:[#allocation65_spill] sm:$0xff] %v10535_v52  ;;  %v2675_v14 = vmul.f32 1.442695, %v10535_v52 }
 0x3bb   : > { %v8275_v60 = vpop.eup %8274  ;;  %12529 = vst [vmem:[#allocation177_spill] sm:$0xff] %v10528_v42  ;;  %v10530_v46 = vpop.xlane.xlu1 %5365 }
 0x3bc   : > { %2889 = vperm.xlu1 %7993, %v8269_v32   ;;  %v8277_v12 = vpop.eup %8276  ;;  %12530 = vst [vmem:[#allocation178_spill] sm:$0xff] %v10530_v46  ;;  %v10542_v46 = vsub.f32 %v12533_v5, %v2404_v61  ;;  %v4392_v32 = vmul.f32 %v8273_v10, %v10468_v7  ;;  %8286 = vpow2.f32 %v2675_v14  ;;  %v4383_v13 = vmul.f32 %v8275_v60, %v10476_v30  ;;  %v8177_v14 = vld [vmem:[%s8727_s21 + $0x1f4] ss:$8 sps:$4 sm:$0xff]  }
 0x3bd   : > { %v8279_v16 = vpop.eup %8278  ;;  %v4394_v5 = vmul.f32 %v8277_v12, %v10484_v34  ;;  %6456 = vmatprep.mubr.bf16.mxu1 %v8177_v14 }
 0x3be   : > { %v8281_v19 = vpop.eup %8280  ;;  %12534 = vst [vmem:[#allocation69_spill] sm:$0xff] %v10542_v46  ;;  %v10544_v42 = vpop.permute.xlu0 %4526  ;;  %v2679_v61 = vmul.f32 1.442695, %v10542_v46 }
 0x3bf   : > { %v8283_v51 = vpop.eup %8282  ;;  %12535 = vst [vmem:[#allocation179_spill] sm:$0xff] %v10544_v42  ;;  %v10547_v53 = vpop.xlane.xlu1 %5359 }
 0x3c0   : > { %2862 = vperm.xlu0 %7992, %v8271_v23   ;;  %2895 = vperm.xlu1 %7993, %v8273_v10   ;;  %12536 = vst [vmem:[#allocation180_spill] sm:$0xff] %v10547_v53  ;;  %8288 = vpow2.f32 %v2679_v61  ;;  %v4385_v10 = vmul.f32 %v8279_v16, %v10488_v11 }
 0x3c2   : > { %v10557_v42 = vpop.permute.xlu0 %4532 }
 0x3c3   : > { %v10559_v53 = vpop.xlane.xlu1 %5485 }
 0x3c4   : > { %2868 = vperm.xlu0 %7992, %v8275_v60   ;;  %2901 = vperm.xlu1 %7993, %v8277_v12   ;;  %12539 = vst [vmem:[#allocation181_spill] sm:$0xff] %v10559_v53 }
 0x3c6   : > { %v10566_v60 = vpop.permute.xlu0 %4538 }
 0x3c7   : > { %v10568_v12 = vpop.xlane.xlu1 %5479 }
 0x3c8   : > { %2874 = vperm.xlu0 %7992, %v8279_v16   ;;  %2907 = vperm.xlu1 %7993, %v8281_v19   ;;  %12540 = vst [vmem:[#allocation182_spill] sm:$0xff] %v10568_v12  ;;  %v2436_v12 = vrot.slane %v10221_v44, %v9851_v21  ;;  %v12548_v21 = vld [vmem:[#allocation75_spill] sm:$0xff] }
 0x3ca   : > { %v10571_v16 = vpop.permute.xlu0 %4544 }
 0x3cc   : > { %2880 = vperm.xlu0 %7992, %v8283_v51   ;;  %4601 = vperm.xlu1 %7993, %v4390_v48   ;;  %v12537_v48 = vld [vmem:[#allocation68_spill] sm:$0xff] }
 0x3cd   : > { %v10552_v8 = vsub.f32 %v12537_v48, %v2412_v54  ;;  %v4396_v54 = vmul.f32 %v8281_v19, %v10496_v41  ;;  %v8285_v48 = vpop.eup %8284  ;;  %v10573_v19 = vpop.permute.xlu1 %2841  ;;  %v12545_v41 = vld [vmem:[#allocation73_spill] sm:$0xff] }
 0x3ce   : > { %v8287_v61 = vpop.eup %8286 }
 0x3cf   : > { %12538 = vst [vmem:[#allocation68_spill] sm:$0xff] %v10552_v8  ;;  %v2683_v23 = vmul.f32 1.442695, %v10552_v8 }
 0x3d0   : > { %4574 = vperm.xlu0 %7992, %v4381_v0   ;;  %4607 = vperm.xlu1 %7993, %v4392_v32   ;;  %v8179_v0 = vld [vmem:[%s8727_s21 + $0x1f0] ss:$8 sps:$4 sm:$0xff]   ;;  %v4387_v32 = vmul.f32 %v8283_v51, %v10505_v59  ;;  %v2428_v51 = vrot.slane %v10221_v44, %v9842_v57  ;;  %v4398_v59 = vmul.f32 %v8285_v48, %v10526_v1 }
 0x3d1   : > { %8290 = vpow2.f32 %v2683_v23  ;;  %6457 = vmatmul.mubr.bf16.gmra.mxu1 %v8179_v0  ;;  %v12542_v23 = vld [vmem:[#allocation72_spill] sm:$0xff]  ;;  %v10584_v14 = vpop.permute.xlu1 %2847  ;;  %v6432_v0 = vpop.f32.mrf.mxu1  ;;  %v12550_v57 = vld [vmem:[#allocation77_spill] sm:$0xff] }
 0x3d2   : > { %v10591_v34 = vsub.f32 %v12545_v41, %v2428_v51  ;;  %v6433_v30 = vadd.f32 %v6432_v0, %v9108_v15  ;;  %v10604_v41 = vsub.f32 %v12548_v21, %v2436_v12 }
 0x3d3   : > { %v6434_v7 = vpop.f32.mrf.mxu1 }
 0x3d4   : > { %4580 = vperm.xlu0 %7992, %v4383_v13   ;;  %4613 = vperm.xlu1 %7993, %v4394_v5   ;;  %v2420_v13 = vrot.slane %v10221_v44, %v9096_v17  ;;  %v8289_v5 = vpop.eup %8288  ;;  %12546 = vst [vmem:[#allocation73_spill] sm:$0xff] %v10591_v34  ;;  %v6435_v49 = vadd.f32 %v6434_v7, %v9117_v29  ;;  %12549 = vst [vmem:[#allocation75_spill] sm:$0xff] %v10604_v41  ;;  %v2691_v51 = vmul.f32 1.442695, %v10591_v34 }
 0x3d5   : > { %v6581_v1 = vmax.f32 %v6433_v30, 0.0  ;;  %v4402_v7 = vmul.f32 %v8289_v5, %v10542_v46  ;;  %v2352_v30 = vrot.slane %v10204_v40, %v9091_v4 }
 0x3d7   : > { %v6721_v12 = vmul.f32 %v9127_v36, %v6581_v1  ;;  %v2360_v1 = vrot.slane %v10204_v40, %v9848_v9 }
 0x3d8   : > { %4586 = vperm.xlu0 %7992, %v4385_v10   ;;  %4619 = vperm.xlu1 %7993, %v4396_v54   ;;  %v10577_v10 = vpop.xlane.xlu0 %6883  ;;  %v10582_v54 = vsub.f32 %v12542_v23, %v2420_v13  ;;  %v10595_v13 = vpop.permute.xlu1 %2853  ;;  %v2444_v23 = vrot.slane %v10221_v44, %v9867_v33  ;;  %v2695_v33 = vmul.f32 1.442695, %v10604_v41 }
 0x3d9   : > { %12541 = vst [vmem:[#allocation183_spill] sm:$0xff] %v10577_v10  ;;  %12547 = vst [vmem:[#allocation185_spill] sm:$0xff] %v10595_v13 }
 0x3da   : > { %12543 = vst [vmem:[#allocation72_spill] sm:$0xff] %v10582_v54  ;;  %v2687_v10 = vmul.f32 1.442695, %v10582_v54  ;;  %v10609_v17 = vsub.f32 %v12550_v57, %v2444_v23 }
 0x3dc   : > { %4592 = vperm.xlu0 %7992, %v4387_v32   ;;  %2913 = vperm.xlu1 %7993, %v8285_v48   ;;  %v10586_v53 = vpop.xlane.xlu0 %5368  ;;  %8292 = vpow2.f32 %v2687_v10  ;;  %v4400_v48 = vmul.f32 %v8287_v61, %v10535_v52  ;;  %12551 = vst [vmem:[#allocation77_spill] sm:$0xff] %v10609_v17  ;;  %v10612_v0 = vpop.permute.xlu1 %2859 }
 0x3dd   : > { %12544 = vst [vmem:[#allocation184_spill] sm:$0xff] %v10586_v53  ;;  %8294 = vpow2.f32 %v2691_v51  ;;  %12552 = vst [vmem:[#allocation186_spill] sm:$0xff] %v10612_v0 }
 0x3de   : > { %v8291_v32 = vpop.eup %8290  ;;  %8296 = vpow2.f32 %v2695_v33 }
 0x3df   : > { %v4404_v57 = vmul.f32 %v8291_v32, %v10552_v8 }
 0x3e0   : > { %2919 = vperm.xlu1 %7993, %v8287_v61   ;;  %v10599_v11 = vpop.permute.xlu0 %2838  ;;  %v10623_v10 = vpop.permute.xlu1 %4553 }
 0x3e4   : > { %2925 = vperm.xlu1 %7993, %v8289_v5   ;;  %v10615_v21 = vpop.permute.xlu0 %2844 }
 0x3e8   : > { %2931 = vperm.xlu1 %7993, %v8291_v32   ;;  %v10625_v23 = vpop.permute.xlu0 %2850  ;;  %v10632_v32 = vpop.permute.xlu1 %4559 }
 0x3e9   : > { %v8293_v51 = vpop.eup %8292 }
 0x3ec   : > { %4625 = vperm.xlu1 %7993, %v4398_v59   ;;  %v6582_v59 = vmax.f32 %v6435_v49, 0.0  ;;  %v2699_v49 = vmul.f32 1.442695, %v10609_v17  ;;  %v10650_v0 = vpop.permute.xlu1 %4565 }
 0x3ed   : > { %12559 = vst [vmem:[#allocation187_spill] sm:$0xff] %v10650_v0 }
 0x3ee   : > { %v6722_v61 = vmul.f32 %v9132_v24, %v6582_v59  ;;  %8298 = vpow2.f32 %v2699_v49  ;;  %v8295_v59 = vpop.eup %8294 }
 0x3ef   : > { %v8297_v49 = vpop.eup %8296 }
 0x3f0   : > { %4631 = vperm.xlu1 %7993, %v4400_v48   ;;  %v6906_v5 = vadd.f32 %v6722_v61, %v6721_v12  ;;  %v12553_v48 = vld [vmem:[#allocation55_spill] sm:$0xff]  ;;  %v10640_v61 = vpop.permute.xlu0 %2856 }
 0x3f1   : > { %v10630_v33 = vsub.f32 %v12553_v48, %v2352_v30  ;;  %12554 = vst [vmem:[#allocation55_spill] sm:$0xff] %v10632_v32  ;;  %v2376_v30 = vrot.slane %v10204_v40, %v9885_v6 }
 0x3f3   : > { %v2653_v12 = vmul.f32 1.442695, %v10630_v33 }
 0x3f4   : > { %4637 = vperm.xlu1 %7993, %v4402_v7   ;;  %v2368_v7 = vrot.slane %v10204_v40, %v9864_v47  ;;  %v10648_v52 = vpop.xlane.xlu0 %5362 }
 0x3f5   : > { %8300 = vpow2.f32 %v2653_v12  ;;  %v4406_v12 = vmul.f32 %v8293_v51, %v10582_v54  ;;  %v12571_v54 = vld [vmem:[#allocation25_spill] sm:$0xff] }
 0x3f8   : > { %4643 = vperm.xlu1 %7993, %v4404_v57   ;;  %v12555_v57 = vld [vmem:[#allocation57_spill] sm:$0xff]  ;;  %v10656_v40 = vpop.xlane.xlu0 %5488 }
 0x3f9   : > { %v10637_v8 = vsub.f32 %v12555_v57, %v2360_v1  ;;  %12556 = vst [vmem:[#allocation57_spill] sm:$0xff] %v10640_v61  ;;  %v12560_v57 = vld [vmem:[#allocation61_spill] sm:$0xff] }
 0x3fa   : > { %v10653_v32 = vsub.f32 %v12560_v57, %v2376_v30  ;;  %12561 = vst [vmem:[#allocation61_spill] sm:$0xff] %v10656_v40  ;;  %v4408_v30 = vmul.f32 %v8295_v59, %v10591_v34  ;;  %v4410_v57 = vmul.f32 %v8297_v49, %v10604_v41 }
 0x3fb   : > { %6907 = vadd.xlane.f32.xlu0 %v6906_v5  ;;  %v12557_v5 = vld [vmem:[#allocation60_spill] sm:$0xff]  ;;  %v2657_v46 = vmul.f32 1.442695, %v10637_v8  ;;  %v8299_v1 = vpop.eup %8298 }
 0x3fc   : > { %2937 = vperm.xlu1 %7993, %v8293_v51   ;;  %v10645_v48 = vsub.f32 %v12557_v5, %v2368_v7  ;;  %12558 = vst [vmem:[#allocation60_spill] sm:$0xff] %v10648_v52  ;;  %v10658_v7 = vpop.permute.xlu1 %4571  ;;  %v2665_v5 = vmul.f32 1.442695, %v10653_v32  ;;  %v10662_v0 = vpop.permute.xlu0 %4550 }
 0x3fd   : > { %8302 = vpow2.f32 %v2657_v46  ;;  %12562 = vst [vmem:[#allocation188_spill] sm:$0xff] %v10658_v7 }
 0x3fe   : > { %v2661_v13 = vmul.f32 1.442695, %v10645_v48 }
 0x400   : > { %2943 = vperm.xlu1 %7993, %v8295_v59   ;;  %8304 = vpow2.f32 %v2661_v13  ;;  %v10664_v61 = vpop.xlane.xlu1 %6886  ;;  %v10668_v40 = vpop.permute.xlu0 %4556  ;;  %v4412_v13 = vmul.f32 %v8299_v1, %v10609_v17 }
 0x401   : > { %12563 = vst [vmem:[#allocation189_spill] sm:$0xff] %v10664_v61  ;;  %8306 = vpow2.f32 %v2665_v5 }
 0x402   : > { %v8301_v46 = vpop.eup %8300  ;;  %8308 = vlog2.f32 %v10648_v52 }
 0x404   : > { %2949 = vperm.xlu1 %7993, %v8297_v49   ;;  %v10670_v51 = vpop.xlane.xlu1 %5377  ;;  %v10673_v61 = vpop.permute.xlu0 %4562  ;;  %v4389_v49 = vmul.f32 %v8301_v46, %v10630_v33 }
 0x405   : > { %12564 = vst [vmem:[#allocation190_spill] sm:$0xff] %v10670_v51  ;;  %12565 = vst [vmem:[#allocation191_spill] sm:$0xff] %v10673_v61  ;;  %v2996_v61 = vrot.slane %v10337_v56, %v12571_v54  ;;  %v3000_v56 = vrot.slane %v10411_v63, %v12571_v54  ;;  %v4712_v63 = vrot.slane %v10438_v39, %v12571_v54  ;;  %8310 = vlog2.f32 %v10670_v51 }
 0x406   : > { %v3016_v39 = vrot.slane %v10424_v26, %v12571_v54  ;;  %v4728_v26 = vrot.slane %v10479_v62, %v12571_v54 }
 0x408   : > { %2955 = vperm.xlu1 %7993, %v8299_v1   ;;  %v10675_v59 = vpop.xlane.xlu1 %5371 }
 0x409   : > { %12566 = vst [vmem:[#allocation192_spill] sm:$0xff] %v10675_v59  ;;  %8312 = vlog2.f32 %v10675_v59 }
 0x40a   : > { %v8303_v7 = vpop.eup %8302 }
 0x40b   : > { %v4391_v1 = vmul.f32 %v8303_v7, %v10637_v8 }
 0x40c   : > { %4649 = vperm.xlu1 %7993, %v4406_v12   ;;  %v10680_v41 = vpop.xlane.xlu1 %5497 }
 0x40d   : > { %v8305_v12 = vpop.eup %8304  ;;  %12567 = vst [vmem:[#allocation193_spill] sm:$0xff] %v10680_v41 }
 0x40e   : > { %v8307_v5 = vpop.eup %8306  ;;  %v4393_v34 = vmul.f32 %v8305_v12, %v10645_v48 }
 0x410   : > { %4655 = vperm.xlu1 %7993, %v4408_v30   ;;  %v10677_v30 = vpop.permute.xlu0 %4568 }
 0x411   : > { %2886 = vperm.xlu0 %7992, %v8301_v46   ;;  %v2992_v46 = vrot.slane %v10393_v18, %v12571_v54  ;;  %v4704_v18 = vrot.slane %v10431_v2, %v12571_v54 }
 0x414   : > { %4661 = vperm.xlu1 %7993, %v4410_v57  }
 0x415   : > { %2892 = vperm.xlu0 %7992, %v8303_v7   ;;  %v3220_v7 = vsel %vm2085_vm2, %v2996_v61, %v2992_v46  ;;  %v3012_v61 = vrot.slane %v10350_v45, %v12571_v54  ;;  %v3008_v46 = vrot.slane %v10420_v37, %v12571_v54  ;;  %v4724_v37 = vrot.slane %v10404_v55, %v12571_v54 }
 0x418   : > { %4667 = vperm.xlu1 %7993, %v4412_v13   ;;  %v10685_v13 = vpop.xlane.xlu1 %5491 }
 0x419   : > { %2898 = vperm.xlu0 %7992, %v8305_v12   ;;  %12569 = vst [vmem:[#allocation195_spill] sm:$0xff] %v10685_v13  ;;  %v12608_v13 = vld [vmem:[#allocation142_spill] sm:$0xff] }
 0x41a   : > { %v4684_v52 = vrot.slane %v12608_v13, %v12571_v54  ;;  %v12611_v13 = vld [vmem:[#allocation171_spill] sm:$0xff] }
 0x41c   : > { %v2866_v12 = vpop.permute.xlu1 %2865 }
 0x41d   : > { %2904 = vperm.xlu0 %7992, %v8307_v5  }
 0x420   : > { %v2872_v2 = vpop.permute.xlu1 %2871 }
 0x421   : > { %4598 = vperm.xlu0 %7992, %v4389_v49   ;;  %v4395_v49 = vmul.f32 %v8307_v5, %v10653_v32 }
 0x423   : > { %v10682_v57 = vpop.xlane.xlu0 %5482 }
 0x424   : > { %12568 = vst [vmem:[#allocation194_spill] sm:$0xff] %v10682_v57  ;;  %v4708_v57 = vrot.slane %v10374_v35, %v12571_v54  ;;  %v4716_v35 = vrot.slane %v10391_v43, %v12571_v54 }
 0x425   : > { %4604 = vperm.xlu0 %7992, %v4391_v1   ;;  %v3004_v1 = vrot.slane %v10344_v3, %v12571_v54 }
 0x426   : > { %v4932_v3 = vsel %vm2085_vm2, %v4708_v57, %v4704_v18  ;;  %v3020_v57 = vrot.slane %v10366_v28, %v12571_v54  ;;  %v4732_v28 = vrot.slane %v10418_v25, %v12571_v54 }
 0x427   : > { %v10687_v17 = vpop.xlane.xlu0 %5380 }
 0x428   : > { %12570 = vst [vmem:[#allocation196_spill] sm:$0xff] %v10687_v17 }
 0x429   : > { %4610 = vperm.xlu0 %7992, %v4393_v34   ;;  %v3221_v34 = vsel %vm2087_vm3, %v3000_v56, %v3220_v7  ;;  %v4720_v56 = vrot.slane %v10457_v38, %v12571_v54 }
 0x42a   : > { %v3222_v5 = vsel %vm2089_vm4, %v3004_v1, %v3221_v34  ;;  %v4933_v1 = vsel %vm2087_vm3, %v4712_v63, %v4932_v3  ;;  %v2878_v3 = vpop.permute.xlu1 %2877 }
 0x42b   : > { %v10694_v41 = vpop.xlane.xlu0 %5374  ;;  %v3223_v7 = vsel %vm2091_vm5, %v3008_v46, %v3222_v5  ;;  %v4934_v43 = vsel %vm2089_vm4, %v4716_v35, %v4933_v1  ;;  %v6438_v35 = vpop.f32.mrf.mxu1 }
 0x42c   : > { %12572 = vst [vmem:[#allocation25_spill] sm:$0xff] %v10694_v41  ;;  %v3224_v45 = vsel %vm2093_vm6, %v3012_v61, %v3223_v7  ;;  %v4935_v18 = vsel %vm2091_vm5, %v4720_v56, %v4934_v43  ;;  %v6439_v25 = vadd.f32 %v6438_v35, %v9108_v15 }
 0x42d   : > { %4616 = vperm.xlu0 %7992, %v4395_v49   ;;  %v3225_v5 = vsel %vm2095_vm7, %v3016_v39, %v3224_v45  ;;  %v4936_v61 = vsel %vm2093_vm6, %v4724_v37, %v4935_v18  ;;  %v6440_v45 = vpop.f32.mrf.mxu1  ;;  %v3092_v37 = vrot.slane %v2866_v12, %v12571_v54 }
 0x42e   : > { %v3226_v55 = vsel %vm2097_vm8, %v3020_v57, %v3225_v5  ;;  %v4937_v63 = vsel %vm2095_vm7, %v4728_v26, %v4936_v61  ;;  %v2884_v43 = vpop.permute.xlu1 %2883  ;;  %v6441_v57 = vadd.f32 %v6440_v45, %v9117_v29  ;;  %v6583_v5 = vmax.f32 %v6439_v25, 0.0 }
 0x42f   : > { %v10717_v49 = vpop.xlane.xlu0 %5500  ;;  %v3280_v38 = vsel %vm2156_vm9, %v3226_v55, 0.0  ;;  %v4938_v7 = vsel %vm2097_vm8, %v4732_v28, %v4937_v63  ;;  %v3100_v55 = vrot.slane %v2872_v2, %v12571_v54  ;;  %v3108_v45 = vrot.slane %v2878_v3, %v12571_v54 }
 0x430   : > { %12573 = vst [vmem:[#allocation197_spill] sm:$0xff] %v10717_v49  ;;  %v4992_v39 = vsel %vm2156_vm9, %v4938_v7, 0.0  ;;  %v6584_v61 = vmax.f32 %v6441_v57, 0.0  ;;  %v6723_v63 = vmul.f32 %v9127_v36, %v6583_v5  ;;  %v2384_v2 = vrot.slane %v10212_v20, %v9091_v4 }
 0x431   : > { %v2392_v3 = vrot.slane %v10212_v20, %v9848_v9 }
 0x432   : > { %v4578_v35 = vpop.permute.xlu1 %4577  ;;  %v6724_v7 = vmul.f32 %v9132_v24, %v6584_v61 }
 0x433   : > { %v10732_v34 = vpop.xlane.xlu0 %5494 }
 0x434   : > { %12574 = vst [vmem:[#allocation198_spill] sm:$0xff] %v10732_v34 }
 0x43b   : > { %v2863_v46 = vpop.permute.xlu0 %2862 }
 0x43c   : > { %3281 = vadd.xlane.f32.xlu1 %v3280_v38  ;;  %v3088_v1 = vrot.slane %v2863_v46, %v12571_v54  ;;  %v12575_v38 = vld [vmem:[#allocation53_spill] sm:$0xff] }
 0x43e   : > { %v3241_v18 = vsel %vm2085_vm2, %v3092_v37, %v3088_v1  ;;  %v3116_v37 = vrot.slane %v2884_v43, %v12571_v54 }
 0x43f   : > { %v2869_v62 = vpop.permute.xlu0 %2868 }
 0x440   : > { %v3096_v56 = vrot.slane %v2869_v62, %v12571_v54  ;;  %4993 = vadd.xlane.f32.xlu1 %v4992_v39  ;;  %v4584_v39 = vpop.permute.xlu1 %4583 }
 0x442   : > { %v3242_v28 = vsel %vm2087_vm3, %v3096_v56, %v3241_v18  ;;  %v6909_v56 = vadd.f32 %v6724_v7, %v6723_v63  ;;  %v12577_v63 = vld [vmem:[#allocation63_spill] sm:$0xff] }
 0x443   : > { %v2875_v26 = vpop.permute.xlu0 %2874  ;;  %v3243_v12 = vsel %vm2089_vm4, %v3100_v55, %v3242_v28  ;;  %v12576_v28 = vld [vmem:[#allocation62_spill] sm:$0xff]  ;;  %v10781_v7 = vsub.f32 %v12577_v63, %v2392_v3  ;;  %v12580_v63 = vld [vmem:[#allocation67_spill] sm:$0xff] }
 0x444   : > { %v3104_v46 = vrot.slane %v2875_v26, %v12571_v54  ;;  %6793 = vadd.xlane.f32.xlu1 %v12575_v38  ;;  %v10772_v55 = vsub.f32 %v12576_v28, %v2384_v2 }
 0x446   : > { %v3244_v1 = vsel %vm2091_vm5, %v3104_v46, %v3243_v12  ;;  %v4804_v46 = vrot.slane %v4578_v35, %v12571_v54  ;;  %v2400_v12 = vrot.slane %v10212_v20, %v9864_v47  ;;  %v2408_v35 = vrot.slane %v10212_v20, %v9885_v6 }
 0x447   : > { %v2881_v25 = vpop.permute.xlu0 %2880  ;;  %v3245_v62 = vsel %vm2093_vm6, %v3108_v45, %v3244_v1  ;;  %v2669_v1 = vmul.f32 1.442695, %v10772_v55  ;;  %v4590_v45 = vpop.permute.xlu1 %4589 }
 0x448   : > { %v3112_v57 = vrot.slane %v2881_v25, %v12571_v54  ;;  %v4820_v20 = vrot.slane %v4590_v45, %v12571_v54 }
 0x449   : > { %8314 = vpow2.f32 %v2669_v1 }
 0x44a   : > { %v3246_v18 = vsel %vm2095_vm7, %v3112_v57, %v3245_v62  ;;  %v8309_v57 = vpop.eup %8308  ;;  %v4812_v62 = vrot.slane %v4584_v39, %v12571_v54 }
 0x44b   : > { %v4575_v5 = vpop.permute.xlu0 %4574  ;;  %v3247_v61 = vsel %vm2097_vm8, %v3116_v37, %v3246_v18  ;;  %v12578_v18 = vld [vmem:[#allocation66_spill] sm:$0xff]  ;;  %v10795_v28 = vmul.f32 0.6931472, %v8309_v57 }
 0x44c   : > { %6910 = vadd.xlane.f32.xlu0 %v6909_v56  ;;  %v3289_v26 = vsel %vm2156_vm9, %v3247_v61, 0.0  ;;  %v4800_v43 = vrot.slane %v4575_v5, %v12571_v54  ;;  %v10791_v5 = vsub.f32 %v12578_v18, %v2400_v12  ;;  %v2673_v61 = vmul.f32 1.442695, %v10781_v7  ;;  %v12582_v18 = vld [vmem:[#allocation19_spill] sm:$0xff] }
 0x44d   : > { %3290 = vadd.xlane.f32.xlu1 %v3289_v26  ;;  %12579 = vst [vmem:[#allocation53_spill] sm:$0xff] %v10795_v28 }
 0x44e   : > { %v4953_v2 = vsel %vm2085_vm2, %v4804_v46, %v4800_v43  ;;  %v8311_v43 = vpop.eup %8310  ;;  %v4596_v46 = vpop.permute.xlu1 %4595  ;;  %8316 = vpow2.f32 %v2673_v61  ;;  %v2677_v12 = vmul.f32 1.442695, %v10791_v5  ;;  %v12583_v61 = vld [vmem:[#allocation24_spill] sm:$0xff] }
 0x44f   : > { %v4581_v38 = vpop.permute.xlu0 %4580  ;;  %v4828_v57 = vrot.slane %v4596_v46, %v12571_v54  ;;  %vm5423_vm11 = vcmp.eq.s32.totalorder %v12583_v61, %v12582_v18 }
 0x450   : > { %v4808_v25 = vrot.slane %v4581_v38, %v12571_v54  ;;  %8318 = vpow2.f32 %v2677_v12 }
 0x452   : > { %v4954_v37 = vsel %vm2087_vm3, %v4808_v25, %v4953_v2  ;;  %v10801_v25 = vsub.f32 %v12580_v63, %v2408_v35  ;;  %v10805_v2 = vmul.f32 0.6931472, %v8311_v43 }
 0x453   : > { %v4587_v56 = vpop.permute.xlu0 %4586  ;;  %v4955_v26 = vsel %vm2089_vm4, %v4812_v62, %v4954_v37  ;;  %v5431_v62 = vsub.f32 %v10265_v27, %v10795_v28  ;;  %v12607_v28 = vld [vmem:[#allocation151_spill] sm:$0xff] }
 0x454   : > { %v4816_v3 = vrot.slane %v4587_v56, %v12571_v54  ;;  %12581 = vst [vmem:[#allocation62_spill] sm:$0xff] %v10805_v2  ;;  %v8313_v56 = vpop.eup %8312  ;;  %v5436_v27 = vsub.f32 %v10252_v58, %v10805_v2 }
 0x455   : > { %v10817_v43 = vmul.f32 0.6931472, %v8313_v56  ;;  %v5439_v46 = vsel %vm5423_vm11, %v5431_v62, 0.0  ;;  %v2416_v62 = vrot.slane %v10221_v44, %v9091_v4 }
 0x456   : > { %v4956_v38 = vsel %vm2091_vm5, %v4816_v3, %v4955_v26  ;;  %v2681_v3 = vmul.f32 1.442695, %v10801_v25 }
 0x457   : > { %v4593_v39 = vpop.permute.xlu0 %4592  ;;  %v4957_v37 = vsel %vm2093_vm6, %v4820_v20, %v4956_v38  ;;  %12584 = vst [vmem:[#allocation63_spill] sm:$0xff] %v10817_v43  ;;  %v12585_v38 = vld [vmem:[#allocation23_spill] sm:$0xff]  ;;  %v5449_v20 = vsel %vm5309_vm10, %v5439_v46, 0.0  ;;  %v5434_v12 = vsub.f32 %v10260_v22, %v10817_v43  ;;  %v2424_v22 = vrot.slane %v10221_v44, %v9848_v9 }
 0x458   : > { %v4824_v1 = vrot.slane %v4593_v39, %v12571_v54  ;;  %vm5428_vm12 = vcmp.eq.s32.totalorder %v12583_v61, %v12585_v38  ;;  %8320 = vpow2.f32 %v2681_v3  ;;  %v8315_v39 = vpop.eup %8314  ;;  %v12588_v46 = vld [vmem:[#allocation71_spill] sm:$0xff]  ;;  %v2984_v43 = vrot.slane %v12607_v28, %v12571_v54  ;;  %v12610_v28 = vld [vmem:[#allocation145_spill] sm:$0xff] }
 0x459   : > { %v5444_v63 = vsel %vm5428_vm12, %v5436_v27, 0.0  ;;  %v10841_v27 = vsub.f32 %v12588_v46, %v2424_v22  ;;  %v10862_v46 = vpop.xlane.xlu1 %6904 }
 0x45a   : > { %v4958_v45 = vsel %vm2095_vm7, %v4824_v1, %v4957_v37  ;;  %v12586_v1 = vld [vmem:[#allocation21_spill] sm:$0xff]  ;;  %12596 = vst [vmem:[#allocation24_spill] sm:$0xff] %v10862_v46 }
 0x45b   : > { %v4959_v35 = vsel %vm2097_vm8, %v4828_v57, %v4958_v45  ;;  %vm5426_vm13 = vcmp.eq.s32.totalorder %v12583_v61, %v12586_v1  ;;  %v5464_v57 = vsel %vm5309_vm10, %v5444_v63, 0.0  ;;  %v8317_v37 = vpop.eup %8316  ;;  %12589 = vst [vmem:[#allocation66_spill] sm:$0xff] %v10841_v27  ;;  %v2440_v63 = vrot.slane %v10221_v44, %v9885_v6 }
 0x45c   : > { %v5001_v26 = vsel %vm2156_vm9, %v4959_v35, 0.0  ;;  %v5442_v58 = vsel %vm5426_vm13, %v5434_v12, 0.0  ;;  %v12587_v35 = vld [vmem:[#allocation70_spill] sm:$0xff] }
 0x45d   : > { %5002 = vadd.xlane.f32.xlu1 %v5001_v26  ;;  %v5458_v56 = vsel %vm5309_vm10, %v5442_v58, 0.0  ;;  %v8319_v45 = vpop.eup %8318  ;;  %v10835_v18 = vsub.f32 %v12587_v35, %v2416_v62  ;;  %v2432_v26 = vrot.slane %v10221_v44, %v9864_v47  ;;  %v12590_v12 = vld [vmem:[#allocation74_spill] sm:$0xff]  ;;  %v12593_v62 = vld [vmem:[#allocation76_spill] sm:$0xff]  ;;  %v12595_v44 = vld [vmem:[#allocation79_spill] sm:$0xff] }
 0x45e   : > { %v12592_v58 = vld [vmem:[#allocation26_spill] sm:$0xff] }
 0x45f   : > { %v2685_v38 = vmul.f32 1.442695, %v10835_v18  ;;  %v10849_v1 = vsub.f32 %v12590_v12, %v2432_v26 }
 0x461   : > { %5450 = vadd.xlane.f32.xlu1 %v5449_v20  ;;  %v4397_v20 = vmul.f32 %v8315_v39, %v10772_v55  ;;  %12591 = vst [vmem:[#allocation67_spill] sm:$0xff] %v10849_v1  ;;  %8322 = vpow2.f32 %v2685_v38 }
 0x462   : > { %2910 = vperm.xlu0 %7992, %v8315_v39   ;;  %v4401_v39 = vmul.f32 %v8319_v45, %v10791_v5 }
 0x465   : > { %5465 = vadd.xlane.f32.xlu1 %v5464_v57  ;;  %v8321_v3 = vpop.eup %8320  ;;  %v4399_v57 = vmul.f32 %v8317_v37, %v10781_v7 }
 0x466   : > { %2916 = vperm.xlu0 %7992, %v8317_v37   ;;  %v4403_v35 = vmul.f32 %v8321_v3, %v10801_v25 }
 0x469   : > { %5459 = vadd.xlane.f32.xlu1 %v5458_v56  ;;  %v10855_v56 = vsub.f32 %v12593_v62, %v2440_v63 }
 0x46a   : > { %2922 = vperm.xlu0 %7992, %v8319_v45   ;;  %v10864_v45 = vpop.permute.xlu1 %2889 }
 0x46b   : > { %12594 = vst [vmem:[#allocation19_spill] sm:$0xff] %v10855_v56  ;;  %v2697_v22 = vmul.f32 1.442695, %v10855_v56 }
 0x46d   : > { %6841 = vadd.xlane.f32.xlu1 %v9905_v31  ;;  %v2689_v31 = vmul.f32 1.442695, %v10841_v27 }
 0x46e   : > { %2928 = vperm.xlu0 %7992, %v8321_v3   ;;  %v8323_v37 = vpop.eup %8322  ;;  %v10867_v12 = vpop.permute.xlu1 %2895 }
 0x46f   : > { %8324 = vpow2.f32 %v2689_v31  ;;  %v4405_v63 = vmul.f32 %v8323_v37, %v10835_v18 }
 0x471   : > { %6889 = vadd.xlane.f32.xlu1 %v10364_v50  ;;  %v2693_v50 = vmul.f32 1.442695, %v10849_v1 }
 0x472   : > { %4622 = vperm.xlu0 %7992, %v4397_v20  }
 0x473   : > { %8326 = vpow2.f32 %v2693_v50 }
 0x474   : > { %8328 = vpow2.f32 %v2697_v22  ;;  %v12598_v22 = vld [vmem:[#allocation136_spill] sm:$0xff] }
 0x475   : > { %6772 = vadd.xlane.f32.xlu1 %v12592_v58 }
 0x476   : > { %4628 = vperm.xlu0 %7992, %v4399_v57   ;;  %v10871_v57 = vpop.permute.xlu1 %2901 }
 0x479   : > { %6820 = vadd.xlane.f32.xlu1 %v12595_v44 }
 0x47a   : > { %4634 = vperm.xlu0 %7992, %v4401_v39   ;;  %v10874_v62 = vpop.permute.xlu1 %2907  ;;  %v12597_v39 = vld [vmem:[#allocation146_spill] sm:$0xff] }
 0x47b   : > { %v2964_v44 = vrot.slane %v12597_v39, %v12571_v54 }
 0x47c   : > { %v8325_v26 = vpop.eup %8324 }
 0x47d   : > { %v4407_v3 = vmul.f32 %v8325_v26, %v10841_v27 }
 0x47e   : > { %4640 = vperm.xlu0 %7992, %v4403_v35   ;;  %v10876_v50 = vpop.permute.xlu1 %4601  ;;  %v2960_v35 = vrot.slane %v12598_v22, %v12571_v54  ;;  %v12603_v22 = vld [vmem:[#allocation152_spill] sm:$0xff] }
 0x47f   : > { %v4676_v34 = vrot.slane %v12603_v22, %v12571_v54 }
 0x480   : > { %v8327_v38 = vpop.eup %8326 }
 0x481   : > { %v8329_v20 = vpop.eup %8328  ;;  %v4409_v31 = vmul.f32 %v8327_v38, %v10849_v1 }
 0x482   : > { %2934 = vperm.xlu0 %7992, %v8323_v37   ;;  %v4411_v58 = vmul.f32 %v8329_v20, %v10855_v56  ;;  %v12599_v37 = vld [vmem:[#allocation148_spill] sm:$0xff]  ;;  %v10892_v2 = vpop.permute.xlu1 %4607 }
 0x486   : > { %2940 = vperm.xlu0 %7992, %v8325_v26   ;;  %v2968_v26 = vrot.slane %v12599_v37, %v12571_v54  ;;  %v12604_v37 = vld [vmem:[#allocation139_spill] sm:$0xff]  ;;  %v10911_v59 = vpop.permute.xlu1 %4613 }
 0x487   : > { %v4672_v51 = vrot.slane %v12604_v37, %v12571_v54 }
 0x489   : > { %v4925_v22 = vsel %vm2085_vm2, %v4676_v34, %v4672_v51  ;;  %v12612_v34 = vld [vmem:[#allocation153_spill] sm:$0xff] }
 0x48a   : > { %2946 = vperm.xlu0 %7992, %v8327_v38   ;;  %v10884_v38 = vpop.xlane.xlu0 %6907  ;;  %v4688_v46 = vrot.slane %v12612_v34, %v12571_v54  ;;  %v10939_v34 = vpop.permute.xlu1 %4619 }
 0x48b   : > { %12600 = vst [vmem:[#allocation23_spill] sm:$0xff] %v10884_v38  ;;  %v3024_v38 = vrot.slane %v12611_v13, %v12571_v54 }
 0x48e   : > { %2952 = vperm.xlu0 %7992, %v8329_v20   ;;  %v12601_v20 = vld [vmem:[#allocation137_spill] sm:$0xff]  ;;  %v10894_v39 = vpop.permute.xlu0 %2886 }
 0x492   : > { %4646 = vperm.xlu0 %7992, %v4405_v63   ;;  %v3213_v63 = vsel %vm2085_vm2, %v2964_v44, %v2960_v35  ;;  %v12605_v35 = vld [vmem:[#allocation138_spill] sm:$0xff]  ;;  %v10913_v37 = vpop.permute.xlu0 %2892 }
 0x496   : > { %4652 = vperm.xlu0 %7992, %v4407_v3   ;;  %v2972_v3 = vrot.slane %v12601_v20, %v12571_v54  ;;  %v2980_v20 = vrot.slane %v12605_v35, %v12571_v54 }
 0x49a   : > { %4658 = vperm.xlu0 %7992, %v4409_v31   ;;  %v3214_v31 = vsel %vm2087_vm3, %v2968_v26, %v3213_v63  ;;  %v12606_v26 = vld [vmem:[#allocation140_spill] sm:$0xff] }
 0x49b   : > { %v3215_v44 = vsel %vm2089_vm4, %v2972_v3, %v3214_v31  ;;  %v4680_v63 = vrot.slane %v12606_v26, %v12571_v54  ;;  %v12609_v31 = vld [vmem:[#allocation45_spill] sm:$0xff] }
 0x49c   : > { %v2988_v35 = vrot.slane %v12609_v31, %v12571_v54  ;;  %v12614_v31 = vld [vmem:[#allocation160_spill] sm:$0xff] }
 0x49d   : > { %v4926_v26 = vsel %vm2087_vm3, %v4680_v63, %v4925_v22  ;;  %v3028_v56 = vrot.slane %v12614_v31, %v12571_v54  ;;  %v12617_v31 = vld [vmem:[#allocation154_spill] sm:$0xff] }
 0x49e   : > { %4664 = vperm.xlu0 %7992, %v4411_v58   ;;  %v12602_v58 = vld [vmem:[#allocation150_spill] sm:$0xff]  ;;  %v4696_v1 = vrot.slane %v12617_v31, %v12571_v54 }
 0x49f   : > { %v2976_v49 = vrot.slane %v12602_v58, %v12571_v54 }
 0x4a1   : > { %v3216_v58 = vsel %vm2091_vm5, %v2976_v49, %v3215_v44  ;;  %v4927_v49 = vsel %vm2089_vm4, %v4684_v52, %v4926_v26  ;;  %v4692_v44 = vrot.slane %v12610_v28, %v12571_v54  ;;  %v12615_v26 = vld [vmem:[#allocation147_spill] sm:$0xff] }
 0x4a2   : > { %v3217_v3 = vsel %vm2093_vm6, %v2980_v20, %v3216_v58  ;;  %v12613_v20 = vld [vmem:[#allocation173_spill] sm:$0xff]  ;;  %v4928_v63 = vsel %vm2091_vm5, %v4688_v46, %v4927_v49  ;;  %v4700_v28 = vrot.slane %v12615_v26, %v12571_v54 }
 0x4a3   : > { %v3218_v51 = vsel %vm2095_vm7, %v2984_v43, %v3217_v3  ;;  %v3032_v58 = vrot.slane %v12613_v20, %v12571_v54  ;;  %v4929_v22 = vsel %vm2093_vm6, %v4692_v44, %v4928_v63  ;;  %v3227_v43 = vsel %vm2085_vm2, %v3028_v56, %v3024_v38  ;;  %v12616_v3 = vld [vmem:[#allocation179_spill] sm:$0xff]  ;;  %v10941_v20 = vpop.permute.xlu0 %2898  ;;  %v12619_v56 = vld [vmem:[#allocation161_spill] sm:$0xff] }
 0x4a4   : > { %v3219_v52 = vsel %vm2097_vm8, %v2988_v35, %v3218_v51  ;;  %v4736_v13 = vrot.slane %v12616_v3, %v12571_v54  ;;  %v12618_v35 = vld [vmem:[#allocation175_spill] sm:$0xff]  ;;  %v4744_v44 = vrot.slane %v10557_v42, %v12571_v54  ;;  %v3036_v38 = vrot.slane %v12619_v56, %v12571_v54  ;;  %v12620_v51 = vld [vmem:[#allocation166_spill] sm:$0xff]  ;;  %v12621_v42 = vld [vmem:[#allocation177_spill] sm:$0xff] }
 0x4a5   : > { %v3228_v46 = vsel %vm2087_vm3, %v3032_v58, %v3227_v43  ;;  %v3040_v49 = vrot.slane %v12618_v35, %v12571_v54  ;;  %v4740_v63 = vrot.slane %v12620_v51, %v12571_v54  ;;  %v4930_v26 = vsel %vm2095_vm7, %v4696_v1, %v4929_v22  ;;  %v12622_v1 = vld [vmem:[#allocation162_spill] sm:$0xff] }
 0x4a6   : > { %v3229_v3 = vsel %vm2089_vm4, %v3036_v38, %v3228_v46  ;;  %v3277_v58 = vsel %vm2156_vm9, %v3219_v52, 0.0  ;;  %v4931_v43 = vsel %vm2097_vm8, %v4700_v28, %v4930_v26  ;;  %v3048_v27 = vrot.slane %v12621_v42, %v12571_v54  ;;  %v12623_v46 = vld [vmem:[#allocation170_spill] sm:$0xff]  ;;  %v10972_v28 = vpop.permute.xlu1 %2913 }
 0x4a7   : > { %v4939_v31 = vsel %vm2085_vm2, %v4740_v63, %v4736_v13  ;;  %v3230_v35 = vsel %vm2091_vm5, %v3040_v49, %v3229_v3  ;;  %v4752_v51 = vrot.slane %v10566_v60, %v12571_v54  ;;  %v3044_v22 = vrot.slane %v12622_v1, %v12571_v54  ;;  %v12624_v38 = vld [vmem:[#allocation178_spill] sm:$0xff]  ;;  %v10974_v49 = vpop.permute.xlu0 %2904  ;;  %v12625_v3 = vld [vmem:[#allocation164_spill] sm:$0xff] }
 0x4a8   : > { %v4940_v56 = vsel %vm2087_vm3, %v4744_v44, %v4939_v31  ;;  %v4748_v13 = vrot.slane %v12623_v46, %v12571_v54  ;;  %8330 = vlog2.f32 %v12624_v38  ;;  %v3056_v52 = vrot.slane %v10599_v11, %v12571_v54  ;;  %v12734_v38 = vld [vmem:[#allocation51_spill] sm:$0xff] }
 0x4a9   : > { %v3064_v44 = vrot.slane %v10615_v21, %v12571_v54  ;;  %v3060_v63 = vrot.slane %v10573_v19, %v12571_v54  ;;  %v3231_v26 = vsel %vm2093_vm6, %v3044_v22, %v3230_v35  ;;  %v3052_v31 = vrot.slane %v12625_v3, %v12571_v54  ;;  %v12626_v21 = vld [vmem:[#allocation180_spill] sm:$0xff] }
 0x4aa   : > { %v4941_v60 = vsel %vm2089_vm4, %v4748_v13, %v4940_v56  ;;  %v4989_v42 = vsel %vm2156_vm9, %v4931_v43, 0.0  ;;  %v3232_v1 = vsel %vm2095_vm7, %v3048_v27, %v3231_v26  ;;  %8332 = vlog2.f32 %v12626_v21  ;;  %v12627_v35 = vld [vmem:[#allocation172_spill] sm:$0xff]  ;;  %v11004_v13 = vpop.permute.xlu1 %2919 }
 0x4ab   : > { %v4942_v11 = vsel %vm2091_vm5, %v4752_v51, %v4941_v60  ;;  %v3234_v56 = vsel %vm2085_vm2, %v3060_v63, %v3056_v52  ;;  %v4768_v19 = vrot.slane %v10662_v0, %v12571_v54  ;;  %v4756_v22 = vrot.slane %v12627_v35, %v12571_v54  ;;  %v11006_v0 = vpop.permute.xlu0 %4598  ;;  %v12628_v60 = vld [vmem:[#allocation78_spill] sm:$0xff]  ;;  %v12629_v63 = vld [vmem:[#allocation57_spill] sm:$0xff]  ;;  %v12633_v35 = vld [vmem:[#allocation55_spill] sm:$0xff] }
 0x4ac   : > { %v3235_v51 = vsel %vm2087_vm3, %v3064_v44, %v3234_v56  ;;  %v3072_v43 = vrot.slane %v10625_v23, %v12571_v54  ;;  %v4776_v27 = vrot.slane %v10668_v40, %v12571_v54  ;;  %v4772_v46 = vrot.slane %v10623_v10, %v12571_v54  ;;  %v12632_v56 = vld [vmem:[#allocation185_spill] sm:$0xff] }
 0x4ad   : > { %v3233_v52 = vsel %vm2097_vm8, %v3052_v31, %v3232_v1  ;;  %v4943_v44 = vsel %vm2093_vm6, %v4756_v22, %v4942_v11  ;;  %8334 = vlog2.f32 %v10586_v53  ;;  %v3080_v26 = vrot.slane %v12629_v63, %v12571_v54  ;;  %v12630_v31 = vld [vmem:[#allocation191_spill] sm:$0xff] }
 0x4ae   : > { %v4946_v40 = vsel %vm2085_vm2, %v4772_v46, %v4768_v19  ;;  %v4784_v11 = vrot.slane %v12630_v31, %v12571_v54  ;;  %v3076_v19 = vrot.slane %v12632_v56, %v12571_v54  ;;  %v4780_v22 = vrot.slane %v12633_v35, %v12571_v54 }
 0x4af   : > { %v4947_v3 = vsel %vm2087_vm3, %v4776_v27, %v4946_v40  ;;  %v4792_v40 = vrot.slane %v10677_v30, %v12571_v54  ;;  %8336 = vlog2.f32 %v10687_v17 }
 0x4b0   : > { %8338 = vlog2.f32 %v10694_v41 }
 0x4bd   : > { %3278 = vadd.xlane.f32.xlu0 %v3277_v58  ;;  %v4760_v58 = vrot.slane %v10571_v16, %v12571_v54  ;;  %v3068_v16 = vrot.slane %v10584_v14, %v12571_v54 }
 0x4bf   : > { %v3236_v23 = vsel %vm2089_vm4, %v3068_v16, %v3235_v51  ;;  %v4944_v14 = vsel %vm2095_vm7, %v4760_v58, %v4943_v44  ;;  %v3283_v58 = vsel %vm2156_vm9, %v3233_v52, 0.0  ;;  %v4948_v51 = vsel %vm2089_vm4, %v4780_v22, %v4947_v3  ;;  %v11031_v16 = vpop.permute.xlu0 %4604  ;;  %v8331_v44 = vpop.eup %8330  ;;  %v12634_v52 = vld [vmem:[#allocation186_spill] sm:$0xff]  ;;  %v12635_v3 = vld [vmem:[#allocation187_spill] sm:$0xff] }
 0x4c0   : > { %v3237_v10 = vsel %vm2091_vm5, %v3072_v43, %v3236_v23  ;;  %v11029_v43 = vpop.permute.xlu1 %2925  ;;  %v4949_v23 = vsel %vm2091_vm5, %v4784_v11, %v4948_v51  ;;  %v3084_v63 = vrot.slane %v12634_v52, %v12571_v54  ;;  %v4788_v31 = vrot.slane %v12635_v3, %v12571_v54  ;;  %v8333_v11 = vpop.eup %8332 }
 0x4c1   : > { %4990 = vadd.xlane.f32.xlu0 %v4989_v42  ;;  %v12631_v42 = vld [vmem:[#allocation174_spill] sm:$0xff]  ;;  %v3238_v46 = vsel %vm2093_vm6, %v3076_v19, %v3237_v10  ;;  %v11044_v56 = vmul.f32 0.6931472, %v8331_v44  ;;  %v8335_v44 = vpop.eup %8334 }
 0x4c2   : > { %v4764_v1 = vrot.slane %v12631_v42, %v12571_v54  ;;  %v4950_v10 = vsel %vm2093_vm6, %v4788_v31, %v4949_v23  ;;  %v12640_v23 = vld [vmem:[#allocation16_spill] sm:$0xff]  ;;  %v11065_v52 = vmul.f32 0.6931472, %v8335_v44 }
 0x4c3   : > { %12636 = vst [vmem:[#allocation21_spill] sm:$0xff] %v11044_v56  ;;  %v4951_v30 = vsel %vm2095_vm7, %v4792_v40, %v4950_v10  ;;  %v11053_v35 = vpop.permute.xlu0 %4610  ;;  %vm5424_vm14 = vcmp.eq.s32.totalorder %v12583_v61, %v12640_v23  ;;  %v6442_v40 = vpop.f32.mrf.mxu1  ;;  %v12643_v10 = vld [vmem:[#allocation13_spill] sm:$0xff]  ;;  %v12645_v23 = vld [vmem:[#allocation18_spill] sm:$0xff] }
 0x4c4   : > { %v4945_v27 = vsel %vm2097_vm8, %v4764_v1, %v4944_v14  ;;  %v11051_v19 = vpop.permute.xlu1 %2931  ;;  %12641 = vst [vmem:[#allocation71_spill] sm:$0xff] %v11065_v52  ;;  %vm5422_vm15 = vcmp.eq.s32.totalorder %v12583_v61, %v12643_v10  ;;  %vm5425_vm0 = vcmp.eq.s32.totalorder %v12583_v61, %v12645_v23  ;;  %v8337_v10 = vpop.eup %8336 }
 0x4c5   : > { %6817 = vadd.xlane.f32.xlu0 %v12628_v60  ;;  %v3239_v60 = vsel %vm2095_vm7, %v3080_v26, %v3238_v46  ;;  %v4995_v42 = vsel %vm2156_vm9, %v4945_v27, 0.0  ;;  %v12637_v26 = vld [vmem:[#allocation188_spill] sm:$0xff]  ;;  %v12639_v27 = vld [vmem:[#allocation38_spill] sm:$0xff] }
 0x4c6   : > { %v3240_v14 = vsel %vm2097_vm8, %v3084_v63, %v3239_v60  ;;  %v4796_v1 = vrot.slane %v12637_v26, %v12571_v54  ;;  %v5432_v46 = vsub.f32 %v12639_v27, %v11044_v56  ;;  %v6443_v27 = vadd.f32 %v6442_v40, %v9108_v15 }
 0x4c7   : > { %v3286_v22 = vsel %vm2156_vm9, %v3240_v14, 0.0  ;;  %v11069_v3 = vpop.permute.xlu0 %4616  ;;  %v3124_v40 = vrot.slane %v10864_v45, %v12571_v54  ;;  %v3136_v45 = vrot.slane %v10941_v20, %v12571_v54  ;;  %v4832_v20 = vrot.slane %v11006_v0, %v12571_v54 }
 0x4c8   : > { %v4952_v51 = vsel %vm2097_vm8, %v4796_v1, %v4951_v30  ;;  %v11067_v63 = vpop.permute.xlu1 %4625  ;;  %v5440_v31 = vsel %vm5424_vm14, %v5432_v46, 0.0  ;;  %v4836_v0 = vrot.slane %v10876_v50, %v12571_v54 }
 0x4c9   : > { %3284 = vadd.xlane.f32.xlu0 %v3283_v58  ;;  %v11056_v58 = vmul.f32 0.6931472, %v8333_v11  ;;  %v4998_v60 = vsel %vm2156_vm9, %v4952_v51, 0.0  ;;  %v6444_v11 = vpop.f32.mrf.mxu1  ;;  %v5452_v30 = vsel %vm5309_vm10, %v5440_v31, 0.0  ;;  %v3120_v31 = vrot.slane %v10894_v39, %v12571_v54 }
 0x4ca   : > { %v6445_v46 = vadd.f32 %v6444_v11, %v9117_v29  ;;  %v6585_v11 = vmax.f32 %v6443_v27, 0.0  ;;  %v3156_v39 = vrot.slane %v10972_v28, %v12571_v54 }
 0x4cb   : > { %12638 = vst [vmem:[#allocation70_spill] sm:$0xff] %v11056_v58 }
 0x4cc   : > { %v11083_v44 = vpop.permute.xlu1 %4631 }
 0x4cd   : > { %4996 = vadd.xlane.f32.xlu0 %v4995_v42  ;;  %v12642_v42 = vld [vmem:[#allocation40_spill] sm:$0xff] }
 0x4ce   : > { %v5430_v14 = vsub.f32 %v12642_v42, %v11056_v58 }
 0x4d0   : > { %v5438_v1 = vsel %vm5422_vm15, %v5430_v14, 0.0 }
 0x4d1   : > { %3287 = vadd.xlane.f32.xlu0 %v3286_v22  ;;  %v12644_v22 = vld [vmem:[#allocation42_spill] sm:$0xff] }
 0x4d2   : > { %v5433_v51 = vsub.f32 %v12644_v22, %v11065_v52  ;;  %v6586_v22 = vmax.f32 %v6445_v46, 0.0  ;;  %v3132_v46 = vrot.slane %v10867_v12, %v12571_v54  ;;  %v12648_v12 = vld [vmem:[#allocation49_spill] sm:$0xff] }
 0x4d4   : > { %v5441_v14 = vsel %vm5425_vm0, %v5433_v51, 0.0  ;;  %v3248_v51 = vsel %vm2085_vm2, %v3124_v40, %v3120_v31  ;;  %v6726_v28 = vmul.f32 %v9132_v24, %v6586_v22 }
 0x4d5   : > { %4999 = vadd.xlane.f32.xlu0 %v4998_v60  ;;  %v11077_v26 = vpop.xlane.xlu0 %6910  ;;  %v5446_v60 = vsel %vm5309_vm10, %v5438_v1, 0.0  ;;  %v5455_v23 = vsel %vm5309_vm10, %v5441_v14, 0.0  ;;  %v11096_v1 = vmul.f32 0.6931472, %v8337_v10  ;;  %v8339_v10 = vpop.eup %8338 }
 0x4d7   : > { %12646 = vst [vmem:[#allocation74_spill] sm:$0xff] %v11096_v1 }
 0x4d9   : > { %5453 = vadd.xlane.f32.xlu0 %v5452_v30  ;;  %v3128_v30 = vrot.slane %v10913_v37, %v12571_v54 }
 0x4db   : > { %v3249_v37 = vsel %vm2087_vm3, %v3128_v30, %v3248_v51  ;;  %v3164_v30 = vrot.slane %v11004_v13, %v12571_v54  ;;  %v3140_v51 = vrot.slane %v10871_v57, %v12571_v54  ;;  %v4960_v57 = vsel %vm2085_vm2, %v4836_v0, %v4832_v20 }
 0x4dc   : > { %v3250_v40 = vsel %vm2089_vm4, %v3132_v46, %v3249_v37  ;;  %v3180_v20 = vrot.slane %v11051_v19, %v12571_v54 }
 0x4dd   : > { %v2911_v42 = vpop.permute.xlu0 %2910  ;;  %5447 = vadd.xlane.f32.xlu0 %v5446_v60  ;;  %v11100_v60 = vpop.permute.xlu1 %4637  ;;  %v3251_v22 = vsel %vm2091_vm5, %v3136_v45, %v3250_v40  ;;  %v12649_v45 = vld [vmem:[#allocation22_spill] sm:$0xff] }
 0x4de   : > { %v3152_v17 = vrot.slane %v2911_v42, %v12571_v54  ;;  %v6725_v42 = vmul.f32 %v9127_v36, %v6585_v11  ;;  %v5437_v11 = vsub.f32 %v12648_v12, %v11096_v1  ;;  %vm5429_vm1 = vcmp.eq.s32.totalorder %v12583_v61, %v12649_v45  ;;  %v12652_v45 = vld [vmem:[#allocation20_spill] sm:$0xff] }
 0x4df   : > { %vm5427_vm11 = vcmp.eq.s32.totalorder %v12583_v61, %v12652_v45 }
 0x4e0   : > { %v3255_v14 = vsel %vm2085_vm2, %v3156_v39, %v3152_v17  ;;  %v3144_v17 = vrot.slane %v10974_v49, %v12571_v54  ;;  %v4840_v39 = vrot.slane %v11031_v16, %v12571_v54  ;;  %v6912_v46 = vadd.f32 %v6726_v28, %v6725_v42 }
 0x4e1   : > { %v2917_v52 = vpop.permute.xlu0 %2916  ;;  %5456 = vadd.xlane.f32.xlu0 %v5455_v23  ;;  %v12647_v23 = vld [vmem:[#allocation112_spill] sm:$0xff]  ;;  %v11131_v37 = vpop.permute.xlu1 %4643  ;;  %v11136_v49 = vmul.f32 0.6931472, %v8339_v10  ;;  %v5445_v50 = vsel %vm5429_vm1, %v5437_v11, 0.0  ;;  %v4848_v42 = vrot.slane %v11053_v35, %v12571_v54 }
 0x4e2   : > { %v3160_v27 = vrot.slane %v2917_v52, %v12571_v54  ;;  %v5467_v12 = vsel %vm5309_vm10, %v5445_v50, 0.0 }
 0x4e3   : > { %12650 = vst [vmem:[#allocation26_spill] sm:$0xff] %v11136_v49 }
 0x4e4   : > { %v3256_v31 = vsel %vm2087_vm3, %v3160_v27, %v3255_v14  ;;  %v3172_v14 = vrot.slane %v11029_v43, %v12571_v54  ;;  %v4844_v43 = vrot.slane %v10892_v2, %v12571_v54  ;;  %v12651_v2 = vld [vmem:[#allocation50_spill] sm:$0xff] }
 0x4e5   : > { %v2923_v52 = vpop.permute.xlu0 %2922  ;;  %6865 = vadd.xlane.f32.xlu0 %v12647_v23  ;;  %v3257_v27 = vsel %vm2089_vm4, %v3164_v30, %v3256_v31  ;;  %v4961_v31 = vsel %vm2087_vm3, %v4840_v39, %v4960_v57  ;;  %v3148_v30 = vrot.slane %v10874_v62, %v12571_v54  ;;  %v11157_v35 = vpop.permute.xlu1 %2937  ;;  %v4868_v57 = vrot.slane %v11067_v63, %v12571_v54 }
 0x4e6   : > { %v3168_v13 = vrot.slane %v2923_v52, %v12571_v54  ;;  %v3252_v52 = vsel %vm2093_vm6, %v3140_v51, %v3251_v22  ;;  %v4962_v22 = vsel %vm2089_vm4, %v4844_v43, %v4961_v31  ;;  %v4856_v51 = vrot.slane %v11069_v3, %v12571_v54 }
 0x4e7   : > { %v3253_v10 = vsel %vm2095_vm7, %v3144_v17, %v3252_v52  ;;  %v4963_v19 = vsel %vm2091_vm5, %v4848_v42, %v4962_v22  ;;  %v4860_v31 = vrot.slane %v10939_v34, %v12571_v54  ;;  %v4876_v43 = vrot.slane %v11083_v44, %v12571_v54 }
 0x4e8   : > { %v3258_v16 = vsel %vm2091_vm5, %v3168_v13, %v3257_v27  ;;  %v3254_v39 = vsel %vm2097_vm8, %v3148_v30, %v3253_v10  ;;  %v5435_v13 = vsub.f32 %v12651_v2, %v11136_v49  ;;  %v4852_v27 = vrot.slane %v10911_v59, %v12571_v54 }
 0x4e9   : > { %v2929_v40 = vpop.permute.xlu0 %2928  ;;  %6913 = vadd.xlane.f32.xlu0 %v6912_v46  ;;  %v3259_v23 = vsel %vm2093_vm6, %v3172_v14, %v3258_v16  ;;  %v3292_v16 = vsel %vm2156_vm9, %v3254_v39, 0.0  ;;  %v6448_v14 = vpop.f32.mrf.mxu1  ;;  %v4884_v39 = vrot.slane %v11100_v60, %v12571_v54 }
 0x4ea   : > { %v3176_v28 = vrot.slane %v2929_v40, %v12571_v54  ;;  %v5443_v3 = vsel %vm5427_vm11, %v5435_v13, 0.0  ;;  %v4964_v50 = vsel %vm2093_vm6, %v4852_v27, %v4963_v19  ;;  %v2944_v42 = vpop.permute.xlu1 %2943  ;;  %v6449_v34 = vadd.f32 %v6448_v14, %v9108_v15 }
 0x4eb   : > { %v4965_v59 = vsel %vm2095_vm7, %v4856_v51, %v4964_v50  ;;  %v5461_v30 = vsel %vm5309_vm10, %v5443_v3, 0.0  ;;  %v6450_v63 = vpop.f32.mrf.mxu1  ;;  %v4892_v19 = vrot.slane %v11131_v37, %v12571_v54 }
 0x4ec   : > { %v3260_v11 = vsel %vm2095_vm7, %v3176_v28, %v3259_v23  ;;  %v4966_v23 = vsel %vm2097_vm8, %v4860_v31, %v4965_v59  ;;  %v6451_v22 = vadd.f32 %v6450_v63, %v9117_v29  ;;  %v6587_v51 = vmax.f32 %v6449_v34, 0.0 }
 0x4ed   : > { %v4623_v17 = vpop.permute.xlu0 %4622  ;;  %5468 = vadd.xlane.f32.xlu0 %v5467_v12  ;;  %v3261_v62 = vsel %vm2097_vm8, %v3180_v20, %v3260_v11  ;;  %v3188_v31 = vrot.slane %v11157_v35, %v12571_v54  ;;  %v3196_v34 = vrot.slane %v2944_v42, %v12571_v54 }
 0x4ee   : > { %v3295_v0 = vsel %vm2156_vm9, %v3261_v62, 0.0  ;;  %v4864_v46 = vrot.slane %v4623_v17, %v12571_v54  ;;  %v5004_v62 = vsel %vm2156_vm9, %v4966_v23, 0.0  ;;  %v2950_v44 = vpop.permute.xlu1 %2949  ;;  %v12656_v23 = vld [vmem:[#allocation156_spill] sm:$0xff] }
 0x4ef   : > { %3296 = vadd.xlane.f32.xlu1 %v3295_v0  ;;  %v6588_v0 = vmax.f32 %v6451_v22, 0.0 }
 0x4f0   : > { %v4967_v28 = vsel %vm2085_vm2, %v4868_v57, %v4864_v46 }
 0x4f1   : > { %v4629_v40 = vpop.permute.xlu0 %4628  ;;  %3293 = vadd.xlane.f32.xlu0 %v3292_v16  ;;  %v12653_v16 = vld [vmem:[#allocation54_spill] sm:$0xff]  ;;  %v6728_v3 = vmul.f32 %v9132_v24, %v6588_v0 }
 0x4f2   : > { %v4872_v52 = vrot.slane %v4629_v40, %v12571_v54  ;;  %v2956_v57 = vpop.permute.xlu1 %2955  ;;  %v6727_v40 = vmul.f32 %v9127_v36, %v6587_v51  ;;  %v12658_v51 = vld [vmem:[#allocation56_spill] sm:$0xff] }
 0x4f4   : > { %v4968_v10 = vsel %vm2087_vm3, %v4872_v52, %v4967_v28  ;;  %v12654_v52 = vld [vmem:[#allocation95_spill] sm:$0xff]  ;;  %v12655_v28 = vld [vmem:[#allocation114_spill] sm:$0xff] }
 0x4f5   : > { %v4635_v20 = vpop.permute.xlu0 %4634  ;;  %5462 = vadd.xlane.f32.xlu0 %v5461_v30  ;;  %v4969_v11 = vsel %vm2089_vm4, %v4876_v43, %v4968_v10  ;;  %v6915_v10 = vadd.f32 %v6728_v3, %v6727_v40  ;;  %v6452_v30 = vpop.f32.mrf.mxu1 }
 0x4f6   : > { %v4880_v12 = vrot.slane %v4635_v20, %v12571_v54  ;;  %v4650_v63 = vpop.permute.xlu1 %4649 }
 0x4f7   : > { %v6454_v22 = vpop.f32.mrf.mxu1 }
 0x4f8   : > { %v4970_v17 = vsel %vm2091_vm5, %v4880_v12, %v4969_v11 }
 0x4f9   : > { %v4641_v2 = vpop.permute.xlu0 %4640  ;;  %5005 = vadd.xlane.f32.xlu0 %v5004_v62  ;;  %v4971_v27 = vsel %vm2093_vm6, %v4884_v39, %v4970_v17  ;;  %v12657_v62 = vld [vmem:[#allocation27_spill] sm:$0xff]  ;;  %v6458_v0 = vpop.f32.mrf.mxu1 }
 0x4fa   : > { %v4888_v13 = vrot.slane %v4641_v2, %v12571_v54 }
 0x4fb   : > { %v6460_v40 = vpop.f32.mrf.mxu1 }
 0x4fc   : > { %v4972_v46 = vsel %vm2095_vm7, %v4888_v13, %v4971_v27  ;;  %v3204_v13 = vrot.slane %v2950_v44, %v12571_v54  ;;  %v4900_v44 = vrot.slane %v4650_v63, %v12571_v54  ;;  %v6461_v63 = vadd.f32 %v6460_v40, %v9117_v29 }
 0x4fd   : > { %v2935_v45 = vpop.permute.xlu0 %2934  ;;  %6796 = vadd.xlane.f32.xlu0 %v12653_v16  ;;  %v4973_v14 = vsel %vm2097_vm8, %v4892_v19, %v4972_v46  ;;  %v4656_v19 = vpop.permute.xlu1 %4655  ;;  %v12659_v46 = vld [vmem:[#allocation81_spill] sm:$0xff]  ;;  %v3212_v16 = vrot.slane %v2956_v57, %v12571_v54 }
 0x4fe   : > { %v5007_v60 = vsel %vm2156_vm9, %v4973_v14, 0.0  ;;  %v3184_v37 = vrot.slane %v2935_v45, %v12571_v54  ;;  %v12662_v57 = vld [vmem:[#allocation157_spill] sm:$0xff] }
 0x4ff   : > { %5008 = vadd.xlane.f32.xlu1 %v5007_v60  ;;  %v12660_v60 = vld [vmem:[#allocation99_spill] sm:$0xff] }
 0x500   : > { %v3262_v43 = vsel %vm2085_vm2, %v3188_v31, %v3184_v37  ;;  %v6453_v31 = vadd.f32 %v6452_v30, %v9108_v15 }
 0x501   : > { %v2941_v50 = vpop.permute.xlu0 %2940  ;;  %6844 = vadd.xlane.f32.xlu0 %v12654_v52  ;;  %v4662_v3 = vpop.permute.xlu1 %4661 }
 0x502   : > { %v3192_v59 = vrot.slane %v2941_v50, %v12571_v54  ;;  %v12661_v50 = vld [vmem:[#allocation115_spill] sm:$0xff] }
 0x503   : > { %6868 = vadd.xlane.f32.xlu1 %v12655_v28 }
 0x504   : > { %v3263_v12 = vsel %vm2087_vm3, %v3192_v59, %v3262_v43  ;;  %v6459_v43 = vadd.f32 %v6458_v0, %v9108_v15 }
 0x505   : > { %v2947_v20 = vpop.permute.xlu0 %2946  ;;  %6892 = vadd.xlane.f32.xlu0 %v12656_v23  ;;  %v3264_v35 = vsel %vm2089_vm4, %v3196_v34, %v3263_v12  ;;  %v4908_v12 = vrot.slane %v4656_v19, %v12571_v54  ;;  %v6589_v34 = vmax.f32 %v6453_v31, 0.0  ;;  %v12667_v31 = vld [vmem:[#allocation59_spill] sm:$0xff] }
 0x506   : > { %v3200_v11 = vrot.slane %v2947_v20, %v12571_v54 }
 0x507   : > { %6916 = vadd.xlane.f32.xlu1 %v6915_v10  ;;  %v6455_v10 = vadd.f32 %v6454_v22, %v9117_v29  ;;  %v12663_v22 = vld [vmem:[#allocation29_spill] sm:$0xff] }
 0x508   : > { %v3265_v39 = vsel %vm2091_vm5, %v3200_v11, %v3264_v35  ;;  %v4668_v35 = vpop.permute.xlu1 %4667 }
 0x509   : > { %v2953_v17 = vpop.permute.xlu0 %2952  ;;  %6775 = vadd.xlane.f32.xlu0 %v12657_v62  ;;  %v3266_v42 = vsel %vm2093_vm6, %v3204_v13, %v3265_v39  ;;  %v6590_v62 = vmax.f32 %v6455_v10, 0.0  ;;  %v6591_v39 = vmax.f32 %v6459_v43, 0.0  ;;  %v4924_v19 = vrot.slane %v4668_v35, %v12571_v54  ;;  %v12670_v10 = vld [vmem:[#allocation30_spill] sm:$0xff] }
 0x50a   : > { %v3208_v2 = vrot.slane %v2953_v17, %v12571_v54 }
 0x50b   : > { %6799 = vadd.xlane.f32.xlu1 %v12658_v51  ;;  %v4916_v51 = vrot.slane %v4662_v3, %v12571_v54 }
 0x50c   : > { %v3267_v45 = vsel %vm2095_vm7, %v3208_v2, %v3266_v42  ;;  %v6592_v2 = vmax.f32 %v6461_v63, 0.0  ;;  %v6730_v42 = vmul.f32 %v9132_v24, %v6590_v62 }
 0x50d   : > { %v4647_v27 = vpop.permute.xlu0 %4646  ;;  %6823 = vadd.xlane.f32.xlu0 %v12659_v46  ;;  %v3268_v52 = vsel %vm2097_vm8, %v3212_v16, %v3267_v45  ;;  %v6731_v45 = vmul.f32 %v9127_v36, %v6591_v39  ;;  %v12676_v39 = vld [vmem:[#allocation91_spill] sm:$0xff] }
 0x50e   : > { %v4896_v14 = vrot.slane %v4647_v27, %v12571_v54  ;;  %v3298_v23 = vsel %vm2156_vm9, %v3268_v52, 0.0  ;;  %v6729_v27 = vmul.f32 %v9127_v36, %v6589_v34  ;;  %v6732_v16 = vmul.f32 %v9132_v24, %v6592_v2 }
 0x50f   : > { %6847 = vadd.xlane.f32.xlu1 %v12660_v60 }
 0x510   : > { %v4974_v28 = vsel %vm2085_vm2, %v4900_v44, %v4896_v14  ;;  %v12664_v14 = vld [vmem:[#allocation83_spill] sm:$0xff]  ;;  %v6918_v52 = vadd.f32 %v6730_v42, %v6729_v27 }
 0x511   : > { %v4653_v37 = vpop.permute.xlu0 %4652  ;;  %6871 = vadd.xlane.f32.xlu0 %v12661_v50  ;;  %v6921_v50 = vadd.f32 %v6732_v16, %v6731_v45  ;;  %v12680_v16 = vld [vmem:[#allocation92_spill] sm:$0xff] }
 0x512   : > { %v4904_v59 = vrot.slane %v4653_v37, %v12571_v54  ;;  %v12665_v37 = vld [vmem:[#allocation118_spill] sm:$0xff] }
 0x513   : > { %6895 = vadd.xlane.f32.xlu1 %v12662_v57  ;;  %v12669_v57 = vld [vmem:[#allocation158_spill] sm:$0xff] }
 0x514   : > { %v4975_v20 = vsel %vm2087_vm3, %v4904_v59, %v4974_v28  ;;  %v12666_v59 = vld [vmem:[#allocation58_spill] sm:$0xff]  ;;  %v12668_v28 = vld [vmem:[#allocation100_spill] sm:$0xff] }
 0x515   : > { %v4659_v11 = vpop.permute.xlu0 %4658  ;;  %3299 = vadd.xlane.f32.xlu0 %v3298_v23  ;;  %v4976_v17 = vsel %vm2089_vm4, %v4908_v12, %v4975_v20  ;;  %v11268_v20 = vpop.xlane.xlu1 %3281 }
 0x516   : > { %v4912_v30 = vrot.slane %v4659_v11, %v12571_v54 }
 0x517   : > { %6778 = vadd.xlane.f32.xlu1 %v12663_v22 }
 0x518   : > { %v4977_v13 = vsel %vm2091_vm5, %v4912_v30, %v4976_v17  ;;  %v12675_v17 = vld [vmem:[#allocation15_spill] sm:$0xff] }
 0x519   : > { %v4665_v0 = vpop.permute.xlu0 %4664  ;;  %v4978_v60 = vsel %vm2093_vm6, %v4916_v51, %v4977_v13  ;;  %v11277_v30 = vpop.xlane.xlu1 %4993  ;;  %v12677_v13 = vld [vmem:[#allocation89_spill] sm:$0xff] }
 0x51a   : > { %v4920_v46 = vrot.slane %v4665_v0, %v12571_v54  ;;  %12673 = vst [vmem:[#allocation146_spill] sm:$0xff] %v11277_v30  ;;  %v12678_v0 = vld [vmem:[#allocation87_spill] sm:$0xff] }
 0x51b   : > { %6826 = vadd.xlane.f32.xlu1 %v12664_v14 }
 0x51c   : > { %v4979_v40 = vsel %vm2095_vm7, %v4920_v46, %v4978_v60  ;;  %v12681_v60 = vld [vmem:[#allocation93_spill] sm:$0xff] }
 0x51d   : > { %v4980_v44 = vsel %vm2097_vm8, %v4924_v19, %v4979_v40  ;;  %v11293_v42 = vpop.xlane.xlu1 %6793 }
 0x51e   : > { %v5010_v3 = vsel %vm2156_vm9, %v4980_v44, 0.0  ;;  %v12682_v44 = vld [vmem:[#allocation88_spill] sm:$0xff] }
 0x51f   : > { %6874 = vadd.xlane.f32.xlu1 %v12665_v37  ;;  %5011 = vadd.xlane.f32.xlu0 %v5010_v3 }
 0x523   : > { %6922 = vadd.xlane.f32.xlu1 %v6921_v50  ;;  %6919 = vadd.xlane.f32.xlu0 %v6918_v52 }
 0x527   : > { %6805 = vadd.xlane.f32.xlu1 %v12666_v59  ;;  %6802 = vadd.xlane.f32.xlu0 %v12667_v31  ;;  %v11305_v59 = vpop.xlane.xlu1 %3290  ;;  %v12685_v31 = vld [vmem:[#allocation94_spill] sm:$0xff] }
 0x52b   : > { %6850 = vadd.xlane.f32.xlu0 %v12668_v28 }
 0x52f   : > { %6898 = vadd.xlane.f32.xlu0 %v12669_v57  ;;  %v12686_v57 = vld [vmem:[#allocation96_spill] sm:$0xff] }
 0x533   : > { %6781 = vadd.xlane.f32.xlu0 %v12670_v10 }
 0x546   : > { %v11263_v43 = vpop.xlane.xlu0 %3278 }
 0x547   : > { %8340 = vlog2.f32 %v11263_v43 }
 0x548   : > { %8342 = vlog2.f32 %v11268_v20 }
 0x54a   : > { %v11266_v63 = vpop.xlane.xlu0 %4990 }
 0x54e   : > { %v11270_v23 = vpop.xlane.xlu0 %6817 }
 0x552   : > { %v11273_v12 = vpop.xlane.xlu0 %3284 }
 0x553   : > { %12671 = vst [vmem:[#allocation76_spill] sm:$0xff] %v11273_v12  ;;  %8344 = vlog2.f32 %v11273_v12 }
 0x554   : > { %v8341_v11 = vpop.eup %8340 }
 0x555   : > { %v11275_v34 = vmul.f32 0.6931472, %v8341_v11  ;;  %v8343_v45 = vpop.eup %8342  ;;  %v12687_v11 = vld [vmem:[#allocation90_spill] sm:$0xff] }
 0x556   : > { %v11279_v35 = vpop.xlane.xlu0 %4996  ;;  %v11303_v52 = vmul.f32 0.6931472, %v8343_v45 }
 0x557   : > { %12672 = vst [vmem:[#allocation79_spill] sm:$0xff] %v11275_v34  ;;  %12674 = vst [vmem:[#allocation136_spill] sm:$0xff] %v11279_v35  ;;  %v3364_v62 = vrot.slane %v11275_v34, %v12675_v17  ;;  %v3360_v22 = vrot.slane %v11275_v34, %v9091_v4  ;;  %v3372_v19 = vrot.slane %v11275_v34, %v12678_v0  ;;  %v12717_v35 = vld [vmem:[#allocation28_spill] sm:$0xff] }
 0x558   : > { %v3368_v27 = vrot.slane %v11275_v34, %v9848_v9  ;;  %v3380_v3 = vrot.slane %v11275_v34, %v12682_v44  ;;  %v3376_v37 = vrot.slane %v11275_v34, %v9864_v47  ;;  %12684 = vst [vmem:[#allocation150_spill] sm:$0xff] %v11303_v52  ;;  %v3396_v45 = vrot.slane %v11303_v52, %v12675_v17 }
 0x559   : > { %v3678_v2 = vsub.f32 %v12676_v39, %v3364_v62  ;;  %v3677_v51 = vsub.f32 %v12677_v13, %v3360_v22  ;;  %v3680_v14 = vsub.f32 %v12680_v16, %v3372_v19  ;;  %v3388_v62 = vrot.slane %v11275_v34, %v12687_v11  ;;  %v12689_v13 = vld [vmem:[#allocation97_spill] sm:$0xff]  ;;  %v12690_v19 = vld [vmem:[#allocation98_spill] sm:$0xff] }
 0x55a   : > { %v11291_v46 = vpop.xlane.xlu0 %3287  ;;  %v3679_v40 = vsub.f32 %v12681_v60, %v3368_v27  ;;  %v3682_v28 = vsub.f32 %v12685_v31, %v3380_v3  ;;  %v3681_v10 = vsub.f32 %v12686_v57, %v3376_v37  ;;  %v3384_v22 = vrot.slane %v11275_v34, %v9885_v6  ;;  %v12692_v60 = vld [vmem:[#allocation106_spill] sm:$0xff]  ;;  %v12693_v3 = vld [vmem:[#allocation104_spill] sm:$0xff] }
 0x55b   : > { %12679 = vst [vmem:[#allocation148_spill] sm:$0xff] %v11291_v46  ;;  %3809 = vperm.xlu1 %7993, %v3678_v2   ;;  %3806 = vperm.xlu0 %7992, %v3677_v51   ;;  %v11316_v2 = vpop.xlane.xlu1 %5002  ;;  %v3684_v51 = vsub.f32 %v12689_v13, %v3388_v62  ;;  %v3392_v16 = vrot.slane %v11303_v52, %v9091_v4  ;;  %8346 = vlog2.f32 %v11291_v46 }
 0x55c   : > { %v3683_v27 = vsub.f32 %v12690_v19, %v3384_v22  ;;  %v3404_v31 = vrot.slane %v11303_v52, %v12678_v0  ;;  %v3412_v62 = vrot.slane %v11303_v52, %v12682_v44  ;;  %v3408_v22 = vrot.slane %v11303_v52, %v9864_v47 }
 0x55d   : > { %v3685_v37 = vsub.f32 %v12693_v3, %v3392_v16  ;;  %v12699_v3 = vld [vmem:[#allocation110_spill] sm:$0xff]  ;;  %8348 = vlog2.f32 %v11305_v59 }
 0x55e   : > { %v11301_v50 = vpop.xlane.xlu0 %4999 }
 0x55f   : > { %12683 = vst [vmem:[#allocation137_spill] sm:$0xff] %v11301_v50  ;;  %3815 = vperm.xlu1 %7993, %v3680_v14   ;;  %3812 = vperm.xlu0 %7992, %v3679_v40   ;;  %v3686_v40 = vsub.f32 %v12692_v60, %v3396_v45  ;;  %v11332_v57 = vpop.xlane.xlu1 %5450 }
 0x560   : > { %12694 = vst [vmem:[#allocation138_spill] sm:$0xff] %v11332_v57  ;;  %v8345_v13 = vpop.eup %8344 }
 0x561   : > { %v11348_v49 = vmul.f32 0.6931472, %v8345_v13 }
 0x562   : > { %v11314_v39 = vpop.xlane.xlu0 %5453 }
 0x563   : > { %12688 = vst [vmem:[#allocation152_spill] sm:$0xff] %v11314_v39  ;;  %3821 = vperm.xlu1 %7993, %v3682_v28   ;;  %3818 = vperm.xlu0 %7992, %v3681_v10   ;;  %v3400_v28 = vrot.slane %v11303_v52, %v9848_v9  ;;  %v11344_v60 = vpop.xlane.xlu1 %5465  ;;  %12701 = vst [vmem:[#allocation142_spill] sm:$0xff] %v11348_v49  ;;  %v3424_v13 = vrot.slane %v11348_v49, %v9091_v4  ;;  %v12709_v39 = vld [vmem:[#allocation116_spill] sm:$0xff] }
 0x564   : > { %12698 = vst [vmem:[#allocation151_spill] sm:$0xff] %v11344_v60  ;;  %v3448_v56 = vrot.slane %v11348_v49, %v9885_v6 }
 0x566   : > { %v11324_v14 = vpop.xlane.xlu0 %5447  ;;  %v3699_v41 = vsub.f32 %v12717_v35, %v3448_v56 }
 0x567   : > { %12691 = vst [vmem:[#allocation139_spill] sm:$0xff] %v11324_v14  ;;  %3827 = vperm.xlu1 %7993, %v3684_v51   ;;  %3824 = vperm.xlu0 %7992, %v3683_v27   ;;  %v12696_v51 = vld [vmem:[#allocation108_spill] sm:$0xff]  ;;  %v12697_v27 = vld [vmem:[#allocation105_spill] sm:$0xff] }
 0x568   : > { %v3688_v19 = vsub.f32 %v12696_v51, %v3404_v31  ;;  %v3687_v45 = vsub.f32 %v12697_v27, %v3400_v28  ;;  %v3416_v31 = vrot.slane %v11303_v52, %v9885_v6  ;;  %v12702_v51 = vld [vmem:[#allocation111_spill] sm:$0xff]  ;;  %v12703_v27 = vld [vmem:[#allocation109_spill] sm:$0xff] }
 0x56a   : > { %v11334_v10 = vpop.xlane.xlu0 %5456 }
 0x56b   : > { %12695 = vst [vmem:[#allocation140_spill] sm:$0xff] %v11334_v10  ;;  %3833 = vperm.xlu1 %7993, %v3686_v40   ;;  %3830 = vperm.xlu0 %7992, %v3685_v37   ;;  %v3690_v40 = vsub.f32 %v12699_v3, %v3412_v62  ;;  %v12700_v37 = vld [vmem:[#allocation107_spill] sm:$0xff]  ;;  %v3420_v10 = vrot.slane %v11303_v52, %v12687_v11 }
 0x56c   : > { %v3689_v1 = vsub.f32 %v12700_v37, %v3408_v22  ;;  %v3691_v62 = vsub.f32 %v12703_v27, %v3416_v31  ;;  %v3428_v22 = vrot.slane %v11348_v49, %v12675_v17  ;;  %v12706_v37 = vld [vmem:[#allocation113_spill] sm:$0xff]  ;;  %v3432_v31 = vrot.slane %v11348_v49, %v9848_v9 }
 0x56e   : > { %v11342_v16 = vpop.xlane.xlu0 %6865  ;;  %v3694_v60 = vsub.f32 %v12706_v37, %v3428_v22  ;;  %v3444_v22 = vrot.slane %v11348_v49, %v12682_v44  ;;  %v8347_v37 = vpop.eup %8346 }
 0x56f   : > { %3839 = vperm.xlu1 %7993, %v3688_v19   ;;  %3836 = vperm.xlu0 %7992, %v3687_v45   ;;  %v3692_v19 = vsub.f32 %v12702_v51, %v3420_v10  ;;  %v11363_v45 = vpop.xlane.xlu1 %5459  ;;  %v3436_v10 = vrot.slane %v11348_v49, %v12678_v0 }
 0x570   : > { %12704 = vst [vmem:[#allocation45_spill] sm:$0xff] %v11363_v45 }
 0x572   : > { %v11355_v28 = vpop.xlane.xlu0 %6913 }
 0x573   : > { %3845 = vperm.xlu1 %7993, %v3690_v40   ;;  %3842 = vperm.xlu0 %7992, %v3689_v1   ;;  %v12707_v40 = vld [vmem:[#allocation121_spill] sm:$0xff]  ;;  %v11375_v27 = vpop.xlane.xlu1 %6841 }
 0x574   : > { %v3693_v1 = vsub.f32 %v12707_v40, %v3424_v13  ;;  %v3440_v13 = vrot.slane %v11348_v49, %v9864_v47 }
 0x576   : > { %v11365_v3 = vpop.xlane.xlu0 %5468 }
 0x577   : > { %12705 = vst [vmem:[#allocation145_spill] sm:$0xff] %v11365_v3  ;;  %3851 = vperm.xlu1 %7993, %v3692_v19   ;;  %3848 = vperm.xlu0 %7992, %v3691_v62   ;;  %v3696_v3 = vsub.f32 %v12709_v39, %v3436_v10  ;;  %v12710_v19 = vld [vmem:[#allocation122_spill] sm:$0xff]  ;;  %v12713_v39 = vld [vmem:[#allocation117_spill] sm:$0xff]  ;;  %v11394_v50 = vpop.xlane.xlu1 %6889 }
 0x578   : > { %v3695_v62 = vsub.f32 %v12710_v19, %v3432_v31  ;;  %v3698_v10 = vsub.f32 %v12713_v39, %v3444_v22  ;;  %v12714_v31 = vld [vmem:[#allocation124_spill] sm:$0xff]  ;;  %v12718_v39 = vld [vmem:[#allocation33_spill] sm:$0xff] }
 0x579   : > { %v3697_v19 = vsub.f32 %v12714_v31, %v3440_v13 }
 0x57a   : > { %v11373_v51 = vpop.xlane.xlu0 %3293 }
 0x57b   : > { %12708 = vst [vmem:[#allocation171_spill] sm:$0xff] %v11373_v51  ;;  %3857 = vperm.xlu1 %7993, %v3694_v60   ;;  %3854 = vperm.xlu0 %7992, %v3693_v1   ;;  %v3452_v60 = vrot.slane %v11348_v49, %v12687_v11  ;;  %v11388_v1 = vmul.f32 0.6931472, %v8347_v37  ;;  %v11404_v13 = vpop.xlane.xlu1 %6772  ;;  %8350 = vlog2.f32 %v11373_v51 }
 0x57d   : > { %12712 = vst [vmem:[#allocation173_spill] sm:$0xff] %v11388_v1  ;;  %v3460_v37 = vrot.slane %v11388_v1, %v12675_v17  ;;  %v3456_v22 = vrot.slane %v11388_v1, %v9091_v4  ;;  %v3464_v56 = vrot.slane %v11388_v1, %v9848_v9 }
 0x57e   : > { %v11383_v40 = vpop.xlane.xlu0 %5462 }
 0x57f   : > { %12711 = vst [vmem:[#allocation153_spill] sm:$0xff] %v11383_v40  ;;  %3863 = vperm.xlu1 %7993, %v3696_v3   ;;  %3860 = vperm.xlu0 %7992, %v3695_v62   ;;  %v12716_v62 = vld [vmem:[#allocation120_spill] sm:$0xff]  ;;  %v3702_v31 = vsub.f32 %v12718_v39, %v3460_v37  ;;  %v3476_v37 = vrot.slane %v11388_v1, %v12682_v44  ;;  %v11420_v39 = vpop.xlane.xlu1 %6820 }
 0x580   : > { %v3700_v40 = vsub.f32 %v12716_v62, %v3452_v60  ;;  %v8349_v60 = vpop.eup %8348  ;;  %v12720_v62 = vld [vmem:[#allocation34_spill] sm:$0xff] }
 0x582   : > { %v11396_v3 = vpop.xlane.xlu0 %5005 }
 0x583   : > { %3869 = vperm.xlu1 %7993, %v3698_v10   ;;  %3866 = vperm.xlu0 %7992, %v3697_v19   ;;  %12715 = vst [vmem:[#allocation160_spill] sm:$0xff] %v11396_v3  ;;  %v12719_v10 = vld [vmem:[#allocation31_spill] sm:$0xff]  ;;  %v3468_v3 = vrot.slane %v11388_v1, %v12678_v0  ;;  %v11433_v57 = vpop.xlane.xlu1 %3296 }
 0x584   : > { %v3701_v19 = vsub.f32 %v12719_v10, %v3456_v22  ;;  %v3472_v22 = vrot.slane %v11388_v1, %v9864_v47  ;;  %v11422_v10 = vmul.f32 0.6931472, %v8349_v60  ;;  %12724 = vst [vmem:[#allocation147_spill] sm:$0xff] %v11433_v57  ;;  %8352 = vlog2.f32 %v11433_v57  ;;  %v12737_v57 = vld [vmem:[#allocation163_spill] sm:$0xff] }
 0x586   : > { %v11412_v35 = vpop.xlane.xlu0 %6796  ;;  %v3492_v52 = vrot.slane %v11422_v10, %v12675_v17  ;;  %v3488_v51 = vrot.slane %v11422_v10, %v9091_v4  ;;  %v3516_v12 = vrot.slane %v11422_v10, %v12687_v11 }
 0x587   : > { %3875 = vperm.xlu1 %7993, %v3700_v40   ;;  %3872 = vperm.xlu0 %7992, %v3699_v41   ;;  %v3704_v40 = vsub.f32 %v12720_v62, %v3468_v3  ;;  %v12721_v41 = vld [vmem:[#allocation32_spill] sm:$0xff]  ;;  %v12722_v3 = vld [vmem:[#allocation39_spill] sm:$0xff] }
 0x588   : > { %v3703_v49 = vsub.f32 %v12721_v41, %v3464_v56  ;;  %v12723_v56 = vld [vmem:[#allocation37_spill] sm:$0xff]  ;;  %v3480_v41 = vrot.slane %v11388_v1, %v9885_v6 }
 0x589   : > { %v3705_v62 = vsub.f32 %v12723_v56, %v3472_v22 }
 0x58a   : > { %v11424_v53 = vpop.xlane.xlu0 %6844 }
 0x58b   : > { %3881 = vperm.xlu1 %7993, %v3702_v31   ;;  %3878 = vperm.xlu0 %7992, %v3701_v19   ;;  %v3484_v31 = vrot.slane %v11388_v1, %v12687_v11  ;;  %v3706_v19 = vsub.f32 %v12722_v3, %v3476_v37  ;;  %v11441_v37 = vpop.xlane.xlu1 %5008  ;;  %v12728_v3 = vld [vmem:[#allocation46_spill] sm:$0xff] }
 0x58c   : > { %12727 = vst [vmem:[#allocation179_spill] sm:$0xff] %v11441_v37  ;;  %v3710_v56 = vsub.f32 %v12728_v3, %v3492_v52  ;;  %v12731_v52 = vld [vmem:[#allocation41_spill] sm:$0xff] }
 0x58e   : > { %v11443_v22 = vpop.xlane.xlu0 %6892 }
 0x58f   : > { %3887 = vperm.xlu1 %7993, %v3704_v40   ;;  %3884 = vperm.xlu0 %7992, %v3703_v49   ;;  %v12725_v49 = vld [vmem:[#allocation36_spill] sm:$0xff]  ;;  %v12726_v40 = vld [vmem:[#allocation35_spill] sm:$0xff] }
 0x590   : > { %v3708_v60 = vsub.f32 %v12725_v49, %v3484_v31  ;;  %v3707_v46 = vsub.f32 %v12726_v40, %v3480_v41  ;;  %v3500_v31 = vrot.slane %v11422_v10, %v12678_v0  ;;  %v3496_v41 = vrot.slane %v11422_v10, %v9848_v9  ;;  %v11451_v49 = vpop.xlane.xlu1 %6868 }
 0x592   : > { %v11453_v40 = vpop.xlane.xlu0 %6775  ;;  %v3711_v3 = vsub.f32 %v12731_v52, %v3496_v41 }
 0x593   : > { %3893 = vperm.xlu1 %7993, %v3706_v19   ;;  %3890 = vperm.xlu0 %7992, %v3705_v62   ;;  %v12729_v19 = vld [vmem:[#allocation44_spill] sm:$0xff] }
 0x594   : > { %v3709_v62 = vsub.f32 %v12729_v19, %v3488_v51  ;;  %v3504_v51 = vrot.slane %v11422_v10, %v9864_v47  ;;  %v8351_v19 = vpop.eup %8350  ;;  %v11470_v41 = vpop.xlane.xlu1 %6916 }
 0x595   : > { %v11463_v1 = vmul.f32 0.6931472, %v8351_v19 }
 0x596   : > { %v3713_v14 = vsub.f32 %v12734_v38, %v3504_v51 }
 0x597   : > { %3899 = vperm.xlu1 %7993, %v3708_v60   ;;  %3896 = vperm.xlu0 %7992, %v3707_v46   ;;  %v3508_v60 = vrot.slane %v11422_v10, %v12682_v44  ;;  %v12730_v46 = vld [vmem:[#allocation43_spill] sm:$0xff]  ;;  %12733 = vst [vmem:[#allocation154_spill] sm:$0xff] %v11463_v1  ;;  %v3524_v19 = vrot.slane %v11463_v1, %v12675_v17 }
 0x598   : > { %v3712_v37 = vsub.f32 %v12730_v46, %v3500_v31  ;;  %v3512_v31 = vrot.slane %v11422_v10, %v9885_v6  ;;  %v11472_v46 = vpop.xlane.xlu0 %6823  ;;  %v3520_v38 = vrot.slane %v11463_v1, %v9091_v4  ;;  %v11480_v51 = vpop.xlane.xlu1 %6799 }
 0x599   : > { %v3718_v30 = vsub.f32 %v12737_v57, %v3524_v19  ;;  %v3536_v57 = vrot.slane %v11463_v1, %v9864_v47 }
 0x59b   : > { %3905 = vperm.xlu1 %7993, %v3710_v56   ;;  %3902 = vperm.xlu0 %7992, %v3709_v62   ;;  %v12732_v56 = vld [vmem:[#allocation52_spill] sm:$0xff] }
 0x59c   : > { %v3714_v62 = vsub.f32 %v12732_v56, %v3508_v60  ;;  %v11482_v56 = vpop.xlane.xlu0 %6871 }
 0x59f   : > { %3911 = vperm.xlu1 %7993, %v3712_v37   ;;  %3908 = vperm.xlu0 %7992, %v3711_v3   ;;  %v12735_v37 = vld [vmem:[#allocation48_spill] sm:$0xff]  ;;  %v12736_v3 = vld [vmem:[#allocation47_spill] sm:$0xff] }
 0x5a0   : > { %v3716_v52 = vsub.f32 %v12735_v37, %v3516_v12  ;;  %v3715_v60 = vsub.f32 %v12736_v3, %v3512_v31  ;;  %v3532_v12 = vrot.slane %v11463_v1, %v12678_v0  ;;  %v8353_v31 = vpop.eup %8352  ;;  %v12738_v37 = vld [vmem:[#allocation165_spill] sm:$0xff]  ;;  %v11498_v19 = vpop.xlane.xlu0 %3299 }
 0x5a1   : > { %12739 = vst [vmem:[#allocation175_spill] sm:$0xff] %v11498_v19  ;;  %8354 = vlog2.f32 %v11498_v19 }
 0x5a3   : > { %3917 = vperm.xlu1 %7993, %v3714_v62   ;;  %3914 = vperm.xlu0 %7992, %v3713_v14   ;;  %v3717_v14 = vsub.f32 %v10630_v33, %v3520_v38  ;;  %v3528_v62 = vrot.slane %v11463_v1, %v9848_v9  ;;  %v11496_v33 = vpop.xlane.xlu1 %6847  ;;  %v11500_v38 = vmul.f32 0.6931472, %v8353_v31  ;;  %v12743_v31 = vld [vmem:[#allocation169_spill] sm:$0xff] }
 0x5a5   : > { %v3719_v3 = vsub.f32 %v10637_v8, %v3528_v62  ;;  %12740 = vst [vmem:[#allocation161_spill] sm:$0xff] %v11500_v38  ;;  %v12741_v8 = vld [vmem:[#allocation167_spill] sm:$0xff]  ;;  %v3544_v62 = vrot.slane %v11463_v1, %v9885_v6  ;;  %v3556_v19 = vrot.slane %v11500_v38, %v12675_v17 }
 0x5a7   : > { %3923 = vperm.xlu1 %7993, %v3716_v52   ;;  %3920 = vperm.xlu0 %7992, %v3715_v60   ;;  %v3720_v52 = vsub.f32 %v12738_v37, %v3532_v12  ;;  %v3540_v60 = vrot.slane %v11463_v1, %v12682_v44  ;;  %v3721_v12 = vsub.f32 %v10645_v48, %v3536_v57  ;;  %v11509_v37 = vpop.xlane.xlu1 %6895  ;;  %v12744_v48 = vld [vmem:[#allocation64_spill] sm:$0xff] }
 0x5a8   : > { %v3723_v58 = vsub.f32 %v10653_v32, %v3544_v62  ;;  %v3726_v57 = vsub.f32 %v12744_v48, %v3556_v19  ;;  %v3572_v62 = vrot.slane %v11500_v38, %v12682_v44 }
 0x5ab   : > { %3929 = vperm.xlu1 %7993, %v3718_v30   ;;  %3926 = vperm.xlu0 %7992, %v3717_v14   ;;  %v3548_v30 = vrot.slane %v11463_v1, %v12687_v11  ;;  %v3722_v14 = vsub.f32 %v12741_v8, %v3540_v60  ;;  %v3552_v60 = vrot.slane %v11500_v38, %v9091_v4 }
 0x5ad   : > { %v3725_v8 = vsub.f32 %v10772_v55, %v3552_v60  ;;  %v3568_v55 = vrot.slane %v11500_v38, %v9864_v47 }
 0x5af   : > { %3935 = vperm.xlu1 %7993, %v3720_v52   ;;  %3932 = vperm.xlu0 %7992, %v3719_v3   ;;  %v11511_v52 = vpop.xlane.xlu0 %5011  ;;  %v3724_v3 = vsub.f32 %v12743_v31, %v3548_v30  ;;  %v3560_v30 = vrot.slane %v11500_v38, %v9848_v9  ;;  %v3729_v1 = vsub.f32 %v10791_v5, %v3568_v55  ;;  %v12749_v55 = vld [vmem:[#allocation72_spill] sm:$0xff] }
 0x5b0   : > { %12742 = vst [vmem:[#allocation166_spill] sm:$0xff] %v11511_v52  ;;  %v12746_v52 = vld [vmem:[#allocation69_spill] sm:$0xff] }
 0x5b1   : > { %v3727_v19 = vsub.f32 %v10781_v7, %v3560_v30  ;;  %v3576_v7 = vrot.slane %v11500_v38, %v9885_v6  ;;  %v12748_v30 = vld [vmem:[#allocation68_spill] sm:$0xff] }
 0x5b3   : > { %3941 = vperm.xlu1 %7993, %v3722_v14   ;;  %3938 = vperm.xlu0 %7992, %v3721_v12   ;;  %v3564_v14 = vrot.slane %v11500_v38, %v12678_v0  ;;  %v11525_v12 = vpop.xlane.xlu1 %6778  ;;  %v11527_v32 = vpop.xlane.xlu0 %6919 }
 0x5b7   : > { %3947 = vperm.xlu1 %7993, %v3724_v3   ;;  %3944 = vperm.xlu0 %7992, %v3723_v58   ;;  %v12745_v58 = vld [vmem:[#allocation65_spill] sm:$0xff]  ;;  %v8355_v3 = vpop.eup %8354  ;;  %v11535_v60 = vpop.xlane.xlu1 %6826 }
 0x5b8   : > { %v3728_v31 = vsub.f32 %v12745_v58, %v3564_v14  ;;  %v11537_v48 = vpop.xlane.xlu0 %6802  ;;  %v3580_v14 = vrot.slane %v11500_v38, %v12687_v11 }
 0x5ba   : > { %v3732_v58 = vsub.f32 %v12748_v30, %v3580_v14  ;;  %v12750_v14 = vld [vmem:[#allocation73_spill] sm:$0xff]  ;;  %v12751_v30 = vld [vmem:[#allocation66_spill] sm:$0xff] }
 0x5bb   : > { %3953 = vperm.xlu1 %7993, %v3726_v57   ;;  %3950 = vperm.xlu0 %7992, %v3725_v8   ;;  %v3730_v57 = vsub.f32 %v12746_v52, %v3572_v62  ;;  %v11540_v8 = vmul.f32 0.6931472, %v8355_v3  ;;  %v11553_v62 = vpop.xlane.xlu1 %6874 }
 0x5bc   : > { %v11555_v5 = vpop.xlane.xlu0 %6850 }
 0x5bd   : > { %12747 = vst [vmem:[#allocation177_spill] sm:$0xff] %v11540_v8  ;;  %v3584_v52 = vrot.slane %v11540_v8, %v9091_v4 }
 0x5bf   : > { %3959 = vperm.xlu1 %7993, %v3728_v31   ;;  %3956 = vperm.xlu0 %7992, %v3727_v19   ;;  %v3731_v31 = vsub.f32 %v10801_v25, %v3576_v7  ;;  %v3588_v19 = vrot.slane %v11540_v8, %v12675_v17  ;;  %v3592_v25 = vrot.slane %v11540_v8, %v9848_v9  ;;  %v11563_v17 = vpop.xlane.xlu1 %6922 }
 0x5c0   : > { %v11565_v4 = vpop.xlane.xlu0 %6898 }
 0x5c1   : > { %v3734_v3 = vsub.f32 %v12749_v55, %v3588_v19  ;;  %v12753_v19 = vld [vmem:[#allocation67_spill] sm:$0xff]  ;;  %v3612_v55 = vrot.slane %v11540_v8, %v12687_v11 }
 0x5c3   : > { %3965 = vperm.xlu1 %7993, %v3730_v57   ;;  %3962 = vperm.xlu0 %7992, %v3729_v1   ;;  %v3733_v1 = vsub.f32 %v10835_v18, %v3584_v52  ;;  %v3596_v57 = vrot.slane %v11540_v8, %v12678_v0  ;;  %v3600_v18 = vrot.slane %v11540_v8, %v9864_v47  ;;  %v12752_v0 = vld [vmem:[#allocation75_spill] sm:$0xff] }
 0x5c5   : > { %v3736_v7 = vsub.f32 %v12750_v14, %v3596_v57  ;;  %v3737_v52 = vsub.f32 %v12753_v19, %v3600_v18  ;;  %v11581_v57 = vpop.xlane.xlu0 %6781 }
 0x5c7   : > { %3971 = vperm.xlu1 %7993, %v3732_v58   ;;  %3968 = vperm.xlu0 %7992, %v3731_v31   ;;  %v3735_v58 = vsub.f32 %v12751_v30, %v3592_v25  ;;  %v3604_v31 = vrot.slane %v11540_v8, %v12682_v44  ;;  %v12754_v44 = vld [vmem:[#allocation77_spill] sm:$0xff]  ;;  %v12755_v25 = vld [vmem:[#allocation19_spill] sm:$0xff] }
 0x5c8   : > { %v3740_v47 = vsub.f32 %v12754_v44, %v3612_v55 }
 0x5c9   : > { %v3738_v9 = vsub.f32 %v12752_v0, %v3604_v31 }
 0x5cb   : > { %3977 = vperm.xlu1 %7993, %v3734_v3   ;;  %3974 = vperm.xlu0 %7992, %v3733_v1   ;;  %v3608_v3 = vrot.slane %v11540_v8, %v9885_v6  ;;  %v11579_v1 = vpop.xlane.xlu1 %6805 }
 0x5cd   : > { %v3739_v14 = vsub.f32 %v12755_v25, %v3608_v3 }
 0x5cf   : > { %3983 = vperm.xlu1 %7993, %v3736_v7   ;;  %3980 = vperm.xlu0 %7992, %v3735_v58  }
 0x5d3   : > { %3989 = vperm.xlu1 %7993, %v3738_v9   ;;  %3986 = vperm.xlu0 %7992, %v3737_v52  }
 0x5d6   : > { %v3807_v7 = vpop.permute.xlu0 %3806  ;;  %v3810_v30 = vpop.permute.xlu1 %3809 }
 0x5d7   : > { %3995 = vperm.xlu1 %7993, %v3740_v47   ;;  %3992 = vperm.xlu0 %7992, %v3739_v14   ;;  %v4000_v6 = vrot.slane %v3807_v7, %v12571_v54  ;;  %v4004_v0 = vrot.slane %v3810_v30, %v12571_v54 }
 0x5d9   : > { %v4253_v55 = vsel %vm2085_vm2, %v4004_v0, %v4000_v6 }
 0x5da   : > { %v3813_v58 = vpop.permute.xlu0 %3812  ;;  %v3816_v31 = vpop.permute.xlu1 %3815 }
 0x5db   : > { %v4008_v19 = vrot.slane %v3813_v58, %v12571_v54  ;;  %v4012_v3 = vrot.slane %v3816_v31, %v12571_v54 }
 0x5dd   : > { %v4254_v44 = vsel %vm2087_vm3, %v4008_v19, %v4253_v55 }
 0x5de   : > { %v3819_v11 = vpop.permute.xlu0 %3818  ;;  %v3822_v18 = vpop.permute.xlu1 %3821  ;;  %v4255_v8 = vsel %vm2089_vm4, %v4012_v3, %v4254_v44 }
 0x5df   : > { %v4016_v47 = vrot.slane %v3819_v11, %v12571_v54  ;;  %v4020_v7 = vrot.slane %v3822_v18, %v12571_v54  ;;  %v6462_v44 = vpop.f32.mrf.mxu1 }
 0x5e1   : > { %v4256_v30 = vsel %vm2091_vm5, %v4016_v47, %v4255_v8 }
 0x5e2   : > { %v3825_v9 = vpop.permute.xlu0 %3824  ;;  %v3828_v52 = vpop.permute.xlu1 %3827  ;;  %v4257_v19 = vsel %vm2093_vm6, %v4020_v7, %v4256_v30  ;;  %v12756_v30 = vld [vmem:[#allocation7_spill] sm:$0xff] }
 0x5e3   : > { %v4024_v58 = vrot.slane %v3825_v9, %v12571_v54  ;;  %v4028_v11 = vrot.slane %v3828_v52, %v12571_v54  ;;  %vm3341_vm10 = vcmp.eq.s32.totalorder %v12583_v61, %v12756_v30 }
 0x5e5   : > { %v4258_v3 = vsel %vm2095_vm7, %v4024_v58, %v4257_v19  ;;  %v6464_v58 = vpop.f32.mrf.mxu1 }
 0x5e6   : > { %v3831_v25 = vpop.permute.xlu0 %3830  ;;  %v3834_v14 = vpop.permute.xlu1 %3833  ;;  %v4259_v34 = vsel %vm2097_vm8, %v4028_v11, %v4258_v3 }
 0x5e7   : > { %v4032_v38 = vrot.slane %v3831_v25, %v12571_v54  ;;  %v4036_v6 = vrot.slane %v3834_v14, %v12571_v54 }
 0x5e9   : > { %v4260_v18 = vsel %vm2085_vm2, %v4036_v6, %v4032_v38 }
 0x5ea   : > { %v3837_v0 = vpop.permute.xlu0 %3836  ;;  %v3840_v31 = vpop.permute.xlu1 %3839 }
 0x5eb   : > { %v4040_v55 = vrot.slane %v3837_v0, %v12571_v54  ;;  %v4044_v8 = vrot.slane %v3840_v31, %v12571_v54  ;;  %v4317_v31 = vsel %vm3341_vm10, %v4259_v34, 0.0 }
 0x5ed   : > { %v4261_v9 = vsel %vm2087_vm3, %v4040_v55, %v4260_v18  ;;  %v6463_v55 = vadd.f32 %v6462_v44, %v9108_v15  ;;  %v6465_v18 = vadd.f32 %v6464_v58, %v9117_v29  ;;  %v12757_v44 = vld [vmem:[#allocation12_spill] sm:$0xff]  ;;  %v12758_v58 = vld [vmem:[#allocation85_spill] sm:$0xff] }
 0x5ee   : > { %v3843_v47 = vpop.permute.xlu0 %3842  ;;  %v3846_v25 = vpop.permute.xlu1 %3845  ;;  %v4262_v7 = vsel %vm2089_vm4, %v4044_v8, %v4261_v9  ;;  %v4325_v9 = vsel %vm2156_vm9, %v4317_v31, 0.0  ;;  %vm3342_vm12 = vcmp.eq.s32.totalorder %v12583_v61, %v12757_v44  ;;  %v12759_v31 = vld [vmem:[#allocation101_spill] sm:$0xff] }
 0x5ef   : > { %v4048_v14 = vrot.slane %v3843_v47, %v12571_v54  ;;  %v4052_v52 = vrot.slane %v3846_v25, %v12571_v54  ;;  %v6594_v30 = vmax.f32 %v6465_v18, 0.0 }
 0x5f1   : > { %v4263_v38 = vsel %vm2091_vm5, %v4048_v14, %v4262_v7  ;;  %v6593_v7 = vmax.f32 %v6463_v55, 0.0  ;;  %v6734_v18 = vmul.f32 %v9132_v24, %v6594_v30 }
 0x5f2   : > { %v3849_v6 = vpop.permute.xlu0 %3848  ;;  %v3852_v0 = vpop.permute.xlu1 %3851  ;;  %v4264_v11 = vsel %vm2093_vm6, %v4052_v52, %v4263_v38 }
 0x5f3   : > { %v4056_v19 = vrot.slane %v3849_v6, %v12571_v54  ;;  %v4060_v3 = vrot.slane %v3852_v0, %v12571_v54  ;;  %v6733_v55 = vmul.f32 %v9127_v36, %v6593_v7 }
 0x5f5   : > { %v4265_v8 = vsel %vm2095_vm7, %v4056_v19, %v4264_v11 }
 0x5f6   : > { %v3855_v47 = vpop.permute.xlu0 %3854  ;;  %4326 = vadd.xlane.f32.xlu0 %v4325_v9  ;;  %v3858_v25 = vpop.permute.xlu1 %3857  ;;  %v4266_v15 = vsel %vm2097_vm8, %v4060_v3, %v4265_v8  ;;  %v12760_v9 = vld [vmem:[#allocation119_spill] sm:$0xff] }
 0x5f7   : > { %v4064_v14 = vrot.slane %v3855_v47, %v12571_v54  ;;  %v4068_v34 = vrot.slane %v3858_v25, %v12571_v54  ;;  %v4318_v19 = vsel %vm3342_vm12, %v4266_v15, 0.0  ;;  %v6924_v15 = vadd.f32 %v6734_v18, %v6733_v55 }
 0x5f8   : > { %v4328_v25 = vsel %vm2156_vm9, %v4318_v19, 0.0 }
 0x5f9   : > { %v4267_v29 = vsel %vm2085_vm2, %v4068_v34, %v4064_v14 }
 0x5fa   : > { %v3861_v52 = vpop.permute.xlu0 %3860  ;;  %6829 = vadd.xlane.f32.xlu0 %v12758_v58  ;;  %v3864_v38 = vpop.permute.xlu1 %3863 }
 0x5fb   : > { %v4072_v6 = vrot.slane %v3861_v52, %v12571_v54  ;;  %v4076_v0 = vrot.slane %v3864_v38, %v12571_v54  ;;  %6853 = vadd.xlane.f32.xlu1 %v12759_v31  ;;  %v12761_v52 = vld [vmem:[#allocation159_spill] sm:$0xff] }
 0x5fd   : > { %v4268_v11 = vsel %vm2087_vm3, %v4072_v6, %v4267_v29 }
 0x5fe   : > { %v4269_v3 = vsel %vm2089_vm4, %v4076_v0, %v4268_v11  ;;  %v3867_v8 = vpop.permute.xlu0 %3866  ;;  %6877 = vadd.xlane.f32.xlu0 %v12760_v9  ;;  %v3870_v47 = vpop.permute.xlu1 %3869 }
 0x5ff   : > { %v4080_v14 = vrot.slane %v3867_v8, %v12571_v54  ;;  %v4084_v34 = vrot.slane %v3870_v47, %v12571_v54  ;;  %4329 = vadd.xlane.f32.xlu1 %v4328_v25 }
 0x601   : > { %v4270_v36 = vsel %vm2091_vm5, %v4080_v14, %v4269_v3 }
 0x602   : > { %v4271_v24 = vsel %vm2093_vm6, %v4084_v34, %v4270_v36  ;;  %v3873_v7 = vpop.permute.xlu0 %3872  ;;  %6925 = vadd.xlane.f32.xlu0 %v6924_v15  ;;  %v3876_v30 = vpop.permute.xlu1 %3875 }
 0x603   : > { %v4088_v29 = vrot.slane %v3873_v7, %v12571_v54  ;;  %v4092_v44 = vrot.slane %v3876_v30, %v12571_v54  ;;  %6901 = vadd.xlane.f32.xlu1 %v12761_v52 }
 0x605   : > { %v4272_v58 = vsel %vm2095_vm7, %v4088_v29, %v4271_v24  ;;  %v7795_v24 = vld [vmem:[#allocation3] ss:$0 sm:$0xff] }
 0x606   : > { %v3879_v38 = vpop.permute.xlu0 %3878  ;;  %v3882_v6 = vpop.permute.xlu1 %3881  ;;  %v11644_v0 = vsel %vm2097_vm8, %v4092_v44, %v4272_v58 }
 0x607   : > { %v4096_v31 = vrot.slane %v3879_v38, %v12571_v54  ;;  %v4100_v19 = vrot.slane %v3882_v6, %v12571_v54 }
 0x609   : > { %v4274_v55 = vsel %vm2085_vm2, %v4100_v19, %v4096_v31 }
 0x60a   : > { %v3885_v18 = vpop.permute.xlu0 %3884  ;;  %v3888_v11 = vpop.permute.xlu1 %3887 }
 0x60b   : > { %v4104_v3 = vrot.slane %v3885_v18, %v12571_v54  ;;  %v4108_v8 = vrot.slane %v3888_v11, %v12571_v54 }
 0x60d   : > { %v4275_v9 = vsel %vm2087_vm3, %v4104_v3, %v4274_v55 }
 0x60e   : > { %v4276_v47 = vsel %vm2089_vm4, %v4108_v8, %v4275_v9  ;;  %v3891_v25 = vpop.permute.xlu0 %3890  ;;  %v3894_v14 = vpop.permute.xlu1 %3893 }
 0x60f   : > { %v4112_v34 = vrot.slane %v3891_v25, %v12571_v54  ;;  %v4116_v15 = vrot.slane %v3894_v14, %v12571_v54 }
 0x611   : > { %v4277_v36 = vsel %vm2091_vm5, %v4112_v34, %v4276_v47 }
 0x612   : > { %v4278_v7 = vsel %vm2093_vm6, %v4116_v15, %v4277_v36  ;;  %v3897_v30 = vpop.permute.xlu0 %3896  ;;  %v3900_v29 = vpop.permute.xlu1 %3899 }
 0x613   : > { %v4120_v44 = vrot.slane %v3897_v30, %v12571_v54  ;;  %v4124_v52 = vrot.slane %v3900_v29, %v12571_v54 }
 0x614   : > { %6934 = vperm.xlu1 %7993, %v7795_v24  }
 0x615   : > { %v4279_v58 = vsel %vm2095_vm7, %v4120_v44, %v4278_v7 }
 0x616   : > { %v3903_v38 = vpop.permute.xlu0 %3902  ;;  %v3906_v6 = vpop.permute.xlu1 %3905  ;;  %v11661_v31 = vsel %vm2097_vm8, %v4124_v52, %v4279_v58 }
 0x617   : > { %v4128_v3 = vrot.slane %v3903_v38, %v12571_v54  ;;  %v4132_v8 = vrot.slane %v3906_v6, %v12571_v54 }
 0x619   : > { %v4281_v14 = vsel %vm2085_vm2, %v4132_v8, %v4128_v3 }
 0x61a   : > { %v3909_v19 = vpop.permute.xlu0 %3908  ;;  %v3912_v55 = vpop.permute.xlu1 %3911 }
 0x61b   : > { %v4136_v9 = vrot.slane %v3909_v19, %v12571_v54  ;;  %v4140_v34 = vrot.slane %v3912_v55, %v12571_v54 }
 0x61d   : > { %v4282_v15 = vsel %vm2087_vm3, %v4136_v9, %v4281_v14 }
 0x61e   : > { %v3915_v18 = vpop.permute.xlu0 %3914  ;;  %v3918_v11 = vpop.permute.xlu1 %3917  ;;  %v4283_v44 = vsel %vm2089_vm4, %v4140_v34, %v4282_v15 }
 0x61f   : > { %v4144_v36 = vrot.slane %v3915_v18, %v12571_v54  ;;  %v4148_v52 = vrot.slane %v3918_v11, %v12571_v54 }
 0x621   : > { %v4284_v38 = vsel %vm2091_vm5, %v4144_v36, %v4283_v44 }
 0x622   : > { %v3921_v47 = vpop.permute.xlu0 %3920  ;;  %v3924_v25 = vpop.permute.xlu1 %3923  ;;  %v4285_v8 = vsel %vm2093_vm6, %v4148_v52, %v4284_v38  ;;  %v12762_v52 = vld [vmem:[#allocation14_spill] sm:$0xff] }
 0x623   : > { %v4152_v6 = vrot.slane %v3921_v47, %v12571_v54  ;;  %v4156_v9 = vrot.slane %v3924_v25, %v12571_v54  ;;  %vm3345_vm13 = vcmp.eq.s32.totalorder %v12583_v61, %v12762_v52 }
 0x625   : > { %v4286_v11 = vsel %vm2095_vm7, %v4152_v6, %v4285_v8 }
 0x626   : > { %v3927_v24 = vpop.permute.xlu0 %3926  ;;  %v3930_v7 = vpop.permute.xlu1 %3929 }
 0x627   : > { %v4160_v30 = vrot.slane %v3927_v24, %v12571_v54  ;;  %v4164_v29 = vrot.slane %v3930_v7, %v12571_v54 }
 0x629   : > { %v4288_v58 = vsel %vm2085_vm2, %v4164_v29, %v4160_v30  ;;  %v4287_v30 = vsel %vm2097_vm8, %v4156_v9, %v4286_v11 }
 0x62a   : > { %v3933_v19 = vpop.permute.xlu0 %3932  ;;  %v3936_v55 = vpop.permute.xlu1 %3935  ;;  %v4321_v6 = vsel %vm3345_vm13, %v4287_v30, 0.0 }
 0x62b   : > { %v4168_v18 = vrot.slane %v3933_v19, %v12571_v54  ;;  %v4172_v3 = vrot.slane %v3936_v55, %v12571_v54  ;;  %v4337_v8 = vsel %vm2156_vm9, %v4321_v6, 0.0 }
 0x62d   : > { %v4289_v14 = vsel %vm2087_vm3, %v4168_v18, %v4288_v58 }
 0x62e   : > { %v4290_v34 = vsel %vm2089_vm4, %v4172_v3, %v4289_v14  ;;  %v3939_v15 = vpop.permute.xlu0 %3938  ;;  %v3942_v36 = vpop.permute.xlu1 %3941 }
 0x62f   : > { %v4176_v47 = vrot.slane %v3939_v15, %v12571_v54  ;;  %v4180_v24 = vrot.slane %v3942_v36, %v12571_v54 }
 0x631   : > { %v4291_v7 = vsel %vm2091_vm5, %v4176_v47, %v4290_v34 }
 0x632   : > { %v4292_v29 = vsel %vm2093_vm6, %v4180_v24, %v4291_v7  ;;  %v3945_v44 = vpop.permute.xlu0 %3944  ;;  %v3948_v25 = vpop.permute.xlu1 %3947 }
 0x633   : > { %v4184_v58 = vrot.slane %v3945_v44, %v12571_v54  ;;  %v4188_v38 = vrot.slane %v3948_v25, %v12571_v54 }
 0x635   : > { %v4293_v19 = vsel %vm2095_vm7, %v4184_v58, %v4292_v29 }
 0x636   : > { %v3951_v55 = vpop.permute.xlu0 %3950  ;;  %v3954_v18 = vpop.permute.xlu1 %3953  ;;  %v11695_v3 = vsel %vm2097_vm8, %v4188_v38, %v4293_v19 }
 0x637   : > { %v4192_v9 = vrot.slane %v3951_v55, %v12571_v54  ;;  %v4196_v14 = vrot.slane %v3954_v18, %v12571_v54 }
 0x638   : > { %4338 = vadd.xlane.f32.xlu1 %v4337_v8  ;;  %v12763_v8 = vld [vmem:[#allocation17_spill] sm:$0xff] }
 0x639   : > { %v4295_v36 = vsel %vm2085_vm2, %v4196_v14, %v4192_v9  ;;  %vm3347_vm14 = vcmp.eq.s32.totalorder %v12583_v61, %v12763_v8 }
 0x63a   : > { %v3957_v11 = vpop.permute.xlu0 %3956  ;;  %v3960_v34 = vpop.permute.xlu1 %3959 }
 0x63b   : > { %v4200_v15 = vrot.slane %v3957_v11, %v12571_v54  ;;  %v4204_v47 = vrot.slane %v3960_v34, %v12571_v54 }
 0x63d   : > { %v4296_v24 = vsel %vm2087_vm3, %v4200_v15, %v4295_v36 }
 0x63e   : > { %v3963_v7 = vpop.permute.xlu0 %3962  ;;  %v3966_v30 = vpop.permute.xlu1 %3965  ;;  %v4297_v44 = vsel %vm2089_vm4, %v4204_v47, %v4296_v24 }
 0x63f   : > { %v4208_v29 = vrot.slane %v3963_v7, %v12571_v54  ;;  %v4212_v25 = vrot.slane %v3966_v30, %v12571_v54 }
 0x641   : > { %v4298_v52 = vsel %vm2091_vm5, %v4208_v29, %v4297_v44 }
 0x642   : > { %v3969_v58 = vpop.permute.xlu0 %3968  ;;  %v3972_v38 = vpop.permute.xlu1 %3971  ;;  %v4299_v55 = vsel %vm2093_vm6, %v4212_v25, %v4298_v52 }
 0x643   : > { %v4216_v6 = vrot.slane %v3969_v58, %v12571_v54  ;;  %v4220_v19 = vrot.slane %v3972_v38, %v12571_v54 }
 0x645   : > { %v4300_v18 = vsel %vm2095_vm7, %v4216_v6, %v4299_v55 }
 0x646   : > { %v3975_v9 = vpop.permute.xlu0 %3974  ;;  %v3978_v14 = vpop.permute.xlu1 %3977  ;;  %v4301_v11 = vsel %vm2097_vm8, %v4220_v19, %v4300_v18 }
 0x647   : > { %v4323_v34 = vsel %vm3347_vm14, %v4301_v11, 0.0  ;;  %v4224_v15 = vrot.slane %v3975_v9, %v12571_v54  ;;  %v4228_v36 = vrot.slane %v3978_v14, %v12571_v54 }
 0x648   : > { %v4343_v47 = vsel %vm2156_vm9, %v4323_v34, 0.0 }
 0x649   : > { %4344 = vadd.xlane.f32.xlu1 %v4343_v47  ;;  %v4302_v44 = vsel %vm2085_vm2, %v4228_v36, %v4224_v15 }
 0x64a   : > { %v3981_v24 = vpop.permute.xlu0 %3980  ;;  %v3984_v7 = vpop.permute.xlu1 %3983 }
 0x64b   : > { %v4232_v30 = vrot.slane %v3981_v24, %v12571_v54  ;;  %v4236_v29 = vrot.slane %v3984_v7, %v12571_v54 }
 0x64d   : > { %v4303_v25 = vsel %vm2087_vm3, %v4232_v30, %v4302_v44  ;;  %v12765_v30 = vld [vmem:[#allocation134_spill] sm:$0xff]  ;;  %v12766_v44 = vld [vmem:[#allocation144_spill] sm:$0xff] }
 0x64e   : > { %v4304_v52 = vsel %vm2089_vm4, %v4236_v29, %v4303_v25  ;;  %v3987_v58 = vpop.permute.xlu0 %3986  ;;  %v3990_v38 = vpop.permute.xlu1 %3989 }
 0x64f   : > { %v4240_v6 = vrot.slane %v3987_v58, %v12571_v54  ;;  %v4244_v19 = vrot.slane %v3990_v38, %v12571_v54 }
 0x651   : > { %v4305_v55 = vsel %vm2091_vm5, %v4240_v6, %v4304_v52  ;;  %v12767_v52 = vld [vmem:[#allocation135_spill] sm:$0xff] }
 0x652   : > { %v4306_v18 = vsel %vm2093_vm6, %v4244_v19, %v4305_v55  ;;  %v3993_v8 = vpop.permute.xlu0 %3992  ;;  %v3996_v9 = vpop.permute.xlu1 %3995 }
 0x653   : > { %v4248_v14 = vrot.slane %v3993_v8, %v12571_v54  ;;  %v4252_v11 = vrot.slane %v3996_v9, %v12571_v54 }
 0x655   : > { %v4307_v34 = vsel %vm2095_vm7, %v4248_v14, %v4306_v18 }
 0x656   : > { %v11731_v15 = vsel %vm2097_vm8, %v4252_v11, %v4307_v34 }
 0x684   : > { %v6854_v36 = vpop.xlane.xlu1 %6853 }
 0x688   : > { %v11733_v47 = vpop.xlane.xlu1 %4329 }
 0x689   : > { %12764 = vst [vmem:[#allocation162_spill] sm:$0xff] %v11733_v47 }
 0x68c   : > { %v11735_v24 = vpop.xlane.xlu1 %6901 }
 0x690   : > { %v11737_v7 = vpop.permute.xlu1 %6934 }
 0x691   : > { %v6969_v29 = vadd.f32 %v11737_v7, %v12765_v30  ;;  %v6970_v25 = vadd.f32 %v11737_v7, %v12766_v44  ;;  %v6971_v58 = vadd.f32 %v11737_v7, %v12767_v52  ;;  %v6972_v38 = vadd.f32 %v11737_v7, %v11375_v27  ;;  %v12770_v44 = vld [vmem:[#allocation82_spill] sm:$0xff]  ;;  %v12771_v52 = vld [vmem:[#allocation127_spill] sm:$0xff] }
 0x692   : > { %v6973_v6 = vadd.f32 %v11737_v7, %v11424_v53  ;;  %v6974_v19 = vadd.f32 %v11737_v7, %v11496_v33  ;;  %v6975_v55 = vadd.f32 %v11737_v7, %v11555_v5  ;;  %v6976_v18 = vadd.f32 %v11737_v7, %v6854_v36  ;;  %v12768_v33 = vld [vmem:[#allocation80_spill] sm:$0xff]  ;;  %v12769_v5 = vld [vmem:[#allocation126_spill] sm:$0xff] }
 0x693   : > { %v7196_v8 = vrot.slane %v6969_v29, %v12571_v54  ;;  %v7200_v9 = vrot.slane %v6970_v25, %v12571_v54  ;;  %v7204_v14 = vrot.slane %v6971_v58, %v12571_v54  ;;  %v7208_v11 = vrot.slane %v6972_v38, %v12571_v54  ;;  %v12772_v38 = vld [vmem:[#allocation84_spill] sm:$0xff] }
 0x694   : > { %v7212_v27 = vrot.slane %v6973_v6, %v12571_v54  ;;  %v7216_v53 = vrot.slane %v6974_v19, %v12571_v54  ;;  %v6937_v30 = vadd.f32 %v11737_v7, %v12768_v33  ;;  %v6938_v36 = vadd.f32 %v11737_v7, %v12769_v5  ;;  %v12773_v19 = vld [vmem:[#allocation128_spill] sm:$0xff] }
 0x695   : > { %v7349_v34 = vsel %vm2085_vm2, %v7200_v9, %v7196_v8  ;;  %v6939_v29 = vadd.f32 %v11737_v7, %v12770_v44  ;;  %v6940_v58 = vadd.f32 %v11737_v7, %v12771_v52  ;;  %v6941_v6 = vadd.f32 %v11737_v7, %v12772_v38 }
 0x696   : > { %v7350_v25 = vsel %vm2087_vm3, %v7204_v14, %v7349_v34  ;;  %v6942_v8 = vadd.f32 %v11737_v7, %v12773_v19  ;;  %v7220_v9 = vrot.slane %v6975_v55, %v12571_v54  ;;  %v7224_v33 = vrot.slane %v6976_v18, %v12571_v54  ;;  %v12774_v14 = vld [vmem:[#allocation86_spill] sm:$0xff]  ;;  %v12775_v19 = vld [vmem:[#allocation129_spill] sm:$0xff] }
 0x697   : > { %v7351_v5 = vsel %vm2089_vm4, %v7208_v11, %v7350_v25  ;;  %v7068_v47 = vrot.slane %v6937_v30, %v12571_v54  ;;  %v6943_v34 = vadd.f32 %v11737_v7, %v12774_v14  ;;  %v7072_v52 = vrot.slane %v6938_v36, %v12571_v54 }
 0x698   : > { %v7352_v44 = vsel %vm2091_vm5, %v7212_v27, %v7351_v5  ;;  %v7076_v38 = vrot.slane %v6939_v29, %v12571_v54  ;;  %v6944_v55 = vadd.f32 %v11737_v7, %v12775_v19  ;;  %v7080_v18 = vrot.slane %v6940_v58, %v12571_v54  ;;  %v12776_v5 = vld [vmem:[#allocation102_spill] sm:$0xff]  ;;  %v12778_v19 = vld [vmem:[#allocation103_spill] sm:$0xff] }
 0x699   : > { %v7353_v45 = vsel %vm2093_vm6, %v7216_v53, %v7352_v44  ;;  %v7084_v11 = vrot.slane %v6941_v6, %v12571_v54  ;;  %v7088_v27 = vrot.slane %v6942_v8, %v12571_v54  ;;  %v7321_v25 = vsel %vm2085_vm2, %v7072_v52, %v7068_v47  ;;  %v12777_v44 = vld [vmem:[#allocation130_spill] sm:$0xff]  ;;  %v12779_v8 = vld [vmem:[#allocation131_spill] sm:$0xff] }
 0x69a   : > { %v7354_v30 = vsel %vm2095_vm7, %v7220_v9, %v7353_v45  ;;  %v6945_v36 = vadd.f32 %v11737_v7, %v12776_v5  ;;  %v7322_v53 = vsel %vm2087_vm3, %v7076_v38, %v7321_v25  ;;  %v6946_v14 = vadd.f32 %v11737_v7, %v12777_v44 }
 0x69b   : > { %v7355_v29 = vsel %vm2097_vm8, %v7224_v33, %v7354_v30  ;;  %v6947_v58 = vadd.f32 %v11737_v7, %v12778_v19  ;;  %v7323_v45 = vsel %vm2089_vm4, %v7080_v18, %v7322_v53  ;;  %v6948_v47 = vadd.f32 %v11737_v7, %v12779_v8  ;;  %v12780_v19 = vld [vmem:[#allocation123_spill] sm:$0xff] }
 0x69c   : > { %v7397_v6 = vsel %vm2156_vm9, %v7355_v29, -inf  ;;  %v6949_v9 = vadd.f32 %v11737_v7, %v11404_v13  ;;  %v7092_v33 = vrot.slane %v6943_v34, %v12571_v54  ;;  %v7096_v52 = vrot.slane %v6944_v55, %v12571_v54 }
 0x69d   : > { %7398 = vmax.xlane.f32.xlu1 %v7397_v6  ;;  %v7324_v38 = vsel %vm2091_vm5, %v7084_v11, %v7323_v45  ;;  %v6950_v30 = vadd.f32 %v11737_v7, %v11453_v40  ;;  %v7100_v18 = vrot.slane %v6945_v36, %v12571_v54  ;;  %v7104_v5 = vrot.slane %v6946_v14, %v12571_v54  ;;  %v12782_v45 = vld [vmem:[#allocation125_spill] sm:$0xff] }
 0x69e   : > { %v7325_v25 = vsel %vm2093_vm6, %v7088_v27, %v7324_v38  ;;  %v7108_v29 = vrot.slane %v6947_v58, %v12571_v54  ;;  %v6951_v34 = vadd.f32 %v11737_v7, %v11525_v12  ;;  %v6952_v55 = vadd.f32 %v11737_v7, %v11581_v57  ;;  %v12781_v58 = vld [vmem:[#allocation132_spill] sm:$0xff] }
 0x69f   : > { %v7326_v13 = vsel %vm2095_vm7, %v7092_v33, %v7325_v25  ;;  %v7112_v11 = vrot.slane %v6948_v47, %v12571_v54  ;;  %v7116_v27 = vrot.slane %v6949_v9, %v12571_v54  ;;  %v7120_v36 = vrot.slane %v6950_v30, %v12571_v54  ;;  %v11842_v25 = vpop.xlane.xlu0 %4326 }
 0x6a0   : > { %v7327_v40 = vsel %vm2097_vm8, %v7096_v52, %v7326_v13  ;;  %v7328_v53 = vsel %vm2085_vm2, %v7104_v5, %v7100_v18  ;;  %v6953_v12 = vadd.f32 %v11737_v7, %v12780_v19  ;;  %v6954_v57 = vadd.f32 %v11737_v7, %v12781_v58 }
 0x6a1   : > { %v7385_v44 = vsel %vm2156_vm9, %v7327_v40, -inf  ;;  %v7329_v14 = vsel %vm2087_vm3, %v7108_v29, %v7328_v53  ;;  %v6955_v8 = vadd.f32 %v11737_v7, %v12782_v45  ;;  %v6956_v47 = vadd.f32 %v11737_v7, %v11293_v42 }
 0x6a2   : > { %7386 = vmax.xlane.f32.xlu0 %v7385_v44  ;;  %v7330_v6 = vsel %vm2089_vm4, %v7112_v11, %v7329_v14  ;;  %v6957_v9 = vadd.f32 %v11737_v7, %v11412_v35  ;;  %v7124_v33 = vrot.slane %v6951_v34, %v12571_v54  ;;  %v7128_v52 = vrot.slane %v6952_v55, %v12571_v54  ;;  %v12783_v44 = vld [vmem:[#allocation133_spill] sm:$0xff] }
 0x6a3   : > { %v7331_v38 = vsel %vm2091_vm5, %v7116_v27, %v7330_v6  ;;  %v6958_v30 = vadd.f32 %v11737_v7, %v11480_v51  ;;  %v7132_v5 = vrot.slane %v6953_v12, %v12571_v54  ;;  %v7136_v42 = vrot.slane %v6954_v57, %v12571_v54  ;;  %v12784_v14 = vld [vmem:[#allocation141_spill] sm:$0xff]  ;;  %v12785_v12 = vld [vmem:[#allocation143_spill] sm:$0xff] }
 0x6a4   : > { %v7332_v18 = vsel %vm2093_vm6, %v7120_v36, %v7331_v38  ;;  %v7140_v29 = vrot.slane %v6955_v8, %v12571_v54  ;;  %v6959_v13 = vadd.f32 %v11737_v7, %v11537_v48  ;;  %v6960_v34 = vadd.f32 %v11737_v7, %v11579_v1 }
 0x6a5   : > { %v7333_v35 = vsel %vm2095_vm7, %v7124_v33, %v7332_v18  ;;  %v7144_v51 = vrot.slane %v6956_v47, %v12571_v54  ;;  %v7148_v11 = vrot.slane %v6957_v9, %v12571_v54  ;;  %v7152_v40 = vrot.slane %v6958_v30, %v12571_v54  ;;  %v6830_v33 = vpop.xlane.xlu0 %6829 }
 0x6a6   : > { %v7334_v55 = vsel %vm2097_vm8, %v7128_v52, %v7333_v35  ;;  %v7335_v27 = vsel %vm2085_vm2, %v7136_v42, %v7132_v5  ;;  %v6961_v48 = vadd.f32 %v11737_v7, %v12783_v44  ;;  %v6962_v1 = vadd.f32 %v11737_v7, %v12784_v14 }
 0x6a7   : > { %v7388_v36 = vsel %vm2156_vm9, %v7334_v55, -inf  ;;  %v7336_v53 = vsel %vm2087_vm3, %v7140_v29, %v7335_v27  ;;  %v6963_v58 = vadd.f32 %v11737_v7, %v12785_v12  ;;  %v6964_v57 = vadd.f32 %v11737_v7, %v11270_v23 }
 0x6a8   : > { %7389 = vmax.xlane.f32.xlu0 %v7388_v36  ;;  %v7337_v19 = vsel %vm2089_vm4, %v7144_v51, %v7336_v53  ;;  %v6965_v6 = vadd.f32 %v11737_v7, %v11420_v39  ;;  %v7156_v45 = vrot.slane %v6959_v13, %v12571_v54  ;;  %v7160_v8 = vrot.slane %v6960_v34, %v12571_v54  ;;  %v12786_v51 = vld [vmem:[#allocation149_spill] sm:$0xff]  ;;  %v12788_v36 = vld [vmem:[#allocation168_spill] sm:$0xff] }
 0x6a9   : > { %v7338_v47 = vsel %vm2091_vm5, %v7148_v11, %v7337_v19  ;;  %v6966_v9 = vadd.f32 %v11737_v7, %v11472_v46  ;;  %v7164_v38 = vrot.slane %v6961_v48, %v12571_v54  ;;  %v7168_v30 = vrot.slane %v6962_v1, %v12571_v54  ;;  %v12787_v11 = vld [vmem:[#allocation155_spill] sm:$0xff]  ;;  %v12789_v48 = vld [vmem:[#allocation8_spill] sm:$0xff] }
 0x6aa   : > { %v7339_v52 = vsel %vm2093_vm6, %v7152_v40, %v7338_v47  ;;  %v7172_v23 = vrot.slane %v6963_v58, %v12571_v54  ;;  %v6967_v18 = vadd.f32 %v11737_v7, %v11535_v60  ;;  %v6968_v5 = vadd.f32 %v11737_v7, %v6830_v33 }
 0x6ab   : > { %v7340_v39 = vsel %vm2095_vm7, %v7156_v45, %v7339_v52  ;;  %v7176_v46 = vrot.slane %v6964_v57, %v12571_v54  ;;  %v7180_v29 = vrot.slane %v6965_v6, %v12571_v54  ;;  %v7342_v35 = vsel %vm2085_vm2, %v7168_v30, %v7164_v38  ;;  %v12790_v45 = vld [vmem:[#allocation9_spill] sm:$0xff] }
 0x6ac   : > { %v7341_v42 = vsel %vm2097_vm8, %v7160_v8, %v7340_v39  ;;  %v7343_v34 = vsel %vm2087_vm3, %v7172_v23, %v7342_v35  ;;  %v6977_v55 = vadd.f32 %v11737_v7, %v12786_v51  ;;  %v6978_v60 = vadd.f32 %v11737_v7, %v12787_v11  ;;  %v12791_v39 = vld [vmem:[#allocation176_spill] sm:$0xff]  ;;  %v12794_v35 = vld [vmem:[#allocation10_spill] sm:$0xff]  ;;  %v6878_v51 = vpop.xlane.xlu0 %6877 }
 0x6ad   : > { %v7391_v13 = vsel %vm2156_vm9, %v7341_v42, -inf  ;;  %v7184_v40 = vrot.slane %v6966_v9, %v12571_v54  ;;  %v7344_v27 = vsel %vm2089_vm4, %v7176_v46, %v7343_v34  ;;  %v6979_v53 = vadd.f32 %v11737_v7, %v12788_v36  ;;  %v12793_v42 = vld [vmem:[#allocation189_spill] sm:$0xff] }
 0x6ae   : > { %7392 = vmax.xlane.f32.xlu0 %v7391_v13  ;;  %v6980_v44 = vadd.f32 %v11737_v7, %v11342_v16  ;;  %vm3343_vm15 = vcmp.eq.s32.totalorder %v12583_v61, %v12789_v48  ;;  %v7188_v14 = vrot.slane %v6967_v18, %v12571_v54  ;;  %v7192_v1 = vrot.slane %v6968_v5, %v12571_v54  ;;  %v12792_v5 = vld [vmem:[#allocation183_spill] sm:$0xff] }
 0x6af   : > { %v7345_v19 = vsel %vm2091_vm5, %v7180_v29, %v7344_v27  ;;  %v7228_v58 = vrot.slane %v6977_v55, %v12571_v54  ;;  %v7232_v57 = vrot.slane %v6978_v60, %v12571_v54  ;;  %v7236_v6 = vrot.slane %v6979_v53, %v12571_v54 }
 0x6b0   : > { %v7346_v12 = vsel %vm2093_vm6, %v7184_v40, %v7345_v19  ;;  %vm3344_vm0 = vcmp.eq.s32.totalorder %v12583_v61, %v12790_v45  ;;  %v4319_v8 = vsel %vm3343_vm15, %v11644_v0, 0.0  ;;  %v6981_v47 = vadd.f32 %v11737_v7, %v11451_v49  ;;  %v12795_v19 = vld [vmem:[#allocation24_spill] sm:$0xff] }
 0x6b1   : > { %v7347_v16 = vsel %vm2095_vm7, %v7188_v14, %v7346_v12  ;;  %v4320_v33 = vsel %vm3344_vm0, %v11661_v31, 0.0  ;;  %v7240_v52 = vrot.slane %v6980_v44, %v12571_v54  ;;  %v7356_v38 = vsel %vm2085_vm2, %v7232_v57, %v7228_v58  ;;  %v12796_v12 = vld [vmem:[#allocation23_spill] sm:$0xff] }
 0x6b2   : > { %v7348_v9 = vsel %vm2097_vm8, %v7192_v1, %v7347_v16  ;;  %v7357_v23 = vsel %vm2087_vm3, %v7236_v6, %v7356_v38  ;;  %v6985_v18 = vadd.f32 %v11737_v7, %v12791_v39  ;;  %v6986_v0 = vadd.f32 %v11737_v7, %v12792_v5 }
 0x6b3   : > { %v7394_v30 = vsel %vm2156_vm9, %v7348_v9, -inf  ;;  %v6982_v49 = vadd.f32 %v11737_v7, %v11482_v56  ;;  %v7358_v31 = vsel %vm2089_vm4, %v7240_v52, %v7357_v23  ;;  %v6987_v46 = vadd.f32 %v11737_v7, %v12793_v42 }
 0x6b4   : > { %7395 = vmax.xlane.f32.xlu0 %v7394_v30  ;;  %v6988_v29 = vadd.f32 %v11737_v7, %v11394_v50  ;;  %vm3346_vm1 = vcmp.eq.s32.totalorder %v12583_v61, %v12794_v35  ;;  %v7244_v13 = vrot.slane %v6981_v47, %v12571_v54  ;;  %v6989_v34 = vadd.f32 %v11737_v7, %v11443_v22 }
 0x6b5   : > { %v4331_v55 = vsel %vm2156_vm9, %v4319_v8, 0.0  ;;  %v7260_v56 = vrot.slane %v6985_v18, %v12571_v54  ;;  %v7264_v11 = vrot.slane %v6986_v0, %v12571_v54  ;;  %v7268_v60 = vrot.slane %v6987_v46, %v12571_v54 }
 0x6b6   : > { %v4334_v40 = vsel %vm2156_vm9, %v4320_v33, 0.0  ;;  %v6983_v50 = vadd.f32 %v11737_v7, %v11553_v62  ;;  %v6984_v27 = vadd.f32 %v11737_v7, %v6878_v51  ;;  %v7359_v36 = vsel %vm2091_vm5, %v7244_v13, %v7358_v31 }
 0x6b7   : > { %v7248_v22 = vrot.slane %v6982_v49, %v12571_v54  ;;  %v6990_v53 = vadd.f32 %v11737_v7, %v11509_v37  ;;  %v7272_v44 = vrot.slane %v6988_v29, %v12571_v54  ;;  %v7363_v48 = vsel %vm2085_vm2, %v7264_v11, %v7260_v56 }
 0x6b8   : > { %4332 = vadd.xlane.f32.xlu0 %v4331_v55  ;;  %v7276_v14 = vrot.slane %v6989_v34, %v12571_v54  ;;  %v7364_v1 = vsel %vm2087_vm3, %v7268_v60, %v7363_v48  ;;  %v6993_v62 = vadd.f32 %v11737_v7, %v12795_v19  ;;  %v6994_v58 = vadd.f32 %v11737_v7, %v12796_v12  ;;  %v6926_v55 = vpop.xlane.xlu0 %6925  ;;  %v12797_v60 = vld [vmem:[#allocation11_spill] sm:$0xff]  ;;  %v12799_v48 = vld [vmem:[#allocation60_spill] sm:$0xff] }
 0x6b9   : > { %v7360_v57 = vsel %vm2093_vm6, %v7248_v22, %v7359_v36  ;;  %v7365_v6 = vsel %vm2089_vm4, %v7272_v44, %v7364_v1  ;;  %v6995_v37 = vadd.f32 %v11737_v7, %v11077_v26  ;;  %v6996_v45 = vadd.f32 %v11737_v7, %v11355_v28 }
 0x6ba   : > { %v4322_v16 = vsel %vm3346_vm1, %v11695_v3, 0.0  ;;  %v7252_v8 = vrot.slane %v6983_v50, %v12571_v54  ;;  %v6991_v47 = vadd.f32 %v11737_v7, %v11565_v4  ;;  %v7366_v9 = vsel %vm2091_vm5, %v7276_v14, %v7365_v6 }
 0x6bb   : > { %v7280_v33 = vrot.slane %v6990_v53, %v12571_v54  ;;  %v7292_v26 = vrot.slane %v6993_v62, %v12571_v54  ;;  %v7296_v52 = vrot.slane %v6994_v58, %v12571_v54  ;;  %v7300_v28 = vrot.slane %v6995_v37, %v12571_v54  ;;  %v12800_v62 = vld [vmem:[#allocation195_spill] sm:$0xff]  ;;  %v12802_v37 = vld [vmem:[#allocation182_spill] sm:$0xff] }
 0x6bc   : > { %4335 = vadd.xlane.f32.xlu0 %v4334_v40  ;;  %v7256_v38 = vrot.slane %v6984_v27, %v12571_v54  ;;  %v7361_v3 = vsel %vm2095_vm7, %v7252_v8, %v7360_v57  ;;  %v6997_v30 = vadd.f32 %v11737_v7, %v11470_v41  ;;  %v6992_v4 = vadd.f32 %v11737_v7, %v11735_v24  ;;  %v12801_v57 = vld [vmem:[#allocation63_spill] sm:$0xff] }
 0x6bd   : > { %v7367_v23 = vsel %vm2093_vm6, %v7280_v33, %v7366_v9  ;;  %v7304_v39 = vrot.slane %v6996_v45, %v12571_v54  ;;  %v7370_v18 = vsel %vm2085_vm2, %v7296_v52, %v7292_v26  ;;  %v4340_v5 = vsel %vm2156_vm9, %v4322_v16, 0.0  ;;  %v12803_v45 = vld [vmem:[#allocation45_spill] sm:$0xff] }
 0x6be   : > { %v7284_v0 = vrot.slane %v6991_v47, %v12571_v54  ;;  %v7371_v49 = vsel %vm2087_vm3, %v7300_v28, %v7370_v18  ;;  %v7362_v31 = vsel %vm2097_vm8, %v7256_v38, %v7361_v3  ;;  %v6998_v41 = vadd.f32 %v11737_v7, %v11527_v32  ;;  %v12804_v47 = vld [vmem:[#allocation79_spill] sm:$0xff]  ;;  %v12805_v28 = vld [vmem:[#allocation70_spill] sm:$0xff] }
 0x6bf   : > { %v7372_v24 = vsel %vm2089_vm4, %v7304_v39, %v7371_v49  ;;  %v7308_v46 = vrot.slane %v6997_v30, %v12571_v54  ;;  %v7288_v29 = vrot.slane %v6992_v4, %v12571_v54  ;;  %v7400_v35 = vsel %vm2156_vm9, %v7362_v31, -inf  ;;  %v12806_v3 = vld [vmem:[#allocation146_spill] sm:$0xff]  ;;  %v12807_v4 = vld [vmem:[#allocation76_spill] sm:$0xff]  ;;  %v12808_v18 = vld [vmem:[#allocation139_spill] sm:$0xff] }
 0x6c0   : > { %4341 = vadd.xlane.f32.xlu0 %v4340_v5  ;;  %v7368_v42 = vsel %vm2095_vm7, %v7284_v0, %v7367_v23  ;;  %v6999_v13 = vadd.f32 %v11737_v7, %v11563_v17  ;;  %v7312_v32 = vrot.slane %v6998_v41, %v12571_v54  ;;  %v7000_v56 = vadd.f32 %v11737_v7, %v6926_v55  ;;  %v12809_v0 = vld [vmem:[#allocation178_spill] sm:$0xff] }
 0x6c1   : > { %v7373_v34 = vsel %vm2091_vm5, %v7308_v46, %v7372_v24  ;;  %v7369_v51 = vsel %vm2097_vm8, %v7288_v29, %v7368_v42  ;;  %vm3348_vm2 = vcmp.eq.s32.totalorder %v12583_v61, %v12797_v60  ;;  %v12798_v61 = vld [vmem:[#allocation192_spill] sm:$0xff]  ;;  %vm7409_vm3 = vcmask 7168   ;;  %v12810_v49 = vld [vmem:[#allocation194_spill] sm:$0xff] }
 0x6c2   : > { %v7374_v11 = vsel %vm2093_vm6, %v7312_v32, %v7373_v34  ;;  %v7403_v40 = vsel %vm2156_vm9, %v7369_v51, -inf  ;;  %v7316_v50 = vrot.slane %v6999_v13, %v12571_v54  ;;  %v4324_v17 = vsel %vm3348_vm2, %v11731_v15, 0.0  ;;  %v4339_v15 = vpop.xlane.xlu1 %4338  ;;  %v12811_v24 = vld [vmem:[#allocation150_spill] sm:$0xff]  ;;  %v12812_v46 = vld [vmem:[#allocation148_spill] sm:$0xff]  ;;  %v12814_v34 = vld [vmem:[#allocation53_spill] sm:$0xff] }
 0x6c3   : > { %v7320_v36 = vrot.slane %v7000_v56, %v12571_v54  ;;  %v4346_v22 = vsel %vm2156_vm9, %v4324_v17, 0.0  ;;  %8356 = vrcp.f32 %v12798_v61  ;;  %vm7418_vm4 = vcmask 15360   ;;  %v12815_v55 = vld [vmem:[#allocation138_spill] sm:$0xff]  ;;  %v12817_v17 = vld [vmem:[#allocation171_spill] sm:$0xff] }
 0x6c4   : > { %7401 = vmax.xlane.f32.xlu0 %v7400_v35  ;;  %v7375_v27 = vsel %vm2095_vm7, %v7316_v50, %v7374_v11  ;;  %8358 = vrcp.f32 %v11305_v59  ;;  %vm7427_vm5 = vcmask 23552   ;;  %vm7436_vm6 = vcmask 31744   ;;  %v12813_v35 = vld [vmem:[#allocation162_spill] sm:$0xff]  ;;  %v12816_v11 = vld [vmem:[#allocation184_spill] sm:$0xff] }
 0x6c5   : > { %v7376_v7 = vsel %vm2097_vm8, %v7320_v36, %v7375_v27  ;;  %8360 = vrcp.f32 %v11263_v43  ;;  %vm7445_vm7 = vcmask 39936   ;;  %v12818_v36 = vld [vmem:[#allocation25_spill] sm:$0xff] }
 0x6c6   : > { %v7406_v53 = vsel %vm2156_vm9, %v7376_v7, -inf  ;;  %8362 = vrcp.f32 %v12626_v21  ;;  %v12819_v7 = vld [vmem:[#allocation136_spill] sm:$0xff] }
 0x6c7   : > { %8364 = vrcp.f32 %v11268_v20 }
 0x6c8   : > { %7404 = vmax.xlane.f32.xlu0 %v7403_v40  ;;  %8366 = vrcp.f32 %v12799_v48 }
 0x6c9   : > { %8368 = vrcp.f32 %v12807_v4 }
 0x6ca   : > { %8370 = vrcp.f32 %v12809_v0 }
 0x6cb   : > { %8372 = vrcp.f32 %v12812_v46  ;;  %v12835_v46 = vld [vmem:[#allocation154_spill] sm:$0xff] }
 0x6cc   : > { %4347 = vadd.xlane.f32.xlu0 %v4346_v22  ;;  %8374 = vrcp.f32 %v12816_v11 }
 0x6cd   : > { %8376 = vrcp.f32 %v12817_v17  ;;  %v12840_v17 = vld [vmem:[#allocation161_spill] sm:$0xff] }
 0x6ce   : > { %8378 = vrcp.f32 %v12818_v36 }
 0x6d0   : > { %7407 = vmax.xlane.f32.xlu0 %v7406_v53  ;;  %v8357_v54 = vpop.eup %8356 }
 0x6d1   : > { %v8359_v44 = vpop.eup %8358  ;;  %v5511_v12 = vmul.f32 %v8357_v54, %v12800_v62  ;;  %v12820_v54 = vld [vmem:[#allocation190_spill] sm:$0xff] }
 0x6d2   : > { %v5022_v14 = vmul.f32 %v8359_v44, %v11316_v2  ;;  %v12019_v1 = vpop.xlane.xlu1 %4344  ;;  %v8361_v19 = vpop.eup %8360  ;;  %8380 = vrcp.f32 %v12820_v54  ;;  %v12821_v44 = vld [vmem:[#allocation181_spill] sm:$0xff] }
 0x6d3   : > { %v8363_v43 = vpop.eup %8362  ;;  %v5014_v59 = vmul.f32 %v8361_v19, %v11266_v63  ;;  %v5522_v2 = vsub.f32 %v12801_v57, %v5511_v12  ;;  %v12823_v19 = vld [vmem:[#allocation142_spill] sm:$0xff]  ;;  %v12824_v12 = vld [vmem:[#allocation137_spill] sm:$0xff] }
 0x6d4   : > { %v5033_v21 = vsub.f32 %v11422_v10, %v5022_v14  ;;  %v5503_v10 = vmul.f32 %v8363_v43, %v12802_v37  ;;  %v8365_v63 = vpop.eup %8364  ;;  %v12822_v14 = vld [vmem:[#allocation147_spill] sm:$0xff] }
 0x6d5   : > { %v5029_v9 = vsub.f32 %v12804_v47, %v5014_v59  ;;  %v5016_v30 = vmul.f32 %v8365_v63, %v12806_v3  ;;  %v8367_v39 = vpop.eup %8366  ;;  %8382 = vrcp.f32 %v12822_v14  ;;  %v12831_v3 = vld [vmem:[#allocation196_spill] sm:$0xff]  ;;  %v12842_v14 = vld [vmem:[#allocation151_spill] sm:$0xff] }
 0x6d6   : > { %v5518_v38 = vsub.f32 %v12805_v28, %v5503_v10  ;;  %v5505_v31 = vmul.f32 %v8367_v39, %v12810_v49  ;;  %v8369_v27 = vpop.eup %8368  ;;  %v12827_v10 = vld [vmem:[#allocation152_spill] sm:$0xff]  ;;  %v12830_v28 = vld [vmem:[#allocation71_spill] sm:$0xff] }
 0x6d7   : > { %v5030_v42 = vsub.f32 %v12811_v24, %v5016_v30  ;;  %v8371_v22 = vpop.eup %8370  ;;  %v5018_v53 = vmul.f32 %v8369_v27, %v12819_v7 }
 0x6d8   : > { %v5519_v51 = vsub.f32 %v12814_v34, %v5505_v31  ;;  %v5507_v48 = vmul.f32 %v8371_v22, %v12821_v44 }
 0x6d9   : > { %v5031_v62 = vsub.f32 %v12823_v19, %v5018_v53 }
 0x726   : > { %v7399_v20 = vpop.xlane.xlu1 %7398 }
 0x727   : > { %v7414_v58 = vsel %vm7409_vm3, %v7399_v20, %v4339_v15  ;;  %v8373_v15 = vpop.eup %8372 }
 0x728   : > { %v7423_v6 = vsel %vm7418_vm4, %v7414_v58, %v5033_v21  ;;  %v5020_v43 = vmul.f32 %v8373_v15, %v12824_v12  ;;  %v8375_v20 = vpop.eup %8374  ;;  %v12825_v58 = vld [vmem:[#allocation21_spill] sm:$0xff]  ;;  %v12841_v15 = vld [vmem:[#allocation62_spill] sm:$0xff] }
 0x729   : > { %v7432_v16 = vsel %vm7427_vm5, %v7423_v6, %v12803_v45  ;;  %v5520_v57 = vsub.f32 %v12825_v58, %v5507_v48  ;;  %v12845_v58 = vld [vmem:[#allocation177_spill] sm:$0xff] }
 0x72a   : > { %v7441_v8 = vsel %vm7436_vm6, %v7432_v16, %v5522_v2  ;;  %v12826_v2 = vld [vmem:[#allocation61_spill] sm:$0xff] }
 0x72b   : > { %v7387_v33 = vpop.xlane.xlu0 %7386  ;;  %v7450_v26 = vsel %vm7445_vm7, %v7441_v8, 0.0  ;;  %v5509_v6 = vmul.f32 %v8375_v20, %v12826_v2  ;;  %v12828_v16 = vld [vmem:[#allocation173_spill] sm:$0xff]  ;;  %v12829_v8 = vld [vmem:[#allocation175_spill] sm:$0xff] }
 0x72c   : > { %v7410_v52 = vsel %vm7409_vm3, %v7387_v33, %v11842_v25  ;;  %7458 = vst.msk [vmem:[%s12031_s20 + $0x20] sm:$0xff] %vm2156_vm9, %v7450_v26  ;;  %v5032_v63 = vsub.f32 %v12828_v16, %v5020_v43  ;;  %8384 = vrcp.f32 %v12829_v8  ;;  %v8377_v33 = vpop.eup %8376  ;;  %v12847_v16 = vld [vmem:[#allocation145_spill] sm:$0xff] }
 0x72d   : > { %v7419_v23 = vsel %vm7418_vm4, %v7410_v52, %v5029_v9  ;;  %8386 = vrcp.f32 %v12831_v3  ;;  %v8379_v4 = vpop.eup %8378 }
 0x72e   : > { %v7428_v5 = vsel %vm7427_vm5, %v7419_v23, %v12808_v18  ;;  %v12832_v23 = vld [vmem:[#allocation140_spill] sm:$0xff] }
 0x72f   : > { %v7437_v25 = vsel %vm7436_vm6, %v7428_v5, %v5518_v38  ;;  %v5521_v38 = vsub.f32 %v12830_v28, %v5509_v6  ;;  %v12833_v18 = vld [vmem:[#allocation160_spill] sm:$0xff] }
 0x730   : > { %v7446_v41 = vsel %vm7445_vm7, %v7437_v25, 0.0  ;;  %v5024_v5 = vmul.f32 %v8377_v33, %v12833_v18  ;;  %v8381_v25 = vpop.eup %8380 }
 0x731   : > { %7454 = vst.msk [vmem:[%s12031_s20] sm:$0xff] %vm2156_vm9, %v7446_v41  ;;  %v7390_v29 = vpop.xlane.xlu0 %7389  ;;  %v12834_v41 = vld [vmem:[#allocation198_spill] sm:$0xff] }
 0x732   : > { %v7411_v13 = vsel %vm7409_vm3, %v7390_v29, %v12813_v35  ;;  %v5513_v24 = vmul.f32 %v8379_v4, %v12834_v41  ;;  %v5034_v29 = vsub.f32 %v12835_v46, %v5024_v5  ;;  %v12836_v35 = vld [vmem:[#allocation179_spill] sm:$0xff] }
 0x733   : > { %v7420_v32 = vsel %vm7418_vm4, %v7411_v13, %v5030_v42  ;;  %v8383_v42 = vpop.eup %8382 }
 0x734   : > { %v7429_v56 = vsel %vm7427_vm5, %v7420_v32, %v12815_v55  ;;  %v5026_v13 = vmul.f32 %v8383_v42, %v12836_v35  ;;  %v12837_v32 = vld [vmem:[#allocation193_spill] sm:$0xff] }
 0x735   : > { %v7438_v60 = vsel %vm7436_vm6, %v7429_v56, %v5519_v51  ;;  %v5515_v55 = vmul.f32 %v8381_v25, %v12837_v32  ;;  %v12838_v56 = vld [vmem:[#allocation26_spill] sm:$0xff] }
 0x736   : > { %v7447_v40 = vsel %vm7445_vm7, %v7438_v60, 0.0  ;;  %v5523_v11 = vsub.f32 %v12838_v56, %v5513_v24  ;;  %v5035_v27 = vsub.f32 %v12840_v17, %v5026_v13 }
 0x737   : > { %7455 = vst.msk [vmem:[%s12031_s20 + $0x8] sm:$0xff] %vm2156_vm9, %v7447_v40  ;;  %v7393_v50 = vpop.xlane.xlu0 %7392  ;;  %v12839_v40 = vld [vmem:[#allocation153_spill] sm:$0xff]  ;;  %v5524_v54 = vsub.f32 %v12841_v15, %v5515_v55 }
 0x739   : > { %v8385_v7 = vpop.eup %8384 }
 0x73a   : > { %v8387_v48 = vpop.eup %8386 }
 0x73d   : > { %v7396_v61 = vpop.xlane.xlu0 %7395 }
 0x741   : > { %v4333_v21 = vpop.xlane.xlu0 %4332 }
 0x742   : > { %v7412_v59 = vsel %vm7409_vm3, %v7393_v50, %v4333_v21 }
 0x743   : > { %v7421_v37 = vsel %vm7418_vm4, %v7412_v59, %v5031_v62  ;;  %v12843_v62 = vld [vmem:[#allocation166_spill] sm:$0xff]  ;;  %v12844_v59 = vld [vmem:[#allocation197_spill] sm:$0xff] }
 0x744   : > { %v7430_v45 = vsel %vm7427_vm5, %v7421_v37, %v12827_v10  ;;  %v5028_v12 = vmul.f32 %v8385_v7, %v12843_v62  ;;  %v12846_v37 = vld [vmem:[#allocation74_spill] sm:$0xff] }
 0x745   : > { %v7439_v47 = vsel %vm7436_vm6, %v7430_v45, %v5520_v57  ;;  %v4336_v9 = vpop.xlane.xlu0 %4335 }
 0x746   : > { %v7448_v26 = vsel %vm7445_vm7, %v7439_v47, 0.0  ;;  %v7413_v52 = vsel %vm7409_vm3, %v7396_v61, %v4336_v9  ;;  %v5036_v57 = vsub.f32 %v12845_v58, %v5028_v12 }
 0x747   : > { %7456 = vst.msk [vmem:[%s12031_s20 + $0x10] sm:$0xff] %vm2156_vm9, %v7448_v26  ;;  %v7422_v30 = vsel %vm7418_vm4, %v7413_v52, %v5032_v63 }
 0x748   : > { %v7431_v39 = vsel %vm7427_vm5, %v7422_v30, %v12832_v23 }
 0x749   : > { %v7440_v0 = vsel %vm7436_vm6, %v7431_v39, %v5521_v38  ;;  %v4342_v49 = vpop.xlane.xlu0 %4341 }
 0x74a   : > { %v7449_v31 = vsel %vm7445_vm7, %v7440_v0, 0.0 }
 0x74b   : > { %7457 = vst.msk [vmem:[%s12031_s20 + $0x18] sm:$0xff] %vm2156_vm9, %v7449_v31 }
 0x74d   : > { %v7402_v34 = vpop.xlane.xlu0 %7401 }
 0x74e   : > { %v7415_v51 = vsel %vm7409_vm3, %v7402_v34, %v4342_v49 }
 0x74f   : > { %v7424_v60 = vsel %vm7418_vm4, %v7415_v51, %v5034_v29 }
 0x750   : > { %v7433_v50 = vsel %vm7427_vm5, %v7424_v60, %v12839_v40 }
 0x751   : > { %v7442_v36 = vsel %vm7436_vm6, %v7433_v50, %v5523_v11  ;;  %v7405_v22 = vpop.xlane.xlu0 %7404 }
 0x752   : > { %v7451_v53 = vsel %vm7445_vm7, %v7442_v36, 0.0  ;;  %v7416_v61 = vsel %vm7409_vm3, %v7405_v22, %v12019_v1  ;;  %v5517_v1 = vmul.f32 %v8387_v48, %v12844_v59 }
 0x753   : > { %7459 = vst.msk [vmem:[%s12031_s20 + $0x28] sm:$0xff] %vm2156_vm9, %v7451_v53  ;;  %v7425_v44 = vsel %vm7418_vm4, %v7416_v61, %v5035_v27 }
 0x754   : > { %v7434_v19 = vsel %vm7427_vm5, %v7425_v44, %v12842_v14  ;;  %v5525_v10 = vsub.f32 %v12846_v37, %v5517_v1 }
 0x755   : > { %v7443_v43 = vsel %vm7436_vm6, %v7434_v19, %v5524_v54  ;;  %v4348_v21 = vpop.xlane.xlu0 %4347 }
 0x756   : > { %v7452_v20 = vsel %vm7445_vm7, %v7443_v43, 0.0 }
 0x757   : > { %7460 = vst.msk [vmem:[%s12031_s20 + $0x30] sm:$0xff] %vm2156_vm9, %v7452_v20 }
 0x759   : > { %v7408_v2 = vpop.xlane.xlu0 %7407 }
 0x75a   : > { %v7417_v6 = vsel %vm7409_vm3, %v7408_v2, %v4348_v21 }
 0x75b   : > { %v7426_v45 = vsel %vm7418_vm4, %v7417_v6, %v5036_v57 }
 0x75c   : > { %v7435_v63 = vsel %vm7427_vm5, %v7426_v45, %v12847_v16 }
 0x75d   : > { %v7444_v8 = vsel %vm7436_vm6, %v7435_v63, %v5525_v10 }
 0x75e   : > { %v7453_v47 = vsel %vm7445_vm7, %v7444_v8, 0.0 }
 0x75f   : > { %7461 = vst.msk [vmem:[%s12031_s20 + $0x38] sm:$0xff] %vm2156_vm9, %v7453_v47 }
 0x760 PF: > { %s33_s0 = sadd.s32 1, %s8425_s0  }
 0x761   : > { %p30_p2 = scmp.ge.s32.totalorder %s33_s0, 4  }
 0x763   :  { %32 = sbr.rel (!%p30_p2) target bundleno = 5 (0x5), region = 142 }
 0x768   :  { %7484 = vsyncpa [#allocation5], 1 }
 0x769   :  { %7486 = vsyncpa [#allocation5 + $0x1], 1 }

</bundles_post_ra>
